<compile_context>
chip_gen: v7x
topology: tpu7x:2x2x1
jax: 0.10.0
libtpu: 0.0.40
codegen_flags: <defaults>
</compile_context>

<pallas_src>
import jax
import jax.numpy as jnp
import numpy as np
from jax.experimental import pallas as pl
from jax.experimental.pallas import tpu as pltpu

C1, C2, DH = 300, 600, 128       # PyTorch channel sizes (conv1, conv2, fc1)
C1P, C2P = 384, 640              # lane-padded channel sizes (multiples of 128)


# ------------------------------------------------------------------ kernel

def _fused_disc_kernel(x_ref, w1_ref, b1_ref, w2_ref, b2_ref,
                       wf1_ref, bf1_ref, wf2_ref, bf2_ref,
                       o_ref, h1_ref):
    """Full forward for one batch tile.

    x_ref : (L, TB, D)   bf16   input tile (time-major so each time step is a
                                 clean leading-dim slice)
    w1_ref: (3, D, C1P)  bf16   conv1 weight, one (D, C1P) matmul per tap
    w2_ref: (3, C1P, C2P) bf16  conv2 weight, one (C1P, C2P) matmul per tap
    h1_ref: (H1, TB, C1P) bf16  VMEM scratch holding the conv1 output tile
    o_ref : (TB, 1)      f32    logits
    """
    H1 = h1_ref.shape[0]
    H2 = (H1 - 3) // 2 + 1

    # TODO(synk): the time loops are Python-unrolled (fine for short L); for
    # long sequences move the time axis onto a grid dimension / fori_loop.

    # ---- conv1: kernel (3, dimh), stride (2, 1), 1 -> 300 channels, + ReLU ---
    # out[t1] = relu(b1 + sum_kh x[2*t1 + kh] @ W1[kh])
    for t1 in range(H1):
        acc = jnp.dot(x_ref[2 * t1], w1_ref[0],
                      preferred_element_type=jnp.float32)
        acc = acc + jnp.dot(x_ref[2 * t1 + 1], w1_ref[1],
                            preferred_element_type=jnp.float32)
        acc = acc + jnp.dot(x_ref[2 * t1 + 2], w1_ref[2],
                            preferred_element_type=jnp.float32)
        h1_ref[t1] = jnp.maximum(acc + b1_ref[...], 0.0).astype(h1_ref.dtype)

    # ---- conv2: kernel (3, 1), stride (2, 1), 300 -> 600, + ReLU,
    #      fused with max-over-time pooling (running max, no h2 materialized) --
    pooled = None
    for t2 in range(H2):
        acc = jnp.dot(h1_ref[2 * t2], w2_ref[0],
                      preferred_element_type=jnp.float32)
        acc = acc + jnp.dot(h1_ref[2 * t2 + 1], w2_ref[1],
                            preferred_element_type=jnp.float32)
        acc = acc + jnp.dot(h1_ref[2 * t2 + 2], w2_ref[2],
                            preferred_element_type=jnp.float32)
        cur = jnp.maximum(acc + b2_ref[...], 0.0)             # (TB, C2P) f32
        pooled = cur if pooled is None else jnp.maximum(pooled, cur)

    # ---- fc1 + ReLU on the MXU; fc2 (N=1) as a VPU multiply + lane reduce ----
    z = jnp.dot(pooled.astype(jnp.bfloat16), wf1_ref[...],
                preferred_element_type=jnp.float32) + bf1_ref[...]
    z = jnp.maximum(z, 0.0)                                   # (TB, DH) f32
    logit = jnp.sum(z * wf2_ref[...], axis=-1, keepdims=True) + bf2_ref[...]
    o_ref[...] = logit.astype(o_ref.dtype)


# ------------------------------------------------------------------ wrapper

def cnn_discriminator_forward(x, params, tile_b=64):
    """x: (B, L, dimh) float32 -> logits (B, 1) float32."""
    B, L, D = x.shape
    H1 = (L - 3) // 2 + 1
    H2 = (H1 - 3) // 2 + 1
    assert L >= 7 and H2 >= 1, "sequence too short for two stride-2 (k=3) convs"
    w1k, b1k, w2k, b2k, wf1k, bf1k, wf2k, bf2k = params

    # Batch tiling: TB rows per grid step, TB a multiple of 8 (sublane aligned).
    b8 = ((B + 7) // 8) * 8
    TB = min(tile_b, b8)
    B_pad = ((B + TB - 1) // TB) * TB

    xp = jnp.zeros((B_pad, L, D), x.dtype).at[:B].set(x)
    # Time-major (L, B_pad, D) so each time step is a leading-dim slice in VMEM;
    # bf16 halves the input DMA bytes.
    xt = jnp.transpose(xp, (1, 0, 2)).astype(jnp.bfloat16)

    out = pl.pallas_call(
        _fused_disc_kernel,
        out_shape=jax.ShapeDtypeStruct((B_pad, 1), jnp.float32),
        grid_spec=pltpu.PrefetchScalarGridSpec(
            num_scalar_prefetch=0,
            grid=(B_pad // TB,),
            in_specs=[
                pl.BlockSpec((L, TB, D), lambda i: (0, i, 0)),   # x batch tile
                pl.BlockSpec(w1k.shape, lambda i: (0, 0, 0)),    # conv1 W (resident)
                pl.BlockSpec(b1k.shape, lambda i: (0, 0)),       # conv1 b
                pl.BlockSpec(w2k.shape, lambda i: (0, 0, 0)),    # conv2 W (resident)
                pl.BlockSpec(b2k.shape, lambda i: (0, 0)),       # conv2 b
                pl.BlockSpec(wf1k.shape, lambda i: (0, 0)),      # fc1 W (resident)
                pl.BlockSpec(bf1k.shape, lambda i: (0, 0)),      # fc1 b
                pl.BlockSpec(wf2k.shape, lambda i: (0, 0)),      # fc2 W row
                pl.BlockSpec(bf2k.shape, lambda i: (0, 0)),      # fc2 b
            ],
            out_specs=pl.BlockSpec((TB, 1), lambda i: (i, 0)),
            scratch_shapes=[pltpu.VMEM((H1, TB, C1P), jnp.bfloat16)],
        ),
        compiler_params=pltpu.CompilerParams(
            dimension_semantics=("parallel",)),
    )(xt, w1k, b1k, w2k, b2k, wf1k, bf1k, wf2k, bf2k)
    return out[:B]


# ------------------------------------------------------------------ parameters

def init_params(key, dimh):
    ks = jax.random.split(key, 8)

    def u(k, shape, fan_in):
        lim = 1.0 / np.sqrt(fan_in)
        return jax.random.uniform(k, shape, jnp.float32, -lim, lim)

    # PyTorch-shaped parameters (PyTorch-style uniform init).
    w1 = u(ks[0], (C1, 1, 3, dimh), 3 * dimh)   # conv1.weight (O, I, KH, KW)
    b1 = u(ks[1], (C1,), 3 * dimh)
    w2 = u(ks[2], (C2, C1, 3, 1), 3 * C1)       # conv2.weight
    b2 = u(ks[3], (C2,), 3 * C1)
    # TODO(synk): the PyTorch module declares fc1 with in_features=300*3=900 but
    # its own forward feeds it the 600-channel pooled conv2 output; fc1 is sized
    # at 600 here (intentional fix so the graph is runnable).
    wf1 = u(ks[4], (DH, C2), C2)                # fc1.weight (out, in)
    bf1 = u(ks[5], (DH,), C2)
    wf2 = u(ks[6], (1, DH), DH)                 # fc2.weight
    bf2 = u(ks[7], (1,), DH)

    # Kernel-form weights: per-tap matmul layout, zero-padded to lane multiples,
    # bf16 for the MXU; biases stay f32 for the f32 epilogue (v5e-safe).
    w1k = jnp.transpose(w1[:, 0, :, :], (1, 2, 0))                    # (3, D, C1)
    w1k = jnp.pad(w1k, ((0, 0), (0, 0), (0, C1P - C1))).astype(jnp.bfloat16)
    b1k = jnp.pad(b1, (0, C1P - C1)).reshape(1, C1P)
    w2k = jnp.transpose(w2[:, :, :, 0], (2, 1, 0))                    # (3, C1, C2)
    w2k = jnp.pad(w2k, ((0, 0), (0, C1P - C1), (0, C2P - C2))).astype(jnp.bfloat16)
    b2k = jnp.pad(b2, (0, C2P - C2)).reshape(1, C2P)
    wf1k = jnp.pad(wf1.T, ((0, C2P - C2), (0, 0))).astype(jnp.bfloat16)  # (C2P, DH)
    bf1k = bf1.reshape(1, DH)
    wf2k = wf2.reshape(1, DH)                                         # f32 VPU row
    bf2k = bf2.reshape(1, 1)

    kernel_params = (w1k, b1k, w2k, b2k, wf1k, bf1k, wf2k, bf2k)
    torch_params = (w1, b1, w2, b2, wf1, bf1, wf2, bf2)
    return kernel_params, torch_params


def reference_forward(x, torch_params):
    """Pure-JAX f32 reference matching the PyTorch NCHW conv semantics."""
    w1, b1, w2, b2, wf1, bf1, wf2, bf2 = torch_params
    x4 = x[:, None, :, :]                                    # (B, 1, L, dimh)
    dn = ('NCHW', 'OIHW', 'NCHW')
    h1 = jax.lax.conv_general_dilated(x4, w1, (2, 1), 'VALID', dimension_numbers=dn)
    h1 = jax.nn.relu(h1 + b1[None, :, None, None])
    h2 = jax.lax.conv_general_dilated(h1, w2, (2, 1), 'VALID', dimension_numbers=dn)
    h2 = jax.nn.relu(h2 + b2[None, :, None, None])
    h4 = jnp.max(h2, axis=2)[:, :, 0]                        # (B, 600)
    h5 = jax.nn.relu(h4 @ wf1.T + bf1)
    return h5 @ wf2.T + bf2                                  # (B, 1)


if __name__ == "__main__":
    B, L, dimh = 2, 16, 32
    key = jax.random.PRNGKey(0)
    kx, kp = jax.random.split(key)
    x = jax.random.normal(kx, (B, L, dimh), jnp.float32)

    kernel_params, torch_params = init_params(kp, dimh)

    fwd = jax.jit(lambda xx: cnn_discriminator_forward(xx, kernel_params))
    logits = jax.block_until_ready(fwd(x))

    ref = jax.block_until_ready(reference_forward(x, torch_params))
    assert logits.shape == (B, 1), logits.shape
    # bf16 MXU inputs with f32 accumulation -> loosened tolerance vs f32 ref.
    np.testing.assert_allclose(np.asarray(logits), np.asarray(ref),
                               rtol=2e-2, atol=2e-2)
    print("KERNEL_OK")
</pallas_src>

<mosaic_0001>
module attributes {stable_mosaic.version = 11 : i64} {
  func.func @_fused_disc_kernel(%arg0: i32, %arg1: memref<16x8x32xbf16, #tpu.memory_space<vmem>>, %arg2: memref<3x32x384xbf16, #tpu.memory_space<vmem>>, %arg3: memref<1x384xf32, #tpu.memory_space<vmem>>, %arg4: memref<3x384x640xbf16, #tpu.memory_space<vmem>>, %arg5: memref<1x640xf32, #tpu.memory_space<vmem>>, %arg6: memref<640x128xbf16, #tpu.memory_space<vmem>>, %arg7: memref<1x128xf32, #tpu.memory_space<vmem>>, %arg8: memref<1x128xf32, #tpu.memory_space<vmem>>, %arg9: memref<1x1xf32, #tpu.memory_space<vmem>>, %arg10: memref<8x1xf32, #tpu.memory_space<vmem>>, %arg11: memref<7x8x384xbf16, #tpu.memory_space<vmem>>) attributes {dimension_semantics = [#tpu.dimension_semantics<parallel>], iteration_bounds = array<i64: 1>, scalar_prefetch = 0 : i64, scratch_operands = 1 : i64, tpu.core_type = #tpu.core_type<tc>, window_params = [{transform_indices = @transform_0, window_bounds = array<i64: 16, 8, 32>}, {pipeline_mode = #tpu.pipeline_mode<synchronous>, transform_indices = @transform_1, window_bounds = array<i64: 3, 32, 384>}, {pipeline_mode = #tpu.pipeline_mode<synchronous>, transform_indices = @transform_2, window_bounds = array<i64: 1, 384>}, {pipeline_mode = #tpu.pipeline_mode<synchronous>, transform_indices = @transform_3, window_bounds = array<i64: 3, 384, 640>}, {pipeline_mode = #tpu.pipeline_mode<synchronous>, transform_indices = @transform_4, window_bounds = array<i64: 1, 640>}, {pipeline_mode = #tpu.pipeline_mode<synchronous>, transform_indices = @transform_5, window_bounds = array<i64: 640, 128>}, {pipeline_mode = #tpu.pipeline_mode<synchronous>, transform_indices = @transform_6, window_bounds = array<i64: 1, 128>}, {pipeline_mode = #tpu.pipeline_mode<synchronous>, transform_indices = @transform_7, window_bounds = array<i64: 1, 128>}, {pipeline_mode = #tpu.pipeline_mode<synchronous>, transform_indices = @transform_8, window_bounds = array<i64: 1, 1>}, {transform_indices = @transform_9, window_bounds = array<i64: 8, 1>}]} {
    %c0 = arith.constant 0 : index
    %c0_0 = arith.constant 0 : index
    %c0_1 = arith.constant 0 : index
    %0 = vector.load %arg1[%c0, %c0_0, %c0_1] : memref<16x8x32xbf16, #tpu.memory_space<vmem>>, vector<1x8x32xbf16>
    %1 = vector.shape_cast %0 : vector<1x8x32xbf16> to vector<8x32xbf16>
    %c0_2 = arith.constant 0 : index
    %c0_3 = arith.constant 0 : index
    %c0_4 = arith.constant 0 : index
    %2 = vector.load %arg2[%c0_2, %c0_3, %c0_4] : memref<3x32x384xbf16, #tpu.memory_space<vmem>>, vector<1x32x384xbf16>
    %3 = vector.shape_cast %2 : vector<1x32x384xbf16> to vector<32x384xbf16>
    %cst = arith.constant dense<0.000000e+00> : vector<8x384xf32>
    %4 = tpu.matmul %1, %3, %cst {dimension_numbers = #tpu.dot_dimension_numbers<[1], [0], [0], [1], [0, 0, 1, 1], [], []>} : vector<8x32xbf16>, vector<32x384xbf16>, vector<8x384xf32> -> vector<8x384xf32>
    %c1 = arith.constant 1 : index
    %c0_5 = arith.constant 0 : index
    %c0_6 = arith.constant 0 : index
    %5 = vector.load %arg1[%c1, %c0_5, %c0_6] : memref<16x8x32xbf16, #tpu.memory_space<vmem>>, vector<1x8x32xbf16>
    %6 = vector.shape_cast %5 : vector<1x8x32xbf16> to vector<8x32xbf16>
    %c1_7 = arith.constant 1 : index
    %c0_8 = arith.constant 0 : index
    %c0_9 = arith.constant 0 : index
    %7 = vector.load %arg2[%c1_7, %c0_8, %c0_9] : memref<3x32x384xbf16, #tpu.memory_space<vmem>>, vector<1x32x384xbf16>
    %8 = vector.shape_cast %7 : vector<1x32x384xbf16> to vector<32x384xbf16>
    %cst_10 = arith.constant dense<0.000000e+00> : vector<8x384xf32>
    %9 = tpu.matmul %6, %8, %cst_10 {dimension_numbers = #tpu.dot_dimension_numbers<[1], [0], [0], [1], [0, 0, 1, 1], [], []>} : vector<8x32xbf16>, vector<32x384xbf16>, vector<8x384xf32> -> vector<8x384xf32>
    %10 = arith.addf %4, %9 : vector<8x384xf32>
    %c2 = arith.constant 2 : index
    %c0_11 = arith.constant 0 : index
    %c0_12 = arith.constant 0 : index
    %11 = vector.load %arg1[%c2, %c0_11, %c0_12] : memref<16x8x32xbf16, #tpu.memory_space<vmem>>, vector<1x8x32xbf16>
    %12 = vector.shape_cast %11 : vector<1x8x32xbf16> to vector<8x32xbf16>
    %c2_13 = arith.constant 2 : index
    %c0_14 = arith.constant 0 : index
    %c0_15 = arith.constant 0 : index
    %13 = vector.load %arg2[%c2_13, %c0_14, %c0_15] : memref<3x32x384xbf16, #tpu.memory_space<vmem>>, vector<1x32x384xbf16>
    %14 = vector.shape_cast %13 : vector<1x32x384xbf16> to vector<32x384xbf16>
    %cst_16 = arith.constant dense<0.000000e+00> : vector<8x384xf32>
    %15 = tpu.matmul %12, %14, %cst_16 {dimension_numbers = #tpu.dot_dimension_numbers<[1], [0], [0], [1], [0, 0, 1, 1], [], []>} : vector<8x32xbf16>, vector<32x384xbf16>, vector<8x384xf32> -> vector<8x384xf32>
    %16 = arith.addf %10, %15 : vector<8x384xf32>
    %c0_17 = arith.constant 0 : index
    %c0_18 = arith.constant 0 : index
    %17 = vector.load %arg3[%c0_17, %c0_18] : memref<1x384xf32, #tpu.memory_space<vmem>>, vector<1x384xf32>
    %18 = vector.broadcast %17 : vector<1x384xf32> to vector<8x384xf32>
    %19 = arith.addf %16, %18 : vector<8x384xf32>
    %cst_19 = arith.constant 0.000000e+00 : f32
    %20 = vector.broadcast %cst_19 : f32 to vector<8x384xf32>
    %21 = arith.maximumf %19, %20 : vector<8x384xf32>
    %22 = arith.truncf %21 : vector<8x384xf32> to vector<8x384xbf16>
    %c0_20 = arith.constant 0 : index
    %c0_21 = arith.constant 0 : index
    %c0_22 = arith.constant 0 : index
    %23 = vector.load %arg11[%c0_20, %c0_21, %c0_22] : memref<7x8x384xbf16, #tpu.memory_space<vmem>>, vector<1x8x384xbf16>
    %24 = vector.shape_cast %23 : vector<1x8x384xbf16> to vector<8x384xbf16>
    %25 = vector.shape_cast %22 : vector<8x384xbf16> to vector<1x8x384xbf16>
    tpu.vector_store %arg11[%c0_20, %c0_21, %c0_22], %25 {strides = array<i32>} : memref<7x8x384xbf16, #tpu.memory_space<vmem>>, vector<1x8x384xbf16>,
    %c2_23 = arith.constant 2 : index
    %c0_24 = arith.constant 0 : index
    %c0_25 = arith.constant 0 : index
    %26 = vector.load %arg1[%c2_23, %c0_24, %c0_25] : memref<16x8x32xbf16, #tpu.memory_space<vmem>>, vector<1x8x32xbf16>
    %27 = vector.shape_cast %26 : vector<1x8x32xbf16> to vector<8x32xbf16>
    %c0_26 = arith.constant 0 : index
    %c0_27 = arith.constant 0 : index
    %c0_28 = arith.constant 0 : index
    %28 = vector.load %arg2[%c0_26, %c0_27, %c0_28] : memref<3x32x384xbf16, #tpu.memory_space<vmem>>, vector<1x32x384xbf16>
    %29 = vector.shape_cast %28 : vector<1x32x384xbf16> to vector<32x384xbf16>
    %cst_29 = arith.constant dense<0.000000e+00> : vector<8x384xf32>
    %30 = tpu.matmul %27, %29, %cst_29 {dimension_numbers = #tpu.dot_dimension_numbers<[1], [0], [0], [1], [0, 0, 1, 1], [], []>} : vector<8x32xbf16>, vector<32x384xbf16>, vector<8x384xf32> -> vector<8x384xf32>
    %c3 = arith.constant 3 : index
    %c0_30 = arith.constant 0 : index
    %c0_31 = arith.constant 0 : index
    %31 = vector.load %arg1[%c3, %c0_30, %c0_31] : memref<16x8x32xbf16, #tpu.memory_space<vmem>>, vector<1x8x32xbf16>
    %32 = vector.shape_cast %31 : vector<1x8x32xbf16> to vector<8x32xbf16>
    %c1_32 = arith.constant 1 : index
    %c0_33 = arith.constant 0 : index
    %c0_34 = arith.constant 0 : index
    %33 = vector.load %arg2[%c1_32, %c0_33, %c0_34] : memref<3x32x384xbf16, #tpu.memory_space<vmem>>, vector<1x32x384xbf16>
    %34 = vector.shape_cast %33 : vector<1x32x384xbf16> to vector<32x384xbf16>
    %cst_35 = arith.constant dense<0.000000e+00> : vector<8x384xf32>
    %35 = tpu.matmul %32, %34, %cst_35 {dimension_numbers = #tpu.dot_dimension_numbers<[1], [0], [0], [1], [0, 0, 1, 1], [], []>} : vector<8x32xbf16>, vector<32x384xbf16>, vector<8x384xf32> -> vector<8x384xf32>
    %36 = arith.addf %30, %35 : vector<8x384xf32>
    %c4 = arith.constant 4 : index
    %c0_36 = arith.constant 0 : index
    %c0_37 = arith.constant 0 : index
    %37 = vector.load %arg1[%c4, %c0_36, %c0_37] : memref<16x8x32xbf16, #tpu.memory_space<vmem>>, vector<1x8x32xbf16>
    %38 = vector.shape_cast %37 : vector<1x8x32xbf16> to vector<8x32xbf16>
    %c2_38 = arith.constant 2 : index
    %c0_39 = arith.constant 0 : index
    %c0_40 = arith.constant 0 : index
    %39 = vector.load %arg2[%c2_38, %c0_39, %c0_40] : memref<3x32x384xbf16, #tpu.memory_space<vmem>>, vector<1x32x384xbf16>
    %40 = vector.shape_cast %39 : vector<1x32x384xbf16> to vector<32x384xbf16>
    %cst_41 = arith.constant dense<0.000000e+00> : vector<8x384xf32>
    %41 = tpu.matmul %38, %40, %cst_41 {dimension_numbers = #tpu.dot_dimension_numbers<[1], [0], [0], [1], [0, 0, 1, 1], [], []>} : vector<8x32xbf16>, vector<32x384xbf16>, vector<8x384xf32> -> vector<8x384xf32>
    %42 = arith.addf %36, %41 : vector<8x384xf32>
    %c0_42 = arith.constant 0 : index
    %c0_43 = arith.constant 0 : index
    %43 = vector.load %arg3[%c0_42, %c0_43] : memref<1x384xf32, #tpu.memory_space<vmem>>, vector<1x384xf32>
    %44 = vector.broadcast %43 : vector<1x384xf32> to vector<8x384xf32>
    %45 = arith.addf %42, %44 : vector<8x384xf32>
    %cst_44 = arith.constant 0.000000e+00 : f32
    %46 = vector.broadcast %cst_44 : f32 to vector<8x384xf32>
    %47 = arith.maximumf %45, %46 : vector<8x384xf32>
    %48 = arith.truncf %47 : vector<8x384xf32> to vector<8x384xbf16>
    %c1_45 = arith.constant 1 : index
    %c0_46 = arith.constant 0 : index
    %c0_47 = arith.constant 0 : index
    %49 = vector.load %arg11[%c1_45, %c0_46, %c0_47] : memref<7x8x384xbf16, #tpu.memory_space<vmem>>, vector<1x8x384xbf16>
    %50 = vector.shape_cast %49 : vector<1x8x384xbf16> to vector<8x384xbf16>
    %51 = vector.shape_cast %48 : vector<8x384xbf16> to vector<1x8x384xbf16>
    tpu.vector_store %arg11[%c1_45, %c0_46, %c0_47], %51 {strides = array<i32>} : memref<7x8x384xbf16, #tpu.memory_space<vmem>>, vector<1x8x384xbf16>,
    %c4_48 = arith.constant 4 : index
    %c0_49 = arith.constant 0 : index
    %c0_50 = arith.constant 0 : index
    %52 = vector.load %arg1[%c4_48, %c0_49, %c0_50] : memref<16x8x32xbf16, #tpu.memory_space<vmem>>, vector<1x8x32xbf16>
    %53 = vector.shape_cast %52 : vector<1x8x32xbf16> to vector<8x32xbf16>
    %c0_51 = arith.constant 0 : index
    %c0_52 = arith.constant 0 : index
    %c0_53 = arith.constant 0 : index
    %54 = vector.load %arg2[%c0_51, %c0_52, %c0_53] : memref<3x32x384xbf16, #tpu.memory_space<vmem>>, vector<1x32x384xbf16>
    %55 = vector.shape_cast %54 : vector<1x32x384xbf16> to vector<32x384xbf16>
    %cst_54 = arith.constant dense<0.000000e+00> : vector<8x384xf32>
    %56 = tpu.matmul %53, %55, %cst_54 {dimension_numbers = #tpu.dot_dimension_numbers<[1], [0], [0], [1], [0, 0, 1, 1], [], []>} : vector<8x32xbf16>, vector<32x384xbf16>, vector<8x384xf32> -> vector<8x384xf32>
    %c5 = arith.constant 5 : index
    %c0_55 = arith.constant 0 : index
    %c0_56 = arith.constant 0 : index
    %57 = vector.load %arg1[%c5, %c0_55, %c0_56] : memref<16x8x32xbf16, #tpu.memory_space<vmem>>, vector<1x8x32xbf16>
    %58 = vector.shape_cast %57 : vector<1x8x32xbf16> to vector<8x32xbf16>
    %c1_57 = arith.constant 1 : index
    %c0_58 = arith.constant 0 : index
    %c0_59 = arith.constant 0 : index
    %59 = vector.load %arg2[%c1_57, %c0_58, %c0_59] : memref<3x32x384xbf16, #tpu.memory_space<vmem>>, vector<1x32x384xbf16>
    %60 = vector.shape_cast %59 : vector<1x32x384xbf16> to vector<32x384xbf16>
    %cst_60 = arith.constant dense<0.000000e+00> : vector<8x384xf32>
    %61 = tpu.matmul %58, %60, %cst_60 {dimension_numbers = #tpu.dot_dimension_numbers<[1], [0], [0], [1], [0, 0, 1, 1], [], []>} : vector<8x32xbf16>, vector<32x384xbf16>, vector<8x384xf32> -> vector<8x384xf32>
    %62 = arith.addf %56, %61 : vector<8x384xf32>
    %c6 = arith.constant 6 : index
    %c0_61 = arith.constant 0 : index
    %c0_62 = arith.constant 0 : index
    %63 = vector.load %arg1[%c6, %c0_61, %c0_62] : memref<16x8x32xbf16, #tpu.memory_space<vmem>>, vector<1x8x32xbf16>
    %64 = vector.shape_cast %63 : vector<1x8x32xbf16> to vector<8x32xbf16>
    %c2_63 = arith.constant 2 : index
    %c0_64 = arith.constant 0 : index
    %c0_65 = arith.constant 0 : index
    %65 = vector.load %arg2[%c2_63, %c0_64, %c0_65] : memref<3x32x384xbf16, #tpu.memory_space<vmem>>, vector<1x32x384xbf16>
    %66 = vector.shape_cast %65 : vector<1x32x384xbf16> to vector<32x384xbf16>
    %cst_66 = arith.constant dense<0.000000e+00> : vector<8x384xf32>
    %67 = tpu.matmul %64, %66, %cst_66 {dimension_numbers = #tpu.dot_dimension_numbers<[1], [0], [0], [1], [0, 0, 1, 1], [], []>} : vector<8x32xbf16>, vector<32x384xbf16>, vector<8x384xf32> -> vector<8x384xf32>
    %68 = arith.addf %62, %67 : vector<8x384xf32>
    %c0_67 = arith.constant 0 : index
    %c0_68 = arith.constant 0 : index
    %69 = vector.load %arg3[%c0_67, %c0_68] : memref<1x384xf32, #tpu.memory_space<vmem>>, vector<1x384xf32>
    %70 = vector.broadcast %69 : vector<1x384xf32> to vector<8x384xf32>
    %71 = arith.addf %68, %70 : vector<8x384xf32>
    %cst_69 = arith.constant 0.000000e+00 : f32
    %72 = vector.broadcast %cst_69 : f32 to vector<8x384xf32>
    %73 = arith.maximumf %71, %72 : vector<8x384xf32>
    %74 = arith.truncf %73 : vector<8x384xf32> to vector<8x384xbf16>
    %c2_70 = arith.constant 2 : index
    %c0_71 = arith.constant 0 : index
    %c0_72 = arith.constant 0 : index
    %75 = vector.load %arg11[%c2_70, %c0_71, %c0_72] : memref<7x8x384xbf16, #tpu.memory_space<vmem>>, vector<1x8x384xbf16>
    %76 = vector.shape_cast %75 : vector<1x8x384xbf16> to vector<8x384xbf16>
    %77 = vector.shape_cast %74 : vector<8x384xbf16> to vector<1x8x384xbf16>
    tpu.vector_store %arg11[%c2_70, %c0_71, %c0_72], %77 {strides = array<i32>} : memref<7x8x384xbf16, #tpu.memory_space<vmem>>, vector<1x8x384xbf16>,
    %c6_73 = arith.constant 6 : index
    %c0_74 = arith.constant 0 : index
    %c0_75 = arith.constant 0 : index
    %78 = vector.load %arg1[%c6_73, %c0_74, %c0_75] : memref<16x8x32xbf16, #tpu.memory_space<vmem>>, vector<1x8x32xbf16>
    %79 = vector.shape_cast %78 : vector<1x8x32xbf16> to vector<8x32xbf16>
    %c0_76 = arith.constant 0 : index
    %c0_77 = arith.constant 0 : index
    %c0_78 = arith.constant 0 : index
    %80 = vector.load %arg2[%c0_76, %c0_77, %c0_78] : memref<3x32x384xbf16, #tpu.memory_space<vmem>>, vector<1x32x384xbf16>
    %81 = vector.shape_cast %80 : vector<1x32x384xbf16> to vector<32x384xbf16>
    %cst_79 = arith.constant dense<0.000000e+00> : vector<8x384xf32>
    %82 = tpu.matmul %79, %81, %cst_79 {dimension_numbers = #tpu.dot_dimension_numbers<[1], [0], [0], [1], [0, 0, 1, 1], [], []>} : vector<8x32xbf16>, vector<32x384xbf16>, vector<8x384xf32> -> vector<8x384xf32>
    %c7 = arith.constant 7 : index
    %c0_80 = arith.constant 0 : index
    %c0_81 = arith.constant 0 : index
    %83 = vector.load %arg1[%c7, %c0_80, %c0_81] : memref<16x8x32xbf16, #tpu.memory_space<vmem>>, vector<1x8x32xbf16>
    %84 = vector.shape_cast %83 : vector<1x8x32xbf16> to vector<8x32xbf16>
    %c1_82 = arith.constant 1 : index
    %c0_83 = arith.constant 0 : index
    %c0_84 = arith.constant 0 : index
    %85 = vector.load %arg2[%c1_82, %c0_83, %c0_84] : memref<3x32x384xbf16, #tpu.memory_space<vmem>>, vector<1x32x384xbf16>
    %86 = vector.shape_cast %85 : vector<1x32x384xbf16> to vector<32x384xbf16>
    %cst_85 = arith.constant dense<0.000000e+00> : vector<8x384xf32>
    %87 = tpu.matmul %84, %86, %cst_85 {dimension_numbers = #tpu.dot_dimension_numbers<[1], [0], [0], [1], [0, 0, 1, 1], [], []>} : vector<8x32xbf16>, vector<32x384xbf16>, vector<8x384xf32> -> vector<8x384xf32>
    %88 = arith.addf %82, %87 : vector<8x384xf32>
    %c8 = arith.constant 8 : index
    %c0_86 = arith.constant 0 : index
    %c0_87 = arith.constant 0 : index
    %89 = vector.load %arg1[%c8, %c0_86, %c0_87] : memref<16x8x32xbf16, #tpu.memory_space<vmem>>, vector<1x8x32xbf16>
    %90 = vector.shape_cast %89 : vector<1x8x32xbf16> to vector<8x32xbf16>
    %c2_88 = arith.constant 2 : index
    %c0_89 = arith.constant 0 : index
    %c0_90 = arith.constant 0 : index
    %91 = vector.load %arg2[%c2_88, %c0_89, %c0_90] : memref<3x32x384xbf16, #tpu.memory_space<vmem>>, vector<1x32x384xbf16>
    %92 = vector.shape_cast %91 : vector<1x32x384xbf16> to vector<32x384xbf16>
    %cst_91 = arith.constant dense<0.000000e+00> : vector<8x384xf32>
    %93 = tpu.matmul %90, %92, %cst_91 {dimension_numbers = #tpu.dot_dimension_numbers<[1], [0], [0], [1], [0, 0, 1, 1], [], []>} : vector<8x32xbf16>, vector<32x384xbf16>, vector<8x384xf32> -> vector<8x384xf32>
    %94 = arith.addf %88, %93 : vector<8x384xf32>
    %c0_92 = arith.constant 0 : index
    %c0_93 = arith.constant 0 : index
    %95 = vector.load %arg3[%c0_92, %c0_93] : memref<1x384xf32, #tpu.memory_space<vmem>>, vector<1x384xf32>
    %96 = vector.broadcast %95 : vector<1x384xf32> to vector<8x384xf32>
    %97 = arith.addf %94, %96 : vector<8x384xf32>
    %cst_94 = arith.constant 0.000000e+00 : f32
    %98 = vector.broadcast %cst_94 : f32 to vector<8x384xf32>
    %99 = arith.maximumf %97, %98 : vector<8x384xf32>
    %100 = arith.truncf %99 : vector<8x384xf32> to vector<8x384xbf16>
    %c3_95 = arith.constant 3 : index
    %c0_96 = arith.constant 0 : index
    %c0_97 = arith.constant 0 : index
    %101 = vector.load %arg11[%c3_95, %c0_96, %c0_97] : memref<7x8x384xbf16, #tpu.memory_space<vmem>>, vector<1x8x384xbf16>
    %102 = vector.shape_cast %101 : vector<1x8x384xbf16> to vector<8x384xbf16>
    %103 = vector.shape_cast %100 : vector<8x384xbf16> to vector<1x8x384xbf16>
    tpu.vector_store %arg11[%c3_95, %c0_96, %c0_97], %103 {strides = array<i32>} : memref<7x8x384xbf16, #tpu.memory_space<vmem>>, vector<1x8x384xbf16>,
    %c8_98 = arith.constant 8 : index
    %c0_99 = arith.constant 0 : index
    %c0_100 = arith.constant 0 : index
    %104 = vector.load %arg1[%c8_98, %c0_99, %c0_100] : memref<16x8x32xbf16, #tpu.memory_space<vmem>>, vector<1x8x32xbf16>
    %105 = vector.shape_cast %104 : vector<1x8x32xbf16> to vector<8x32xbf16>
    %c0_101 = arith.constant 0 : index
    %c0_102 = arith.constant 0 : index
    %c0_103 = arith.constant 0 : index
    %106 = vector.load %arg2[%c0_101, %c0_102, %c0_103] : memref<3x32x384xbf16, #tpu.memory_space<vmem>>, vector<1x32x384xbf16>
    %107 = vector.shape_cast %106 : vector<1x32x384xbf16> to vector<32x384xbf16>
    %cst_104 = arith.constant dense<0.000000e+00> : vector<8x384xf32>
    %108 = tpu.matmul %105, %107, %cst_104 {dimension_numbers = #tpu.dot_dimension_numbers<[1], [0], [0], [1], [0, 0, 1, 1], [], []>} : vector<8x32xbf16>, vector<32x384xbf16>, vector<8x384xf32> -> vector<8x384xf32>
    %c9 = arith.constant 9 : index
    %c0_105 = arith.constant 0 : index
    %c0_106 = arith.constant 0 : index
    %109 = vector.load %arg1[%c9, %c0_105, %c0_106] : memref<16x8x32xbf16, #tpu.memory_space<vmem>>, vector<1x8x32xbf16>
    %110 = vector.shape_cast %109 : vector<1x8x32xbf16> to vector<8x32xbf16>
    %c1_107 = arith.constant 1 : index
    %c0_108 = arith.constant 0 : index
    %c0_109 = arith.constant 0 : index
    %111 = vector.load %arg2[%c1_107, %c0_108, %c0_109] : memref<3x32x384xbf16, #tpu.memory_space<vmem>>, vector<1x32x384xbf16>
    %112 = vector.shape_cast %111 : vector<1x32x384xbf16> to vector<32x384xbf16>
    %cst_110 = arith.constant dense<0.000000e+00> : vector<8x384xf32>
    %113 = tpu.matmul %110, %112, %cst_110 {dimension_numbers = #tpu.dot_dimension_numbers<[1], [0], [0], [1], [0, 0, 1, 1], [], []>} : vector<8x32xbf16>, vector<32x384xbf16>, vector<8x384xf32> -> vector<8x384xf32>
    %114 = arith.addf %108, %113 : vector<8x384xf32>
    %c10 = arith.constant 10 : index
    %c0_111 = arith.constant 0 : index
    %c0_112 = arith.constant 0 : index
    %115 = vector.load %arg1[%c10, %c0_111, %c0_112] : memref<16x8x32xbf16, #tpu.memory_space<vmem>>, vector<1x8x32xbf16>
    %116 = vector.shape_cast %115 : vector<1x8x32xbf16> to vector<8x32xbf16>
    %c2_113 = arith.constant 2 : index
    %c0_114 = arith.constant 0 : index
    %c0_115 = arith.constant 0 : index
    %117 = vector.load %arg2[%c2_113, %c0_114, %c0_115] : memref<3x32x384xbf16, #tpu.memory_space<vmem>>, vector<1x32x384xbf16>
    %118 = vector.shape_cast %117 : vector<1x32x384xbf16> to vector<32x384xbf16>
    %cst_116 = arith.constant dense<0.000000e+00> : vector<8x384xf32>
    %119 = tpu.matmul %116, %118, %cst_116 {dimension_numbers = #tpu.dot_dimension_numbers<[1], [0], [0], [1], [0, 0, 1, 1], [], []>} : vector<8x32xbf16>, vector<32x384xbf16>, vector<8x384xf32> -> vector<8x384xf32>
    %120 = arith.addf %114, %119 : vector<8x384xf32>
    %c0_117 = arith.constant 0 : index
    %c0_118 = arith.constant 0 : index
    %121 = vector.load %arg3[%c0_117, %c0_118] : memref<1x384xf32, #tpu.memory_space<vmem>>, vector<1x384xf32>
    %122 = vector.broadcast %121 : vector<1x384xf32> to vector<8x384xf32>
    %123 = arith.addf %120, %122 : vector<8x384xf32>
    %cst_119 = arith.constant 0.000000e+00 : f32
    %124 = vector.broadcast %cst_119 : f32 to vector<8x384xf32>
    %125 = arith.maximumf %123, %124 : vector<8x384xf32>
    %126 = arith.truncf %125 : vector<8x384xf32> to vector<8x384xbf16>
    %c4_120 = arith.constant 4 : index
    %c0_121 = arith.constant 0 : index
    %c0_122 = arith.constant 0 : index
    %127 = vector.load %arg11[%c4_120, %c0_121, %c0_122] : memref<7x8x384xbf16, #tpu.memory_space<vmem>>, vector<1x8x384xbf16>
    %128 = vector.shape_cast %127 : vector<1x8x384xbf16> to vector<8x384xbf16>
    %129 = vector.shape_cast %126 : vector<8x384xbf16> to vector<1x8x384xbf16>
    tpu.vector_store %arg11[%c4_120, %c0_121, %c0_122], %129 {strides = array<i32>} : memref<7x8x384xbf16, #tpu.memory_space<vmem>>, vector<1x8x384xbf16>,
    %c10_123 = arith.constant 10 : index
    %c0_124 = arith.constant 0 : index
    %c0_125 = arith.constant 0 : index
    %130 = vector.load %arg1[%c10_123, %c0_124, %c0_125] : memref<16x8x32xbf16, #tpu.memory_space<vmem>>, vector<1x8x32xbf16>
    %131 = vector.shape_cast %130 : vector<1x8x32xbf16> to vector<8x32xbf16>
    %c0_126 = arith.constant 0 : index
    %c0_127 = arith.constant 0 : index
    %c0_128 = arith.constant 0 : index
    %132 = vector.load %arg2[%c0_126, %c0_127, %c0_128] : memref<3x32x384xbf16, #tpu.memory_space<vmem>>, vector<1x32x384xbf16>
    %133 = vector.shape_cast %132 : vector<1x32x384xbf16> to vector<32x384xbf16>
    %cst_129 = arith.constant dense<0.000000e+00> : vector<8x384xf32>
    %134 = tpu.matmul %131, %133, %cst_129 {dimension_numbers = #tpu.dot_dimension_numbers<[1], [0], [0], [1], [0, 0, 1, 1], [], []>} : vector<8x32xbf16>, vector<32x384xbf16>, vector<8x384xf32> -> vector<8x384xf32>
    %c11 = arith.constant 11 : index
    %c0_130 = arith.constant 0 : index
    %c0_131 = arith.constant 0 : index
    %135 = vector.load %arg1[%c11, %c0_130, %c0_131] : memref<16x8x32xbf16, #tpu.memory_space<vmem>>, vector<1x8x32xbf16>
    %136 = vector.shape_cast %135 : vector<1x8x32xbf16> to vector<8x32xbf16>
    %c1_132 = arith.constant 1 : index
    %c0_133 = arith.constant 0 : index
    %c0_134 = arith.constant 0 : index
    %137 = vector.load %arg2[%c1_132, %c0_133, %c0_134] : memref<3x32x384xbf16, #tpu.memory_space<vmem>>, vector<1x32x384xbf16>
    %138 = vector.shape_cast %137 : vector<1x32x384xbf16> to vector<32x384xbf16>
    %cst_135 = arith.constant dense<0.000000e+00> : vector<8x384xf32>
    %139 = tpu.matmul %136, %138, %cst_135 {dimension_numbers = #tpu.dot_dimension_numbers<[1], [0], [0], [1], [0, 0, 1, 1], [], []>} : vector<8x32xbf16>, vector<32x384xbf16>, vector<8x384xf32> -> vector<8x384xf32>
    %140 = arith.addf %134, %139 : vector<8x384xf32>
    %c12 = arith.constant 12 : index
    %c0_136 = arith.constant 0 : index
    %c0_137 = arith.constant 0 : index
    %141 = vector.load %arg1[%c12, %c0_136, %c0_137] : memref<16x8x32xbf16, #tpu.memory_space<vmem>>, vector<1x8x32xbf16>
    %142 = vector.shape_cast %141 : vector<1x8x32xbf16> to vector<8x32xbf16>
    %c2_138 = arith.constant 2 : index
    %c0_139 = arith.constant 0 : index
    %c0_140 = arith.constant 0 : index
    %143 = vector.load %arg2[%c2_138, %c0_139, %c0_140] : memref<3x32x384xbf16, #tpu.memory_space<vmem>>, vector<1x32x384xbf16>
    %144 = vector.shape_cast %143 : vector<1x32x384xbf16> to vector<32x384xbf16>
    %cst_141 = arith.constant dense<0.000000e+00> : vector<8x384xf32>
    %145 = tpu.matmul %142, %144, %cst_141 {dimension_numbers = #tpu.dot_dimension_numbers<[1], [0], [0], [1], [0, 0, 1, 1], [], []>} : vector<8x32xbf16>, vector<32x384xbf16>, vector<8x384xf32> -> vector<8x384xf32>
    %146 = arith.addf %140, %145 : vector<8x384xf32>
    %c0_142 = arith.constant 0 : index
    %c0_143 = arith.constant 0 : index
    %147 = vector.load %arg3[%c0_142, %c0_143] : memref<1x384xf32, #tpu.memory_space<vmem>>, vector<1x384xf32>
    %148 = vector.broadcast %147 : vector<1x384xf32> to vector<8x384xf32>
    %149 = arith.addf %146, %148 : vector<8x384xf32>
    %cst_144 = arith.constant 0.000000e+00 : f32
    %150 = vector.broadcast %cst_144 : f32 to vector<8x384xf32>
    %151 = arith.maximumf %149, %150 : vector<8x384xf32>
    %152 = arith.truncf %151 : vector<8x384xf32> to vector<8x384xbf16>
    %c5_145 = arith.constant 5 : index
    %c0_146 = arith.constant 0 : index
    %c0_147 = arith.constant 0 : index
    %153 = vector.load %arg11[%c5_145, %c0_146, %c0_147] : memref<7x8x384xbf16, #tpu.memory_space<vmem>>, vector<1x8x384xbf16>
    %154 = vector.shape_cast %153 : vector<1x8x384xbf16> to vector<8x384xbf16>
    %155 = vector.shape_cast %152 : vector<8x384xbf16> to vector<1x8x384xbf16>
    tpu.vector_store %arg11[%c5_145, %c0_146, %c0_147], %155 {strides = array<i32>} : memref<7x8x384xbf16, #tpu.memory_space<vmem>>, vector<1x8x384xbf16>,
    %c12_148 = arith.constant 12 : index
    %c0_149 = arith.constant 0 : index
    %c0_150 = arith.constant 0 : index
    %156 = vector.load %arg1[%c12_148, %c0_149, %c0_150] : memref<16x8x32xbf16, #tpu.memory_space<vmem>>, vector<1x8x32xbf16>
    %157 = vector.shape_cast %156 : vector<1x8x32xbf16> to vector<8x32xbf16>
    %c0_151 = arith.constant 0 : index
    %c0_152 = arith.constant 0 : index
    %c0_153 = arith.constant 0 : index
    %158 = vector.load %arg2[%c0_151, %c0_152, %c0_153] : memref<3x32x384xbf16, #tpu.memory_space<vmem>>, vector<1x32x384xbf16>
    %159 = vector.shape_cast %158 : vector<1x32x384xbf16> to vector<32x384xbf16>
    %cst_154 = arith.constant dense<0.000000e+00> : vector<8x384xf32>
    %160 = tpu.matmul %157, %159, %cst_154 {dimension_numbers = #tpu.dot_dimension_numbers<[1], [0], [0], [1], [0, 0, 1, 1], [], []>} : vector<8x32xbf16>, vector<32x384xbf16>, vector<8x384xf32> -> vector<8x384xf32>
    %c13 = arith.constant 13 : index
    %c0_155 = arith.constant 0 : index
    %c0_156 = arith.constant 0 : index
    %161 = vector.load %arg1[%c13, %c0_155, %c0_156] : memref<16x8x32xbf16, #tpu.memory_space<vmem>>, vector<1x8x32xbf16>
    %162 = vector.shape_cast %161 : vector<1x8x32xbf16> to vector<8x32xbf16>
    %c1_157 = arith.constant 1 : index
    %c0_158 = arith.constant 0 : index
    %c0_159 = arith.constant 0 : index
    %163 = vector.load %arg2[%c1_157, %c0_158, %c0_159] : memref<3x32x384xbf16, #tpu.memory_space<vmem>>, vector<1x32x384xbf16>
    %164 = vector.shape_cast %163 : vector<1x32x384xbf16> to vector<32x384xbf16>
    %cst_160 = arith.constant dense<0.000000e+00> : vector<8x384xf32>
    %165 = tpu.matmul %162, %164, %cst_160 {dimension_numbers = #tpu.dot_dimension_numbers<[1], [0], [0], [1], [0, 0, 1, 1], [], []>} : vector<8x32xbf16>, vector<32x384xbf16>, vector<8x384xf32> -> vector<8x384xf32>
    %166 = arith.addf %160, %165 : vector<8x384xf32>
    %c14 = arith.constant 14 : index
    %c0_161 = arith.constant 0 : index
    %c0_162 = arith.constant 0 : index
    %167 = vector.load %arg1[%c14, %c0_161, %c0_162] : memref<16x8x32xbf16, #tpu.memory_space<vmem>>, vector<1x8x32xbf16>
    %168 = vector.shape_cast %167 : vector<1x8x32xbf16> to vector<8x32xbf16>
    %c2_163 = arith.constant 2 : index
    %c0_164 = arith.constant 0 : index
    %c0_165 = arith.constant 0 : index
    %169 = vector.load %arg2[%c2_163, %c0_164, %c0_165] : memref<3x32x384xbf16, #tpu.memory_space<vmem>>, vector<1x32x384xbf16>
    %170 = vector.shape_cast %169 : vector<1x32x384xbf16> to vector<32x384xbf16>
    %cst_166 = arith.constant dense<0.000000e+00> : vector<8x384xf32>
    %171 = tpu.matmul %168, %170, %cst_166 {dimension_numbers = #tpu.dot_dimension_numbers<[1], [0], [0], [1], [0, 0, 1, 1], [], []>} : vector<8x32xbf16>, vector<32x384xbf16>, vector<8x384xf32> -> vector<8x384xf32>
    %172 = arith.addf %166, %171 : vector<8x384xf32>
    %c0_167 = arith.constant 0 : index
    %c0_168 = arith.constant 0 : index
    %173 = vector.load %arg3[%c0_167, %c0_168] : memref<1x384xf32, #tpu.memory_space<vmem>>, vector<1x384xf32>
    %174 = vector.broadcast %173 : vector<1x384xf32> to vector<8x384xf32>
    %175 = arith.addf %172, %174 : vector<8x384xf32>
    %cst_169 = arith.constant 0.000000e+00 : f32
    %176 = vector.broadcast %cst_169 : f32 to vector<8x384xf32>
    %177 = arith.maximumf %175, %176 : vector<8x384xf32>
    %178 = arith.truncf %177 : vector<8x384xf32> to vector<8x384xbf16>
    %c6_170 = arith.constant 6 : index
    %c0_171 = arith.constant 0 : index
    %c0_172 = arith.constant 0 : index
    %179 = vector.load %arg11[%c6_170, %c0_171, %c0_172] : memref<7x8x384xbf16, #tpu.memory_space<vmem>>, vector<1x8x384xbf16>
    %180 = vector.shape_cast %179 : vector<1x8x384xbf16> to vector<8x384xbf16>
    %181 = vector.shape_cast %178 : vector<8x384xbf16> to vector<1x8x384xbf16>
    tpu.vector_store %arg11[%c6_170, %c0_171, %c0_172], %181 {strides = array<i32>} : memref<7x8x384xbf16, #tpu.memory_space<vmem>>, vector<1x8x384xbf16>,
    %c0_173 = arith.constant 0 : index
    %c0_174 = arith.constant 0 : index
    %c0_175 = arith.constant 0 : index
    %182 = vector.load %arg11[%c0_173, %c0_174, %c0_175] : memref<7x8x384xbf16, #tpu.memory_space<vmem>>, vector<1x8x384xbf16>
    %183 = vector.shape_cast %182 : vector<1x8x384xbf16> to vector<8x384xbf16>
    %c0_176 = arith.constant 0 : index
    %c0_177 = arith.constant 0 : index
    %c0_178 = arith.constant 0 : index
    %184 = vector.load %arg4[%c0_176, %c0_177, %c0_178] : memref<3x384x640xbf16, #tpu.memory_space<vmem>>, vector<1x384x640xbf16>
    %185 = vector.shape_cast %184 : vector<1x384x640xbf16> to vector<384x640xbf16>
    %cst_179 = arith.constant dense<0.000000e+00> : vector<8x640xf32>
    %186 = tpu.matmul %183, %185, %cst_179 {dimension_numbers = #tpu.dot_dimension_numbers<[1], [0], [0], [1], [0, 0, 1, 1], [], []>} : vector<8x384xbf16>, vector<384x640xbf16>, vector<8x640xf32> -> vector<8x640xf32>
    %c1_180 = arith.constant 1 : index
    %c0_181 = arith.constant 0 : index
    %c0_182 = arith.constant 0 : index
    %187 = vector.load %arg11[%c1_180, %c0_181, %c0_182] : memref<7x8x384xbf16, #tpu.memory_space<vmem>>, vector<1x8x384xbf16>
    %188 = vector.shape_cast %187 : vector<1x8x384xbf16> to vector<8x384xbf16>
    %c1_183 = arith.constant 1 : index
    %c0_184 = arith.constant 0 : index
    %c0_185 = arith.constant 0 : index
    %189 = vector.load %arg4[%c1_183, %c0_184, %c0_185] : memref<3x384x640xbf16, #tpu.memory_space<vmem>>, vector<1x384x640xbf16>
    %190 = vector.shape_cast %189 : vector<1x384x640xbf16> to vector<384x640xbf16>
    %cst_186 = arith.constant dense<0.000000e+00> : vector<8x640xf32>
    %191 = tpu.matmul %188, %190, %cst_186 {dimension_numbers = #tpu.dot_dimension_numbers<[1], [0], [0], [1], [0, 0, 1, 1], [], []>} : vector<8x384xbf16>, vector<384x640xbf16>, vector<8x640xf32> -> vector<8x640xf32>
    %192 = arith.addf %186, %191 : vector<8x640xf32>
    %c2_187 = arith.constant 2 : index
    %c0_188 = arith.constant 0 : index
    %c0_189 = arith.constant 0 : index
    %193 = vector.load %arg11[%c2_187, %c0_188, %c0_189] : memref<7x8x384xbf16, #tpu.memory_space<vmem>>, vector<1x8x384xbf16>
    %194 = vector.shape_cast %193 : vector<1x8x384xbf16> to vector<8x384xbf16>
    %c2_190 = arith.constant 2 : index
    %c0_191 = arith.constant 0 : index
    %c0_192 = arith.constant 0 : index
    %195 = vector.load %arg4[%c2_190, %c0_191, %c0_192] : memref<3x384x640xbf16, #tpu.memory_space<vmem>>, vector<1x384x640xbf16>
    %196 = vector.shape_cast %195 : vector<1x384x640xbf16> to vector<384x640xbf16>
    %cst_193 = arith.constant dense<0.000000e+00> : vector<8x640xf32>
    %197 = tpu.matmul %194, %196, %cst_193 {dimension_numbers = #tpu.dot_dimension_numbers<[1], [0], [0], [1], [0, 0, 1, 1], [], []>} : vector<8x384xbf16>, vector<384x640xbf16>, vector<8x640xf32> -> vector<8x640xf32>
    %198 = arith.addf %192, %197 : vector<8x640xf32>
    %c0_194 = arith.constant 0 : index
    %c0_195 = arith.constant 0 : index
    %199 = vector.load %arg5[%c0_194, %c0_195] : memref<1x640xf32, #tpu.memory_space<vmem>>, vector<1x640xf32>
    %200 = vector.broadcast %199 : vector<1x640xf32> to vector<8x640xf32>
    %201 = arith.addf %198, %200 : vector<8x640xf32>
    %cst_196 = arith.constant 0.000000e+00 : f32
    %202 = vector.broadcast %cst_196 : f32 to vector<8x640xf32>
    %203 = arith.maximumf %201, %202 : vector<8x640xf32>
    %c2_197 = arith.constant 2 : index
    %c0_198 = arith.constant 0 : index
    %c0_199 = arith.constant 0 : index
    %204 = vector.load %arg11[%c2_197, %c0_198, %c0_199] : memref<7x8x384xbf16, #tpu.memory_space<vmem>>, vector<1x8x384xbf16>
    %205 = vector.shape_cast %204 : vector<1x8x384xbf16> to vector<8x384xbf16>
    %c0_200 = arith.constant 0 : index
    %c0_201 = arith.constant 0 : index
    %c0_202 = arith.constant 0 : index
    %206 = vector.load %arg4[%c0_200, %c0_201, %c0_202] : memref<3x384x640xbf16, #tpu.memory_space<vmem>>, vector<1x384x640xbf16>
    %207 = vector.shape_cast %206 : vector<1x384x640xbf16> to vector<384x640xbf16>
    %cst_203 = arith.constant dense<0.000000e+00> : vector<8x640xf32>
    %208 = tpu.matmul %205, %207, %cst_203 {dimension_numbers = #tpu.dot_dimension_numbers<[1], [0], [0], [1], [0, 0, 1, 1], [], []>} : vector<8x384xbf16>, vector<384x640xbf16>, vector<8x640xf32> -> vector<8x640xf32>
    %c3_204 = arith.constant 3 : index
    %c0_205 = arith.constant 0 : index
    %c0_206 = arith.constant 0 : index
    %209 = vector.load %arg11[%c3_204, %c0_205, %c0_206] : memref<7x8x384xbf16, #tpu.memory_space<vmem>>, vector<1x8x384xbf16>
    %210 = vector.shape_cast %209 : vector<1x8x384xbf16> to vector<8x384xbf16>
    %c1_207 = arith.constant 1 : index
    %c0_208 = arith.constant 0 : index
    %c0_209 = arith.constant 0 : index
    %211 = vector.load %arg4[%c1_207, %c0_208, %c0_209] : memref<3x384x640xbf16, #tpu.memory_space<vmem>>, vector<1x384x640xbf16>
    %212 = vector.shape_cast %211 : vector<1x384x640xbf16> to vector<384x640xbf16>
    %cst_210 = arith.constant dense<0.000000e+00> : vector<8x640xf32>
    %213 = tpu.matmul %210, %212, %cst_210 {dimension_numbers = #tpu.dot_dimension_numbers<[1], [0], [0], [1], [0, 0, 1, 1], [], []>} : vector<8x384xbf16>, vector<384x640xbf16>, vector<8x640xf32> -> vector<8x640xf32>
    %214 = arith.addf %208, %213 : vector<8x640xf32>
    %c4_211 = arith.constant 4 : index
    %c0_212 = arith.constant 0 : index
    %c0_213 = arith.constant 0 : index
    %215 = vector.load %arg11[%c4_211, %c0_212, %c0_213] : memref<7x8x384xbf16, #tpu.memory_space<vmem>>, vector<1x8x384xbf16>
    %216 = vector.shape_cast %215 : vector<1x8x384xbf16> to vector<8x384xbf16>
    %c2_214 = arith.constant 2 : index
    %c0_215 = arith.constant 0 : index
    %c0_216 = arith.constant 0 : index
    %217 = vector.load %arg4[%c2_214, %c0_215, %c0_216] : memref<3x384x640xbf16, #tpu.memory_space<vmem>>, vector<1x384x640xbf16>
    %218 = vector.shape_cast %217 : vector<1x384x640xbf16> to vector<384x640xbf16>
    %cst_217 = arith.constant dense<0.000000e+00> : vector<8x640xf32>
    %219 = tpu.matmul %216, %218, %cst_217 {dimension_numbers = #tpu.dot_dimension_numbers<[1], [0], [0], [1], [0, 0, 1, 1], [], []>} : vector<8x384xbf16>, vector<384x640xbf16>, vector<8x640xf32> -> vector<8x640xf32>
    %220 = arith.addf %214, %219 : vector<8x640xf32>
    %c0_218 = arith.constant 0 : index
    %c0_219 = arith.constant 0 : index
    %221 = vector.load %arg5[%c0_218, %c0_219] : memref<1x640xf32, #tpu.memory_space<vmem>>, vector<1x640xf32>
    %222 = vector.broadcast %221 : vector<1x640xf32> to vector<8x640xf32>
    %223 = arith.addf %220, %222 : vector<8x640xf32>
    %cst_220 = arith.constant 0.000000e+00 : f32
    %224 = vector.broadcast %cst_220 : f32 to vector<8x640xf32>
    %225 = arith.maximumf %223, %224 : vector<8x640xf32>
    %226 = arith.maximumf %203, %225 : vector<8x640xf32>
    %c4_221 = arith.constant 4 : index
    %c0_222 = arith.constant 0 : index
    %c0_223 = arith.constant 0 : index
    %227 = vector.load %arg11[%c4_221, %c0_222, %c0_223] : memref<7x8x384xbf16, #tpu.memory_space<vmem>>, vector<1x8x384xbf16>
    %228 = vector.shape_cast %227 : vector<1x8x384xbf16> to vector<8x384xbf16>
    %c0_224 = arith.constant 0 : index
    %c0_225 = arith.constant 0 : index
    %c0_226 = arith.constant 0 : index
    %229 = vector.load %arg4[%c0_224, %c0_225, %c0_226] : memref<3x384x640xbf16, #tpu.memory_space<vmem>>, vector<1x384x640xbf16>
    %230 = vector.shape_cast %229 : vector<1x384x640xbf16> to vector<384x640xbf16>
    %cst_227 = arith.constant dense<0.000000e+00> : vector<8x640xf32>
    %231 = tpu.matmul %228, %230, %cst_227 {dimension_numbers = #tpu.dot_dimension_numbers<[1], [0], [0], [1], [0, 0, 1, 1], [], []>} : vector<8x384xbf16>, vector<384x640xbf16>, vector<8x640xf32> -> vector<8x640xf32>
    %c5_228 = arith.constant 5 : index
    %c0_229 = arith.constant 0 : index
    %c0_230 = arith.constant 0 : index
    %232 = vector.load %arg11[%c5_228, %c0_229, %c0_230] : memref<7x8x384xbf16, #tpu.memory_space<vmem>>, vector<1x8x384xbf16>
    %233 = vector.shape_cast %232 : vector<1x8x384xbf16> to vector<8x384xbf16>
    %c1_231 = arith.constant 1 : index
    %c0_232 = arith.constant 0 : index
    %c0_233 = arith.constant 0 : index
    %234 = vector.load %arg4[%c1_231, %c0_232, %c0_233] : memref<3x384x640xbf16, #tpu.memory_space<vmem>>, vector<1x384x640xbf16>
    %235 = vector.shape_cast %234 : vector<1x384x640xbf16> to vector<384x640xbf16>
    %cst_234 = arith.constant dense<0.000000e+00> : vector<8x640xf32>
    %236 = tpu.matmul %233, %235, %cst_234 {dimension_numbers = #tpu.dot_dimension_numbers<[1], [0], [0], [1], [0, 0, 1, 1], [], []>} : vector<8x384xbf16>, vector<384x640xbf16>, vector<8x640xf32> -> vector<8x640xf32>
    %237 = arith.addf %231, %236 : vector<8x640xf32>
    %c6_235 = arith.constant 6 : index
    %c0_236 = arith.constant 0 : index
    %c0_237 = arith.constant 0 : index
    %238 = vector.load %arg11[%c6_235, %c0_236, %c0_237] : memref<7x8x384xbf16, #tpu.memory_space<vmem>>, vector<1x8x384xbf16>
    %239 = vector.shape_cast %238 : vector<1x8x384xbf16> to vector<8x384xbf16>
    %c2_238 = arith.constant 2 : index
    %c0_239 = arith.constant 0 : index
    %c0_240 = arith.constant 0 : index
    %240 = vector.load %arg4[%c2_238, %c0_239, %c0_240] : memref<3x384x640xbf16, #tpu.memory_space<vmem>>, vector<1x384x640xbf16>
    %241 = vector.shape_cast %240 : vector<1x384x640xbf16> to vector<384x640xbf16>
    %cst_241 = arith.constant dense<0.000000e+00> : vector<8x640xf32>
    %242 = tpu.matmul %239, %241, %cst_241 {dimension_numbers = #tpu.dot_dimension_numbers<[1], [0], [0], [1], [0, 0, 1, 1], [], []>} : vector<8x384xbf16>, vector<384x640xbf16>, vector<8x640xf32> -> vector<8x640xf32>
    %243 = arith.addf %237, %242 : vector<8x640xf32>
    %c0_242 = arith.constant 0 : index
    %c0_243 = arith.constant 0 : index
    %244 = vector.load %arg5[%c0_242, %c0_243] : memref<1x640xf32, #tpu.memory_space<vmem>>, vector<1x640xf32>
    %245 = vector.broadcast %244 : vector<1x640xf32> to vector<8x640xf32>
    %246 = arith.addf %243, %245 : vector<8x640xf32>
    %cst_244 = arith.constant 0.000000e+00 : f32
    %247 = vector.broadcast %cst_244 : f32 to vector<8x640xf32>
    %248 = arith.maximumf %246, %247 : vector<8x640xf32>
    %249 = arith.maximumf %226, %248 : vector<8x640xf32>
    %250 = arith.truncf %249 : vector<8x640xf32> to vector<8x640xbf16>
    %c0_245 = arith.constant 0 : index
    %c0_246 = arith.constant 0 : index
    %251 = vector.load %arg6[%c0_245, %c0_246] : memref<640x128xbf16, #tpu.memory_space<vmem>>, vector<640x128xbf16>
    %cst_247 = arith.constant dense<0.000000e+00> : vector<8x128xf32>
    %252 = tpu.matmul %250, %251, %cst_247 {dimension_numbers = #tpu.dot_dimension_numbers<[1], [0], [0], [1], [0, 0, 1, 1], [], []>} : vector<8x640xbf16>, vector<640x128xbf16>, vector<8x128xf32> -> vector<8x128xf32>
    %c0_248 = arith.constant 0 : index
    %c0_249 = arith.constant 0 : index
    %253 = vector.load %arg7[%c0_248, %c0_249] : memref<1x128xf32, #tpu.memory_space<vmem>>, vector<1x128xf32>
    %254 = vector.broadcast %253 : vector<1x128xf32> to vector<8x128xf32>
    %255 = arith.addf %252, %254 : vector<8x128xf32>
    %cst_250 = arith.constant 0.000000e+00 : f32
    %256 = vector.broadcast %cst_250 : f32 to vector<8x128xf32>
    %257 = arith.maximumf %255, %256 : vector<8x128xf32>
    %c0_251 = arith.constant 0 : index
    %c0_252 = arith.constant 0 : index
    %258 = vector.load %arg8[%c0_251, %c0_252] : memref<1x128xf32, #tpu.memory_space<vmem>>, vector<1x128xf32>
    %259 = vector.broadcast %258 : vector<1x128xf32> to vector<8x128xf32>
    %260 = arith.mulf %257, %259 : vector<8x128xf32>
    %cst_253 = arith.constant dense<0.000000e+00> : vector<8xf32>
    %261 = vector.multi_reduction <add>, %260, %cst_253 [1] : vector<8x128xf32> to vector<8xf32>
    %262 = vector.shape_cast %261 : vector<8xf32> to vector<8x1xf32>
    %c0_254 = arith.constant 0 : index
    %c0_255 = arith.constant 0 : index
    %263 = vector.load %arg9[%c0_254, %c0_255] : memref<1x1xf32, #tpu.memory_space<vmem>>, vector<1x1xf32>
    %264 = vector.broadcast %263 : vector<1x1xf32> to vector<8x1xf32>
    %265 = arith.addf %262, %264 : vector<8x1xf32>
    %c0_256 = arith.constant 0 : index
    %c0_257 = arith.constant 0 : index
    %266 = vector.load %arg10[%c0_256, %c0_257] : memref<8x1xf32, #tpu.memory_space<vmem>>, vector<8x1xf32>
    tpu.vector_store %arg10[%c0_256, %c0_257], %265 {strides = array<i32>} : memref<8x1xf32, #tpu.memory_space<vmem>>, vector<8x1xf32>,
    return
  }
  func.func @transform_0(%arg0: i32) -> (i32, i32, i32) {
    %c0_i32 = arith.constant 0 : i32
    %c0_i32_0 = arith.constant 0 : i32
    %c0_i32_1 = arith.constant 0 : i32
    return %c0_i32, %arg0, %c0_i32_0 : i32, i32, i32
  }
  func.func @transform_1(%arg0: i32) -> (i32, i32, i32) {
    %c0_i32 = arith.constant 0 : i32
    %c0_i32_0 = arith.constant 0 : i32
    %c0_i32_1 = arith.constant 0 : i32
    %c0_i32_2 = arith.constant 0 : i32
    return %c0_i32, %c0_i32_0, %c0_i32_1 : i32, i32, i32
  }
  func.func @transform_2(%arg0: i32) -> (i32, i32) {
    %c0_i32 = arith.constant 0 : i32
    %c0_i32_0 = arith.constant 0 : i32
    %c0_i32_1 = arith.constant 0 : i32
    return %c0_i32, %c0_i32_0 : i32, i32
  }
  func.func @transform_3(%arg0: i32) -> (i32, i32, i32) {
    %c0_i32 = arith.constant 0 : i32
    %c0_i32_0 = arith.constant 0 : i32
    %c0_i32_1 = arith.constant 0 : i32
    %c0_i32_2 = arith.constant 0 : i32
    return %c0_i32, %c0_i32_0, %c0_i32_1 : i32, i32, i32
  }
  func.func @transform_4(%arg0: i32) -> (i32, i32) {
    %c0_i32 = arith.constant 0 : i32
    %c0_i32_0 = arith.constant 0 : i32
    %c0_i32_1 = arith.constant 0 : i32
    return %c0_i32, %c0_i32_0 : i32, i32
  }
  func.func @transform_5(%arg0: i32) -> (i32, i32) {
    %c0_i32 = arith.constant 0 : i32
    %c0_i32_0 = arith.constant 0 : i32
    %c0_i32_1 = arith.constant 0 : i32
    return %c0_i32, %c0_i32_0 : i32, i32
  }
  func.func @transform_6(%arg0: i32) -> (i32, i32) {
    %c0_i32 = arith.constant 0 : i32
    %c0_i32_0 = arith.constant 0 : i32
    %c0_i32_1 = arith.constant 0 : i32
    return %c0_i32, %c0_i32_0 : i32, i32
  }
  func.func @transform_7(%arg0: i32) -> (i32, i32) {
    %c0_i32 = arith.constant 0 : i32
    %c0_i32_0 = arith.constant 0 : i32
    %c0_i32_1 = arith.constant 0 : i32
    return %c0_i32, %c0_i32_0 : i32, i32
  }
  func.func @transform_8(%arg0: i32) -> (i32, i32) {
    %c0_i32 = arith.constant 0 : i32
    %c0_i32_0 = arith.constant 0 : i32
    %c0_i32_1 = arith.constant 0 : i32
    return %c0_i32, %c0_i32_0 : i32, i32
  }
  func.func @transform_9(%arg0: i32) -> (i32, i32) {
    %c0_i32 = arith.constant 0 : i32
    %c0_i32_0 = arith.constant 0 : i32
    return %arg0, %c0_i32 : i32, i32
  }
}

</mosaic_0001>

<bundles_post_ra>
// kernel: _lambda_.1
= control target key start
LH: loop header
LB: loop body
LE: loop exit
PB: predicated region body
PF: predicated region fallthrough
CT: control target
= control target key end

     0   :  { %v11286_v1 = vmov 0   ;;  %vm87_vm0 = vcmask 261120   ;;  %v11287_v12 = vmov 0.0   ;;  %vm11288_vm1 = vmmov 0   ;;  %s15916_s1 = inlined_call_operand.vmem [shape: bf16[3,32,384], index: 1, kind: input, shape index: {}]   ;;  %s15917_s0 = inlined_call_operand.vmem [shape: bf16[16,8,32], index: 0, kind: input, shape index: {}]   ;;  %s15918_s3 = inlined_call_operand.vmem [shape: bf16[3,384,640], index: 3, kind: input, shape index: {}]   ;;  %s15919_s2 = inlined_call_operand.vmem [shape: f32[1,384], index: 2, kind: input, shape index: {}]   ;;  %s15920_s4 = inlined_call_operand.vmem [shape: f32[1,640], index: 4, kind: input, shape index: {}]   ;;  %s15921_s5 = inlined_call_operand.vmem [shape: bf16[640,128], index: 5, kind: input, shape index: {}]   ;;  %s15922_s8 = inlined_call_operand.<no memory space> [shape: f32[1,1], index: 8, kind: input, shape index: {}]   ;;  %s15923_s6 = inlined_call_operand.vmem [shape: f32[1,128], index: 6, kind: input, shape index: {}]   ;;  %s15924_s7 = inlined_call_operand.vmem [shape: f32[1,128], index: 7, kind: input, shape index: {}]   ;;  %s15925_s9 = inlined_call_operand.vmem [shape: f32[8,1], index: 9, kind: output, shape index: {}]  }
   0x1   :  { %v11342_v0 = vld [vmem:[%s15916_s1 + $0x34] ss:$12 sps:$4 sm:$0xff]   ;;  %123 = vmatprep.mubr.bf16.mxu1 %v11286_v1  ;;  %366 = vmatprep.mubr.bf16.mxu0 %v11286_v1  ;;  %v11349_v2 = vld [vmem:[%s15916_s1 + $0x64] ss:$12 sps:$4 sm:$0xff]   ;;  %v11366_v5 = vld [vmem:[%s15916_s1 + $0x4c] ss:$12 sps:$4 sm:$0xff]  }
   0x2   :  { %91 = vmatprep.subr.bf16.mxu1 %v11342_v0  ;;  %v11355_v3 = vld [vmem:[%s15916_s1 + $0x30] ss:$12 sps:$4 sm:$0xff]   ;;  %v11360_v4 = vld [vmem:[%s15916_s1 + $0x60] ss:$12 sps:$4 sm:$0xff]   ;;  %334 = vmatprep.subr.bf16.mxu0 %v11349_v2  ;;  %v11378_v7 = vld [vmem:[%s15916_s1 + $0x48] ss:$12 sps:$4 sm:$0xff]  }
   0x3   :  { %92 = vmatpush1.bf16.msra.mxu1 %v11355_v3  ;;  %335 = vmatpush1.bf16.msra.mxu0 %v11360_v4  ;;  %v11373_v6 = vld [vmem:[%s15916_s1 + $0x7c] ss:$12 sps:$4 sm:$0xff]   ;;  %v11384_v8 = vld [vmem:[%s15916_s1 + $0x78] ss:$12 sps:$4 sm:$0xff]   ;;  %v11422_v15 = vld [vmem:[%s15916_s1] ss:$12 sps:$4 sm:$0xff]  }
   0x4   :  { %93 = vmatprep.subr.bf16.mxu1 %v11366_v5  ;;  %336 = vmatprep.subr.bf16.mxu0 %v11373_v6  ;;  %v8122_v9 = vld [vmem:[%s15917_s0 + $0x4] sm:$0xf]  ;;  %v11393_v10 = vld [vmem:[%s15917_s0 + $0x8] sm:$0xf]  ;;  %v9941_v13 = vld [vmem:[%s15916_s1 + $0x50] ss:$12 sps:$4 sm:$0xff]  }
   0x5   :  { %v9940_v11 = vld [vmem:[%s15916_s1 + $0x38] ss:$12 sps:$4 sm:$0xff]   ;;  %v11428_v16 = vld [vmem:[%s15917_s0 + $0xc] sm:$0xf]  ;;  %v11435_v17 = vld [vmem:[%s15916_s1 + $0x1c] ss:$12 sps:$4 sm:$0xff]  }
   0x6   :  { %v11414_v14 = vld [vmem:[%s15916_s1 + $0x4] ss:$12 sps:$4 sm:$0xff]   ;;  %v35_v19 = vld [vmem:[%s15917_s0] sm:$0xf]  ;;  %v11457_v20 = vld [vmem:[%s15917_s0 + $0x8] sm:$0xf] }
   0x7   :  { %94 = vmatpush1.bf16.msra.mxu1 %v11378_v7  ;;  %337 = vmatpush1.bf16.msra.mxu0 %v11384_v8  ;;  %v11445_v18 = vld [vmem:[%s15916_s1 + $0x18] ss:$12 sps:$4 sm:$0xff]   ;;  %v9948_v21 = vld [vmem:[%s15916_s1 + $0x8] ss:$12 sps:$4 sm:$0xff]   ;;  %v9949_v22 = vld [vmem:[%s15916_s1 + $0x20] ss:$12 sps:$4 sm:$0xff]  }
   0x8   :  { %9557 = vmatprep.subr.bf16.mxu1 %v11287_v12  ;;  %510 = vmatprep.subr.bf16.mxu0 %v11342_v0  ;;  %v11481_v23 = vld [vmem:[%s15917_s0 + $0x10] sm:$0xf]  ;;  %v9950_v24 = vld [vmem:[%s15916_s1 + $0x68] ss:$12 sps:$4 sm:$0xff]   ;;  %v9951_v25 = vld [vmem:[%s15916_s1 + $0x80] ss:$12 sps:$4 sm:$0xff]  }
   0x9   :  { %v9952_v26 = vld [vmem:[%s15916_s1 + $0x38] ss:$12 sps:$4 sm:$0xff]   ;;  %v11510_v27 = vld [vmem:[%s15917_s0 + $0x14] sm:$0xf]  ;;  %v9953_v28 = vld [vmem:[%s15916_s1 + $0x50] ss:$12 sps:$4 sm:$0xff]  }
   0xa   :  { %8137 = vmatmul.mubr.msk.bf16.vlgmr.msra.gmra.mrb[0].mxu1 %vm87_vm0, %v8122_v9  ;;  %8162 = vmatmul.mubr.msk.bf16.vlgmr.msra.gmra.mrb[0].mxu0 %vm87_vm0, %v11393_v10  ;;  %v9954_v29 = vld [vmem:[%s15916_s1 + $0x8] ss:$12 sps:$4 sm:$0xff]   ;;  %v11533_v30 = vld [vmem:[%s15917_s0 + $0x10] sm:$0xf]  ;;  %v9955_v31 = vld [vmem:[%s15916_s1 + $0x20] ss:$12 sps:$4 sm:$0xff]  }
   0xb   :  { %9558 = vmatpush3.bf16.msra.mxu1 %v9940_v11  ;;  %511 = vmatpush1.bf16.msra.mxu0 %v11355_v3  ;;  %v9956_v32 = vld [vmem:[%s15916_s1 + $0x68] ss:$12 sps:$4 sm:$0xff]   ;;  %v11555_v33 = vld [vmem:[%s15917_s0 + $0x18] sm:$0xf]  ;;  %v9957_v34 = vld [vmem:[%s15916_s1 + $0x80] ss:$12 sps:$4 sm:$0xff]  }
   0xc   :  { %9559 = vmatprep.subr.bf16.mxu1 %v11287_v12  ;;  %512 = vmatprep.subr.bf16.mxu0 %v11366_v5  ;;  %v9958_v35 = vld [vmem:[%s15916_s1 + $0x38] ss:$12 sps:$4 sm:$0xff]   ;;  %v11579_v36 = vld [vmem:[%s15917_s0 + $0x1c] sm:$0xf]  ;;  %v9960_v38 = vld [vmem:[%s15916_s1 + $0x8] ss:$12 sps:$4 sm:$0xff]  }
   0xd   :  { %9561 = vmatprep.mubr.msk.bf16.mxu1 %vm11288_vm1, %v11287_v12  ;;  %542 = vmatprep.mubr.bf16.mxu0 %v11286_v1  ;;  %v9959_v37 = vld [vmem:[%s15916_s1 + $0x50] ss:$12 sps:$4 sm:$0xff]   ;;  %v11603_v39 = vld [vmem:[%s15917_s0 + $0x18] sm:$0xf]  ;;  %v9961_v40 = vld [vmem:[%s15916_s1 + $0x20] ss:$12 sps:$4 sm:$0xff]  }
   0xe   :  { %v9962_v41 = vld [vmem:[%s15916_s1 + $0x68] ss:$12 sps:$4 sm:$0xff]   ;;  %v11627_v42 = vld [vmem:[%s15917_s0 + $0x20] sm:$0xf]  ;;  %v9964_v44 = vld [vmem:[%s15916_s1 + $0x38] ss:$12 sps:$4 sm:$0xff]  }
   0xf   :  { %9560 = vmatpush3.bf16.msra.mxu1 %v9941_v13  ;;  %513 = vmatpush1.bf16.msra.mxu0 %v11378_v7  ;;  %v9963_v43 = vld [vmem:[%s15916_s1 + $0x80] ss:$12 sps:$4 sm:$0xff]   ;;  %v11651_v45 = vld [vmem:[%s15917_s0 + $0x24] sm:$0xf]  ;;  %v9965_v46 = vld [vmem:[%s15916_s1 + $0x50] ss:$12 sps:$4 sm:$0xff]  }
  0x10   :  { %207 = vmatprep.subr.bf16.mxu1 %v11414_v14  ;;  %626 = vmatprep.subr.bf16.mxu0 %v11414_v14  ;;  %v9966_v47 = vld [vmem:[%s15916_s1 + $0x8] ss:$12 sps:$4 sm:$0xff]   ;;  %v11675_v48 = vld [vmem:[%s15917_s0 + $0x20] sm:$0xf]  ;;  %v9970_v53 = vld [vmem:[%s15916_s1 + $0x38] ss:$12 sps:$4 sm:$0xff]  }
  0x11   :  { %v9967_v49 = vld [vmem:[%s15916_s1 + $0x20] ss:$12 sps:$4 sm:$0xff]   ;;  %v9968_v50 = vld [vmem:[%s15916_s1 + $0x68] ss:$12 sps:$4 sm:$0xff]   ;;  %v9971_v55 = vld [vmem:[%s15916_s1 + $0x50] ss:$12 sps:$4 sm:$0xff]  }
  0x12   :  { %9562 = vmatmul.mubr.msk.bf16.vlgmr.msra.gmra.mrb[4].mxu1 %vm87_vm0, %v8122_v9  ;;  %8182 = vmatmul.mubr.msk.bf16.vlgmr.msra.gmra.mrb[4].mxu0 %vm87_vm0, %v11428_v16  ;;  %v11699_v51 = vld [vmem:[%s15917_s0 + $0x28] sm:$0xf]  ;;  %v9969_v52 = vld [vmem:[%s15916_s1 + $0x80] ss:$12 sps:$4 sm:$0xff]   ;;  %v11771_v60 = vld [vmem:[%s15917_s0 + $0x30] sm:$0xf] }
  0x13   :  { %208 = vmatpush1.bf16.msra.mxu1 %v11422_v15  ;;  %627 = vmatpush1.bf16.msra.mxu0 %v11422_v15  ;;  %v11723_v54 = vld [vmem:[%s15917_s0 + $0x2c] sm:$0xf]  ;;  %v9972_v56 = vld [vmem:[%s15916_s1 + $0x8] ss:$12 sps:$4 sm:$0xff]   ;;  %v10547_v61 = vld [vmem:[%s15916_s1 + $0x78] ss:$12 sps:$4 sm:$0xff]  }
  0x14   :  { %209 = vmatprep.subr.bf16.mxu1 %v11435_v17  ;;  %628 = vmatprep.subr.bf16.mxu0 %v11435_v17  ;;  %v11749_v57 = vld [vmem:[%s15917_s0 + $0x28] sm:$0xf]  ;;  %v9973_v58 = vld [vmem:[%s15916_s1 + $0x20] ss:$12 sps:$4 sm:$0xff]   ;;  %v11835_v11 = vld [vmem:[%s15917_s0 + $0x30] sm:$0xf] }
  0x15   :  { %239 = vmatprep.mubr.bf16.mxu1 %v11286_v1  ;;  %658 = vmatprep.mubr.bf16.mxu0 %v11286_v1  ;;  %v9974_v59 = vld [vmem:[%s15916_s1 + $0x68] ss:$12 sps:$4 sm:$0xff]   ;;  %v9975_v62 = vld [vmem:[%s15916_s1 + $0x80] ss:$12 sps:$4 sm:$0xff]   ;;  %v10555_v13 = vld [vmem:[%s15916_s1 + $0x18] ss:$12 sps:$4 sm:$0xff]  }
  0x16   :  { %v10548_v63 = vld [vmem:[%s15916_s1 + $0x34] ss:$12 sps:$4 sm:$0xff]   ;;  %vm8116_vm2 = vcmask 7168  }
  0x17   :  { %210 = vmatpush1.bf16.msra.mxu1 %v11445_v18  ;;  %629 = vmatpush1.bf16.msra.mxu0 %v11445_v18  ;;  %v9987_v9 = vld [vmem:[%s15916_s1 + $0x8] ss:$12 sps:$4 sm:$0xff]  }
  0x18   :  { %9565 = vmatprep.subr.bf16.mxu1 %v11287_v12  ;;  %752 = vmatprep.subr.bf16.mxu0 %v11349_v2 }
  0x1a   :  { %8145 = vmatmul.mubr.msk.bf16.vlgmr.msra.gmra.mrb[8].mxu1 %vm87_vm0, %v35_v19  ;;  %8190 = vmatmul.mubr.msk.bf16.vlgmr.msra.gmra.mrb[8].mxu0 %vm87_vm0, %v11457_v20 }
  0x1b   :  { %9566 = vmatpush3.bf16.msra.mxu1 %v9948_v21  ;;  %753 = vmatpush1.bf16.msra.mxu0 %v11360_v4  ;;  %v11873_v21 = vld [vmem:[%s15917_s0 + $0x38] sm:$0xf] }
  0x1c   :  { %9567 = vmatprep.subr.bf16.mxu1 %v11287_v12  ;;  %754 = vmatprep.subr.bf16.mxu0 %v11373_v6 }
  0x1d   :  { %9569 = vmatprep.mubr.msk.bf16.mxu1 %vm11288_vm1, %v11287_v12  ;;  %784 = vmatprep.mubr.bf16.mxu0 %v11286_v1 }
  0x1f   :  { %9568 = vmatpush3.bf16.msra.mxu1 %v9949_v22  ;;  %755 = vmatpush1.bf16.msra.mxu0 %v11384_v8  ;;  %v9982_v22 = vld [vmem:[%s15918_s3 + $0x3ec] ss:$20 sps:$4 sm:$0xff]  }
  0x20   :  { %9573 = vmatprep.subr.bf16.mxu1 %v11287_v12  ;;  %929 = vmatprep.subr.bf16.mxu0 %v11342_v0 }
  0x22   :  { %9570 = vmatmul.mubr.msk.bf16.vlgmr.msra.gmra.mrb[12].mxu1 %vm87_vm0, %v35_v19  ;;  %8207 = vmatmul.mubr.msk.bf16.vlgmr.msra.gmra.mrb[12].mxu0 %vm87_vm0, %v11481_v23  ;;  %v10558_v19 = vld [vmem:[%s15916_s1 + $0x7c] ss:$12 sps:$4 sm:$0xff]  }
  0x23   :  { %9574 = vmatpush3.bf16.msra.mxu1 %v9950_v24  ;;  %9577 = vmatprep.mubr.msk.bf16.mxu1 %vm11288_vm1, %v11287_v12  ;;  %v9980_v24 = vld [vmem:[%s15918_s3 + $0x3e8] ss:$20 sps:$4 sm:$0xff]  }
  0x24   :  { %9575 = vmatprep.subr.bf16.mxu1 %v11287_v12  ;;  %930 = vmatpush1.bf16.msra.mxu0 %v11355_v3 }
  0x25   :  { %931 = vmatprep.subr.bf16.mxu0 %v11366_v5  ;;  %961 = vmatprep.mubr.bf16.mxu0 %v11286_v1 }
  0x27   :  { %9576 = vmatpush3.bf16.msra.mxu1 %v9951_v25  ;;  %v9986_v25 = vld [vmem:[%s15918_s3 + $0x414] ss:$20 sps:$4 sm:$0xff]  }
  0x28   :  { %9581 = vmatprep.subr.bf16.mxu1 %v11287_v12  ;;  %932 = vmatpush1.bf16.msra.mxu0 %v11378_v7 }
  0x29   :  { %1045 = vmatprep.subr.bf16.mxu0 %v11414_v14 }
  0x2a   :  { %9578 = vmatmul.mubr.msk.bf16.vlgmr.msra.gmra.mrb[16].mxu1 %vm87_vm0, %v11393_v10  ;;  %v10554_v10 = vld [vmem:[%s15916_s1 + $0x1c] ss:$12 sps:$4 sm:$0xff]  }
  0x2b   :  { %9582 = vmatpush3.bf16.msra.mxu1 %v9952_v26  ;;  %9585 = vmatprep.mubr.msk.bf16.mxu1 %vm11288_vm1, %v11287_v12  ;;  %v9984_v26 = vld [vmem:[%s15918_s3 + $0x410] ss:$20 sps:$4 sm:$0xff]  }
  0x2c   :  { %9583 = vmatprep.subr.bf16.mxu1 %v11287_v12  ;;  %8227 = vmatmul.mubr.msk.bf16.vlgmr.msra.gmra.mrb[16].mxu0 %vm87_vm0, %v11510_v27 }
  0x2d   :  { %1046 = vmatpush1.bf16.msra.mxu0 %v11422_v15  ;;  %1077 = vmatprep.mubr.bf16.mxu0 %v11286_v1 }
  0x2e   :  { %1047 = vmatprep.subr.bf16.mxu0 %v11435_v17 }
  0x2f   :  { %9584 = vmatpush3.bf16.msra.mxu1 %v9953_v28  ;;  %v9990_v28 = vld [vmem:[%s15918_s3 + $0x43c] ss:$20 sps:$4 sm:$0xff]  }
  0x30   :  { %9589 = vmatprep.subr.bf16.mxu1 %v11287_v12 }
  0x31   :  { %1048 = vmatpush1.bf16.msra.mxu0 %v11445_v18 }
  0x32   :  { %9586 = vmatmul.mubr.msk.bf16.vlgmr.msra.gmra.mrb[20].mxu1 %vm87_vm0, %v11428_v16  ;;  %1171 = vmatprep.subr.bf16.mxu0 %v11349_v2  ;;  %v10557_v16 = vld [vmem:[%s15916_s1 + $0x60] ss:$12 sps:$4 sm:$0xff]  }
  0x33   :  { %9590 = vmatpush3.bf16.msra.mxu1 %v9954_v29  ;;  %9593 = vmatprep.mubr.msk.bf16.mxu1 %vm11288_vm1, %v11287_v12  ;;  %v10007_v29 = vld [vmem:[%s15916_s1 + $0x50] ss:$12 sps:$4 sm:$0xff]  }
  0x34   :  { %9591 = vmatprep.subr.bf16.mxu1 %v11287_v12  ;;  %8235 = vmatmul.mubr.msk.bf16.vlgmr.msra.gmra.mrb[20].mxu0 %vm87_vm0, %v11533_v30 }
  0x35   :  { %1172 = vmatpush1.bf16.msra.mxu0 %v11360_v4  ;;  %1203 = vmatprep.mubr.bf16.mxu0 %v11286_v1 }
  0x36   :  { %1173 = vmatprep.subr.bf16.mxu0 %v11373_v6 }
  0x37   :  { %9592 = vmatpush3.bf16.msra.mxu1 %v9955_v31  ;;  %v9994_v31 = vld [vmem:[%s15918_s3 + $0x464] ss:$20 sps:$4 sm:$0xff]  }
  0x38   :  { %9597 = vmatprep.subr.bf16.mxu1 %v11287_v12 }
  0x39   :  { %1174 = vmatpush1.bf16.msra.mxu0 %v11384_v8 }
  0x3a   :  { %9594 = vmatmul.mubr.msk.bf16.vlgmr.msra.gmra.mrb[24].mxu1 %vm87_vm0, %v11457_v20  ;;  %1348 = vmatprep.subr.bf16.mxu0 %v11342_v0  ;;  %v9976_v20 = vld [vmem:[%s15918_s3 + $0x3c0] ss:$20 sps:$4 sm:$0xff]  }
  0x3b   :  { %9598 = vmatpush3.bf16.msra.mxu1 %v9956_v32  ;;  %9601 = vmatprep.mubr.msk.bf16.mxu1 %vm11288_vm1, %v11287_v12  ;;  %v10011_v32 = vld [vmem:[%s15916_s1 + $0x8] ss:$12 sps:$4 sm:$0xff]  }
  0x3c   :  { %9599 = vmatprep.subr.bf16.mxu1 %v11287_v12  ;;  %8252 = vmatmul.mubr.msk.bf16.vlgmr.msra.gmra.mrb[24].mxu0 %vm87_vm0, %v11555_v33 }
  0x3d   :  { %1349 = vmatpush1.bf16.msra.mxu0 %v11355_v3  ;;  %1380 = vmatprep.mubr.bf16.mxu0 %v11286_v1 }
  0x3e   :  { %1350 = vmatprep.subr.bf16.mxu0 %v11366_v5 }
  0x3f   :  { %9600 = vmatpush3.bf16.msra.mxu1 %v9957_v34  ;;  %v9998_v34 = vld [vmem:[%s15918_s3 + $0x48c] ss:$20 sps:$4 sm:$0xff]  }
  0x40   :  { %9605 = vmatprep.subr.bf16.mxu1 %v11287_v12 }
  0x41   :  { %1351 = vmatpush1.bf16.msra.mxu0 %v11378_v7 }
  0x42   :  { %9602 = vmatmul.mubr.msk.bf16.vlgmr.msra.gmra.mrb[28].mxu1 %vm87_vm0, %v11481_v23  ;;  %1464 = vmatprep.subr.bf16.mxu0 %v11414_v14  ;;  %v9999_v23 = vld [vmem:[%s15916_s1 + $0x80] ss:$12 sps:$4 sm:$0xff]  }
  0x43   :  { %9606 = vmatpush3.bf16.msra.mxu1 %v9958_v35  ;;  %9609 = vmatprep.mubr.msk.bf16.mxu1 %vm11288_vm1, %v11287_v12  ;;  %v10015_v35 = vld [vmem:[%s15916_s1 + $0x20] ss:$12 sps:$4 sm:$0xff]  }
  0x44   :  { %8272 = vmatmul.mubr.msk.bf16.vlgmr.msra.gmra.mrb[28].mxu0 %vm87_vm0, %v11579_v36  ;;  %9607 = vmatprep.subr.bf16.mxu1 %v11287_v12 }
  0x45   :  { %1465 = vmatpush1.bf16.msra.mxu0 %v11422_v15  ;;  %1496 = vmatprep.mubr.bf16.mxu0 %v11286_v1 }
  0x46   :  { %1466 = vmatprep.subr.bf16.mxu0 %v11435_v17 }
  0x47   :  { %9608 = vmatpush3.bf16.msra.mxu1 %v9959_v37  ;;  %v10002_v37 = vld [vmem:[%s15918_s3 + $0x4b4] ss:$20 sps:$4 sm:$0xff]  }
  0x48   :  { %9613 = vmatprep.subr.bf16.mxu1 %v11287_v12 }
  0x49   :  { %1467 = vmatpush1.bf16.msra.mxu0 %v11445_v18 }
  0x4a   :  { %1590 = vmatprep.subr.bf16.mxu0 %v11349_v2  ;;  %9610 = vmatmul.mubr.msk.bf16.vlgmr.msra.gmra.mrb[32].mxu1 %vm87_vm0, %v11510_v27  ;;  %v10003_v27 = vld [vmem:[%s15916_s1 + $0x38] ss:$12 sps:$4 sm:$0xff]  }
  0x4b   :  { %9614 = vmatpush3.bf16.msra.mxu1 %v9960_v38  ;;  %9617 = vmatprep.mubr.msk.bf16.mxu1 %vm11288_vm1, %v11287_v12  ;;  %v10019_v38 = vld [vmem:[%s15916_s1 + $0x68] ss:$12 sps:$4 sm:$0xff]  }
  0x4c   :  { %8280 = vmatmul.mubr.msk.bf16.vlgmr.msra.gmra.mrb[32].mxu0 %vm87_vm0, %v11603_v39  ;;  %9615 = vmatprep.subr.bf16.mxu1 %v11287_v12 }
  0x4d   :  { %1591 = vmatpush1.bf16.msra.mxu0 %v11360_v4  ;;  %1622 = vmatprep.mubr.bf16.mxu0 %v11286_v1 }
  0x4e   :  { %1592 = vmatprep.subr.bf16.mxu0 %v11373_v6 }
  0x4f   :  { %9616 = vmatpush3.bf16.msra.mxu1 %v9961_v40  ;;  %v10006_v40 = vld [vmem:[%s15918_s3 + $0x4dc] ss:$20 sps:$4 sm:$0xff]  }
  0x50   :  { %9621 = vmatprep.subr.bf16.mxu1 %v11287_v12 }
  0x51   :  { %1593 = vmatpush1.bf16.msra.mxu0 %v11384_v8 }
  0x52   :  { %1767 = vmatprep.subr.bf16.mxu0 %v11342_v0  ;;  %9618 = vmatmul.mubr.msk.bf16.vlgmr.msra.gmra.mrb[36].mxu1 %vm87_vm0, %v11533_v30  ;;  %v9988_v30 = vld [vmem:[%s15918_s3 + $0x438] ss:$20 sps:$4 sm:$0xff]  }
  0x53   :  { %9622 = vmatpush3.bf16.msra.mxu1 %v9962_v41  ;;  %9625 = vmatprep.mubr.msk.bf16.mxu1 %vm11288_vm1, %v11287_v12  ;;  %v10023_v41 = vld [vmem:[%s15916_s1 + $0x80] ss:$12 sps:$4 sm:$0xff]  }
  0x54   :  { %8297 = vmatmul.mubr.msk.bf16.vlgmr.msra.gmra.mrb[36].mxu0 %vm87_vm0, %v11627_v42  ;;  %9623 = vmatprep.subr.bf16.mxu1 %v11287_v12 }
  0x55   :  { %1768 = vmatpush1.bf16.msra.mxu0 %v11355_v3  ;;  %1799 = vmatprep.mubr.bf16.mxu0 %v11286_v1 }
  0x56   :  { %1769 = vmatprep.subr.bf16.mxu0 %v11366_v5 }
  0x57   :  { %9624 = vmatpush3.bf16.msra.mxu1 %v9963_v43  ;;  %v10038_v43 = vld [vmem:[%s15918_s3 + $0x644] ss:$20 sps:$4 sm:$0xff]  }
  0x58   :  { %9629 = vmatprep.subr.bf16.mxu1 %v11287_v12 }
  0x59   :  { %1770 = vmatpush1.bf16.msra.mxu0 %v11378_v7 }
  0x5a   :  { %1883 = vmatprep.subr.bf16.mxu0 %v11414_v14  ;;  %9626 = vmatmul.mubr.msk.bf16.vlgmr.msra.gmra.mrb[40].mxu1 %vm87_vm0, %v11555_v33  ;;  %v9992_v33 = vld [vmem:[%s15918_s3 + $0x460] ss:$20 sps:$4 sm:$0xff]  }
  0x5b   :  { %9630 = vmatpush3.bf16.msra.mxu1 %v9964_v44  ;;  %9633 = vmatprep.mubr.msk.bf16.mxu1 %vm11288_vm1, %v11287_v12  ;;  %v10010_v44 = vld [vmem:[%s15918_s3 + $0x504] ss:$20 sps:$4 sm:$0xff]  }
  0x5c   :  { %8317 = vmatmul.mubr.msk.bf16.vlgmr.msra.gmra.mrb[40].mxu0 %vm87_vm0, %v11651_v45  ;;  %9631 = vmatprep.subr.bf16.mxu1 %v11287_v12 }
  0x5d   :  { %1884 = vmatpush1.bf16.msra.mxu0 %v11422_v15  ;;  %1915 = vmatprep.mubr.bf16.mxu0 %v11286_v1 }
  0x5e   :  { %1885 = vmatprep.subr.bf16.mxu0 %v11435_v17 }
  0x5f   :  { %9632 = vmatpush3.bf16.msra.mxu1 %v9965_v46  ;;  %v10008_v46 = vld [vmem:[%s15918_s3 + $0x500] ss:$20 sps:$4 sm:$0xff]  }
  0x60   :  { %9637 = vmatprep.subr.bf16.mxu1 %v11287_v12 }
  0x61   :  { %1886 = vmatpush1.bf16.msra.mxu0 %v11445_v18 }
  0x62   :  { %2009 = vmatprep.subr.bf16.mxu0 %v11349_v2  ;;  %9634 = vmatmul.mubr.msk.bf16.vlgmr.msra.gmra.mrb[44].mxu1 %vm87_vm0, %v11579_v36  ;;  %v9996_v36 = vld [vmem:[%s15918_s3 + $0x488] ss:$20 sps:$4 sm:$0xff]  }
  0x63   :  { %9638 = vmatpush3.bf16.msra.mxu1 %v9966_v47  ;;  %9641 = vmatprep.mubr.msk.bf16.mxu1 %vm11288_vm1, %v11287_v12  ;;  %v10044_v47 = vld [vmem:[%s15918_s3 + $0x66c] ss:$20 sps:$4 sm:$0xff]  }
  0x64   :  { %8325 = vmatmul.mubr.msk.bf16.vlgmr.msra.gmra.mrb[44].mxu0 %vm87_vm0, %v11675_v48  ;;  %9639 = vmatprep.subr.bf16.mxu1 %v11287_v12 }
  0x65   :  { %2010 = vmatpush1.bf16.msra.mxu0 %v11360_v4  ;;  %2041 = vmatprep.mubr.bf16.mxu0 %v11286_v1 }
  0x66   :  { %2011 = vmatprep.subr.bf16.mxu0 %v11373_v6 }
  0x67   :  { %9640 = vmatpush3.bf16.msra.mxu1 %v9967_v49  ;;  %v10042_v49 = vld [vmem:[%s15918_s3 + $0x668] ss:$20 sps:$4 sm:$0xff]  }
  0x68   :  { %9645 = vmatprep.subr.bf16.mxu1 %v11287_v12 }
  0x69   :  { %2012 = vmatpush1.bf16.msra.mxu0 %v11384_v8  ;;  %v10553_v8 = vld [vmem:[%s15916_s1] ss:$12 sps:$4 sm:$0xff]  }
  0x6a   :  { %2186 = vmatprep.subr.bf16.mxu0 %v11342_v0  ;;  %9642 = vmatmul.mubr.msk.bf16.vlgmr.msra.gmra.mrb[48].mxu1 %vm87_vm0, %v11603_v39  ;;  %v10549_v0 = vld [vmem:[%s15916_s1 + $0x30] ss:$12 sps:$4 sm:$0xff]  }
  0x6b   :  { %9646 = vmatpush3.bf16.msra.mxu1 %v9968_v50  ;;  %9649 = vmatprep.mubr.msk.bf16.mxu1 %vm11288_vm1, %v11287_v12  ;;  %v10000_v39 = vld [vmem:[%s15918_s3 + $0x4b0] ss:$20 sps:$4 sm:$0xff]   ;;  %v10012_v50 = vld [vmem:[%s15918_s3 + $0x528] ss:$20 sps:$4 sm:$0xff]  }
  0x6c   :  { %8342 = vmatmul.mubr.msk.bf16.vlgmr.msra.gmra.mrb[48].mxu0 %vm87_vm0, %v11699_v51  ;;  %9647 = vmatprep.subr.bf16.mxu1 %v11287_v12 }
  0x6d   :  { %2187 = vmatpush1.bf16.msra.mxu0 %v11355_v3  ;;  %2218 = vmatprep.mubr.bf16.mxu0 %v11286_v1  ;;  %v10550_v3 = vld [vmem:[%s15916_s1 + $0x4c] ss:$12 sps:$4 sm:$0xff]  }
  0x6e   :  { %2188 = vmatprep.subr.bf16.mxu0 %v11366_v5  ;;  %v10551_v5 = vld [vmem:[%s15916_s1 + $0x48] ss:$12 sps:$4 sm:$0xff]  }
  0x6f   :  { %9648 = vmatpush3.bf16.msra.mxu1 %v9969_v52  ;;  %v10018_v52 = vld [vmem:[%s15918_s3 + $0x554] ss:$20 sps:$4 sm:$0xff]  }
  0x70   :  { %9653 = vmatprep.subr.bf16.mxu1 %v11287_v12 }
  0x71   :  { %2189 = vmatpush1.bf16.msra.mxu0 %v11378_v7  ;;  %v10552_v7 = vld [vmem:[%s15916_s1 + $0x4] ss:$12 sps:$4 sm:$0xff]  }
  0x72   :  { %2302 = vmatprep.subr.bf16.mxu0 %v11414_v14  ;;  %9650 = vmatmul.mubr.msk.bf16.vlgmr.msra.gmra.mrb[52].mxu1 %vm87_vm0, %v11627_v42  ;;  %v9991_v14 = vld [vmem:[%s15916_s1 + $0x20] ss:$12 sps:$4 sm:$0xff]  }
  0x73   :  { %9654 = vmatpush3.bf16.msra.mxu1 %v9970_v53  ;;  %9657 = vmatprep.mubr.msk.bf16.mxu1 %vm11288_vm1, %v11287_v12  ;;  %v10004_v42 = vld [vmem:[%s15918_s3 + $0x4d8] ss:$20 sps:$4 sm:$0xff]   ;;  %v10048_v53 = vld [vmem:[%s15918_s3 + $0x690] ss:$20 sps:$4 sm:$0xff]  }
  0x74   :  { %8362 = vmatmul.mubr.msk.bf16.vlgmr.msra.gmra.mrb[52].mxu0 %vm87_vm0, %v11723_v54  ;;  %9655 = vmatprep.subr.bf16.mxu1 %v11287_v12 }
  0x75   :  { %2303 = vmatpush1.bf16.msra.mxu0 %v11422_v15  ;;  %2334 = vmatprep.mubr.bf16.mxu0 %v11286_v1  ;;  %v10556_v15 = vld [vmem:[%s15916_s1 + $0x64] ss:$12 sps:$4 sm:$0xff]  }
  0x76   :  { %2304 = vmatprep.subr.bf16.mxu0 %v11435_v17  ;;  %v9978_v17 = vld [vmem:[%s15918_s3 + $0x3c4] ss:$20 sps:$4 sm:$0xff]  }
  0x77   :  { %9656 = vmatpush3.bf16.msra.mxu1 %v9971_v55  ;;  %v10056_v55 = vld [vmem:[%s15918_s3 + $0x6bc] ss:$20 sps:$4 sm:$0xff]  }
  0x78   :  { %9661 = vmatprep.subr.bf16.mxu1 %v11287_v12 }
  0x79   :  { %2305 = vmatpush1.bf16.msra.mxu0 %v11445_v18  ;;  %v9995_v18 = vld [vmem:[%s15916_s1 + $0x68] ss:$12 sps:$4 sm:$0xff]  }
  0x7a   :  { %2428 = vmatprep.subr.bf16.mxu0 %v11349_v2  ;;  %9658 = vmatmul.mubr.msk.bf16.vlgmr.msra.gmra.mrb[56].mxu1 %vm87_vm0, %v11651_v45  ;;  %v9979_v2 = vld [vmem:[%s15916_s1 + $0x38] ss:$12 sps:$4 sm:$0xff]   ;;  %v10036_v45 = vld [vmem:[%s15918_s3 + $0x640] ss:$20 sps:$4 sm:$0xff]  }
  0x7b   :  { %9662 = vmatpush3.bf16.msra.mxu1 %v9972_v56  ;;  %9665 = vmatprep.mubr.msk.bf16.mxu1 %vm11288_vm1, %v11287_v12  ;;  %v10022_v56 = vld [vmem:[%s15918_s3 + $0x57c] ss:$20 sps:$4 sm:$0xff]  }
  0x7c   :  { %8370 = vmatmul.mubr.msk.bf16.vlgmr.msra.gmra.mrb[56].mxu0 %vm87_vm0, %v11749_v57  ;;  %9663 = vmatprep.subr.bf16.mxu1 %v11287_v12 }
  0x7d   :  { %2429 = vmatpush1.bf16.msra.mxu0 %v11360_v4  ;;  %2460 = vmatprep.mubr.bf16.mxu0 %v11286_v1  ;;  %v11803_v4 = vld [vmem:[%s15917_s0 + $0x34] sm:$0xf] }
  0x7e   :  { %2430 = vmatprep.subr.bf16.mxu0 %v11373_v6  ;;  %v9983_v6 = vld [vmem:[%s15916_s1 + $0x50] ss:$12 sps:$4 sm:$0xff]  }
  0x7f   :  { %9664 = vmatpush3.bf16.msra.mxu1 %v9973_v58  ;;  %v10020_v58 = vld [vmem:[%s15918_s3 + $0x578] ss:$20 sps:$4 sm:$0xff]  }
  0x80   :  { %9669 = vmatprep.subr.bf16.mxu1 %v11287_v12 }
  0x81   :  { %2431 = vmatpush1.bf16.msra.mxu0 %v10547_v61 }
  0x82   :  { %2605 = vmatprep.subr.bf16.mxu0 %v10548_v63  ;;  %9666 = vmatmul.mubr.msk.bf16.vlgmr.msra.gmra.mrb[60].mxu1 %vm87_vm0, %v11675_v48  ;;  %v10014_v48 = vld [vmem:[%s15918_s3 + $0x52c] ss:$20 sps:$4 sm:$0xff]  }
  0x83   :  { %9670 = vmatpush3.bf16.msra.mxu1 %v9974_v59  ;;  %9673 = vmatprep.mubr.msk.bf16.mxu1 %vm11288_vm1, %v11287_v12  ;;  %v10026_v59 = vld [vmem:[%s15918_s3 + $0x5a4] ss:$20 sps:$4 sm:$0xff]   ;;  %v10024_v63 = vld [vmem:[%s15918_s3 + $0x5a0] ss:$20 sps:$4 sm:$0xff]  }
  0x84   :  { %8387 = vmatmul.mubr.msk.bf16.vlgmr.msra.gmra.mrb[60].mxu0 %vm87_vm0, %v11771_v60  ;;  %9671 = vmatprep.subr.bf16.mxu1 %v11287_v12 }
  0x85   :  { %2606 = vmatpush1.bf16.msra.mxu0 %v10549_v0  ;;  %2637 = vmatprep.mubr.bf16.mxu0 %v11286_v1  ;;  %v10029_v0 = vld [vmem:[%s15918_s3 + $0x5cc] ss:$20 sps:$4 sm:$0xff]  }
  0x86   :  { %2607 = vmatprep.subr.bf16.mxu0 %v10550_v3  ;;  %v10027_v3 = vld [vmem:[%s15918_s3 + $0x5c8] ss:$20 sps:$4 sm:$0xff]  }
  0x87   :  { %9672 = vmatpush3.bf16.msra.mxu1 %v9975_v62  ;;  %v10068_v62 = vld [vmem:[%s15918_s3 + $0x70c] ss:$20 sps:$4 sm:$0xff]  }
  0x88   :  { %9677 = vmatprep.subr.bf16.mxu1 %v11287_v12 }
  0x89   :  { %2608 = vmatpush1.bf16.msra.mxu0 %v10551_v5  ;;  %v10032_v5 = vld [vmem:[%s15918_s3 + $0x5f4] ss:$20 sps:$4 sm:$0xff]  }
  0x8a   :  { %2721 = vmatprep.subr.bf16.mxu0 %v10552_v7  ;;  %9674 = vmatmul.mubr.msk.bf16.vlgmr.msra.gmra.mrb[64].mxu1 %vm87_vm0, %v11699_v51  ;;  %v10050_v51 = vld [vmem:[%s15918_s3 + $0x694] ss:$20 sps:$4 sm:$0xff]   ;;  %v10030_v7 = vld [vmem:[%s15918_s3 + $0x5f0] ss:$20 sps:$4 sm:$0xff]  }
  0x8b   :  { %9678 = vmatpush3.bf16.msra.mxu1 %v9979_v2  ;;  %9681 = vmatprep.mubr.msk.bf16.mxu1 %vm11288_vm1, %v11287_v12  ;;  %v10066_v2 = vld [vmem:[%s15918_s3 + $0x708] ss:$20 sps:$4 sm:$0xff]  }
  0x8c   :  { %8407 = vmatmul.mubr.msk.bf16.vlgmr.msra.gmra.mrb[64].mxu0 %vm87_vm0, %v11803_v4  ;;  %9679 = vmatprep.subr.bf16.mxu1 %v11287_v12 }
  0x8d   :  { %2722 = vmatpush1.bf16.msra.mxu0 %v10553_v8  ;;  %2753 = vmatprep.mubr.bf16.mxu0 %v11286_v1  ;;  %v10080_v8 = vld [vmem:[%s15918_s3 + $0x75c] ss:$20 sps:$4 sm:$0xff]  }
  0x8e   :  { %2723 = vmatprep.subr.bf16.mxu0 %v10554_v10  ;;  %v10078_v10 = vld [vmem:[%s15918_s3 + $0x758] ss:$20 sps:$4 sm:$0xff]  }
  0x8f   :  { %9680 = vmatpush3.bf16.msra.mxu1 %v9983_v6  ;;  %v10072_v6 = vld [vmem:[%s15918_s3 + $0x730] ss:$20 sps:$4 sm:$0xff]  }
  0x90   :  { %9685 = vmatprep.subr.bf16.mxu1 %v11287_v12 }
  0x91   :  { %2724 = vmatpush1.bf16.msra.mxu0 %v10555_v13  ;;  %v10086_v13 = vld [vmem:[%s15918_s3 + $0x3cc] ss:$20 sps:$4 sm:$0xff]  }
  0x92   :  { %2847 = vmatprep.subr.bf16.mxu0 %v10556_v15  ;;  %9682 = vmatmul.mubr.msk.bf16.vlgmr.msra.gmra.mrb[68].mxu1 %vm87_vm0, %v11723_v54  ;;  %v10016_v54 = vld [vmem:[%s15918_s3 + $0x550] ss:$20 sps:$4 sm:$0xff]  }
  0x93   :  { %9686 = vmatpush3.bf16.msra.mxu1 %v9987_v9  ;;  %9689 = vmatprep.mubr.msk.bf16.mxu1 %vm11288_vm1, %v11287_v12  ;;  %v10035_v9 = vld [vmem:[%s15918_s3 + $0x61c] ss:$20 sps:$4 sm:$0xff]  }
  0x94   :  { %8415 = vmatmul.mubr.msk.bf16.vlgmr.msra.gmra.mrb[68].mxu0 %vm87_vm0, %v11835_v11  ;;  %9687 = vmatprep.subr.bf16.mxu1 %v11287_v12 }
  0x95   :  { %2848 = vmatpush1.bf16.msra.mxu0 %v10557_v16  ;;  %2879 = vmatprep.mubr.bf16.mxu0 %v11286_v1 }
  0x96   :  { %2849 = vmatprep.subr.bf16.mxu0 %v10558_v19 }
  0x97   :  { %9688 = vmatpush3.bf16.msra.mxu1 %v9991_v14  ;;  %v10041_v14 = vld [vmem:[%s15918_s3 + $0x64c] ss:$20 sps:$4 sm:$0xff]  }
  0x98   :  { %9693 = vmatprep.subr.bf16.mxu1 %v11287_v12 }
  0x99   :  { %2850 = vmatpush1.bf16.msra.mxu0 %v10547_v61  ;;  %v10060_v61 = vld [vmem:[%s15918_s3 + $0x6e0] ss:$20 sps:$4 sm:$0xff]  }
  0x9a   :  { %3898 = vmatprep.subr.bf16.mxu0 %v9978_v17  ;;  %9690 = vmatmul.mubr.msk.bf16.vlgmr.msra.gmra.mrb[72].mxu1 %vm87_vm0, %v11749_v57  ;;  %v10054_v57 = vld [vmem:[%s15918_s3 + $0x6b8] ss:$20 sps:$4 sm:$0xff]  }
  0x9b   :  { %9694 = vmatpush3.bf16.msra.mxu1 %v9995_v18  ;;  %9697 = vmatprep.mubr.msk.bf16.mxu1 %vm11288_vm1, %v11287_v12 }
  0x9c   :  { %8432 = vmatmul.mubr.msk.bf16.vlgmr.msra.gmra.mrb[72].mxu0 %vm87_vm0, %v11873_v21  ;;  %9695 = vmatprep.subr.bf16.mxu1 %v11287_v12 }
  0x9d   :  { %3899 = vmatpush1.bf16.msra.mxu0 %v9976_v20 }
  0x9e   :  { %3900 = vmatprep.subr.bf16.mxu0 %v9982_v22 }
  0x9f   :  { %9696 = vmatpush3.bf16.msra.mxu1 %v9999_v23  ;;  %v420_v23 = vlaneseq }
  0xa0   :  { %9701 = vmatprep.subr.bf16.mxu1 %v11287_v12 }
  0xa1   :  { %3901 = vmatpush1.bf16.msra.mxu0 %v9980_v24 }
  0xa2   :  { %3902 = vmatprep.subr.bf16.mxu0 %v9986_v25  ;;  %9698 = vmatmul.mubr.msk.bf16.vlgmr.msra.gmra.mrb[76].mxu1 %vm87_vm0, %v11771_v60  ;;  %v10062_v60 = vld [vmem:[%s15918_s3 + $0x6e4] ss:$20 sps:$4 sm:$0xff]  }
  0xa3   :  { %9702 = vmatpush3.bf16.msra.mxu1 %v10003_v27  ;;  %9705 = vmatprep.mubr.msk.bf16.mxu1 %vm11288_vm1, %v11287_v12  ;;  %v12069_v27 = vshrl.u32 %v420_v23, 7 }
  0xa4   :  { %9703 = vmatprep.subr.bf16.mxu1 %v11287_v12 }
  0xa5   :  { %3903 = vmatpush1.bf16.msra.mxu0 %v9984_v26 }
  0xa6   :  { %3904 = vmatprep.subr.bf16.mxu0 %v9990_v28 }
  0xa7   :  { %9704 = vmatpush3.bf16.msra.mxu1 %v10007_v29 }
  0xa8   :  { %9709 = vmatprep.subr.bf16.mxu1 %v11287_v12 }
  0xa9   :  { %3905 = vmatpush1.bf16.msra.mxu0 %v9988_v30 }
  0xaa   :  { %3906 = vmatprep.subr.bf16.mxu0 %v9994_v31  ;;  %9706 = vmatmul.mubr.msk.bf16.vlgmr.msra.gmra.mrb[80].mxu1 %vm87_vm0, %v11803_v4  ;;  %v10074_v4 = vld [vmem:[%s15918_s3 + $0x734] ss:$20 sps:$4 sm:$0xff]  }
  0xab   :  { %9710 = vmatpush3.bf16.msra.mxu1 %v10011_v32  ;;  %9713 = vmatprep.mubr.msk.bf16.mxu1 %vm11288_vm1, %v11287_v12 }
  0xac   :  { %9711 = vmatprep.subr.bf16.mxu1 %v11287_v12 }
  0xad   :  { %3907 = vmatpush1.bf16.msra.mxu0 %v9992_v33  ;;  %v12072_v33 = vsub.s32 0, %v12069_v27 }
  0xae   :  { %3908 = vmatprep.subr.bf16.mxu0 %v9998_v34  ;;  %v418_v34 = vld [vmem:[%s15919_s2] sm:$0x7] }
  0xaf   :  { %9712 = vmatpush3.bf16.msra.mxu1 %v10015_v35  ;;  %v12078_v35 = vsub.s32 1, %v12069_v27 }
  0xb0   :  { %9717 = vmatprep.subr.bf16.mxu1 %v11287_v12 }
  0xb1   :  { %3909 = vmatpush1.bf16.msra.mxu0 %v9996_v36 }
  0xb2   :  { %3910 = vmatprep.subr.bf16.mxu0 %v10002_v37  ;;  %9714 = vmatmul.mubr.msk.bf16.vlgmr.msra.gmra.mrb[84].mxu1 %vm87_vm0, %v11835_v11  ;;  %v10033_v11 = vld [vmem:[%s15918_s3 + $0x618] ss:$20 sps:$4 sm:$0xff]  }
  0xb3   :  { %9718 = vmatpush3.bf16.msra.mxu1 %v10019_v38  ;;  %9721 = vmatprep.mubr.msk.bf16.mxu1 %vm11288_vm1, %v11287_v12 }
  0xb4   :  { %9719 = vmatprep.subr.bf16.mxu1 %v11287_v12 }
  0xb5   :  { %3911 = vmatpush1.bf16.msra.mxu0 %v10000_v39  ;;  %v423_v39 = vrot.slane %v418_v34, %v12072_v33 }
  0xb6   :  { %3912 = vmatprep.subr.bf16.mxu0 %v10006_v40 }
  0xb7   :  { %9720 = vmatpush3.bf16.msra.mxu1 %v10023_v41 }
  0xb8   :  { %3939 = vmatprep.subr.bf16.mxu1 %v10038_v43 }
  0xb9   :  { %3913 = vmatpush1.bf16.msra.mxu0 %v10004_v42 }
  0xba   :  { %3914 = vmatprep.subr.bf16.mxu0 %v10010_v44  ;;  %9722 = vmatmul.mubr.msk.bf16.vlgmr.msra.gmra.mrb[88].mxu1 %vm87_vm0, %v11873_v21  ;;  %v427_v44 = vrot.slane %v418_v34, %v12078_v35 }
  0xbb   :  { %3940 = vmatpush1.bf16.msra.mxu1 %v10036_v45  ;;  %3971 = vmatprep.mubr.bf16.mxu1 %v11286_v1 }
  0xbc   :  { %3941 = vmatprep.subr.bf16.mxu1 %v10044_v47 }
  0xbd   :  { %3915 = vmatpush1.bf16.msra.mxu0 %v10008_v46 }
  0xbe   :  { %3916 = vmatprep.subr.bf16.mxu0 %v10014_v48 }
  0xbf   :  { %3942 = vmatpush1.bf16.msra.mxu1 %v10042_v49 }
  0xc0   :  { %3943 = vmatprep.subr.bf16.mxu1 %v10050_v51 }
  0xc1   :  { %3917 = vmatpush1.bf16.msra.mxu0 %v10012_v50 }
  0xc2   :  { %3918 = vmatprep.subr.bf16.mxu0 %v10018_v52  ;;  %v12085_v52 = vld [vmem:[%s15919_s2] sm:$0x7] }
  0xc3   :  { %3944 = vmatpush1.bf16.msra.mxu1 %v10048_v53 }
  0xc4   :  { %3945 = vmatprep.subr.bf16.mxu1 %v10056_v55 }
  0xc5   :  { %3919 = vmatpush1.bf16.msra.mxu0 %v10016_v54 }
  0xc6   :  { %3920 = vmatprep.subr.bf16.mxu0 %v10022_v56  ;;  %v841_v56 = vrot.slane %v12085_v52, %v12072_v33 }
  0xc7   :  { %3946 = vmatpush1.bf16.msra.mxu1 %v10054_v57 }
  0xc8   :  { %3947 = vmatprep.subr.bf16.mxu1 %v10062_v60  ;;  %v845_v60 = vrot.slane %v12085_v52, %v12078_v35 }
  0xc9   :  { %3921 = vmatpush1.bf16.msra.mxu0 %v10020_v58 }
  0xca   :  { %3922 = vmatprep.subr.bf16.mxu0 %v10026_v59 }
  0xcb   :  { %3948 = vmatpush1.bf16.msra.mxu1 %v10060_v61 }
  0xcc   :  { %3949 = vmatprep.subr.bf16.mxu1 %v10068_v62 }
  0xcd   :  { %3923 = vmatpush1.bf16.msra.mxu0 %v10024_v63 }
  0xce   :  { %3924 = vmatprep.subr.bf16.mxu0 %v10029_v0 }
  0xcf   :  { %3950 = vmatpush1.bf16.msra.mxu1 %v10066_v2 }
  0xd0   :  { %3951 = vmatprep.subr.bf16.mxu1 %v10074_v4  ;;  %v12098_v4 = vsub.s32 2, %v12069_v27 }
  0xd1   :  { %3925 = vmatpush1.bf16.msra.mxu0 %v10027_v3 }
  0xd2   :  { %3926 = vmatprep.subr.bf16.mxu0 %v10032_v5 }
  0xd3   :  { %3952 = vmatpush1.bf16.msra.mxu1 %v10072_v6 }
  0xd4   :  { %3953 = vmatprep.subr.bf16.mxu1 %v10080_v8 }
  0xd5   :  { %3927 = vmatpush1.bf16.msra.mxu0 %v10030_v7 }
  0xd6   :  { %3928 = vmatprep.subr.bf16.mxu0 %v10035_v9 }
  0xd7   :  { %3954 = vmatpush1.bf16.msra.mxu1 %v10078_v10 }
  0xd8   :  { %3980 = vmatprep.subr.bf16.mxu1 %v10086_v13  ;;  %v431_v13 = vrot.slane %v418_v34, %v12098_v4 }
  0xd9   :  { %3929 = vmatpush1.bf16.msra.mxu0 %v10033_v11 }
  0xda   :  { %4021 = vmatprep.subr.bf16.mxu0 %v10041_v14 }
  0xdd   :  { %v125_v15 = vpop.f32.mrb[0].mxu1  ;;  %v368_v16 = vpop.f32.mrb[0].mxu0 }
  0xde   :  { %v127_v17 = vpop.f32.mrb[1].mxu1  ;;  %v370_v18 = vpop.f32.mrb[1].mxu0 }
  0xdf   :  { %v129_v19 = vpop.f32.mrb[2].mxu1  ;;  %v372_v20 = vpop.f32.mrb[2].mxu0 }
  0xe0   :  { %v130_v21 = vpop.f32.mrb[3].mxu1  ;;  %v373_v22 = vpop.f32.mrb[3].mxu0  ;;  %v10039_v20 = vld [vmem:[%s15918_s3 + $0x648] ss:$20 sps:$4 sm:$0xff]  }
  0xe5   :  { %v166_v24 = vpop.f32.mrb[4].mxu1  ;;  %v544_v25 = vpop.f32.mrb[4].mxu0 }
  0xe6   :  { %v9563_v26 = vpop.f32.mrb[5].mxu1  ;;  %v546_v28 = vpop.f32.mrb[5].mxu0 }
  0xe7   :  { %v169_v29 = vpop.f32.mrb[6].mxu1  ;;  %v548_v30 = vpop.f32.mrb[6].mxu0 }
  0xe8   :  { %v9564_v31 = vpop.f32.mrb[7].mxu1  ;;  %v549_v32 = vpop.f32.mrb[7].mxu0  ;;  %v10045_v30 = vld [vmem:[%s15918_s3 + $0x670] ss:$20 sps:$4 sm:$0xff]  }
  0xe9   :  { %v10053_v32 = vld [vmem:[%s15918_s3 + $0x69c] ss:$20 sps:$4 sm:$0xff]  }
  0xed   :  { %v241_v36 = vpop.f32.mrb[8].mxu1  ;;  %v660_v37 = vpop.f32.mrb[8].mxu0 }
  0xee   :  { %v242_v38 = vadd.f32 %v241_v36, %v125_v15  ;;  %v243_v40 = vpop.f32.mrb[9].mxu1  ;;  %v661_v41 = vadd.f32 %v660_v37, %v544_v25  ;;  %v662_v42 = vpop.f32.mrb[9].mxu0 }
  0xef   :  { %v244_v43 = vadd.f32 %v243_v40, %v127_v17  ;;  %v245_v45 = vpop.f32.mrb[10].mxu1  ;;  %v663_v46 = vadd.f32 %v662_v42, %v546_v28  ;;  %v664_v47 = vpop.f32.mrb[10].mxu0 }
  0xf0   :  { %v415_v48 = vadd.f32 %v368_v16, %v242_v38  ;;  %v246_v49 = vpop.f32.mrb[11].mxu1  ;;  %v665_v50 = vpop.f32.mrb[11].mxu0  ;;  %v10051_v38 = vld [vmem:[%s15918_s3 + $0x698] ss:$20 sps:$4 sm:$0xff]   ;;  %v10057_v47 = vld [vmem:[%s15918_s3 + $0x6c0] ss:$20 sps:$4 sm:$0xff]  }
  0xf1   :  { %v416_v51 = vadd.f32 %v370_v18, %v244_v43  ;;  %v10065_v49 = vld [vmem:[%s15918_s3 + $0x6ec] ss:$20 sps:$4 sm:$0xff]  }
  0xf2   :  { %v12087_v53 = vadd.f32 %v423_v39, %v415_v48  ;;  %v12132_v48 = vld [vmem:[%s15919_s2] sm:$0x7] }
  0xf3   :  { %v12089_v54 = vadd.f32 %v427_v44, %v416_v51 }
  0xf4   :  { %v438_v55 = vmax.f32 %v12087_v53, 0.0  ;;  %v10211_v53 = vld [vmem:[%s15918_s3 + $0x2a8] ss:$20 sps:$4 sm:$0xff]  }
  0xf5   :  { %v439_v57 = vmax.f32 %v12089_v54, 0.0  ;;  %v282_v58 = vpop.f32.mrb[12].mxu1  ;;  %v786_v59 = vpop.f32.mrb[12].mxu0  ;;  %v10139_v54 = vld [vmem:[%s15918_s3 + $0x55c] ss:$20 sps:$4 sm:$0xff]  }
  0xf6   :  { %v283_v61 = vadd.f32 %v282_v58, %v166_v24  ;;  %v833_v62 = vadd.f32 %v786_v59, %v661_v41  ;;  %v9571_v63 = vpop.f32.mrb[13].mxu1  ;;  %v788_v0 = vpop.f32.mrb[13].mxu0  ;;  %v10047_v24 = vld [vmem:[%s15918_s3 + $0x674] ss:$20 sps:$4 sm:$0xff]   ;;  %v10059_v41 = vld [vmem:[%s15918_s3 + $0x6c4] ss:$20 sps:$4 sm:$0xff]   ;;  %v1260_v58 = vrot.slane %v12132_v48, %v12072_v33 }
  0xf7   :  { %v834_v2 = vadd.f32 %v788_v0, %v663_v46  ;;  %v285_v3 = vpop.f32.mrb[14].mxu1  ;;  %v790_v5 = vpop.f32.mrb[14].mxu0  ;;  %v10071_v0 = vld [vmem:[%s15918_s3 + $0x714] ss:$20 sps:$4 sm:$0xff]  }
  0xf8   :  { %v853_v6 = vadd.f32 %v841_v56, %v833_v62  ;;  %v9572_v7 = vpop.f32.mrb[15].mxu1  ;;  %v791_v8 = vpop.f32.mrb[15].mxu0  ;;  %v1264_v62 = vrot.slane %v12132_v48, %v12078_v35 }
  0xf9   :  { %v854_v9 = vadd.f32 %v845_v60, %v834_v2  ;;  %v10063_v60 = vld [vmem:[%s15918_s3 + $0x6e8] ss:$20 sps:$4 sm:$0xff]  }
  0xfa   :  { %v856_v10 = vmax.f32 %v853_v6, 0.0 }
  0xfb   :  { %v857_v11 = vmax.f32 %v854_v9, 0.0  ;;  %v10069_v9 = vld [vmem:[%s15918_s3 + $0x710] ss:$20 sps:$4 sm:$0xff]  }
  0xfc   :  { %v12101_v18 = vpack.c.bf16 %v856_v10, %v856_v10 }
  0xfd   :  { %v409_v14 = vpop.f32.mrb[16].mxu1  ;;  %v12103_v19 = vpack.c.bf16 %v857_v11, %v857_v11  ;;  %v849_v11 = vrot.slane %v12085_v52, %v12098_v4 }
  0xfe   :  { %v417_v15 = vadd.f32 %v409_v14, %v283_v61  ;;  %v9579_v16 = vpop.f32.mrb[17].mxu1 }
  0xff   :  { %v412_v17 = vpop.f32.mrb[18].mxu1  ;;  %v963_v21 = vpop.f32.mrb[16].mxu0  ;;  %3930 = vmatprep.mubr.bf16.mxu0 %v12103_v19 }
 0x100   :  { %v437_v22 = vadd.f32 %v431_v13, %v417_v15  ;;  %v9580_v23 = vpop.f32.mrb[19].mxu1  ;;  %v965_v25 = vpop.f32.mrb[17].mxu0  ;;  %3931 = vmatmul.mubr.bf16.vlgmr.msra.gmra.mrb[76].mxu0 %v12101_v18  ;;  %v10077_v13 = vld [vmem:[%s15918_s3 + $0x73c] ss:$20 sps:$4 sm:$0xff]  }
 0x101   :  { %v967_v26 = vpop.f32.mrb[18].mxu0  ;;  %4022 = vmatpush1.bf16.msra.mxu0 %v10039_v20  ;;  %4053 = vmatprep.mubr.bf16.mxu0 %v11286_v1 }
 0x102   :  { %v440_v28 = vmax.f32 %v437_v22, 0.0  ;;  %v968_v29 = vpop.f32.mrb[19].mxu0  ;;  %4023 = vmatprep.subr.bf16.mxu0 %v10047_v24  ;;  %v10075_v22 = vld [vmem:[%s15918_s3 + $0x738] ss:$20 sps:$4 sm:$0xff]  }
 0x103   :  { %v10083_v26 = vld [vmem:[%s15918_s3 + $0x764] ss:$20 sps:$4 sm:$0xff]  }
 0x104   :  { %v9149_v31 = vpack.c.bf16 %v440_v28, %v440_v28 }
 0x105   :  { %v585_v34 = vpop.f32.mrb[20].mxu1  ;;  %4024 = vmatpush1.bf16.msra.mxu0 %v10045_v30 }
 0x106   :  { %455 = vst [vmem:[#allocation2 + $0x8] sm:$0xf] %v9149_v31  ;;  %v9587_v36 = vpop.f32.mrb[21].mxu1  ;;  %4025 = vmatprep.subr.bf16.mxu0 %v10053_v32  ;;  %v10081_v32 = vld [vmem:[%s15918_s3 + $0x760] ss:$20 sps:$4 sm:$0xff]  }
 0x107   :  { %v588_v37 = vpop.f32.mrb[22].mxu1  ;;  %v1079_v39 = vpop.f32.mrb[20].mxu0  ;;  %v10088_v36 = vld [vmem:[%s15918_s3 + $0x510] ss:$20 sps:$4 sm:$0xff]  }
 0x108   :  { %v9588_v40 = vpop.f32.mrb[23].mxu1  ;;  %v1080_v42 = vadd.f32 %v1079_v39, %v963_v21  ;;  %v1081_v43 = vpop.f32.mrb[21].mxu0 }
 0x109   :  { %v1082_v44 = vadd.f32 %v1081_v43, %v965_v25  ;;  %v1083_v45 = vpop.f32.mrb[22].mxu0  ;;  %4026 = vmatpush1.bf16.msra.mxu0 %v10051_v38 }
 0x10a   :  { %v1084_v46 = vpop.f32.mrb[23].mxu0  ;;  %4027 = vmatprep.subr.bf16.mxu0 %v10059_v41 }
 0x10d   :  { %v701_v50 = vpop.f32.mrb[24].mxu1  ;;  %4028 = vmatpush1.bf16.msra.mxu0 %v10057_v47  ;;  %v10084_v47 = vld [vmem:[%s15918_s3 + $0x3c8] ss:$20 sps:$4 sm:$0xff]  }
 0x10e   :  { %v702_v51 = vadd.f32 %v701_v50, %v585_v34  ;;  %v9595_v56 = vpop.f32.mrb[25].mxu1  ;;  %4029 = vmatprep.subr.bf16.mxu0 %v10065_v49  ;;  %v12173_v49 = vld [vmem:[%s15919_s2] sm:$0x7]  ;;  %v10089_v50 = vld [vmem:[%s15918_s3 + $0x3d0] ss:$20 sps:$4 sm:$0xff]  }
 0x10f   :  { %v704_v59 = vpop.f32.mrb[26].mxu1  ;;  %v1205_v61 = vpop.f32.mrb[24].mxu0  ;;  %v10093_v56 = vld [vmem:[%s15918_s3 + $0x538] ss:$20 sps:$4 sm:$0xff]  }
 0x110   :  { %v9596_v63 = vpop.f32.mrb[27].mxu1  ;;  %v1252_v2 = vadd.f32 %v1205_v61, %v1080_v42  ;;  %v1207_v3 = vpop.f32.mrb[25].mxu0 }
 0x111   :  { %v1253_v5 = vadd.f32 %v1207_v3, %v1082_v44  ;;  %v1209_v6 = vpop.f32.mrb[26].mxu0  ;;  %4030 = vmatpush1.bf16.msra.mxu0 %v10063_v60  ;;  %v10090_v3 = vld [vmem:[%s15918_s3 + $0x3f0] ss:$20 sps:$4 sm:$0xff]  }
 0x112   :  { %v1272_v7 = vadd.f32 %v1260_v58, %v1252_v2  ;;  %v1210_v8 = vpop.f32.mrb[27].mxu0  ;;  %4031 = vmatprep.subr.bf16.mxu0 %v10071_v0  ;;  %v1683_v2 = vrot.slane %v12173_v49, %v12078_v35 }
 0x113   :  { %v1273_v10 = vadd.f32 %v1264_v62, %v1253_v5  ;;  %v1679_v62 = vrot.slane %v12173_v49, %v12072_v33  ;;  %v10094_v5 = vld [vmem:[%s15918_s3 + $0x3f8] ss:$20 sps:$4 sm:$0xff]  }
 0x114   :  { %v1275_v14 = vmax.f32 %v1272_v7, 0.0 }
 0x115   :  { %v827_v15 = vpop.f32.mrb[28].mxu1  ;;  %v1276_v16 = vmax.f32 %v1273_v10, 0.0  ;;  %4032 = vmatpush1.bf16.msra.mxu0 %v10069_v9  ;;  %v10097_v9 = vld [vmem:[%s15918_s3 + $0x41c] ss:$20 sps:$4 sm:$0xff]   ;;  %v10098_v10 = vld [vmem:[%s15918_s3 + $0x560] ss:$20 sps:$4 sm:$0xff]  }
 0x116   :  { %v835_v17 = vadd.f32 %v827_v15, %v702_v51  ;;  %v9603_v20 = vpop.f32.mrb[29].mxu1  ;;  %4033 = vmatprep.subr.bf16.mxu0 %v10077_v13  ;;  %v10092_v51 = vld [vmem:[%s15918_s3 + $0x3f4] ss:$20 sps:$4 sm:$0xff]  }
 0x117   :  { %v830_v21 = vpop.f32.mrb[30].mxu1  ;;  %v9152_v23 = vpack.c.bf16 %v1276_v16, %v1275_v14  ;;  %v1382_v24 = vpop.f32.mrb[28].mxu0  ;;  %v10099_v20 = vld [vmem:[%s15918_s3 + $0x420] ss:$20 sps:$4 sm:$0xff]  }
 0x118   :  { %v855_v25 = vadd.f32 %v849_v11, %v835_v17  ;;  %v9604_v52 = vpop.f32.mrb[31].mxu1  ;;  %v1384_v28 = vpop.f32.mrb[29].mxu0  ;;  %v10095_v17 = vld [vmem:[%s15918_s3 + $0x418] ss:$20 sps:$4 sm:$0xff]   ;;  %v1268_v21 = vrot.slane %v12132_v48, %v12098_v4  ;;  %v10100_v48 = vld [vmem:[%s15918_s3 + $0x440] ss:$20 sps:$4 sm:$0xff]  }
 0x119   :  { %1292 = vst [vmem:[#allocation2 + $0x18] sm:$0xff] %v9152_v23  ;;  %v1386_v29 = vpop.f32.mrb[30].mxu0  ;;  %4034 = vmatpush1.bf16.msra.mxu0 %v10075_v22  ;;  %v10103_v23 = vld [vmem:[%s15918_s3 + $0x588] ss:$20 sps:$4 sm:$0xff]  }
 0x11a   :  { %v858_v30 = vmax.f32 %v855_v25, 0.0  ;;  %v1387_v31 = vpop.f32.mrb[31].mxu0  ;;  %4035 = vmatprep.subr.bf16.mxu0 %v10083_v26 }
 0x11b   :  { %v10104_v31 = vld [vmem:[%s15918_s3 + $0x448] ss:$20 sps:$4 sm:$0xff]  }
 0x11c   :  { %v9151_v34 = vpack.c.bf16 %v858_v30, %v858_v30 }
 0x11d   :  { %v1004_v37 = vpop.f32.mrb[32].mxu1  ;;  %4036 = vmatpush1.bf16.msra.mxu0 %v10081_v32 }
 0x11e   :  { %874 = vst [vmem:[#allocation2 + $0x14] sm:$0xf] %v9151_v34  ;;  %v9611_v38 = vpop.f32.mrb[33].mxu1  ;;  %9225 = vmatprep.subr.bf16.mxu0 %v10088_v36 }
 0x11f   :  { %v1007_v39 = vpop.f32.mrb[34].mxu1  ;;  %v1498_v40 = vpop.f32.mrb[32].mxu0  ;;  %v10108_v38 = vld [vmem:[%s15918_s3 + $0x5b0] ss:$20 sps:$4 sm:$0xff]  }
 0x120   :  { %v9612_v41 = vpop.f32.mrb[35].mxu1  ;;  %v1499_v42 = vadd.f32 %v1498_v40, %v1382_v24  ;;  %v1500_v43 = vpop.f32.mrb[33].mxu0 }
 0x121   :  { %v1501_v44 = vadd.f32 %v1500_v43, %v1384_v28  ;;  %v1502_v45 = vpop.f32.mrb[34].mxu0  ;;  %v10109_v43 = vld [vmem:[%s15918_s3 + $0x470] ss:$20 sps:$4 sm:$0xff]  }
 0x122   :  { %v1503_v46 = vpop.f32.mrb[35].mxu0  ;;  %v10112_v45 = vld [vmem:[%s15918_s3 + $0x494] ss:$20 sps:$4 sm:$0xff]  }
 0x123   :  { %v10113_v46 = vld [vmem:[%s15918_s3 + $0x5d8] ss:$20 sps:$4 sm:$0xff]  }
 0x125   :  { %v12184_v58 = vld [vmem:[#allocation2 + $0x14] ss:$0 sps:$4 sm:$0xff]   ;;  %v1120_v59 = vpop.f32.mrb[36].mxu1 }
 0x126   :  { %v1121_v60 = vadd.f32 %v1120_v59, %v1004_v37  ;;  %v9619_v61 = vpop.f32.mrb[37].mxu1  ;;  %3972 = vmatmul.mubr.bf16.vlgmr.msra.gmra.mrb[92].mxu1 %v12184_v58  ;;  %4054 = vmatmul.mubr.bf16.vlgmr.msra.gmra.mrb[80].mxu0 %v12184_v58  ;;  %v10107_v37 = vld [vmem:[%s15918_s3 + $0x46c] ss:$20 sps:$4 sm:$0xff]   ;;  %v10110_v59 = vld [vmem:[%s15918_s3 + $0x490] ss:$20 sps:$4 sm:$0xff]  }
 0x127   :  { %v1123_v63 = vpop.f32.mrb[38].mxu1  ;;  %v1624_v0 = vpop.f32.mrb[36].mxu0  ;;  %3981 = vmatpush1.bf16.msra.mxu1 %v10084_v47  ;;  %9226 = vmatpush3.bf16.msra.mxu0 %v10089_v50 }
 0x128   :  { %v9620_v6 = vpop.f32.mrb[39].mxu1  ;;  %v1671_v7 = vadd.f32 %v1624_v0, %v1499_v42  ;;  %v1626_v8 = vpop.f32.mrb[37].mxu0  ;;  %3982 = vmatprep.subr.bf16.mxu1 %v10092_v51  ;;  %9227 = vmatprep.subr.bf16.mxu0 %v10093_v56  ;;  %v10105_v42 = vld [vmem:[%s15918_s3 + $0x468] ss:$20 sps:$4 sm:$0xff]  }
 0x129   :  { %v1672_v11 = vadd.f32 %v1626_v8, %v1501_v44  ;;  %v1628_v13 = vpop.f32.mrb[38].mxu0  ;;  %4012 = vmatprep.mubr.bf16.mxu1 %v12103_v19  ;;  %4094 = vmatprep.mubr.bf16.mxu0 %v12103_v19  ;;  %v10102_v19 = vld [vmem:[%s15918_s3 + $0x444] ss:$20 sps:$4 sm:$0xff]   ;;  %v10117_v0 = vld [vmem:[%s15918_s3 + $0x4bc] ss:$20 sps:$4 sm:$0xff]  }
 0x12a   :  { %v1691_v14 = vadd.f32 %v1679_v62, %v1671_v7  ;;  %v1629_v15 = vpop.f32.mrb[39].mxu0  ;;  %v12259_v7 = vld [vmem:[%s15919_s2] sm:$0x7]  ;;  %v10115_v8 = vld [vmem:[%s15918_s3 + $0x4b8] ss:$20 sps:$4 sm:$0xff]  }
 0x12b   :  { %v1692_v16 = vadd.f32 %v1683_v2, %v1672_v11  ;;  %3983 = vmatpush1.bf16.msra.mxu1 %v10090_v3  ;;  %9228 = vmatpush3.bf16.msra.mxu0 %v10094_v5  ;;  %v10118_v2 = vld [vmem:[%s15918_s3 + $0x600] ss:$20 sps:$4 sm:$0xff]   ;;  %v10123_v11 = vld [vmem:[%s15918_s3 + $0x628] ss:$20 sps:$4 sm:$0xff]  }
 0x12c   :  { %v1694_v22 = vmax.f32 %v1691_v14, 0.0  ;;  %3984 = vmatprep.subr.bf16.mxu1 %v10097_v9  ;;  %9229 = vmatprep.subr.bf16.mxu0 %v10098_v10  ;;  %v10119_v9 = vld [vmem:[%s15918_s3 + $0x4c0] ss:$20 sps:$4 sm:$0xff]   ;;  %v10122_v10 = vld [vmem:[%s15918_s3 + $0x4e4] ss:$20 sps:$4 sm:$0xff]  }
 0x12d   :  { %v1246_v24 = vpop.f32.mrb[40].mxu1  ;;  %v1695_v25 = vmax.f32 %v1692_v16, 0.0  ;;  %v2098_v16 = vrot.slane %v12259_v7, %v12072_v33 }
 0x12e   :  { %v1254_v52 = vadd.f32 %v1246_v24, %v1121_v60  ;;  %v9627_v26 = vpop.f32.mrb[41].mxu1  ;;  %v10114_v60 = vld [vmem:[%s15918_s3 + $0x498] ss:$20 sps:$4 sm:$0xff]  }
 0x12f   :  { %v1249_v28 = vpop.f32.mrb[42].mxu1  ;;  %v9154_v29 = vpack.c.bf16 %v1695_v25, %v1694_v22  ;;  %v1801_v30 = vpop.f32.mrb[40].mxu0  ;;  %3985 = vmatpush1.bf16.msra.mxu1 %v10095_v17  ;;  %9230 = vmatpush3.bf16.msra.mxu0 %v10099_v20  ;;  %v10120_v22 = vld [vmem:[%s15918_s3 + $0x4e0] ss:$20 sps:$4 sm:$0xff]   ;;  %v10130_v26 = vld [vmem:[%s15918_s3 + $0x4] ss:$20 sps:$4 sm:$0xff]  }
 0x130   :  { %v1274_v32 = vadd.f32 %v1268_v21, %v1254_v52  ;;  %v9628_v34 = vpop.f32.mrb[43].mxu1  ;;  %v1803_v36 = vpop.f32.mrb[41].mxu0  ;;  %3986 = vmatprep.subr.bf16.mxu1 %v10102_v19  ;;  %9231 = vmatprep.subr.bf16.mxu0 %v10103_v23  ;;  %v2102_v21 = vrot.slane %v12259_v7, %v12078_v35  ;;  %v10124_v19 = vld [vmem:[%s15918_s3 + $0x4e8] ss:$20 sps:$4 sm:$0xff]   ;;  %v10127_v52 = vld [vmem:[%s15918_s3 + $0x50c] ss:$20 sps:$4 sm:$0xff]  }
 0x131   :  { %1711 = vst [vmem:[#allocation2 + $0x24] sm:$0xff] %v9154_v29  ;;  %v1805_v39 = vpop.f32.mrb[42].mxu0  ;;  %v10128_v34 = vld [vmem:[%s15918_s3] ss:$20 sps:$4 sm:$0xff]  }
 0x132   :  { %v1277_v40 = vmax.f32 %v1274_v32, 0.0  ;;  %v1806_v41 = vpop.f32.mrb[43].mxu0  ;;  %v10125_v32 = vld [vmem:[%s15918_s3 + $0x508] ss:$20 sps:$4 sm:$0xff]  }
 0x133   :  { %3987 = vmatpush1.bf16.msra.mxu1 %v10100_v48  ;;  %9232 = vmatpush3.bf16.msra.mxu0 %v10104_v31  ;;  %v10136_v41 = vld [vmem:[%s15918_s3 + $0x2c] ss:$20 sps:$4 sm:$0xff]  }
 0x134   :  { %v9153_v44 = vpack.c.bf16 %v1277_v40, %v1277_v40  ;;  %3988 = vmatprep.subr.bf16.mxu1 %v10107_v37  ;;  %9233 = vmatprep.subr.bf16.mxu0 %v10108_v38  ;;  %v10133_v38 = vld [vmem:[%s15918_s3 + $0x534] ss:$20 sps:$4 sm:$0xff]  }
 0x135   :  { %v1423_v47 = vpop.f32.mrb[44].mxu1 }
 0x136   :  { %1293 = vst [vmem:[#allocation2 + $0x20] sm:$0xf] %v9153_v44  ;;  %v9635_v50 = vpop.f32.mrb[45].mxu1 }
 0x137   :  { %v1426_v51 = vpop.f32.mrb[46].mxu1  ;;  %v1917_v56 = vpop.f32.mrb[44].mxu0  ;;  %3989 = vmatpush1.bf16.msra.mxu1 %v10105_v42  ;;  %9234 = vmatpush3.bf16.msra.mxu0 %v10109_v43  ;;  %v10134_v50 = vld [vmem:[%s15918_s3 + $0x28] ss:$20 sps:$4 sm:$0xff]  }
 0x138   :  { %v9636_v61 = vpop.f32.mrb[47].mxu1  ;;  %v1918_v62 = vadd.f32 %v1917_v56, %v1801_v30  ;;  %v1919_v63 = vpop.f32.mrb[45].mxu0  ;;  %3990 = vmatprep.subr.bf16.mxu1 %v10112_v45  ;;  %9235 = vmatprep.subr.bf16.mxu0 %v10113_v46 }
 0x139   :  { %v1920_v3 = vadd.f32 %v1919_v63, %v1803_v36  ;;  %v1921_v5 = vpop.f32.mrb[46].mxu0  ;;  %v1687_v36 = vrot.slane %v12173_v49, %v12098_v4  ;;  %v12307_v49 = vpack.c.bf16 %v439_v57, %v439_v57  ;;  %v10142_v57 = vld [vmem:[%s15918_s3 + $0x54] ss:$20 sps:$4 sm:$0xff]   ;;  %v10137_v63 = vld [vmem:[%s15918_s3 + $0x558] ss:$20 sps:$4 sm:$0xff]  }
 0x13a   :  { %v1922_v6 = vpop.f32.mrb[47].mxu0  ;;  %v10148_v5 = vld [vmem:[%s15918_s3 + $0x7c] ss:$20 sps:$4 sm:$0xff]  }
 0x13b   :  { %3991 = vmatpush1.bf16.msra.mxu1 %v10110_v59  ;;  %9236 = vmatpush3.bf16.msra.mxu0 %v10114_v60 }
 0x13c   :  { %3992 = vmatprep.subr.bf16.mxu1 %v10117_v0  ;;  %9237 = vmatprep.subr.bf16.mxu0 %v10118_v2  ;;  %v10140_v0 = vld [vmem:[%s15918_s3 + $0x50] ss:$20 sps:$4 sm:$0xff]  }
 0x13d   :  { %v1539_v13 = vpop.f32.mrb[48].mxu1 }
 0x13e   :  { %v1540_v14 = vadd.f32 %v1539_v13, %v1423_v47  ;;  %v9643_v15 = vpop.f32.mrb[49].mxu1  ;;  %v10131_v47 = vld [vmem:[%s15918_s3 + $0x530] ss:$20 sps:$4 sm:$0xff]   ;;  %v10146_v13 = vld [vmem:[%s15918_s3 + $0x78] ss:$20 sps:$4 sm:$0xff]  }
 0x13f   :  { %v1542_v17 = vpop.f32.mrb[50].mxu1  ;;  %v2043_v20 = vpop.f32.mrb[48].mxu0  ;;  %3993 = vmatpush1.bf16.msra.mxu1 %v10115_v8  ;;  %9238 = vmatpush3.bf16.msra.mxu0 %v10119_v9 }
 0x140   :  { %v9644_v23 = vpop.f32.mrb[51].mxu1  ;;  %v2090_v24 = vadd.f32 %v2043_v20, %v1918_v62  ;;  %v2045_v25 = vpop.f32.mrb[49].mxu0  ;;  %3994 = vmatprep.subr.bf16.mxu1 %v10122_v10  ;;  %9239 = vmatprep.subr.bf16.mxu0 %v10123_v11  ;;  %v10143_v11 = vld [vmem:[%s15918_s3 + $0x580] ss:$20 sps:$4 sm:$0xff]   ;;  %v10154_v20 = vld [vmem:[%s15918_s3 + $0xa4] ss:$20 sps:$4 sm:$0xff]  }
 0x141   :  { %v2091_v28 = vadd.f32 %v2045_v25, %v1920_v3  ;;  %v2047_v29 = vpop.f32.mrb[50].mxu0  ;;  %v10145_v3 = vld [vmem:[%s15918_s3 + $0x584] ss:$20 sps:$4 sm:$0xff]   ;;  %v10151_v17 = vld [vmem:[%s15918_s3 + $0x5ac] ss:$20 sps:$4 sm:$0xff]  }
 0x142   :  { %v2110_v30 = vadd.f32 %v2098_v16, %v2090_v24  ;;  %v2048_v48 = vpop.f32.mrb[51].mxu0  ;;  %v12349_v23 = vld [vmem:[%s15919_s2] sm:$0x7]  ;;  %v10149_v24 = vld [vmem:[%s15918_s3 + $0x5a8] ss:$20 sps:$4 sm:$0xff]  }
 0x143   :  { %v2111_v31 = vadd.f32 %v2102_v21, %v2091_v28  ;;  %3995 = vmatpush1.bf16.msra.mxu1 %v10120_v22  ;;  %9240 = vmatpush3.bf16.msra.mxu0 %v10124_v19  ;;  %v10152_v25 = vld [vmem:[%s15918_s3 + $0xa0] ss:$20 sps:$4 sm:$0xff]   ;;  %v2517_v48 = vrot.slane %v12349_v23, %v12072_v33 }
 0x144   :  { %v2113_v37 = vmax.f32 %v2110_v30, 0.0  ;;  %3996 = vmatprep.subr.bf16.mxu1 %v10127_v52  ;;  %4777 = vmatprep.subr.bf16.mxu0 %v10130_v26  ;;  %v10157_v52 = vld [vmem:[%s15918_s3 + $0x5d4] ss:$20 sps:$4 sm:$0xff]   ;;  %v10160_v26 = vld [vmem:[%s15918_s3 + $0xcc] ss:$20 sps:$4 sm:$0xff]  }
 0x145   :  { %v1665_v39 = vpop.f32.mrb[52].mxu1  ;;  %v2114_v40 = vmax.f32 %v2111_v31, 0.0 }
 0x146   :  { %v1673_v42 = vadd.f32 %v1665_v39, %v1540_v14  ;;  %v9651_v43 = vpop.f32.mrb[53].mxu1  ;;  %4095 = vmatmul.mubr.bf16.vlgmr.msra.gmra.mrb[84].mxu0 %v12101_v18 }
 0x147   :  { %v1668_v44 = vpop.f32.mrb[54].mxu1  ;;  %v9156_v45 = vpack.c.bf16 %v2114_v40, %v2113_v37  ;;  %v2220_v46 = vpop.f32.mrb[52].mxu0  ;;  %3997 = vmatpush1.bf16.msra.mxu1 %v10125_v32  ;;  %4778 = vmatpush1.bf16.msra.mxu0 %v10128_v34  ;;  %v2521_v34 = vrot.slane %v12349_v23, %v12078_v35  ;;  %v10158_v37 = vld [vmem:[%s15918_s3 + $0xc8] ss:$20 sps:$4 sm:$0xff]  }
 0x148   :  { %v1693_v51 = vadd.f32 %v1687_v36, %v1673_v42  ;;  %v9652_v56 = vpop.f32.mrb[55].mxu1  ;;  %v2222_v59 = vpop.f32.mrb[53].mxu0  ;;  %4809 = vmatprep.mubr.bf16.mxu0 %v12307_v49  ;;  %3998 = vmatprep.subr.bf16.mxu1 %v10133_v38  ;;  %v10155_v36 = vld [vmem:[%s15918_s3 + $0x5d0] ss:$20 sps:$4 sm:$0xff]   ;;  %v10166_v42 = vld [vmem:[%s15918_s3 + $0xf4] ss:$20 sps:$4 sm:$0xff]  }
 0x149   :  { %2130 = vst [vmem:[#allocation2 + $0x30] sm:$0xff] %v9156_v45  ;;  %v2224_v60 = vpop.f32.mrb[54].mxu0  ;;  %4779 = vmatprep.subr.bf16.mxu0 %v10136_v41  ;;  %v10163_v41 = vld [vmem:[%s15918_s3 + $0x5fc] ss:$20 sps:$4 sm:$0xff]   ;;  %v2106_v56 = vrot.slane %v12259_v7, %v12098_v4  ;;  %v10167_v7 = vld [vmem:[%s15918_s3 + $0x620] ss:$20 sps:$4 sm:$0xff]  }
 0x14a   :  { %v1696_v61 = vmax.f32 %v1693_v51, 0.0  ;;  %v2225_v62 = vpop.f32.mrb[55].mxu0  ;;  %v10164_v51 = vld [vmem:[%s15918_s3 + $0xf0] ss:$20 sps:$4 sm:$0xff]  }
 0x14b   :  { %3999 = vmatpush1.bf16.msra.mxu1 %v10131_v47  ;;  %4780 = vmatpush1.bf16.msra.mxu0 %v10134_v50  ;;  %v10161_v50 = vld [vmem:[%s15918_s3 + $0x5f8] ss:$20 sps:$4 sm:$0xff]  }
 0x14c   :  { %v9155_v2 = vpack.c.bf16 %v1696_v61, %v1696_v61  ;;  %4000 = vmatprep.subr.bf16.mxu1 %v10139_v54  ;;  %4781 = vmatprep.subr.bf16.mxu0 %v10142_v57  ;;  %v10169_v54 = vld [vmem:[%s15918_s3 + $0x624] ss:$20 sps:$4 sm:$0xff]   ;;  %v10172_v57 = vld [vmem:[%s15918_s3 + $0x11c] ss:$20 sps:$4 sm:$0xff]  }
 0x14d   :  { %v1842_v6 = vpop.f32.mrb[56].mxu1 }
 0x14e   :  { %1712 = vst [vmem:[#allocation2 + $0x2c] sm:$0xf] %v9155_v2  ;;  %v9659_v8 = vpop.f32.mrb[57].mxu1 }
 0x14f   :  { %v1845_v9 = vpop.f32.mrb[58].mxu1  ;;  %v2336_v10 = vpop.f32.mrb[56].mxu0  ;;  %4001 = vmatpush1.bf16.msra.mxu1 %v10137_v63  ;;  %4782 = vmatpush1.bf16.msra.mxu0 %v10140_v0 }
 0x150   :  { %v9660_v14 = vpop.f32.mrb[59].mxu1  ;;  %v2337_v15 = vadd.f32 %v2336_v10, %v2220_v46  ;;  %v2338_v16 = vpop.f32.mrb[57].mxu0  ;;  %4002 = vmatprep.subr.bf16.mxu1 %v10145_v3  ;;  %4783 = vmatprep.subr.bf16.mxu0 %v10148_v5  ;;  %v10170_v5 = vld [vmem:[%s15918_s3 + $0x118] ss:$20 sps:$4 sm:$0xff]  }
 0x151   :  { %v2339_v21 = vadd.f32 %v2338_v16, %v2222_v59  ;;  %v2340_v22 = vpop.f32.mrb[58].mxu0  ;;  %v10176_v10 = vld [vmem:[%s15918_s3 + $0x144] ss:$20 sps:$4 sm:$0xff]   ;;  %v10174_v16 = vld [vmem:[%s15918_s3 + $0x140] ss:$20 sps:$4 sm:$0xff]  }
 0x152   :  { %v2341_v19 = vpop.f32.mrb[59].mxu0 }
 0x153   :  { %4003 = vmatpush1.bf16.msra.mxu1 %v10143_v11  ;;  %4784 = vmatpush1.bf16.msra.mxu0 %v10146_v13 }
 0x154   :  { %4004 = vmatprep.subr.bf16.mxu1 %v10151_v17  ;;  %4785 = vmatprep.subr.bf16.mxu0 %v10154_v20  ;;  %v10180_v20 = vld [vmem:[%s15918_s3 + $0x16c] ss:$20 sps:$4 sm:$0xff]  }
 0x155   :  { %v1958_v28 = vpop.f32.mrb[60].mxu1 }
 0x156   :  { %v1959_v29 = vadd.f32 %v1958_v28, %v1842_v6  ;;  %v9667_v30 = vpop.f32.mrb[61].mxu1 }
 0x157   :  { %v1961_v31 = vpop.f32.mrb[62].mxu1  ;;  %v2462_v32 = vpop.f32.mrb[60].mxu0  ;;  %4005 = vmatpush1.bf16.msra.mxu1 %v10149_v24  ;;  %4786 = vmatpush1.bf16.msra.mxu0 %v10152_v25  ;;  %v10177_v25 = vld [vmem:[%s15918_s3 + $0x678] ss:$20 sps:$4 sm:$0xff]  }
 0x158   :  { %v9668_v38 = vpop.f32.mrb[63].mxu1  ;;  %v2509_v39 = vadd.f32 %v2462_v32, %v2337_v15  ;;  %v2464_v40 = vpop.f32.mrb[61].mxu0  ;;  %4006 = vmatprep.subr.bf16.mxu1 %v10157_v52  ;;  %4787 = vmatprep.subr.bf16.mxu0 %v10160_v26  ;;  %v10173_v15 = vld [vmem:[%s15918_s3 + $0x650] ss:$20 sps:$4 sm:$0xff]   ;;  %v10178_v52 = vld [vmem:[%s15918_s3 + $0x168] ss:$20 sps:$4 sm:$0xff]  }
 0x159   :  { %v2510_v43 = vadd.f32 %v2464_v40, %v2339_v21  ;;  %v2466_v44 = vpop.f32.mrb[62].mxu0  ;;  %v12428_v32 = vld [vmem:[%s15919_s2] sm:$0x7] }
 0x15a   :  { %v2529_v45 = vadd.f32 %v2517_v48, %v2509_v39  ;;  %v2467_v46 = vpop.f32.mrb[63].mxu0  ;;  %v2940_v44 = vrot.slane %v12428_v32, %v12078_v35 }
 0x15b   :  { %v2530_v47 = vadd.f32 %v2521_v34, %v2510_v43  ;;  %4007 = vmatpush1.bf16.msra.mxu1 %v10155_v36  ;;  %4788 = vmatpush1.bf16.msra.mxu0 %v10158_v37  ;;  %v10181_v34 = vld [vmem:[%s15918_s3 + $0x6a0] ss:$20 sps:$4 sm:$0xff]   ;;  %v10182_v36 = vld [vmem:[%s15918_s3 + $0x190] ss:$20 sps:$4 sm:$0xff]   ;;  %v10186_v46 = vld [vmem:[%s15918_s3 + $0x1b8] ss:$20 sps:$4 sm:$0xff]  }
 0x15c   :  { %v2532_v59 = vmax.f32 %v2529_v45, 0.0  ;;  %4008 = vmatprep.subr.bf16.mxu1 %v10163_v41  ;;  %4789 = vmatprep.subr.bf16.mxu0 %v10166_v42  ;;  %v10188_v37 = vld [vmem:[%s15918_s3 + $0x1bc] ss:$20 sps:$4 sm:$0xff]   ;;  %v2936_v41 = vrot.slane %v12428_v32, %v12072_v33 }
 0x15d   :  { %v2084_v60 = vpop.f32.mrb[64].mxu1  ;;  %v2533_v61 = vmax.f32 %v2530_v47, 0.0  ;;  %v10185_v45 = vld [vmem:[%s15918_s3 + $0x6c8] ss:$20 sps:$4 sm:$0xff]  }
 0x15e   :  { %v2092_v62 = vadd.f32 %v2084_v60, %v1959_v29  ;;  %v9675_v63 = vpop.f32.mrb[65].mxu1 }
 0x15f   :  { %v2087_v0 = vpop.f32.mrb[66].mxu1  ;;  %v9158_v2 = vpack.c.bf16 %v2533_v61, %v2532_v59  ;;  %v2639_v3 = vpop.f32.mrb[64].mxu0  ;;  %4009 = vmatpush1.bf16.msra.mxu1 %v10161_v50  ;;  %4790 = vmatpush1.bf16.msra.mxu0 %v10164_v51  ;;  %v10190_v63 = vld [vmem:[%s15918_s3 + $0x1e0] ss:$20 sps:$4 sm:$0xff]  }
 0x160   :  { %v2112_v6 = vadd.f32 %v2106_v56, %v2092_v62  ;;  %v9676_v8 = vpop.f32.mrb[67].mxu1  ;;  %v2641_v9 = vpop.f32.mrb[65].mxu0  ;;  %4010 = vmatprep.subr.bf16.mxu1 %v10169_v54  ;;  %4791 = vmatprep.subr.bf16.mxu0 %v10172_v57  ;;  %v10192_v56 = vld [vmem:[%s15918_s3 + $0x1e4] ss:$20 sps:$4 sm:$0xff]   ;;  %v2525_v0 = vrot.slane %v12349_v23, %v12098_v4 }
 0x161   :  { %2549 = vst [vmem:[#allocation2 + $0x3c] sm:$0xff] %v9158_v2  ;;  %v2643_v11 = vpop.f32.mrb[66].mxu0  ;;  %v10189_v62 = vld [vmem:[%s15918_s3 + $0x6f0] ss:$20 sps:$4 sm:$0xff]   ;;  %v10193_v23 = vld [vmem:[%s15918_s3 + $0x718] ss:$20 sps:$4 sm:$0xff]  }
 0x162   :  { %v2115_v13 = vmax.f32 %v2112_v6, 0.0  ;;  %v2644_v14 = vpop.f32.mrb[67].mxu0  ;;  %v10194_v11 = vld [vmem:[%s15918_s3 + $0x208] ss:$20 sps:$4 sm:$0xff]  }
 0x163   :  { %4011 = vmatpush1.bf16.msra.mxu1 %v10167_v7  ;;  %4792 = vmatpush1.bf16.msra.mxu0 %v10170_v5 }
 0x164   :  { %v9157_v17 = vpack.c.bf16 %v2115_v13, %v2115_v13  ;;  %9725 = vmatprep.subr.bf16.mxu1 %v11287_v12  ;;  %4793 = vmatprep.subr.bf16.mxu0 %v10176_v10 }
 0x165   :  { %v2261_v21 = vpop.f32.mrb[68].mxu1 }
 0x166   :  { %2131 = vst [vmem:[#allocation2 + $0x38] sm:$0xf] %v9157_v17  ;;  %v9683_v22 = vpop.f32.mrb[69].mxu1  ;;  %4013 = vmatmul.mubr.bf16.vlgmr.msra.gmra.mrb[96].mxu1 %v12101_v18  ;;  %v10184_v18 = vld [vmem:[%s15918_s3 + $0x194] ss:$20 sps:$4 sm:$0xff]  }
 0x167   :  { %v2264_v19 = vpop.f32.mrb[70].mxu1  ;;  %v2755_v24 = vpop.f32.mrb[68].mxu0  ;;  %9726 = vmatpush3.bf16.msra.mxu1 %v10173_v15  ;;  %4794 = vmatpush1.bf16.msra.mxu0 %v10174_v16  ;;  %v10200_v15 = vld [vmem:[%s15918_s3 + $0x234] ss:$20 sps:$4 sm:$0xff]   ;;  %v10204_v22 = vld [vmem:[%s15918_s3 + $0x25c] ss:$20 sps:$4 sm:$0xff]  }
 0x168   :  { %v9684_v26 = vpop.f32.mrb[71].mxu1  ;;  %v2756_v28 = vadd.f32 %v2755_v24, %v2639_v3  ;;  %v2757_v29 = vpop.f32.mrb[69].mxu0  ;;  %9727 = vmatprep.subr.bf16.mxu1 %v11287_v12  ;;  %4795 = vmatprep.subr.bf16.mxu0 %v10180_v20  ;;  %v10196_v3 = vld [vmem:[%s15918_s3 + $0x20c] ss:$20 sps:$4 sm:$0xff]   ;;  %v10198_v20 = vld [vmem:[%s15918_s3 + $0x230] ss:$20 sps:$4 sm:$0xff]  }
 0x169   :  { %v2758_v30 = vadd.f32 %v2757_v29, %v2641_v9  ;;  %v2759_v48 = vpop.f32.mrb[70].mxu0  ;;  %9741 = vmatprep.mubr.msk.bf16.mxu1 %vm11288_vm1, %v11287_v12  ;;  %v10197_v17 = vld [vmem:[%s15918_s3 + $0x740] ss:$20 sps:$4 sm:$0xff]   ;;  %v10202_v26 = vld [vmem:[%s15918_s3 + $0x258] ss:$20 sps:$4 sm:$0xff]  }
 0x16a   :  { %v2760_v31 = vpop.f32.mrb[71].mxu0  ;;  %v10207_v29 = vld [vmem:[%s15918_s3 + $0x284] ss:$20 sps:$4 sm:$0xff]   ;;  %v10208_v48 = vld [vmem:[%s15918_s3 + $0x288] ss:$20 sps:$4 sm:$0xff]  }
 0x16b   :  { %9728 = vmatpush3.bf16.msra.mxu1 %v10177_v25  ;;  %4796 = vmatpush1.bf16.msra.mxu0 %v10178_v52  ;;  %v10201_v52 = vld [vmem:[%s15918_s3 + $0x768] ss:$20 sps:$4 sm:$0xff]   ;;  %v10213_v31 = vld [vmem:[%s15918_s3 + $0x2ac] ss:$20 sps:$4 sm:$0xff]  }
 0x16c   :  { %9729 = vmatprep.subr.bf16.mxu1 %v11287_v12  ;;  %4797 = vmatprep.subr.bf16.mxu0 %v10184_v18  ;;  %v10210_v18 = vld [vmem:[%s15918_s3 + $0x28c] ss:$20 sps:$4 sm:$0xff]  }
 0x16d   :  { %v2377_v38 = vpop.f32.mrb[72].mxu1 }
 0x16e   :  { %v2378_v39 = vadd.f32 %v2377_v38, %v2261_v21  ;;  %v9691_v40 = vpop.f32.mrb[73].mxu1 }
 0x16f   :  { %v2380_v42 = vpop.f32.mrb[74].mxu1  ;;  %v2881_v43 = vpop.f32.mrb[72].mxu0  ;;  %9730 = vmatpush3.bf16.msra.mxu1 %v10181_v34  ;;  %4798 = vmatpush1.bf16.msra.mxu0 %v10182_v36  ;;  %v12511_v34 = vpack.c.bf16 %v438_v55, %v438_v55  ;;  %v10216_v36 = vld [vmem:[%s15918_s3 + $0x2b4] ss:$20 sps:$4 sm:$0xff]   ;;  %v10214_v55 = vld [vmem:[%s15918_s3 + $0x2b0] ss:$20 sps:$4 sm:$0xff]  }
 0x170   :  { %v9692_v47 = vpop.f32.mrb[75].mxu1  ;;  %v2928_v50 = vadd.f32 %v2881_v43, %v2756_v28  ;;  %v2883_v51 = vpop.f32.mrb[73].mxu0  ;;  %9731 = vmatprep.subr.bf16.mxu1 %v11287_v12  ;;  %4799 = vmatprep.subr.bf16.mxu0 %v10188_v37  ;;  %v10222_v42 = vld [vmem:[%s15918_s3 + $0x2dc] ss:$20 sps:$4 sm:$0xff]  }
 0x171   :  { %v2929_v59 = vadd.f32 %v2883_v51, %v2758_v30  ;;  %v2885_v54 = vpop.f32.mrb[74].mxu0  ;;  %v10205_v30 = vld [vmem:[%s15918_s3 + $0x280] ss:$20 sps:$4 sm:$0xff]   ;;  %v10217_v43 = vld [vmem:[%s15918_s3 + $0x2d0] ss:$20 sps:$4 sm:$0xff]  }
 0x172   :  { %v2948_v57 = vadd.f32 %v2936_v41, %v2928_v50  ;;  %v2886_v60 = vpop.f32.mrb[75].mxu0  ;;  %v10228_v47 = vld [vmem:[%s15918_s3 + $0x304] ss:$20 sps:$4 sm:$0xff]   ;;  %v10226_v54 = vld [vmem:[%s15918_s3 + $0x300] ss:$20 sps:$4 sm:$0xff]  }
 0x173   :  { %v2949_v61 = vadd.f32 %v2940_v44, %v2929_v59  ;;  %9732 = vmatpush3.bf16.msra.mxu1 %v10185_v45  ;;  %4800 = vmatpush1.bf16.msra.mxu0 %v10186_v46  ;;  %v10220_v44 = vld [vmem:[%s15918_s3 + $0x2d8] ss:$20 sps:$4 sm:$0xff]   ;;  %v2944_v45 = vrot.slane %v12428_v32, %v12098_v4  ;;  %v10225_v46 = vld [vmem:[%s15918_s3 + $0x2fc] ss:$20 sps:$4 sm:$0xff]  }
 0x174   :  { %v2951_v2 = vmax.f32 %v2948_v57, 0.0  ;;  %9733 = vmatprep.subr.bf16.mxu1 %v11287_v12  ;;  %4801 = vmatprep.subr.bf16.mxu0 %v10192_v56  ;;  %v10223_v32 = vld [vmem:[%s15918_s3 + $0x2f8] ss:$20 sps:$4 sm:$0xff]  }
 0x175   :  { %v2503_v7 = vpop.f32.mrb[76].mxu1  ;;  %v2952_v5 = vmax.f32 %v2949_v61, 0.0  ;;  %v10231_v61 = vld [vmem:[%s15918_s3 + $0x324] ss:$20 sps:$4 sm:$0xff]  }
 0x176   :  { %v2511_v6 = vadd.f32 %v2503_v7, %v2378_v39  ;;  %v9699_v8 = vpop.f32.mrb[77].mxu1  ;;  %v10237_v7 = vld [vmem:[%s15918_s3 + $0x34c] ss:$20 sps:$4 sm:$0xff]  }
 0x177   :  { %v2506_v9 = vpop.f32.mrb[78].mxu1  ;;  %v9160_v10 = vpack.c.bf16 %v2952_v5, %v2951_v2  ;;  %9734 = vmatpush3.bf16.msra.mxu1 %v10189_v62  ;;  %4802 = vmatpush1.bf16.msra.mxu0 %v10190_v63  ;;  %v10234_v62 = vld [vmem:[%s15918_s3 + $0x32c] ss:$20 sps:$4 sm:$0xff]   ;;  %v10232_v2 = vld [vmem:[%s15918_s3 + $0x328] ss:$20 sps:$4 sm:$0xff]  }
 0x178   :  { %v2531_v13 = vadd.f32 %v2525_v0, %v2511_v6  ;;  %v9700_v14 = vpop.f32.mrb[79].mxu1  ;;  %9735 = vmatprep.subr.bf16.mxu1 %v11287_v12  ;;  %4803 = vmatprep.subr.bf16.mxu0 %v10196_v3  ;;  %v10229_v0 = vld [vmem:[%s15918_s3 + $0x320] ss:$20 sps:$4 sm:$0xff]   ;;  %v10235_v6 = vld [vmem:[%s15918_s3 + $0x348] ss:$20 sps:$4 sm:$0xff]  }
 0x179   :  { %2968 = vst [vmem:[#allocation2 + $0x48] sm:$0xff] %v9160_v10  ;;  %v10240_v5 = vld [vmem:[%s15918_s3 + $0x354] ss:$20 sps:$4 sm:$0xff]   ;;  %v10238_v8 = vld [vmem:[%s15918_s3 + $0x350] ss:$20 sps:$4 sm:$0xff]  }
 0x17a   :  { %v2534_v16 = vmax.f32 %v2531_v13, 0.0  ;;  %v10243_v9 = vld [vmem:[%s15918_s3 + $0x374] ss:$20 sps:$4 sm:$0xff]   ;;  %v10246_v10 = vld [vmem:[%s15918_s3 + $0x37c] ss:$20 sps:$4 sm:$0xff]  }
 0x17b   :  { %9736 = vmatpush3.bf16.msra.mxu1 %v10193_v23  ;;  %4804 = vmatpush1.bf16.msra.mxu0 %v10194_v11  ;;  %v10241_v23 = vld [vmem:[%s15918_s3 + $0x370] ss:$20 sps:$4 sm:$0xff]   ;;  %v10244_v11 = vld [vmem:[%s15918_s3 + $0x378] ss:$20 sps:$4 sm:$0xff]  }
 0x17c   :  { %v9159_v21 = vpack.c.bf16 %v2534_v16, %v2534_v16  ;;  %9737 = vmatprep.subr.bf16.mxu1 %v11287_v12  ;;  %4805 = vmatprep.subr.bf16.mxu0 %v10200_v15  ;;  %v10249_v13 = vld [vmem:[%s15918_s3 + $0x39c] ss:$20 sps:$4 sm:$0xff]   ;;  %v10252_v14 = vld [vmem:[%s15918_s3 + $0x3a4] ss:$20 sps:$4 sm:$0xff]   ;;  %v10250_v16 = vld [vmem:[%s15918_s3 + $0x3a0] ss:$20 sps:$4 sm:$0xff]  }
 0x17d   :  { %v2680_v19 = vpop.f32.mrb[80].mxu1  ;;  %v10247_v15 = vld [vmem:[%s15918_s3 + $0x398] ss:$20 sps:$4 sm:$0xff]  }
 0x17e   :  { %2550 = vst [vmem:[#allocation2 + $0x44] sm:$0xf] %v9159_v21  ;;  %v9707_v24 = vpop.f32.mrb[81].mxu1  ;;  %v10254_v21 = vld [vmem:[%s15918_s3 + $0x8] ss:$20 sps:$4 sm:$0xff]  }
 0x17f   :  { %v2683_v25 = vpop.f32.mrb[82].mxu1  ;;  %9738 = vmatpush3.bf16.msra.mxu1 %v10197_v17  ;;  %4806 = vmatpush1.bf16.msra.mxu0 %v10198_v20  ;;  %v10256_v17 = vld [vmem:[%s15918_s3 + $0xc] ss:$20 sps:$4 sm:$0xff]   ;;  %v10257_v20 = vld [vmem:[%s15918_s3 + $0x150] ss:$20 sps:$4 sm:$0xff]  }
 0x180   :  { %v9708_v28 = vpop.f32.mrb[83].mxu1  ;;  %9739 = vmatprep.subr.bf16.mxu1 %v11287_v12  ;;  %4807 = vmatprep.subr.bf16.mxu0 %v10204_v22  ;;  %v12609_v22 = vld [vmem:[#allocation2 + $0x8] ss:$0 sps:$4 sm:$0xff]   ;;  %v10262_v25 = vld [vmem:[%s15918_s3 + $0x178] ss:$20 sps:$4 sm:$0xff]  }
 0x181   :  { %v10261_v24 = vld [vmem:[%s15918_s3 + $0x34] ss:$20 sps:$4 sm:$0xff]   ;;  %v10266_v28 = vld [vmem:[%s15918_s3 + $0x5c] ss:$20 sps:$4 sm:$0xff]  }
 0x183   :  { %9740 = vmatpush3.bf16.msra.mxu1 %v10201_v52  ;;  %4808 = vmatpush1.bf16.msra.mxu0 %v10202_v26  ;;  %v10259_v52 = vld [vmem:[%s15918_s3 + $0x30] ss:$20 sps:$4 sm:$0xff]   ;;  %v10263_v26 = vld [vmem:[%s15918_s3 + $0x38] ss:$20 sps:$4 sm:$0xff]  }
 0x184   :  { %4818 = vmatprep.subr.bf16.mxu1 %v10207_v29  ;;  %4900 = vmatprep.subr.bf16.mxu0 %v10210_v18  ;;  %v10267_v29 = vld [vmem:[%s15918_s3 + $0x1a0] ss:$20 sps:$4 sm:$0xff]   ;;  %v10264_v18 = vld [vmem:[%s15918_s3 + $0x58] ss:$20 sps:$4 sm:$0xff]  }
 0x185   :  { %v2796_v37 = vpop.f32.mrb[84].mxu1 }
 0x186   :  { %v2797_v38 = vadd.f32 %v2796_v37, %v2680_v19  ;;  %v9715_v39 = vpop.f32.mrb[85].mxu1  ;;  %9742 = vmatmul.mubr.bf16.vlgmr.msra.gmra.mrb[100].mxu1 %v12184_v58  ;;  %4810 = vmatmul.mubr.bf16.vlgmr.msra.gmra.mrb[88].mxu0 %v12511_v34  ;;  %v10219_v58 = vld [vmem:[%s15918_s3 + $0x2d4] ss:$20 sps:$4 sm:$0xff]   ;;  %v10258_v19 = vld [vmem:[%s15918_s3 + $0x10] ss:$20 sps:$4 sm:$0xff]  }
 0x187   :  { %v2799_v40 = vpop.f32.mrb[86].mxu1  ;;  %4819 = vmatpush1.bf16.msra.mxu1 %v10205_v30  ;;  %4901 = vmatpush1.bf16.msra.mxu0 %v10208_v48  ;;  %v10271_v30 = vld [vmem:[%s15918_s3 + $0x84] ss:$20 sps:$4 sm:$0xff]   ;;  %v10272_v48 = vld [vmem:[%s15918_s3 + $0x1c8] ss:$20 sps:$4 sm:$0xff]  }
 0x188   :  { %v9716_v41 = vpop.f32.mrb[87].mxu1  ;;  %4820 = vmatprep.subr.bf16.mxu1 %v10213_v31  ;;  %4902 = vmatprep.subr.bf16.mxu0 %v10216_v36  ;;  %v10269_v31 = vld [vmem:[%s15918_s3 + $0x80] ss:$20 sps:$4 sm:$0xff]   ;;  %v10273_v36 = vld [vmem:[%s15918_s3 + $0x88] ss:$20 sps:$4 sm:$0xff]  }
 0x189   :  { %4850 = vmatprep.mubr.bf16.mxu1 %v11286_v1  ;;  %4932 = vmatprep.mubr.bf16.mxu0 %v11286_v1  ;;  %v10276_v37 = vld [vmem:[%s15918_s3 + $0xac] ss:$20 sps:$4 sm:$0xff]   ;;  %v10274_v39 = vld [vmem:[%s15918_s3 + $0xa8] ss:$20 sps:$4 sm:$0xff]   ;;  %v10278_v40 = vld [vmem:[%s15918_s3 + $0xb0] ss:$20 sps:$4 sm:$0xff]  }
 0x18a   :  { %v10279_v41 = vld [vmem:[%s15918_s3 + $0xd0] ss:$20 sps:$4 sm:$0xff]  }
 0x18b   :  { %4821 = vmatpush1.bf16.msra.mxu1 %v10211_v53  ;;  %4903 = vmatpush1.bf16.msra.mxu0 %v10214_v55  ;;  %v10281_v53 = vld [vmem:[%s15918_s3 + $0xd4] ss:$20 sps:$4 sm:$0xff]   ;;  %v10282_v55 = vld [vmem:[%s15918_s3 + $0x218] ss:$20 sps:$4 sm:$0xff]  }
 0x18c   :  { %4822 = vmatprep.subr.bf16.mxu1 %v10219_v58  ;;  %4904 = vmatprep.subr.bf16.mxu0 %v10222_v42  ;;  %v10283_v58 = vld [vmem:[%s15918_s3 + $0xd8] ss:$20 sps:$4 sm:$0xff]   ;;  %v10286_v42 = vld [vmem:[%s15918_s3 + $0xfc] ss:$20 sps:$4 sm:$0xff]  }
 0x18d   :  { %v2922_v50 = vpop.f32.mrb[88].mxu1 }
 0x18e   :  { %v2930_v51 = vadd.f32 %v2922_v50, %v2797_v38  ;;  %v9723_v56 = vpop.f32.mrb[89].mxu1  ;;  %v10277_v38 = vld [vmem:[%s15918_s3 + $0x1f0] ss:$20 sps:$4 sm:$0xff]   ;;  %v10289_v50 = vld [vmem:[%s15918_s3 + $0x120] ss:$20 sps:$4 sm:$0xff]  }
 0x18f   :  { %v2925_v59 = vpop.f32.mrb[90].mxu1  ;;  %4823 = vmatpush1.bf16.msra.mxu1 %v10217_v43  ;;  %4905 = vmatpush1.bf16.msra.mxu0 %v10220_v44  ;;  %v10287_v43 = vld [vmem:[%s15918_s3 + $0x240] ss:$20 sps:$4 sm:$0xff]   ;;  %v10284_v44 = vld [vmem:[%s15918_s3 + $0xf8] ss:$20 sps:$4 sm:$0xff]  }
 0x190   :  { %v2950_v57 = vadd.f32 %v2944_v45, %v2930_v51  ;;  %v9724_v60 = vpop.f32.mrb[91].mxu1  ;;  %4824 = vmatprep.subr.bf16.mxu1 %v10225_v46  ;;  %4906 = vmatprep.subr.bf16.mxu0 %v10228_v47  ;;  %v10288_v45 = vld [vmem:[%s15918_s3 + $0x100] ss:$20 sps:$4 sm:$0xff]   ;;  %v10291_v46 = vld [vmem:[%s15918_s3 + $0x124] ss:$20 sps:$4 sm:$0xff]  }
 0x191   :  { %v10292_v47 = vld [vmem:[%s15918_s3 + $0x268] ss:$20 sps:$4 sm:$0xff]   ;;  %v10296_v56 = vld [vmem:[%s15918_s3 + $0x14c] ss:$20 sps:$4 sm:$0xff]   ;;  %v10299_v59 = vld [vmem:[%s15918_s3 + $0x784] ss:$20 sps:$4 sm:$0xff]  }
 0x192   :  { %v2953_v63 = vmax.f32 %v2950_v57, 0.0  ;;  %v10293_v51 = vld [vmem:[%s15918_s3 + $0x128] ss:$20 sps:$4 sm:$0xff]   ;;  %v10305_v60 = vld [vmem:[%s15918_s3 + $0x7ac] ss:$20 sps:$4 sm:$0xff]  }
 0x193   :  { %4825 = vmatpush1.bf16.msra.mxu1 %v10223_v32  ;;  %4907 = vmatpush1.bf16.msra.mxu0 %v10226_v54  ;;  %v10294_v32 = vld [vmem:[%s15918_s3 + $0x148] ss:$20 sps:$4 sm:$0xff]   ;;  %v10297_v54 = vld [vmem:[%s15918_s3 + $0x780] ss:$20 sps:$4 sm:$0xff]  }
 0x194   :  { %v9161_v3 = vpack.c.bf16 %v2953_v63, %v2953_v63  ;;  %4826 = vmatprep.subr.bf16.mxu1 %v10231_v61  ;;  %4908 = vmatprep.subr.bf16.mxu0 %v10234_v62  ;;  %v10302_v57 = vld [vmem:[%s15918_s3 + $0x174] ss:$20 sps:$4 sm:$0xff]   ;;  %v12720_v61 = vld [vmem:[#allocation2 + $0x18] sm:$0xff]  ;;  %v10300_v63 = vld [vmem:[%s15918_s3 + $0x170] ss:$20 sps:$4 sm:$0xff]  }
 0x195   :  { %v12724_v62 = vcombine.high %v12720_v61, %v12720_v61 }
 0x196   :  { %2969 = vst [vmem:[#allocation2 + $0x50] sm:$0xf] %v9161_v3  ;;  %v10311_v3 = vld [vmem:[%s15918_s3 + $0x7d4] ss:$20 sps:$4 sm:$0xff]  }
 0x197   :  { %4827 = vmatpush1.bf16.msra.mxu1 %v10229_v0  ;;  %4909 = vmatpush1.bf16.msra.mxu0 %v10232_v2  ;;  %v10303_v0 = vld [vmem:[%s15918_s3 + $0x7a8] ss:$20 sps:$4 sm:$0xff]  }
 0x198   :  { %4828 = vmatprep.subr.bf16.mxu1 %v10237_v7  ;;  %4910 = vmatprep.subr.bf16.mxu0 %v10240_v5  ;;  %v10308_v2 = vld [vmem:[%s15918_s3 + $0x19c] ss:$20 sps:$4 sm:$0xff]   ;;  %v10306_v7 = vld [vmem:[%s15918_s3 + $0x198] ss:$20 sps:$4 sm:$0xff]  }
 0x199   :  { %v10309_v5 = vld [vmem:[%s15918_s3 + $0x7d0] ss:$20 sps:$4 sm:$0xff]  }
 0x19b   :  { %4829 = vmatpush1.bf16.msra.mxu1 %v10235_v6  ;;  %4911 = vmatpush1.bf16.msra.mxu0 %v10238_v8  ;;  %v10314_v6 = vld [vmem:[%s15918_s3 + $0x1c4] ss:$20 sps:$4 sm:$0xff]   ;;  %v10317_v8 = vld [vmem:[%s15918_s3 + $0x7fc] ss:$20 sps:$4 sm:$0xff]  }
 0x19c   :  { %4830 = vmatprep.subr.bf16.mxu1 %v10243_v9  ;;  %4912 = vmatprep.subr.bf16.mxu0 %v10246_v10  ;;  %v10312_v9 = vld [vmem:[%s15918_s3 + $0x1c0] ss:$20 sps:$4 sm:$0xff]   ;;  %v10315_v10 = vld [vmem:[%s15918_s3 + $0x7f8] ss:$20 sps:$4 sm:$0xff]  }
 0x19f   :  { %4831 = vmatpush1.bf16.msra.mxu1 %v10241_v23  ;;  %4913 = vmatpush1.bf16.msra.mxu0 %v10244_v11  ;;  %v10320_v23 = vld [vmem:[%s15918_s3 + $0x1ec] ss:$20 sps:$4 sm:$0xff]   ;;  %v10323_v11 = vld [vmem:[%s15918_s3 + $0x824] ss:$20 sps:$4 sm:$0xff]  }
 0x1a0   :  { %4832 = vmatprep.subr.bf16.mxu1 %v10249_v13  ;;  %4914 = vmatprep.subr.bf16.mxu0 %v10252_v14  ;;  %v10318_v13 = vld [vmem:[%s15918_s3 + $0x1e8] ss:$20 sps:$4 sm:$0xff]   ;;  %v10321_v14 = vld [vmem:[%s15918_s3 + $0x820] ss:$20 sps:$4 sm:$0xff]  }
 0x1a3   :  { %4833 = vmatpush1.bf16.msra.mxu1 %v10247_v15  ;;  %4915 = vmatpush1.bf16.msra.mxu0 %v10250_v16  ;;  %v10326_v15 = vld [vmem:[%s15918_s3 + $0x214] ss:$20 sps:$4 sm:$0xff]  }
 0x1a4   :  { %4859 = vmatprep.subr.bf16.mxu1 %v10256_v17  ;;  %9256 = vmatprep.subr.bf16.mxu0 %v10257_v20  ;;  %v10329_v17 = vld [vmem:[%s15918_s3 + $0x84c] ss:$20 sps:$4 sm:$0xff]  }
 0x1a6   :  { %4851 = vmatmul.mubr.bf16.vlgmr.msra.gmra.mrb[104].mxu1 %v12609_v22  ;;  %4933 = vmatmul.mubr.bf16.vlgmr.msra.gmra.mrb[92].mxu0 %v12609_v22 }
 0x1a7   :  { %4860 = vmatpush1.bf16.msra.mxu1 %v10254_v21  ;;  %4891 = vmatprep.mubr.bf16.mxu1 %v12307_v49 }
 0x1a8   :  { %9257 = vmatpush3.bf16.msra.mxu0 %v10258_v19  ;;  %4973 = vmatprep.mubr.bf16.mxu0 %v12307_v49  ;;  %v10268_v49 = vld [vmem:[%s15918_s3 + $0x60] ss:$20 sps:$4 sm:$0xff]   ;;  %v10324_v19 = vld [vmem:[%s15918_s3 + $0x210] ss:$20 sps:$4 sm:$0xff]  }
 0x1a9   :  { %4861 = vmatprep.subr.bf16.mxu1 %v10261_v24  ;;  %9258 = vmatprep.subr.bf16.mxu0 %v10262_v25  ;;  %v10327_v25 = vld [vmem:[%s15918_s3 + $0x848] ss:$20 sps:$4 sm:$0xff]  }
 0x1ab   :  { %4862 = vmatpush1.bf16.msra.mxu1 %v10259_v52  ;;  %v10332_v52 = vld [vmem:[%s15918_s3 + $0x23c] ss:$20 sps:$4 sm:$0xff]  }
 0x1ac   :  { %9259 = vmatpush3.bf16.msra.mxu0 %v10263_v26  ;;  %4863 = vmatprep.subr.bf16.mxu1 %v10266_v28  ;;  %v10335_v26 = vld [vmem:[%s15918_s3 + $0x874] ss:$20 sps:$4 sm:$0xff]   ;;  %v10330_v28 = vld [vmem:[%s15918_s3 + $0x238] ss:$20 sps:$4 sm:$0xff]  }
 0x1ad   :  { %9260 = vmatprep.subr.bf16.mxu0 %v10267_v29  ;;  %v10333_v29 = vld [vmem:[%s15918_s3 + $0x870] ss:$20 sps:$4 sm:$0xff]  }
 0x1af   :  { %4864 = vmatpush1.bf16.msra.mxu1 %v10264_v18  ;;  %v10338_v18 = vld [vmem:[%s15918_s3 + $0x264] ss:$20 sps:$4 sm:$0xff]  }
 0x1b0   :  { %9261 = vmatpush3.bf16.msra.mxu0 %v10268_v49  ;;  %4865 = vmatprep.subr.bf16.mxu1 %v10271_v30  ;;  %v10341_v49 = vld [vmem:[%s15918_s3 + $0x89c] ss:$20 sps:$4 sm:$0xff]   ;;  %v10336_v30 = vld [vmem:[%s15918_s3 + $0x260] ss:$20 sps:$4 sm:$0xff]  }
 0x1b1   :  { %9262 = vmatprep.subr.bf16.mxu0 %v10272_v48  ;;  %v10339_v48 = vld [vmem:[%s15918_s3 + $0x898] ss:$20 sps:$4 sm:$0xff]  }
 0x1b3   :  { %4866 = vmatpush1.bf16.msra.mxu1 %v10269_v31  ;;  %v10345_v31 = vld [vmem:[%s15918_s3 + $0x8c4] ss:$20 sps:$4 sm:$0xff]  }
 0x1b4   :  { %9263 = vmatpush3.bf16.msra.mxu0 %v10273_v36  ;;  %4867 = vmatprep.subr.bf16.mxu1 %v10276_v37  ;;  %v10342_v36 = vld [vmem:[%s15918_s3 + $0x290] ss:$20 sps:$4 sm:$0xff]   ;;  %v10343_v37 = vld [vmem:[%s15918_s3 + $0x8c0] ss:$20 sps:$4 sm:$0xff]  }
 0x1b5   :  { %9264 = vmatprep.subr.bf16.mxu0 %v10277_v38  ;;  %v10349_v38 = vld [vmem:[%s15918_s3 + $0x8ec] ss:$20 sps:$4 sm:$0xff]  }
 0x1b7   :  { %4868 = vmatpush1.bf16.msra.mxu1 %v10274_v39  ;;  %v10346_v39 = vld [vmem:[%s15918_s3 + $0x2b8] ss:$20 sps:$4 sm:$0xff]  }
 0x1b8   :  { %9265 = vmatpush3.bf16.msra.mxu0 %v10278_v40  ;;  %4869 = vmatprep.subr.bf16.mxu1 %v10281_v53  ;;  %v10347_v40 = vld [vmem:[%s15918_s3 + $0x8e8] ss:$20 sps:$4 sm:$0xff]   ;;  %v10350_v53 = vld [vmem:[%s15918_s3 + $0x2e0] ss:$20 sps:$4 sm:$0xff]  }
 0x1b9   :  { %9266 = vmatprep.subr.bf16.mxu0 %v10282_v55  ;;  %v10351_v55 = vld [vmem:[%s15918_s3 + $0x910] ss:$20 sps:$4 sm:$0xff]  }
 0x1bb   :  { %4870 = vmatpush1.bf16.msra.mxu1 %v10279_v41  ;;  %v10357_v41 = vld [vmem:[%s15918_s3 + $0x93c] ss:$20 sps:$4 sm:$0xff]  }
 0x1bc   :  { %9267 = vmatpush3.bf16.msra.mxu0 %v10283_v58  ;;  %4871 = vmatprep.subr.bf16.mxu1 %v10286_v42  ;;  %v10354_v58 = vld [vmem:[%s15918_s3 + $0x308] ss:$20 sps:$4 sm:$0xff]   ;;  %v10355_v42 = vld [vmem:[%s15918_s3 + $0x938] ss:$20 sps:$4 sm:$0xff]  }
 0x1bd   :  { %9268 = vmatprep.subr.bf16.mxu0 %v10287_v43  ;;  %v10361_v43 = vld [vmem:[%s15918_s3 + $0x964] ss:$20 sps:$4 sm:$0xff]  }
 0x1bf   :  { %4872 = vmatpush1.bf16.msra.mxu1 %v10284_v44  ;;  %v10358_v44 = vld [vmem:[%s15918_s3 + $0x330] ss:$20 sps:$4 sm:$0xff]  }
 0x1c0   :  { %9269 = vmatpush3.bf16.msra.mxu0 %v10288_v45  ;;  %4873 = vmatprep.subr.bf16.mxu1 %v10291_v46  ;;  %v10359_v45 = vld [vmem:[%s15918_s3 + $0x960] ss:$20 sps:$4 sm:$0xff]  }
 0x1c1   :  { %9270 = vmatprep.subr.bf16.mxu0 %v10292_v47  ;;  %v10365_v46 = vld [vmem:[%s15918_s3 + $0x98c] ss:$20 sps:$4 sm:$0xff]  }
 0x1c2   :  { %v10362_v47 = vld [vmem:[%s15918_s3 + $0x358] ss:$20 sps:$4 sm:$0xff]  }
 0x1c3   :  { %4874 = vmatpush1.bf16.msra.mxu1 %v10289_v50  ;;  %v10363_v50 = vld [vmem:[%s15918_s3 + $0x988] ss:$20 sps:$4 sm:$0xff]  }
 0x1c4   :  { %9271 = vmatpush3.bf16.msra.mxu0 %v10293_v51  ;;  %4875 = vmatprep.subr.bf16.mxu1 %v10296_v56 }
 0x1c5   :  { %5803 = vmatprep.subr.bf16.mxu0 %v10299_v59  ;;  %v10369_v59 = vld [vmem:[%s15918_s3 + $0x9b4] ss:$20 sps:$4 sm:$0xff]  }
 0x1c7   :  { %4876 = vmatpush1.bf16.msra.mxu1 %v10294_v32  ;;  %4974 = vmatmul.mubr.bf16.vlgmr.msra.gmra.mrb[96].mxu0 %v12511_v34 }
 0x1c8   :  { %5804 = vmatpush1.bf16.msra.mxu0 %v10297_v54  ;;  %5835 = vmatprep.mubr.bf16.mxu0 %v12724_v62 }
 0x1c9   :  { %4877 = vmatprep.subr.bf16.mxu1 %v10302_v57  ;;  %5805 = vmatprep.subr.bf16.mxu0 %v10305_v60 }
 0x1cb   :  { %4878 = vmatpush1.bf16.msra.mxu1 %v10300_v63 }
 0x1cc   :  { %5806 = vmatpush1.bf16.msra.mxu0 %v10303_v0  ;;  %4879 = vmatprep.subr.bf16.mxu1 %v10308_v2  ;;  %v10366_v2 = vld [vmem:[%s15918_s3 + $0x380] ss:$20 sps:$4 sm:$0xff]  }
 0x1cd   :  { %5807 = vmatprep.subr.bf16.mxu0 %v10311_v3 }
 0x1cf   :  { %4880 = vmatpush1.bf16.msra.mxu1 %v10306_v7 }
 0x1d0   :  { %5808 = vmatpush1.bf16.msra.mxu0 %v10309_v5  ;;  %4881 = vmatprep.subr.bf16.mxu1 %v10314_v6  ;;  %v10367_v5 = vld [vmem:[%s15918_s3 + $0x9b0] ss:$20 sps:$4 sm:$0xff]  }
 0x1d1   :  { %5809 = vmatprep.subr.bf16.mxu0 %v10317_v8  ;;  %v10373_v6 = vld [vmem:[%s15918_s3 + $0x9dc] ss:$20 sps:$4 sm:$0xff]  }
 0x1d2   :  { %v10370_v8 = vld [vmem:[%s15918_s3 + $0x3a8] ss:$20 sps:$4 sm:$0xff]  }
 0x1d3   :  { %4882 = vmatpush1.bf16.msra.mxu1 %v10312_v9  ;;  %v12773_v16 = vpop.f32.mrb[76].mxu0  ;;  %v10371_v9 = vld [vmem:[%s15918_s3 + $0x9d8] ss:$20 sps:$4 sm:$0xff]  }
 0x1d4   :  { %5810 = vmatpush1.bf16.msra.mxu0 %v10315_v10  ;;  %4883 = vmatprep.subr.bf16.mxu1 %v10320_v23  ;;  %v12778_v20 = vpop.f32.mrb[77].mxu0  ;;  %v10376_v10 = vld [vmem:[%s15918_s3 + $0xa04] ss:$20 sps:$4 sm:$0xff]   ;;  %v10379_v23 = vld [vmem:[%s15918_s3 + $0xa0c] ss:$20 sps:$4 sm:$0xff]  }
 0x1d5   :  { %5811 = vmatprep.subr.bf16.mxu0 %v10323_v11  ;;  %v3936_v21 = vpop.f32.mrb[78].mxu0  ;;  %v10374_v11 = vld [vmem:[%s15918_s3 + $0xa00] ss:$20 sps:$4 sm:$0xff]  }
 0x1d6   :  { %v3937_v24 = vpop.f32.mrb[79].mxu0  ;;  %v10386_v21 = vld [vmem:[%s15918_s3 + $0xa50] ss:$20 sps:$4 sm:$0xff]  }
 0x1d7   :  { %4884 = vmatpush1.bf16.msra.mxu1 %v10318_v13  ;;  %v10377_v13 = vld [vmem:[%s15918_s3 + $0xa08] ss:$20 sps:$4 sm:$0xff]  }
 0x1d8   :  { %5812 = vmatpush1.bf16.msra.mxu0 %v10321_v14  ;;  %4885 = vmatprep.subr.bf16.mxu1 %v10326_v15  ;;  %v10382_v14 = vld [vmem:[%s15918_s3 + $0xa2c] ss:$20 sps:$4 sm:$0xff]   ;;  %v12920_v15 = vcombine.low %v12720_v61, %v12720_v61  ;;  %v10383_v61 = vld [vmem:[%s15918_s3 + $0xa30] ss:$20 sps:$4 sm:$0xff]  }
 0x1d9   :  { %5813 = vmatprep.subr.bf16.mxu0 %v10329_v17  ;;  %v10380_v17 = vld [vmem:[%s15918_s3 + $0xa28] ss:$20 sps:$4 sm:$0xff]  }
 0x1da   :  { %v10394_v24 = vld [vmem:[%s15918_s3 + $0xa7c] ss:$20 sps:$4 sm:$0xff]  }
 0x1db   :  { %4886 = vmatpush1.bf16.msra.mxu1 %v10324_v19  ;;  %v10389_v19 = vld [vmem:[%s15918_s3 + $0xa58] ss:$20 sps:$4 sm:$0xff]  }
 0x1dc   :  { %5814 = vmatpush1.bf16.msra.mxu0 %v10327_v25  ;;  %4887 = vmatprep.subr.bf16.mxu1 %v10332_v52  ;;  %v10397_v25 = vld [vmem:[%s15918_s3 + $0xa84] ss:$20 sps:$4 sm:$0xff]  }
 0x1dd   :  { %5815 = vmatprep.subr.bf16.mxu0 %v10335_v26  ;;  %v10392_v52 = vld [vmem:[%s15918_s3 + $0xa78] ss:$20 sps:$4 sm:$0xff]   ;;  %v10395_v26 = vld [vmem:[%s15918_s3 + $0xa80] ss:$20 sps:$4 sm:$0xff]  }
 0x1df   :  { %4888 = vmatpush1.bf16.msra.mxu1 %v10330_v28  ;;  %v10400_v28 = vld [vmem:[%s15918_s3 + $0xaa4] ss:$20 sps:$4 sm:$0xff]  }
 0x1e0   :  { %5816 = vmatpush1.bf16.msra.mxu0 %v10333_v29  ;;  %4889 = vmatprep.subr.bf16.mxu1 %v10338_v18  ;;  %v10403_v29 = vld [vmem:[%s15918_s3 + $0xaac] ss:$20 sps:$4 sm:$0xff]  }
 0x1e1   :  { %5817 = vmatprep.subr.bf16.mxu0 %v10341_v49  ;;  %v10398_v18 = vld [vmem:[%s15918_s3 + $0xaa0] ss:$20 sps:$4 sm:$0xff]   ;;  %v10401_v49 = vld [vmem:[%s15918_s3 + $0xaa8] ss:$20 sps:$4 sm:$0xff]  }
 0x1e3   :  { %4890 = vmatpush1.bf16.msra.mxu1 %v10336_v30  ;;  %v10406_v30 = vld [vmem:[%s15918_s3 + $0xacc] ss:$20 sps:$4 sm:$0xff]  }
 0x1e4   :  { %5818 = vmatpush1.bf16.msra.mxu0 %v10339_v48  ;;  %9745 = vmatprep.subr.bf16.mxu1 %v11287_v12  ;;  %v10409_v48 = vld [vmem:[%s15918_s3 + $0xad4] ss:$20 sps:$4 sm:$0xff]  }
 0x1e5   :  { %5819 = vmatprep.subr.bf16.mxu0 %v10345_v31  ;;  %v10404_v31 = vld [vmem:[%s15918_s3 + $0xac8] ss:$20 sps:$4 sm:$0xff]  }
 0x1e6   :  { %4892 = vmatmul.mubr.bf16.vlgmr.msra.gmra.mrb[108].mxu1 %v12511_v34  ;;  %v10353_v34 = vld [vmem:[%s15918_s3 + $0x914] ss:$20 sps:$4 sm:$0xff]  }
 0x1e7   :  { %9746 = vmatpush3.bf16.msra.mxu1 %v10342_v36  ;;  %9761 = vmatprep.mubr.msk.bf16.mxu1 %vm11288_vm1, %v11287_v12  ;;  %v10407_v36 = vld [vmem:[%s15918_s3 + $0xad0] ss:$20 sps:$4 sm:$0xff]  }
 0x1e8   :  { %5820 = vmatpush1.bf16.msra.mxu0 %v10343_v37  ;;  %9747 = vmatprep.subr.bf16.mxu1 %v11287_v12  ;;  %v10412_v37 = vld [vmem:[%s15918_s3 + $0xaf4] ss:$20 sps:$4 sm:$0xff]  }
 0x1e9   :  { %5821 = vmatprep.subr.bf16.mxu0 %v10349_v38 }
 0x1eb   :  { %9748 = vmatpush3.bf16.msra.mxu1 %v10346_v39  ;;  %v10415_v39 = vld [vmem:[%s15918_s3 + $0xafc] ss:$20 sps:$4 sm:$0xff]  }
 0x1ec   :  { %5822 = vmatpush1.bf16.msra.mxu0 %v10347_v40  ;;  %9749 = vmatprep.subr.bf16.mxu1 %v11287_v12 }
 0x1ed   :  { %5823 = vmatprep.subr.bf16.mxu0 %v10353_v34 }
 0x1ef   :  { %9750 = vmatpush3.bf16.msra.mxu1 %v10350_v53 }
 0x1f0   :  { %5824 = vmatpush1.bf16.msra.mxu0 %v10351_v55  ;;  %9751 = vmatprep.subr.bf16.mxu1 %v11287_v12  ;;  %v10410_v55 = vld [vmem:[%s15918_s3 + $0xaf0] ss:$20 sps:$4 sm:$0xff]  }
 0x1f1   :  { %5825 = vmatprep.subr.bf16.mxu0 %v10357_v41 }
 0x1f3   :  { %9752 = vmatpush3.bf16.msra.mxu1 %v10354_v58  ;;  %v10413_v58 = vld [vmem:[%s15918_s3 + $0xaf8] ss:$20 sps:$4 sm:$0xff]  }
 0x1f4   :  { %5826 = vmatpush1.bf16.msra.mxu0 %v10355_v42  ;;  %9753 = vmatprep.subr.bf16.mxu1 %v11287_v12  ;;  %v10418_v42 = vld [vmem:[%s15918_s3 + $0xb1c] ss:$20 sps:$4 sm:$0xff]  }
 0x1f5   :  { %5827 = vmatprep.subr.bf16.mxu0 %v10361_v43  ;;  %v10421_v43 = vld [vmem:[%s15918_s3 + $0xb24] ss:$20 sps:$4 sm:$0xff]  }
 0x1f7   :  { %9754 = vmatpush3.bf16.msra.mxu1 %v10358_v44  ;;  %v10416_v44 = vld [vmem:[%s15918_s3 + $0xb18] ss:$20 sps:$4 sm:$0xff]  }
 0x1f8   :  { %5828 = vmatpush1.bf16.msra.mxu0 %v10359_v45  ;;  %9755 = vmatprep.subr.bf16.mxu1 %v11287_v12  ;;  %v10419_v45 = vld [vmem:[%s15918_s3 + $0xb20] ss:$20 sps:$4 sm:$0xff]  }
 0x1f9   :  { %v3973_v51 = vpop.f32.mrb[92].mxu1  ;;  %v12873_v56 = vpop.f32.mrb[80].mxu0  ;;  %5829 = vmatprep.subr.bf16.mxu0 %v10365_v46  ;;  %v10425_v46 = vld [vmem:[%s15918_s3 + $0x78c] ss:$20 sps:$4 sm:$0xff]  }
 0x1fa   :  { %v12879_v32 = vadd.f32 %v3973_v51, %v12773_v16  ;;  %v3975_v54 = vpop.f32.mrb[93].mxu1  ;;  %v12881_v57 = vpop.f32.mrb[81].mxu0  ;;  %v10385_v16 = vld [vmem:[%s15918_s3 + $0xa34] ss:$20 sps:$4 sm:$0xff]   ;;  %v13018_v51 = vld [vmem:[#allocation2 + $0x20] ss:$0 sps:$4 sm:$0xff]  }
 0x1fb   :  { %v12884_v60 = vadd.f32 %v3975_v54, %v12778_v20  ;;  %9756 = vmatpush3.bf16.msra.mxu1 %v10362_v47  ;;  %v3977_v63 = vpop.f32.mrb[94].mxu1  ;;  %v4059_v0 = vpop.f32.mrb[82].mxu0  ;;  %v10388_v20 = vld [vmem:[%s15918_s3 + $0xa54] ss:$20 sps:$4 sm:$0xff]   ;;  %v10426_v47 = vld [vmem:[%s15918_s3 + $0x8d0] ss:$20 sps:$4 sm:$0xff]  }
 0x1fc   :  { %v3978_v3 = vpop.f32.mrb[95].mxu1  ;;  %5830 = vmatpush1.bf16.msra.mxu0 %v10363_v50  ;;  %v4060_v7 = vpop.f32.mrb[83].mxu0  ;;  %9757 = vmatprep.subr.bf16.mxu1 %v11287_v12  ;;  %v10423_v50 = vld [vmem:[%s15918_s3 + $0x788] ss:$20 sps:$4 sm:$0xff]   ;;  %v10427_v54 = vld [vmem:[%s15918_s3 + $0x790] ss:$20 sps:$4 sm:$0xff]  }
 0x1fd   :  { %5831 = vmatprep.subr.bf16.mxu0 %v10369_v59  ;;  %v10430_v59 = vld [vmem:[%s15918_s3 + $0x7b4] ss:$20 sps:$4 sm:$0xff]   ;;  %v10431_v63 = vld [vmem:[%s15918_s3 + $0x8f8] ss:$20 sps:$4 sm:$0xff]   ;;  %v10428_v0 = vld [vmem:[%s15918_s3 + $0x7b0] ss:$20 sps:$4 sm:$0xff]  }
 0x1fe   :  { %v10432_v3 = vld [vmem:[%s15918_s3 + $0x7b8] ss:$20 sps:$4 sm:$0xff]   ;;  %v10436_v7 = vld [vmem:[%s15918_s3 + $0x920] ss:$20 sps:$4 sm:$0xff]  }
 0x1ff   :  { %9758 = vmatpush3.bf16.msra.mxu1 %v10366_v2  ;;  %v10435_v2 = vld [vmem:[%s15918_s3 + $0x7dc] ss:$20 sps:$4 sm:$0xff]  }
 0x200   :  { %5832 = vmatpush1.bf16.msra.mxu0 %v10367_v5  ;;  %9759 = vmatprep.subr.bf16.mxu1 %v11287_v12  ;;  %v10433_v5 = vld [vmem:[%s15918_s3 + $0x7d8] ss:$20 sps:$4 sm:$0xff]  }
 0x201   :  { %5833 = vmatprep.subr.bf16.mxu0 %v10373_v6  ;;  %v10440_v6 = vld [vmem:[%s15918_s3 + $0x804] ss:$20 sps:$4 sm:$0xff]  }
 0x203   :  { %9760 = vmatpush3.bf16.msra.mxu1 %v10370_v8  ;;  %v10437_v8 = vld [vmem:[%s15918_s3 + $0x7e0] ss:$20 sps:$4 sm:$0xff]  }
 0x204   :  { %5834 = vmatpush1.bf16.msra.mxu0 %v10371_v9  ;;  %5844 = vmatprep.subr.bf16.mxu1 %v10376_v10  ;;  %v10441_v9 = vld [vmem:[%s15918_s3 + $0x948] ss:$20 sps:$4 sm:$0xff]   ;;  %v10438_v10 = vld [vmem:[%s15918_s3 + $0x800] ss:$20 sps:$4 sm:$0xff]  }
 0x205   :  { %5926 = vmatprep.subr.bf16.mxu0 %v10379_v23  ;;  %v10445_v23 = vld [vmem:[%s15918_s3 + $0x82c] ss:$20 sps:$4 sm:$0xff]  }
 0x206   :  { %9762 = vmatmul.mubr.bf16.vlgmr.msra.gmra.mrb[112].mxu1 %v12609_v22  ;;  %v10391_v22 = vld [vmem:[%s15918_s3 + $0xa5c] ss:$20 sps:$4 sm:$0xff]  }
 0x207   :  { %5845 = vmatpush1.bf16.msra.mxu1 %v10374_v11  ;;  %5836 = vmatmul.mubr.bf16.vlgmr.msra.gmra.mrb[100].mxu0 %v12920_v15  ;;  %v10442_v11 = vld [vmem:[%s15918_s3 + $0x808] ss:$20 sps:$4 sm:$0xff]  }
 0x208   :  { %5927 = vmatpush1.bf16.msra.mxu0 %v10377_v13  ;;  %5846 = vmatprep.subr.bf16.mxu1 %v10382_v14  ;;  %v10446_v13 = vld [vmem:[%s15918_s3 + $0x970] ss:$20 sps:$4 sm:$0xff]   ;;  %v10443_v14 = vld [vmem:[%s15918_s3 + $0x828] ss:$20 sps:$4 sm:$0xff]  }
 0x209   :  { %5928 = vmatprep.subr.bf16.mxu0 %v10385_v16  ;;  %5876 = vmatprep.mubr.bf16.mxu1 %v11286_v1  ;;  %v10450_v16 = vld [vmem:[%s15918_s3 + $0x854] ss:$20 sps:$4 sm:$0xff]  }
 0x20a   :  { %5958 = vmatprep.mubr.bf16.mxu0 %v11286_v1 }
 0x20b   :  { %5847 = vmatpush1.bf16.msra.mxu1 %v10380_v17  ;;  %v10447_v17 = vld [vmem:[%s15918_s3 + $0x830] ss:$20 sps:$4 sm:$0xff]  }
 0x20c   :  { %5929 = vmatpush1.bf16.msra.mxu0 %v10383_v61  ;;  %5848 = vmatprep.subr.bf16.mxu1 %v10388_v20  ;;  %v10451_v61 = vld [vmem:[%s15918_s3 + $0x998] ss:$20 sps:$4 sm:$0xff]   ;;  %v10448_v20 = vld [vmem:[%s15918_s3 + $0x850] ss:$20 sps:$4 sm:$0xff]  }
 0x20d   :  { %5930 = vmatprep.subr.bf16.mxu0 %v10391_v22  ;;  %v10455_v22 = vld [vmem:[%s15918_s3 + $0x87c] ss:$20 sps:$4 sm:$0xff]  }
 0x20f   :  { %5849 = vmatpush1.bf16.msra.mxu1 %v10386_v21 }
 0x210   :  { %5931 = vmatpush1.bf16.msra.mxu0 %v10389_v19  ;;  %5850 = vmatprep.subr.bf16.mxu1 %v10394_v24  ;;  %v10452_v19 = vld [vmem:[%s15918_s3 + $0x858] ss:$20 sps:$4 sm:$0xff]  }
 0x211   :  { %5932 = vmatprep.subr.bf16.mxu0 %v10397_v25 }
 0x213   :  { %5851 = vmatpush1.bf16.msra.mxu1 %v10392_v52  ;;  %v10456_v52 = vld [vmem:[%s15918_s3 + $0x9c0] ss:$20 sps:$4 sm:$0xff]  }
 0x214   :  { %5933 = vmatpush1.bf16.msra.mxu0 %v10395_v26  ;;  %5852 = vmatprep.subr.bf16.mxu1 %v10400_v28 }
 0x215   :  { %5934 = vmatprep.subr.bf16.mxu0 %v10403_v29  ;;  %v10453_v29 = vld [vmem:[%s15918_s3 + $0x878] ss:$20 sps:$4 sm:$0xff]  }
 0x217   :  { %5853 = vmatpush1.bf16.msra.mxu1 %v10398_v18 }
 0x218   :  { %5935 = vmatpush1.bf16.msra.mxu0 %v10401_v49  ;;  %5854 = vmatprep.subr.bf16.mxu1 %v10406_v30  ;;  %v10457_v49 = vld [vmem:[%s15918_s3 + $0x880] ss:$20 sps:$4 sm:$0xff]  }
 0x219   :  { %v9241_v38 = vpop.f32.mrb[84].mxu0  ;;  %5936 = vmatprep.subr.bf16.mxu0 %v10409_v48  ;;  %v10458_v30 = vld [vmem:[%s15918_s3 + $0x8a0] ss:$20 sps:$4 sm:$0xff]  }
 0x21a   :  { %v9242_v40 = vpop.f32.mrb[85].mxu0  ;;  %v10465_v48 = vld [vmem:[%s15918_s3 + $0x8cc] ss:$20 sps:$4 sm:$0xff]  }
 0x21b   :  { %5855 = vmatpush1.bf16.msra.mxu1 %v10404_v31  ;;  %v12989_v34 = vadd.f32 %v9242_v40, %v9241_v38  ;;  %v9244_v53 = vpop.f32.mrb[86].mxu0  ;;  %v10462_v31 = vld [vmem:[%s15918_s3 + $0x8a8] ss:$20 sps:$4 sm:$0xff]  }
 0x21c   :  { %5937 = vmatpush1.bf16.msra.mxu0 %v10407_v36  ;;  %v9245_v41 = vpop.f32.mrb[87].mxu0  ;;  %5856 = vmatprep.subr.bf16.mxu1 %v10412_v37  ;;  %v10463_v36 = vld [vmem:[%s15918_s3 + $0x8c8] ss:$20 sps:$4 sm:$0xff]   ;;  %v10468_v53 = vld [vmem:[%s15918_s3 + $0x8f0] ss:$20 sps:$4 sm:$0xff]  }
 0x21d   :  { %5938 = vmatprep.subr.bf16.mxu0 %v10415_v39  ;;  %v13123_v37 = vld [vmem:[#allocation2 + $0x24] sm:$0xff]  ;;  %v10561_v41 = vld [vmem:[%s15918_s3 + $0x3c0] ss:$20 sps:$4 sm:$0xff]  }
 0x21e   :  { %v10470_v38 = vld [vmem:[%s15918_s3 + $0x8f4] ss:$20 sps:$4 sm:$0xff]   ;;  %v10560_v39 = vld [vmem:[%s15918_s3 + $0x3c4] ss:$20 sps:$4 sm:$0xff]   ;;  %v13133_v40 = vcombine.high %v13123_v37, %v13123_v37 }
 0x21f   :  { %5857 = vmatpush1.bf16.msra.mxu1 %v10410_v55  ;;  %v10473_v55 = vld [vmem:[%s15918_s3 + $0x91c] ss:$20 sps:$4 sm:$0xff]  }
 0x220   :  { %5939 = vmatpush1.bf16.msra.mxu0 %v10413_v58  ;;  %5858 = vmatprep.subr.bf16.mxu1 %v10418_v42  ;;  %v10562_v58 = vld [vmem:[%s15918_s3 + $0x3ec] ss:$20 sps:$4 sm:$0xff]  }
 0x221   :  { %5940 = vmatprep.subr.bf16.mxu0 %v10421_v43  ;;  %v10471_v42 = vld [vmem:[%s15918_s3 + $0x918] ss:$20 sps:$4 sm:$0xff]  }
 0x222   :  { %v10476_v43 = vld [vmem:[%s15918_s3 + $0x944] ss:$20 sps:$4 sm:$0xff]  }
 0x223   :  { %5859 = vmatpush1.bf16.msra.mxu1 %v10416_v44  ;;  %v10563_v44 = vld [vmem:[%s15918_s3 + $0x3e8] ss:$20 sps:$4 sm:$0xff]  }
 0x224   :  { %5941 = vmatpush1.bf16.msra.mxu0 %v10419_v45  ;;  %5885 = vmatprep.subr.bf16.mxu1 %v10425_v46  ;;  %v10564_v45 = vld [vmem:[%s15918_s3 + $0x414] ss:$20 sps:$4 sm:$0xff]  }
 0x225   :  { %9287 = vmatprep.subr.bf16.mxu0 %v10426_v47  ;;  %v10474_v46 = vld [vmem:[%s15918_s3 + $0x940] ss:$20 sps:$4 sm:$0xff]  }
 0x226   :  { %5877 = vmatmul.mubr.bf16.vlgmr.msra.gmra.mrb[116].mxu1 %v13018_v51  ;;  %v10479_v47 = vld [vmem:[%s15918_s3 + $0x96c] ss:$20 sps:$4 sm:$0xff]  }
 0x227   :  { %5886 = vmatpush1.bf16.msra.mxu1 %v10423_v50  ;;  %5917 = vmatprep.mubr.bf16.mxu1 %v12724_v62  ;;  %v10565_v50 = vld [vmem:[%s15918_s3 + $0x410] ss:$20 sps:$4 sm:$0xff]  }
 0x228   :  { %5959 = vmatmul.mubr.bf16.vlgmr.msra.gmra.mrb[104].mxu0 %v13018_v51  ;;  %5887 = vmatprep.subr.bf16.mxu1 %v10430_v59  ;;  %v10566_v59 = vld [vmem:[%s15918_s3 + $0x43c] ss:$20 sps:$4 sm:$0xff]  }
 0x229   :  { %9288 = vmatpush3.bf16.msra.mxu0 %v10427_v54  ;;  %5999 = vmatprep.mubr.bf16.mxu0 %v12724_v62  ;;  %v10477_v54 = vld [vmem:[%s15918_s3 + $0x968] ss:$20 sps:$4 sm:$0xff]  }
 0x22a   :  { %9289 = vmatprep.subr.bf16.mxu0 %v10431_v63  ;;  %v10482_v63 = vld [vmem:[%s15918_s3 + $0x994] ss:$20 sps:$4 sm:$0xff]  }
 0x22b   :  { %5888 = vmatpush1.bf16.msra.mxu1 %v10428_v0  ;;  %v10567_v0 = vld [vmem:[%s15918_s3 + $0x438] ss:$20 sps:$4 sm:$0xff]  }
 0x22c   :  { %5889 = vmatprep.subr.bf16.mxu1 %v10435_v2  ;;  %v10568_v2 = vld [vmem:[%s15918_s3 + $0x464] ss:$20 sps:$4 sm:$0xff]  }
 0x22d   :  { %9290 = vmatpush3.bf16.msra.mxu0 %v10432_v3  ;;  %v10480_v3 = vld [vmem:[%s15918_s3 + $0x990] ss:$20 sps:$4 sm:$0xff]  }
 0x22e   :  { %9291 = vmatprep.subr.bf16.mxu0 %v10436_v7  ;;  %v10485_v7 = vld [vmem:[%s15918_s3 + $0x9bc] ss:$20 sps:$4 sm:$0xff]  }
 0x22f   :  { %5890 = vmatpush1.bf16.msra.mxu1 %v10433_v5 }
 0x230   :  { %5891 = vmatprep.subr.bf16.mxu1 %v10440_v6  ;;  %v10569_v6 = vld [vmem:[%s15918_s3 + $0x460] ss:$20 sps:$4 sm:$0xff]  }
 0x231   :  { %9292 = vmatpush3.bf16.msra.mxu0 %v10437_v8 }
 0x232   :  { %9293 = vmatprep.subr.bf16.mxu0 %v10441_v9 }
 0x233   :  { %5892 = vmatpush1.bf16.msra.mxu1 %v10438_v10 }
 0x234   :  { %5893 = vmatprep.subr.bf16.mxu1 %v10445_v23 }
 0x235   :  { %9294 = vmatpush3.bf16.msra.mxu0 %v10442_v11 }
 0x236   :  { %9295 = vmatprep.subr.bf16.mxu0 %v10446_v13  ;;  %v10570_v13 = vld [vmem:[%s15918_s3 + $0x48c] ss:$20 sps:$4 sm:$0xff]  }
 0x237   :  { %5894 = vmatpush1.bf16.msra.mxu1 %v10443_v14 }
 0x238   :  { %5895 = vmatprep.subr.bf16.mxu1 %v10450_v16 }
 0x239   :  { %v4014_v21 = vpop.f32.mrb[96].mxu1  ;;  %9296 = vmatpush3.bf16.msra.mxu0 %v10447_v17 }
 0x23a   :  { %v13091_v24 = vadd.f32 %v12873_v56, %v4014_v21  ;;  %v4016_v25 = vpop.f32.mrb[97].mxu1  ;;  %9297 = vmatprep.subr.bf16.mxu0 %v10451_v61  ;;  %v10460_v56 = vld [vmem:[%s15918_s3 + $0x8a4] ss:$20 sps:$4 sm:$0xff]   ;;  %v10486_v21 = vld [vmem:[%s15918_s3 + $0x9e0] ss:$20 sps:$4 sm:$0xff]  }
 0x23b   :  { %v13097_v26 = vadd.f32 %v12881_v57, %v4016_v25  ;;  %v4018_v28 = vpop.f32.mrb[98].mxu1  ;;  %5896 = vmatpush1.bf16.msra.mxu1 %v10448_v20  ;;  %v10461_v57 = vld [vmem:[%s15918_s3 + $0x9e8] ss:$20 sps:$4 sm:$0xff]  }
 0x23c   :  { %v4019_v18 = vpop.f32.mrb[99].mxu1  ;;  %5897 = vmatprep.subr.bf16.mxu1 %v10455_v22  ;;  %v10571_v22 = vld [vmem:[%s15918_s3 + $0x488] ss:$20 sps:$4 sm:$0xff]   ;;  %v10575_v28 = vld [vmem:[%s15918_s3 + $0x4d8] ss:$20 sps:$4 sm:$0xff]  }
 0x23d   :  { %9298 = vmatpush3.bf16.msra.mxu0 %v10452_v19  ;;  %v10573_v19 = vld [vmem:[%s15918_s3 + $0x4b0] ss:$20 sps:$4 sm:$0xff]   ;;  %v10490_v18 = vld [vmem:[%s15918_s3 + $0xa38] ss:$20 sps:$4 sm:$0xff]  }
 0x23e   :  { %9299 = vmatprep.subr.bf16.mxu0 %v10456_v52  ;;  %v10574_v25 = vld [vmem:[%s15918_s3 + $0x4dc] ss:$20 sps:$4 sm:$0xff]  }
 0x23f   :  { %5898 = vmatpush1.bf16.msra.mxu1 %v10453_v29  ;;  %v10489_v52 = vld [vmem:[%s15918_s3 + $0xa10] ss:$20 sps:$4 sm:$0xff]  }
 0x240   :  { %5899 = vmatprep.subr.bf16.mxu1 %v10460_v56  ;;  %v10576_v29 = vld [vmem:[%s15918_s3 + $0x504] ss:$20 sps:$4 sm:$0xff]   ;;  %v10577_v56 = vld [vmem:[%s15918_s3 + $0x500] ss:$20 sps:$4 sm:$0xff]  }
 0x241   :  { %9300 = vmatpush3.bf16.msra.mxu0 %v10457_v49  ;;  %v10578_v49 = vld [vmem:[%s15918_s3 + $0x52c] ss:$20 sps:$4 sm:$0xff]  }
 0x242   :  { %9301 = vmatprep.subr.bf16.mxu0 %v10461_v57  ;;  %v10491_v57 = vld [vmem:[%s15918_s3 + $0xa60] ss:$20 sps:$4 sm:$0xff]  }
 0x243   :  { %5900 = vmatpush1.bf16.msra.mxu1 %v10458_v30  ;;  %v10579_v30 = vld [vmem:[%s15918_s3 + $0x528] ss:$20 sps:$4 sm:$0xff]  }
 0x244   :  { %5901 = vmatprep.subr.bf16.mxu1 %v10465_v48  ;;  %v10580_v48 = vld [vmem:[%s15918_s3 + $0x554] ss:$20 sps:$4 sm:$0xff]  }
 0x245   :  { %9302 = vmatpush3.bf16.msra.mxu0 %v10462_v31  ;;  %v10492_v31 = vld [vmem:[%s15918_s3 + $0xa88] ss:$20 sps:$4 sm:$0xff]  }
 0x246   :  { %6102 = vmatprep.subr.bf16.mxu0 %v10560_v39  ;;  %v10493_v39 = vld [vmem:[%s15918_s3 + $0xab0] ss:$20 sps:$4 sm:$0xff]  }
 0x247   :  { %5902 = vmatpush1.bf16.msra.mxu1 %v10463_v36  ;;  %v10581_v36 = vld [vmem:[%s15918_s3 + $0x550] ss:$20 sps:$4 sm:$0xff]  }
 0x248   :  { %6000 = vmatmul.mubr.bf16.vlgmr.msra.gmra.mrb[108].mxu0 %v12920_v15  ;;  %5903 = vmatprep.subr.bf16.mxu1 %v10470_v38  ;;  %v10582_v38 = vld [vmem:[%s15918_s3 + $0x57c] ss:$20 sps:$4 sm:$0xff]  }
 0x249   :  { %6103 = vmatpush1.bf16.msra.mxu0 %v10561_v41  ;;  %6134 = vmatprep.mubr.bf16.mxu0 %v13133_v40  ;;  %v10494_v41 = vld [vmem:[%s15918_s3 + $0xad8] ss:$20 sps:$4 sm:$0xff]  }
 0x24a   :  { %6104 = vmatprep.subr.bf16.mxu0 %v10562_v58 }
 0x24b   :  { %5904 = vmatpush1.bf16.msra.mxu1 %v10468_v53  ;;  %v10583_v53 = vld [vmem:[%s15918_s3 + $0x578] ss:$20 sps:$4 sm:$0xff]  }
 0x24c   :  { %5905 = vmatprep.subr.bf16.mxu1 %v10473_v55  ;;  %v10584_v55 = vld [vmem:[%s15918_s3 + $0x5a4] ss:$20 sps:$4 sm:$0xff]  }
 0x24d   :  { %6105 = vmatpush1.bf16.msra.mxu0 %v10563_v44 }
 0x24e   :  { %6106 = vmatprep.subr.bf16.mxu0 %v10564_v45 }
 0x24f   :  { %5906 = vmatpush1.bf16.msra.mxu1 %v10471_v42  ;;  %v10585_v42 = vld [vmem:[%s15918_s3 + $0x5a0] ss:$20 sps:$4 sm:$0xff]  }
 0x250   :  { %5907 = vmatprep.subr.bf16.mxu1 %v10476_v43 }
 0x251   :  { %6107 = vmatpush1.bf16.msra.mxu0 %v10565_v50 }
 0x252   :  { %6108 = vmatprep.subr.bf16.mxu0 %v10566_v59 }
 0x253   :  { %5908 = vmatpush1.bf16.msra.mxu1 %v10474_v46 }
 0x254   :  { %5909 = vmatprep.subr.bf16.mxu1 %v10479_v47  ;;  %v10586_v47 = vld [vmem:[%s15918_s3 + $0x5cc] ss:$20 sps:$4 sm:$0xff]  }
 0x255   :  { %6109 = vmatpush1.bf16.msra.mxu0 %v10567_v0 }
 0x256   :  { %6110 = vmatprep.subr.bf16.mxu0 %v10568_v2 }
 0x257   :  { %5910 = vmatpush1.bf16.msra.mxu1 %v10477_v54 }
 0x258   :  { %5911 = vmatprep.subr.bf16.mxu1 %v10482_v63  ;;  %v10495_v63 = vld [vmem:[%s15918_s3 + $0xb00] ss:$20 sps:$4 sm:$0xff]  }
 0x259   :  { %v4136_v5 = vpop.f32.mrb[100].mxu1  ;;  %6111 = vmatpush1.bf16.msra.mxu0 %v10569_v6  ;;  %v4811_v8 = vpop.f32.mrb[88].mxu0  ;;  %v10589_v6 = vld [vmem:[%s15918_s3 + $0x5f0] ss:$20 sps:$4 sm:$0xff]  }
 0x25a   :  { %v13195_v9 = vadd.f32 %v12989_v34, %v4136_v5  ;;  %v9743_v10 = vpop.f32.mrb[101].mxu1  ;;  %v13198_v23 = vadd.f32 %v4811_v8, %v12879_v32  ;;  %v4813_v11 = vpop.f32.mrb[89].mxu0  ;;  %6112 = vmatprep.subr.bf16.mxu0 %v10570_v13  ;;  %v10483_v34 = vld [vmem:[%s15918_s3 + $0x9b8] ss:$20 sps:$4 sm:$0xff]   ;;  %v10496_v5 = vld [vmem:[%s15918_s3 + $0xb28] ss:$20 sps:$4 sm:$0xff]  }
 0x25b   :  { %v4139_v14 = vpop.f32.mrb[102].mxu1  ;;  %5912 = vmatpush1.bf16.msra.mxu1 %v10480_v3  ;;  %v13204_v16 = vadd.f32 %v4813_v11, %v12884_v60  ;;  %v4815_v17 = vpop.f32.mrb[90].mxu0  ;;  %v10488_v32 = vld [vmem:[%s15918_s3 + $0x9e4] ss:$20 sps:$4 sm:$0xff]   ;;  %v10572_v60 = vld [vmem:[%s15918_s3 + $0x4b4] ss:$20 sps:$4 sm:$0xff]   ;;  %v13328_v11 = vcombine.low %v13123_v37, %v13123_v37 }
 0x25c   :  { %v9744_v61 = vpop.f32.mrb[103].mxu1  ;;  %v4816_v20 = vpop.f32.mrb[91].mxu0  ;;  %5913 = vmatprep.subr.bf16.mxu1 %v10485_v7  ;;  %v10587_v3 = vld [vmem:[%s15918_s3 + $0x5c8] ss:$20 sps:$4 sm:$0xff]   ;;  %v10591_v10 = vld [vmem:[%s15918_s3 + $0x644] ss:$20 sps:$4 sm:$0xff]  }
 0x25d   :  { %6113 = vmatpush1.bf16.msra.mxu0 %v10571_v22  ;;  %v10588_v7 = vld [vmem:[%s15918_s3 + $0x5f4] ss:$20 sps:$4 sm:$0xff]   ;;  %v10590_v8 = vld [vmem:[%s15918_s3 + $0x61c] ss:$20 sps:$4 sm:$0xff]   ;;  %v10593_v13 = vld [vmem:[%s15918_s3 + $0x64c] ss:$20 sps:$4 sm:$0xff]  }
 0x25e   :  { %6114 = vmatprep.subr.bf16.mxu0 %v10572_v60  ;;  %v10594_v14 = vld [vmem:[%s15918_s3 + $0x640] ss:$20 sps:$4 sm:$0xff]   ;;  %v10600_v20 = vld [vmem:[%s15918_s3 + $0x670] ss:$20 sps:$4 sm:$0xff]  }
 0x25f   :  { %5914 = vmatpush1.bf16.msra.mxu1 %v10483_v34  ;;  %v10595_v37 = vld [vmem:[%s15918_s3 + $0x66c] ss:$20 sps:$4 sm:$0xff]   ;;  %v10597_v17 = vld [vmem:[%s15918_s3 + $0x674] ss:$20 sps:$4 sm:$0xff]   ;;  %v10602_v22 = vld [vmem:[%s15918_s3 + $0x690] ss:$20 sps:$4 sm:$0xff]  }
 0x260   :  { %5915 = vmatprep.subr.bf16.mxu1 %v10488_v32  ;;  %v10598_v34 = vld [vmem:[%s15918_s3 + $0x668] ss:$20 sps:$4 sm:$0xff]  }
 0x261   :  { %6115 = vmatpush1.bf16.msra.mxu0 %v10573_v19  ;;  %v10599_v61 = vld [vmem:[%s15918_s3 + $0x694] ss:$20 sps:$4 sm:$0xff]   ;;  %v10601_v32 = vld [vmem:[%s15918_s3 + $0x69c] ss:$20 sps:$4 sm:$0xff]   ;;  %v10605_v19 = vld [vmem:[%s15918_s3 + $0x6c4] ss:$20 sps:$4 sm:$0xff]  }
 0x262   :  { %6116 = vmatprep.subr.bf16.mxu0 %v10574_v25  ;;  %v10603_v60 = vld [vmem:[%s15918_s3 + $0x6bc] ss:$20 sps:$4 sm:$0xff]   ;;  %v10606_v25 = vld [vmem:[%s15918_s3 + $0x6b8] ss:$20 sps:$4 sm:$0xff]  }
 0x263   :  { %5916 = vmatpush1.bf16.msra.mxu1 %v10486_v21  ;;  %v10604_v21 = vld [vmem:[%s15918_s3 + $0x698] ss:$20 sps:$4 sm:$0xff]  }
 0x264   :  { %9765 = vmatprep.subr.bf16.mxu1 %v11287_v12 }
 0x265   :  { %6117 = vmatpush1.bf16.msra.mxu0 %v10575_v28  ;;  %v10608_v28 = vld [vmem:[%s15918_s3 + $0x6c0] ss:$20 sps:$4 sm:$0xff]  }
 0x266   :  { %5918 = vmatmul.mubr.bf16.vlgmr.msra.gmra.mrb[120].mxu1 %v12920_v15  ;;  %6118 = vmatprep.subr.bf16.mxu0 %v10576_v29  ;;  %v10609_v29 = vld [vmem:[%s15918_s3 + $0x6ec] ss:$20 sps:$4 sm:$0xff]  }
 0x267   :  { %9766 = vmatpush3.bf16.msra.mxu1 %v10489_v52  ;;  %9781 = vmatprep.mubr.msk.bf16.mxu1 %vm11288_vm1, %v11287_v12  ;;  %v10607_v52 = vld [vmem:[%s15918_s3 + $0x6e4] ss:$20 sps:$4 sm:$0xff]  }
 0x268   :  { %9767 = vmatprep.subr.bf16.mxu1 %v11287_v12 }
 0x269   :  { %6119 = vmatpush1.bf16.msra.mxu0 %v10577_v56  ;;  %v10611_v56 = vld [vmem:[%s15918_s3 + $0x70c] ss:$20 sps:$4 sm:$0xff]  }
 0x26a   :  { %6120 = vmatprep.subr.bf16.mxu0 %v10578_v49  ;;  %v10612_v49 = vld [vmem:[%s15918_s3 + $0x6e8] ss:$20 sps:$4 sm:$0xff]  }
 0x26b   :  { %9768 = vmatpush3.bf16.msra.mxu1 %v10490_v18  ;;  %v10610_v18 = vld [vmem:[%s15918_s3 + $0x6e0] ss:$20 sps:$4 sm:$0xff]  }
 0x26c   :  { %9769 = vmatprep.subr.bf16.mxu1 %v11287_v12 }
 0x26d   :  { %6121 = vmatpush1.bf16.msra.mxu0 %v10579_v30  ;;  %v10613_v30 = vld [vmem:[%s15918_s3 + $0x714] ss:$20 sps:$4 sm:$0xff]  }
 0x26e   :  { %6122 = vmatprep.subr.bf16.mxu0 %v10580_v48  ;;  %v10614_v48 = vld [vmem:[%s15918_s3 + $0x708] ss:$20 sps:$4 sm:$0xff]  }
 0x26f   :  { %9770 = vmatpush3.bf16.msra.mxu1 %v10491_v57 }
 0x270   :  { %9771 = vmatprep.subr.bf16.mxu1 %v11287_v12 }
 0x271   :  { %6123 = vmatpush1.bf16.msra.mxu0 %v10581_v36 }
 0x272   :  { %6124 = vmatprep.subr.bf16.mxu0 %v10582_v38 }
 0x273   :  { %9772 = vmatpush3.bf16.msra.mxu1 %v10492_v31 }
 0x274   :  { %9773 = vmatprep.subr.bf16.mxu1 %v11287_v12 }
 0x275   :  { %6125 = vmatpush1.bf16.msra.mxu0 %v10583_v53  ;;  %v10616_v53 = vld [vmem:[%s15918_s3 + $0x710] ss:$20 sps:$4 sm:$0xff]  }
 0x276   :  { %6126 = vmatprep.subr.bf16.mxu0 %v10584_v55 }
 0x277   :  { %9774 = vmatpush3.bf16.msra.mxu1 %v10493_v39  ;;  %v10615_v39 = vld [vmem:[%s15918_s3 + $0x734] ss:$20 sps:$4 sm:$0xff]  }
 0x278   :  { %9775 = vmatprep.subr.bf16.mxu1 %v11287_v12 }
 0x279   :  { %v4852_v58 = vpop.f32.mrb[104].mxu1  ;;  %6127 = vmatpush1.bf16.msra.mxu0 %v10585_v42  ;;  %v13287_v43 = vpop.f32.mrb[92].mxu0  ;;  %v10618_v42 = vld [vmem:[%s15918_s3 + $0x730] ss:$20 sps:$4 sm:$0xff]  }
 0x27a   :  { %v13290_v44 = vadd.f32 %v4852_v58, %v13198_v23  ;;  %v4854_v45 = vpop.f32.mrb[105].mxu1  ;;  %v13292_v46 = vpop.f32.mrb[93].mxu0  ;;  %6128 = vmatprep.subr.bf16.mxu0 %v10586_v47  ;;  %v10592_v23 = vld [vmem:[%s15918_s3 + $0x618] ss:$20 sps:$4 sm:$0xff]  }
 0x27b   :  { %v13298_v50 = vadd.f32 %v4854_v45, %v13204_v16  ;;  %v4856_v59 = vpop.f32.mrb[106].mxu1  ;;  %9776 = vmatpush3.bf16.msra.mxu1 %v10494_v41  ;;  %v4938_v54 = vpop.f32.mrb[94].mxu0  ;;  %v10596_v16 = vld [vmem:[%s15918_s3 + $0x648] ss:$20 sps:$4 sm:$0xff]   ;;  %v10620_v47 = vld [vmem:[%s15918_s3 + $0x738] ss:$20 sps:$4 sm:$0xff]  }
 0x27c   :  { %v4857_v0 = vpop.f32.mrb[107].mxu1  ;;  %v4939_v2 = vpop.f32.mrb[95].mxu0  ;;  %9777 = vmatprep.subr.bf16.mxu1 %v11287_v12  ;;  %v10617_v41 = vld [vmem:[%s15918_s3 + $0x73c] ss:$20 sps:$4 sm:$0xff]   ;;  %v10622_v59 = vld [vmem:[%s15918_s3 + $0x758] ss:$20 sps:$4 sm:$0xff]  }
 0x27d   :  { %6129 = vmatpush1.bf16.msra.mxu0 %v10587_v3  ;;  %v10619_v45 = vld [vmem:[%s15918_s3 + $0x75c] ss:$20 sps:$4 sm:$0xff]   ;;  %v13427_v54 = vld [vmem:[#allocation2 + $0x2c] ss:$0 sps:$4 sm:$0xff]   ;;  %v10624_v0 = vld [vmem:[%s15918_s3 + $0x760] ss:$20 sps:$4 sm:$0xff]  }
 0x27e   :  { %6130 = vmatprep.subr.bf16.mxu0 %v10588_v7  ;;  %v10625_v2 = vld [vmem:[%s15918_s3 + $0x510] ss:$20 sps:$4 sm:$0xff]   ;;  %v10626_v3 = vld [vmem:[%s15918_s3 + $0x3c8] ss:$20 sps:$4 sm:$0xff]  }
 0x27f   :  { %9778 = vmatpush3.bf16.msra.mxu1 %v10495_v63  ;;  %v10623_v63 = vld [vmem:[%s15918_s3 + $0x3cc] ss:$20 sps:$4 sm:$0xff]   ;;  %v10627_v7 = vld [vmem:[%s15918_s3 + $0x3f4] ss:$20 sps:$4 sm:$0xff]  }
 0x280   :  { %9779 = vmatprep.subr.bf16.mxu1 %v11287_v12 }
 0x281   :  { %6131 = vmatpush1.bf16.msra.mxu0 %v10589_v6  ;;  %v10629_v6 = vld [vmem:[%s15918_s3 + $0x538] ss:$20 sps:$4 sm:$0xff]  }
 0x282   :  { %6132 = vmatprep.subr.bf16.mxu0 %v10590_v8  ;;  %v10630_v8 = vld [vmem:[%s15918_s3 + $0x3f0] ss:$20 sps:$4 sm:$0xff]  }
 0x283   :  { %9780 = vmatpush3.bf16.msra.mxu1 %v10496_v5  ;;  %v10628_v5 = vld [vmem:[%s15918_s3 + $0x3d0] ss:$20 sps:$4 sm:$0xff]  }
 0x284   :  { %6143 = vmatprep.subr.bf16.mxu1 %v10591_v10  ;;  %v10631_v10 = vld [vmem:[%s15918_s3 + $0x41c] ss:$20 sps:$4 sm:$0xff]  }
 0x285   :  { %6133 = vmatpush1.bf16.msra.mxu0 %v10592_v23  ;;  %v10632_v23 = vld [vmem:[%s15918_s3 + $0x3f8] ss:$20 sps:$4 sm:$0xff]  }
 0x286   :  { %9782 = vmatmul.mubr.bf16.vlgmr.msra.gmra.mrb[124].mxu1 %v13018_v51  ;;  %6225 = vmatprep.subr.bf16.mxu0 %v10593_v13  ;;  %v10634_v13 = vld [vmem:[%s15918_s3 + $0x418] ss:$20 sps:$4 sm:$0xff]  }
 0x287   :  { %6144 = vmatpush1.bf16.msra.mxu1 %v10594_v14  ;;  %6175 = vmatprep.mubr.bf16.mxu1 %v11286_v1  ;;  %v10635_v14 = vld [vmem:[%s15918_s3 + $0x444] ss:$20 sps:$4 sm:$0xff]  }
 0x288   :  { %6135 = vmatmul.mubr.bf16.vlgmr.msra.gmra.mrb[112].mxu0 %v13328_v11  ;;  %6145 = vmatprep.subr.bf16.mxu1 %v10595_v37  ;;  %v10636_v37 = vld [vmem:[%s15918_s3 + $0x420] ss:$20 sps:$4 sm:$0xff]  }
 0x289   :  { %6226 = vmatpush1.bf16.msra.mxu0 %v10596_v16  ;;  %6257 = vmatprep.mubr.bf16.mxu0 %v11286_v1  ;;  %v10637_v16 = vld [vmem:[%s15918_s3 + $0x588] ss:$20 sps:$4 sm:$0xff]  }
 0x28a   :  { %6227 = vmatprep.subr.bf16.mxu0 %v10597_v17  ;;  %v10638_v17 = vld [vmem:[%s15918_s3 + $0x440] ss:$20 sps:$4 sm:$0xff]  }
 0x28b   :  { %6146 = vmatpush1.bf16.msra.mxu1 %v10598_v34  ;;  %v10639_v34 = vld [vmem:[%s15918_s3 + $0x46c] ss:$20 sps:$4 sm:$0xff]  }
 0x28c   :  { %6147 = vmatprep.subr.bf16.mxu1 %v10599_v61  ;;  %v10640_v61 = vld [vmem:[%s15918_s3 + $0x448] ss:$20 sps:$4 sm:$0xff]  }
 0x28d   :  { %6228 = vmatpush1.bf16.msra.mxu0 %v10600_v20  ;;  %v10641_v20 = vld [vmem:[%s15918_s3 + $0x5b0] ss:$20 sps:$4 sm:$0xff]  }
 0x28e   :  { %6229 = vmatprep.subr.bf16.mxu0 %v10601_v32  ;;  %v10642_v32 = vld [vmem:[%s15918_s3 + $0x468] ss:$20 sps:$4 sm:$0xff]  }
 0x28f   :  { %6148 = vmatpush1.bf16.msra.mxu1 %v10602_v22  ;;  %v10643_v22 = vld [vmem:[%s15918_s3 + $0x494] ss:$20 sps:$4 sm:$0xff]  }
 0x290   :  { %6149 = vmatprep.subr.bf16.mxu1 %v10603_v60 }
 0x291   :  { %6230 = vmatpush1.bf16.msra.mxu0 %v10604_v21  ;;  %v10644_v21 = vld [vmem:[%s15918_s3 + $0x470] ss:$20 sps:$4 sm:$0xff]  }
 0x292   :  { %6231 = vmatprep.subr.bf16.mxu0 %v10605_v19 }
 0x293   :  { %6150 = vmatpush1.bf16.msra.mxu1 %v10606_v25 }
 0x294   :  { %6151 = vmatprep.subr.bf16.mxu1 %v10607_v52  ;;  %v10645_v52 = vld [vmem:[%s15918_s3 + $0x5d8] ss:$20 sps:$4 sm:$0xff]  }
 0x295   :  { %6232 = vmatpush1.bf16.msra.mxu0 %v10608_v28 }
 0x296   :  { %6233 = vmatprep.subr.bf16.mxu0 %v10609_v29 }
 0x297   :  { %6152 = vmatpush1.bf16.msra.mxu1 %v10610_v18  ;;  %v10646_v18 = vld [vmem:[%s15918_s3 + $0x490] ss:$20 sps:$4 sm:$0xff]  }
 0x298   :  { %6153 = vmatprep.subr.bf16.mxu1 %v10611_v56 }
 0x299   :  { %6234 = vmatpush1.bf16.msra.mxu0 %v10612_v49 }
 0x29a   :  { %v9272_v57 = vpop.f32.mrb[96].mxu0  ;;  %6235 = vmatprep.subr.bf16.mxu0 %v10613_v30  ;;  %v10649_v30 = vld [vmem:[%s15918_s3 + $0x600] ss:$20 sps:$4 sm:$0xff]  }
 0x29b   :  { %6154 = vmatpush1.bf16.msra.mxu1 %v10614_v48  ;;  %v9273_v31 = vpop.f32.mrb[97].mxu0  ;;  %v10652_v48 = vld [vmem:[%s15918_s3 + $0x4c0] ss:$20 sps:$4 sm:$0xff]  }
 0x29c   :  { %v9274_v36 = vadd.f32 %v9273_v31, %v9272_v57  ;;  %v9275_v38 = vpop.f32.mrb[98].mxu0  ;;  %6155 = vmatprep.subr.bf16.mxu1 %v10615_v39  ;;  %v10653_v31 = vld [vmem:[%s15918_s3 + $0x628] ss:$20 sps:$4 sm:$0xff]  }
 0x29d   :  { %6236 = vmatpush1.bf16.msra.mxu0 %v10616_v53  ;;  %v9276_v55 = vpop.f32.mrb[99].mxu0  ;;  %v10655_v38 = vld [vmem:[%s15918_s3 + $0x50c] ss:$20 sps:$4 sm:$0xff]   ;;  %v10656_v39 = vld [vmem:[%s15918_s3 + $0x4e8] ss:$20 sps:$4 sm:$0xff]  }
 0x29e   :  { %6237 = vmatprep.subr.bf16.mxu0 %v10617_v41  ;;  %v13410_v58 = vadd.f32 %v9274_v36, %v13195_v9  ;;  %v10621_v9 = vld [vmem:[%s15918_s3 + $0x764] ss:$20 sps:$4 sm:$0xff]   ;;  %v10654_v36 = vld [vmem:[%s15918_s3 + $0x4e0] ss:$20 sps:$4 sm:$0xff]   ;;  %v10658_v55 = vld [vmem:[%s15918_s3 + $0x508] ss:$20 sps:$4 sm:$0xff]  }
 0x29f   :  { %6156 = vmatpush1.bf16.msra.mxu1 %v10618_v42  ;;  %v10657_v53 = vld [vmem:[%s15918_s3 + $0x4] ss:$20 sps:$4 sm:$0xff]   ;;  %v10659_v41 = vld [vmem:[%s15918_s3 + $0x534] ss:$20 sps:$4 sm:$0xff]  }
 0x2a0   :  { %6157 = vmatprep.subr.bf16.mxu1 %v10619_v45  ;;  %v10660_v42 = vld [vmem:[%s15918_s3] ss:$20 sps:$4 sm:$0xff]  }
 0x2a1   :  { %6238 = vmatpush1.bf16.msra.mxu0 %v10620_v47  ;;  %v10661_v45 = vld [vmem:[%s15918_s3 + $0x2c] ss:$20 sps:$4 sm:$0xff]   ;;  %v10662_v47 = vld [vmem:[%s15918_s3 + $0x530] ss:$20 sps:$4 sm:$0xff]  }
 0x2a2   :  { %6239 = vmatprep.subr.bf16.mxu0 %v10621_v9  ;;  %v10663_v9 = vld [vmem:[%s15918_s3 + $0x55c] ss:$20 sps:$4 sm:$0xff]  }
 0x2a3   :  { %6158 = vmatpush1.bf16.msra.mxu1 %v10622_v59  ;;  %v10664_v59 = vld [vmem:[%s15918_s3 + $0x28] ss:$20 sps:$4 sm:$0xff]  }
 0x2a4   :  { %6184 = vmatprep.subr.bf16.mxu1 %v10623_v63  ;;  %v10665_v63 = vld [vmem:[%s15918_s3 + $0x54] ss:$20 sps:$4 sm:$0xff]  }
 0x2a5   :  { %6240 = vmatpush1.bf16.msra.mxu0 %v10624_v0  ;;  %v10666_v0 = vld [vmem:[%s15918_s3 + $0x558] ss:$20 sps:$4 sm:$0xff]  }
 0x2a6   :  { %6176 = vmatmul.mubr.bf16.vlgmr.msra.gmra.mrb[128].mxu1 %v13427_v54  ;;  %9318 = vmatprep.subr.bf16.mxu0 %v10625_v2  ;;  %v10667_v2 = vld [vmem:[%s15918_s3 + $0x584] ss:$20 sps:$4 sm:$0xff]  }
 0x2a7   :  { %6185 = vmatpush1.bf16.msra.mxu1 %v10626_v3  ;;  %6216 = vmatprep.mubr.bf16.mxu1 %v13133_v40  ;;  %v10668_v3 = vld [vmem:[%s15918_s3 + $0x50] ss:$20 sps:$4 sm:$0xff]  }
 0x2a8   :  { %6258 = vmatmul.mubr.bf16.vlgmr.msra.gmra.mrb[116].mxu0 %v13427_v54  ;;  %6186 = vmatprep.subr.bf16.mxu1 %v10627_v7  ;;  %v10669_v7 = vld [vmem:[%s15918_s3 + $0x7c] ss:$20 sps:$4 sm:$0xff]  }
 0x2a9   :  { %9319 = vmatpush3.bf16.msra.mxu0 %v10628_v5  ;;  %6298 = vmatprep.mubr.bf16.mxu0 %v13133_v40  ;;  %v10633_v40 = vld [vmem:[%s15918_s3 + $0x560] ss:$20 sps:$4 sm:$0xff]  }
 0x2aa   :  { %9320 = vmatprep.subr.bf16.mxu0 %v10629_v6  ;;  %v10670_v5 = vld [vmem:[%s15918_s3 + $0x580] ss:$20 sps:$4 sm:$0xff]  }
 0x2ab   :  { %6187 = vmatpush1.bf16.msra.mxu1 %v10630_v8  ;;  %v10671_v6 = vld [vmem:[%s15918_s3 + $0x5ac] ss:$20 sps:$4 sm:$0xff]  }
 0x2ac   :  { %6188 = vmatprep.subr.bf16.mxu1 %v10631_v10  ;;  %v10672_v8 = vld [vmem:[%s15918_s3 + $0x78] ss:$20 sps:$4 sm:$0xff]  }
 0x2ad   :  { %9321 = vmatpush3.bf16.msra.mxu0 %v10632_v23  ;;  %v10673_v10 = vld [vmem:[%s15918_s3 + $0xa4] ss:$20 sps:$4 sm:$0xff]   ;;  %v10674_v23 = vld [vmem:[%s15918_s3 + $0x5a8] ss:$20 sps:$4 sm:$0xff]  }
 0x2ae   :  { %9322 = vmatprep.subr.bf16.mxu0 %v10633_v40  ;;  %v10675_v40 = vld [vmem:[%s15918_s3 + $0x5d4] ss:$20 sps:$4 sm:$0xff]  }
 0x2af   :  { %6189 = vmatpush1.bf16.msra.mxu1 %v10634_v13 }
 0x2b0   :  { %6190 = vmatprep.subr.bf16.mxu1 %v10635_v14  ;;  %v10676_v14 = vld [vmem:[%s15918_s3 + $0xa0] ss:$20 sps:$4 sm:$0xff]  }
 0x2b1   :  { %9323 = vmatpush3.bf16.msra.mxu0 %v10636_v37 }
 0x2b2   :  { %9324 = vmatprep.subr.bf16.mxu0 %v10637_v16 }
 0x2b3   :  { %6191 = vmatpush1.bf16.msra.mxu1 %v10638_v17 }
 0x2b4   :  { %6192 = vmatprep.subr.bf16.mxu1 %v10639_v34  ;;  %v10677_v34 = vld [vmem:[%s15918_s3 + $0xcc] ss:$20 sps:$4 sm:$0xff]  }
 0x2b5   :  { %9325 = vmatpush3.bf16.msra.mxu0 %v10640_v61 }
 0x2b6   :  { %9326 = vmatprep.subr.bf16.mxu0 %v10641_v20  ;;  %v10678_v20 = vld [vmem:[%s15918_s3 + $0x5d0] ss:$20 sps:$4 sm:$0xff]  }
 0x2b7   :  { %6193 = vmatpush1.bf16.msra.mxu1 %v10642_v32 }
 0x2b8   :  { %6194 = vmatprep.subr.bf16.mxu1 %v10643_v22 }
 0x2b9   :  { %v4893_v60 = vpop.f32.mrb[108].mxu1  ;;  %9327 = vmatpush3.bf16.msra.mxu0 %v10644_v21  ;;  %v10680_v21 = vld [vmem:[%s15918_s3 + $0xc8] ss:$20 sps:$4 sm:$0xff]  }
 0x2ba   :  { %v4894_v19 = vadd.f32 %v4893_v60, %v13091_v24  ;;  %v4895_v25 = vpop.f32.mrb[109].mxu1  ;;  %9328 = vmatprep.subr.bf16.mxu0 %v10645_v52  ;;  %v10647_v24 = vld [vmem:[%s15918_s3 + $0x4bc] ss:$20 sps:$4 sm:$0xff]   ;;  %v10682_v52 = vld [vmem:[%s15918_s3 + $0x5f8] ss:$20 sps:$4 sm:$0xff]  }
 0x2bb   :  { %v4896_v28 = vadd.f32 %v4895_v25, %v13097_v26  ;;  %v4897_v29 = vpop.f32.mrb[110].mxu1  ;;  %6195 = vmatpush1.bf16.msra.mxu1 %v10646_v18  ;;  %v10648_v26 = vld [vmem:[%s15918_s3 + $0x498] ss:$20 sps:$4 sm:$0xff]   ;;  %v10681_v25 = vld [vmem:[%s15918_s3 + $0xf4] ss:$20 sps:$4 sm:$0xff]  }
 0x2bc   :  { %v13508_v56 = vadd.f32 %v13287_v43, %v4894_v19  ;;  %v4898_v49 = vpop.f32.mrb[111].mxu1  ;;  %6196 = vmatprep.subr.bf16.mxu1 %v10647_v24  ;;  %v10650_v43 = vld [vmem:[%s15918_s3 + $0x4b8] ss:$20 sps:$4 sm:$0xff]   ;;  %v10684_v29 = vld [vmem:[%s15918_s3 + $0xf0] ss:$20 sps:$4 sm:$0xff]  }
 0x2bd   :  { %v13514_v57 = vadd.f32 %v13292_v46, %v4896_v28  ;;  %9329 = vmatpush3.bf16.msra.mxu0 %v10648_v26  ;;  %v10651_v46 = vld [vmem:[%s15918_s3 + $0x4e4] ss:$20 sps:$4 sm:$0xff]   ;;  %v10685_v18 = vld [vmem:[%s15918_s3 + $0x11c] ss:$20 sps:$4 sm:$0xff]   ;;  %v10686_v49 = vld [vmem:[%s15918_s3 + $0x620] ss:$20 sps:$4 sm:$0xff]  }
 0x2be   :  { %9330 = vmatprep.subr.bf16.mxu0 %v10649_v30  ;;  %v10683_v28 = vld [vmem:[%s15918_s3 + $0x624] ss:$20 sps:$4 sm:$0xff]  }
 0x2bf   :  { %6197 = vmatpush1.bf16.msra.mxu1 %v10650_v43  ;;  %v10687_v24 = vld [vmem:[%s15918_s3 + $0x118] ss:$20 sps:$4 sm:$0xff]   ;;  %v10689_v30 = vld [vmem:[%s15918_s3 + $0x650] ss:$20 sps:$4 sm:$0xff]   ;;  %v10690_v43 = vld [vmem:[%s15918_s3 + $0x140] ss:$20 sps:$4 sm:$0xff]  }
 0x2c0   :  { %6198 = vmatprep.subr.bf16.mxu1 %v10651_v46  ;;  %v10688_v26 = vld [vmem:[%s15918_s3 + $0x144] ss:$20 sps:$4 sm:$0xff]  }
 0x2c1   :  { %9331 = vmatpush3.bf16.msra.mxu0 %v10652_v48  ;;  %v10692_v46 = vld [vmem:[%s15918_s3 + $0x678] ss:$20 sps:$4 sm:$0xff]   ;;  %v10693_v48 = vld [vmem:[%s15918_s3 + $0x168] ss:$20 sps:$4 sm:$0xff]  }
 0x2c2   :  { %9332 = vmatprep.subr.bf16.mxu0 %v10653_v31  ;;  %v10694_v31 = vld [vmem:[%s15918_s3 + $0x194] ss:$20 sps:$4 sm:$0xff]  }
 0x2c3   :  { %6199 = vmatpush1.bf16.msra.mxu1 %v10654_v36  ;;  %v10695_v36 = vld [vmem:[%s15918_s3 + $0x6a0] ss:$20 sps:$4 sm:$0xff]  }
 0x2c4   :  { %6200 = vmatprep.subr.bf16.mxu1 %v10655_v38  ;;  %v10696_v38 = vld [vmem:[%s15918_s3 + $0x190] ss:$20 sps:$4 sm:$0xff]  }
 0x2c5   :  { %9333 = vmatpush3.bf16.msra.mxu0 %v10656_v39  ;;  %v10697_v39 = vld [vmem:[%s15918_s3 + $0x1bc] ss:$20 sps:$4 sm:$0xff]  }
 0x2c6   :  { %6346 = vmatprep.subr.bf16.mxu0 %v10657_v53  ;;  %v10698_v53 = vld [vmem:[%s15918_s3 + $0x6c8] ss:$20 sps:$4 sm:$0xff]  }
 0x2c7   :  { %6201 = vmatpush1.bf16.msra.mxu1 %v10658_v55  ;;  %v10699_v55 = vld [vmem:[%s15918_s3 + $0x1b8] ss:$20 sps:$4 sm:$0xff]  }
 0x2c8   :  { %6299 = vmatmul.mubr.bf16.vlgmr.msra.gmra.mrb[120].mxu0 %v13328_v11  ;;  %6202 = vmatprep.subr.bf16.mxu1 %v10659_v41  ;;  %v10700_v41 = vld [vmem:[%s15918_s3 + $0x1e4] ss:$20 sps:$4 sm:$0xff]  }
 0x2c9   :  { %6347 = vmatpush1.bf16.msra.mxu0 %v10660_v42  ;;  %6378 = vmatprep.mubr.bf16.mxu0 %v12724_v62  ;;  %v10701_v42 = vld [vmem:[%s15918_s3 + $0x6f0] ss:$20 sps:$4 sm:$0xff]  }
 0x2ca   :  { %6348 = vmatprep.subr.bf16.mxu0 %v10661_v45 }
 0x2cb   :  { %6203 = vmatpush1.bf16.msra.mxu1 %v10662_v47  ;;  %v10702_v47 = vld [vmem:[%s15918_s3 + $0x1e0] ss:$20 sps:$4 sm:$0xff]  }
 0x2cc   :  { %6204 = vmatprep.subr.bf16.mxu1 %v10663_v9 }
 0x2cd   :  { %6349 = vmatpush1.bf16.msra.mxu0 %v10664_v59 }
 0x2ce   :  { %6350 = vmatprep.subr.bf16.mxu0 %v10665_v63  ;;  %v10703_v63 = vld [vmem:[%s15918_s3 + $0x20c] ss:$20 sps:$4 sm:$0xff]  }
 0x2cf   :  { %6205 = vmatpush1.bf16.msra.mxu1 %v10666_v0 }
 0x2d0   :  { %6206 = vmatprep.subr.bf16.mxu1 %v10667_v2 }
 0x2d1   :  { %6351 = vmatpush1.bf16.msra.mxu0 %v10668_v3 }
 0x2d2   :  { %6352 = vmatprep.subr.bf16.mxu0 %v10669_v7  ;;  %v10704_v7 = vld [vmem:[%s15918_s3 + $0x718] ss:$20 sps:$4 sm:$0xff]  }
 0x2d3   :  { %6207 = vmatpush1.bf16.msra.mxu1 %v10670_v5 }
 0x2d4   :  { %6208 = vmatprep.subr.bf16.mxu1 %v10671_v6 }
 0x2d5   :  { %6353 = vmatpush1.bf16.msra.mxu0 %v10672_v8 }
 0x2d6   :  { %6354 = vmatprep.subr.bf16.mxu0 %v10673_v10 }
 0x2d7   :  { %6209 = vmatpush1.bf16.msra.mxu1 %v10674_v23 }
 0x2d8   :  { %6210 = vmatprep.subr.bf16.mxu1 %v10675_v40  ;;  %v10705_v40 = vld [vmem:[%s15918_s3 + $0x208] ss:$20 sps:$4 sm:$0xff]  }
 0x2d9   :  { %v5015_v13 = vpop.f32.mrb[112].mxu1  ;;  %6355 = vmatpush1.bf16.msra.mxu0 %v10676_v14  ;;  %v10707_v14 = vld [vmem:[%s15918_s3 + $0x740] ss:$20 sps:$4 sm:$0xff]  }
 0x2da   :  { %v13606_v37 = vadd.f32 %v5015_v13, %v13410_v58  ;;  %v9763_v16 = vpop.f32.mrb[113].mxu1  ;;  %v13608_v17 = vpop.f32.mrb[100].mxu0  ;;  %6356 = vmatprep.subr.bf16.mxu0 %v10677_v34  ;;  %v10679_v58 = vld [vmem:[%s15918_s3 + $0x5fc] ss:$20 sps:$4 sm:$0xff]   ;;  %v10711_v34 = vld [vmem:[%s15918_s3 + $0x284] ss:$20 sps:$4 sm:$0xff]  }
 0x2db   :  { %v5018_v61 = vpop.f32.mrb[114].mxu1  ;;  %6211 = vmatpush1.bf16.msra.mxu1 %v10678_v20  ;;  %v13616_v32 = vpop.f32.mrb[101].mxu0  ;;  %v10709_v16 = vld [vmem:[%s15918_s3 + $0x25c] ss:$20 sps:$4 sm:$0xff]   ;;  %v10713_v20 = vld [vmem:[%s15918_s3 + $0x28c] ss:$20 sps:$4 sm:$0xff]  }
 0x2dc   :  { %v9764_v22 = vpop.f32.mrb[115].mxu1  ;;  %v5841_v60 = vpop.f32.mrb[102].mxu0  ;;  %6212 = vmatprep.subr.bf16.mxu1 %v10679_v58  ;;  %v10712_v61 = vld [vmem:[%s15918_s3 + $0x258] ss:$20 sps:$4 sm:$0xff]   ;;  %v10718_v58 = vld [vmem:[%s15918_s3 + $0x2a8] ss:$20 sps:$4 sm:$0xff]  }
 0x2dd   :  { %6357 = vmatpush1.bf16.msra.mxu0 %v10680_v21  ;;  %v5842_v19 = vpop.f32.mrb[103].mxu0  ;;  %v10715_v22 = vld [vmem:[%s15918_s3 + $0x2ac] ss:$20 sps:$4 sm:$0xff]   ;;  %v10717_v60 = vld [vmem:[%s15918_s3 + $0x2b4] ss:$20 sps:$4 sm:$0xff]  }
 0x2de   :  { %6358 = vmatprep.subr.bf16.mxu0 %v10681_v25  ;;  %v10719_v21 = vld [vmem:[%s15918_s3 + $0x2d4] ss:$20 sps:$4 sm:$0xff]   ;;  %v10720_v19 = vld [vmem:[%s15918_s3 + $0x2b0] ss:$20 sps:$4 sm:$0xff]  }
 0x2df   :  { %6213 = vmatpush1.bf16.msra.mxu1 %v10682_v52  ;;  %v10721_v25 = vld [vmem:[%s15918_s3 + $0x2dc] ss:$20 sps:$4 sm:$0xff]  }
 0x2e0   :  { %6214 = vmatprep.subr.bf16.mxu1 %v10683_v28  ;;  %v10722_v52 = vld [vmem:[%s15918_s3 + $0x2d0] ss:$20 sps:$4 sm:$0xff]  }
 0x2e1   :  { %6359 = vmatpush1.bf16.msra.mxu0 %v10684_v29  ;;  %v10723_v28 = vld [vmem:[%s15918_s3 + $0x2fc] ss:$20 sps:$4 sm:$0xff]   ;;  %v10724_v29 = vld [vmem:[%s15918_s3 + $0x2d8] ss:$20 sps:$4 sm:$0xff]  }
 0x2e2   :  { %6360 = vmatprep.subr.bf16.mxu0 %v10685_v18  ;;  %v10725_v18 = vld [vmem:[%s15918_s3 + $0x304] ss:$20 sps:$4 sm:$0xff]  }
 0x2e3   :  { %6215 = vmatpush1.bf16.msra.mxu1 %v10686_v49  ;;  %v10726_v49 = vld [vmem:[%s15918_s3 + $0x2f8] ss:$20 sps:$4 sm:$0xff]  }
 0x2e4   :  { %9785 = vmatprep.subr.bf16.mxu1 %v11287_v12 }
 0x2e5   :  { %6361 = vmatpush1.bf16.msra.mxu0 %v10687_v24  ;;  %v10727_v24 = vld [vmem:[%s15918_s3 + $0x324] ss:$20 sps:$4 sm:$0xff]  }
 0x2e6   :  { %6217 = vmatmul.mubr.bf16.vlgmr.msra.gmra.mrb[132].mxu1 %v13328_v11  ;;  %6362 = vmatprep.subr.bf16.mxu0 %v10688_v26  ;;  %v10691_v11 = vld [vmem:[%s15918_s3 + $0x16c] ss:$20 sps:$4 sm:$0xff]  }
 0x2e7   :  { %9786 = vmatpush3.bf16.msra.mxu1 %v10689_v30  ;;  %9801 = vmatprep.mubr.msk.bf16.mxu1 %vm11288_vm1, %v11287_v12  ;;  %v10728_v26 = vld [vmem:[%s15918_s3 + $0x300] ss:$20 sps:$4 sm:$0xff]  }
 0x2e8   :  { %9787 = vmatprep.subr.bf16.mxu1 %v11287_v12  ;;  %v10729_v30 = vld [vmem:[%s15918_s3 + $0x32c] ss:$20 sps:$4 sm:$0xff]  }
 0x2e9   :  { %6363 = vmatpush1.bf16.msra.mxu0 %v10690_v43  ;;  %v10730_v43 = vld [vmem:[%s15918_s3 + $0x320] ss:$20 sps:$4 sm:$0xff]  }
 0x2ea   :  { %6364 = vmatprep.subr.bf16.mxu0 %v10691_v11  ;;  %v10731_v11 = vld [vmem:[%s15918_s3 + $0x34c] ss:$20 sps:$4 sm:$0xff]  }
 0x2eb   :  { %9788 = vmatpush3.bf16.msra.mxu1 %v10692_v46  ;;  %v10732_v46 = vld [vmem:[%s15918_s3 + $0x328] ss:$20 sps:$4 sm:$0xff]  }
 0x2ec   :  { %9789 = vmatprep.subr.bf16.mxu1 %v11287_v12 }
 0x2ed   :  { %6365 = vmatpush1.bf16.msra.mxu0 %v10693_v48  ;;  %v10733_v48 = vld [vmem:[%s15918_s3 + $0x354] ss:$20 sps:$4 sm:$0xff]  }
 0x2ee   :  { %6366 = vmatprep.subr.bf16.mxu0 %v10694_v31 }
 0x2ef   :  { %9790 = vmatpush3.bf16.msra.mxu1 %v10695_v36  ;;  %v10734_v36 = vld [vmem:[%s15918_s3 + $0x348] ss:$20 sps:$4 sm:$0xff]  }
 0x2f0   :  { %9791 = vmatprep.subr.bf16.mxu1 %v11287_v12 }
 0x2f1   :  { %6367 = vmatpush1.bf16.msra.mxu0 %v10696_v38 }
 0x2f2   :  { %6368 = vmatprep.subr.bf16.mxu0 %v10697_v39  ;;  %v10735_v39 = vld [vmem:[%s15918_s3 + $0x374] ss:$20 sps:$4 sm:$0xff]  }
 0x2f3   :  { %9792 = vmatpush3.bf16.msra.mxu1 %v10698_v53 }
 0x2f4   :  { %9793 = vmatprep.subr.bf16.mxu1 %v11287_v12 }
 0x2f5   :  { %6369 = vmatpush1.bf16.msra.mxu0 %v10699_v55 }
 0x2f6   :  { %6370 = vmatprep.subr.bf16.mxu0 %v10700_v41  ;;  %v10736_v41 = vld [vmem:[%s15918_s3 + $0x350] ss:$20 sps:$4 sm:$0xff]  }
 0x2f7   :  { %9794 = vmatpush3.bf16.msra.mxu1 %v10701_v42 }
 0x2f8   :  { %9795 = vmatprep.subr.bf16.mxu1 %v11287_v12 }
 0x2f9   :  { %v5878_v45 = vpop.f32.mrb[116].mxu1  ;;  %6371 = vmatpush1.bf16.msra.mxu0 %v10702_v47  ;;  %v10738_v47 = vld [vmem:[%s15918_s3 + $0x370] ss:$20 sps:$4 sm:$0xff]  }
 0x2fa   :  { %v5879_v9 = vadd.f32 %v5878_v45, %v13608_v17  ;;  %v5880_v59 = vpop.f32.mrb[117].mxu1  ;;  %6372 = vmatprep.subr.bf16.mxu0 %v10703_v63  ;;  %v10710_v17 = vld [vmem:[%s15918_s3 + $0x768] ss:$20 sps:$4 sm:$0xff]   ;;  %v10741_v63 = vld [vmem:[%s15918_s3 + $0x3a4] ss:$20 sps:$4 sm:$0xff]  }
 0x2fb   :  { %v5881_v0 = vadd.f32 %v5880_v59, %v13616_v32  ;;  %v5882_v2 = vpop.f32.mrb[118].mxu1  ;;  %v13704_v3 = vpop.f32.mrb[104].mxu0  ;;  %9796 = vmatpush3.bf16.msra.mxu1 %v10704_v7  ;;  %v10714_v32 = vld [vmem:[%s15918_s3 + $0x280] ss:$20 sps:$4 sm:$0xff]   ;;  %v10737_v45 = vld [vmem:[%s15918_s3 + $0x37c] ss:$20 sps:$4 sm:$0xff]  }
 0x2fc   :  { %v13710_v5 = vadd.f32 %v5879_v9, %v13290_v44  ;;  %v5883_v6 = vpop.f32.mrb[119].mxu1  ;;  %v13712_v8 = vpop.f32.mrb[105].mxu0  ;;  %9797 = vmatprep.subr.bf16.mxu1 %v11287_v12  ;;  %v10706_v44 = vld [vmem:[%s15918_s3 + $0x234] ss:$20 sps:$4 sm:$0xff]   ;;  %v10739_v9 = vld [vmem:[%s15918_s3 + $0x39c] ss:$20 sps:$4 sm:$0xff]  }
 0x2fd   :  { %v13716_v10 = vadd.f32 %v5881_v0, %v13298_v50  ;;  %v5964_v23 = vpop.f32.mrb[106].mxu0  ;;  %6373 = vmatpush1.bf16.msra.mxu0 %v10705_v40  ;;  %v10708_v50 = vld [vmem:[%s15918_s3 + $0x230] ss:$20 sps:$4 sm:$0xff]   ;;  %v10740_v59 = vld [vmem:[%s15918_s3 + $0x378] ss:$20 sps:$4 sm:$0xff]  }
 0x2fe   :  { %v5965_v13 = vpop.f32.mrb[107].mxu0  ;;  %6374 = vmatprep.subr.bf16.mxu0 %v10706_v44  ;;  %v10742_v0 = vld [vmem:[%s15918_s3 + $0x398] ss:$20 sps:$4 sm:$0xff]   ;;  %v10744_v7 = vld [vmem:[%s15918_s3 + $0x3a0] ss:$20 sps:$4 sm:$0xff]  }
 0x2ff   :  { %9798 = vmatpush3.bf16.msra.mxu1 %v10707_v14  ;;  %v10743_v2 = vld [vmem:[%s15918_s3 + $0xc] ss:$20 sps:$4 sm:$0xff]   ;;  %v10745_v6 = vld [vmem:[%s15918_s3 + $0x150] ss:$20 sps:$4 sm:$0xff]   ;;  %v10746_v23 = vld [vmem:[%s15918_s3 + $0x8] ss:$20 sps:$4 sm:$0xff]  }
 0x300   :  { %9799 = vmatprep.subr.bf16.mxu1 %v11287_v12  ;;  %v10747_v40 = vld [vmem:[%s15918_s3 + $0x34] ss:$20 sps:$4 sm:$0xff]   ;;  %v10748_v13 = vld [vmem:[%s15918_s3 + $0x10] ss:$20 sps:$4 sm:$0xff]   ;;  %v10749_v44 = vld [vmem:[%s15918_s3 + $0x178] ss:$20 sps:$4 sm:$0xff]  }
 0x301   :  { %6375 = vmatpush1.bf16.msra.mxu0 %v10708_v50  ;;  %v10751_v14 = vld [vmem:[%s15918_s3 + $0x5c] ss:$20 sps:$4 sm:$0xff]   ;;  %v10752_v50 = vld [vmem:[%s15918_s3 + $0x38] ss:$20 sps:$4 sm:$0xff]  }
 0x302   :  { %6376 = vmatprep.subr.bf16.mxu0 %v10709_v16  ;;  %v10754_v16 = vld [vmem:[%s15918_s3 + $0x58] ss:$20 sps:$4 sm:$0xff]  }
 0x303   :  { %9800 = vmatpush3.bf16.msra.mxu1 %v10710_v17  ;;  %v10755_v17 = vld [vmem:[%s15918_s3 + $0x84] ss:$20 sps:$4 sm:$0xff]  }
 0x304   :  { %6387 = vmatprep.subr.bf16.mxu1 %v10711_v34  ;;  %v10756_v34 = vld [vmem:[%s15918_s3 + $0x60] ss:$20 sps:$4 sm:$0xff]  }
 0x305   :  { %6377 = vmatpush1.bf16.msra.mxu0 %v10712_v61  ;;  %v10757_v61 = vld [vmem:[%s15918_s3 + $0x1c8] ss:$20 sps:$4 sm:$0xff]  }
 0x306   :  { %9802 = vmatmul.mubr.bf16.vlgmr.msra.gmra.mrb[136].mxu1 %v13427_v54  ;;  %6469 = vmatprep.subr.bf16.mxu0 %v10713_v20  ;;  %v10716_v54 = vld [vmem:[%s15918_s3 + $0x288] ss:$20 sps:$4 sm:$0xff]   ;;  %v10758_v20 = vld [vmem:[%s15918_s3 + $0x80] ss:$20 sps:$4 sm:$0xff]  }
 0x307   :  { %6388 = vmatpush1.bf16.msra.mxu1 %v10714_v32  ;;  %6419 = vmatprep.mubr.bf16.mxu1 %v11286_v1  ;;  %v10759_v32 = vld [vmem:[%s15918_s3 + $0xac] ss:$20 sps:$4 sm:$0xff]  }
 0x308   :  { %6379 = vmatmul.mubr.bf16.vlgmr.msra.gmra.mrb[124].mxu0 %v12920_v15  ;;  %6389 = vmatprep.subr.bf16.mxu1 %v10715_v22  ;;  %v10760_v22 = vld [vmem:[%s15918_s3 + $0x88] ss:$20 sps:$4 sm:$0xff]  }
 0x309   :  { %6470 = vmatpush1.bf16.msra.mxu0 %v10716_v54  ;;  %6501 = vmatprep.mubr.bf16.mxu0 %v11286_v1  ;;  %v10761_v54 = vld [vmem:[%s15918_s3 + $0x1f0] ss:$20 sps:$4 sm:$0xff]  }
 0x30a   :  { %6471 = vmatprep.subr.bf16.mxu0 %v10717_v60  ;;  %v10762_v60 = vld [vmem:[%s15918_s3 + $0xa8] ss:$20 sps:$4 sm:$0xff]  }
 0x30b   :  { %6390 = vmatpush1.bf16.msra.mxu1 %v10718_v58  ;;  %v10763_v58 = vld [vmem:[%s15918_s3 + $0xd4] ss:$20 sps:$4 sm:$0xff]  }
 0x30c   :  { %6391 = vmatprep.subr.bf16.mxu1 %v10719_v21 }
 0x30d   :  { %6472 = vmatpush1.bf16.msra.mxu0 %v10720_v19  ;;  %v10764_v19 = vld [vmem:[%s15918_s3 + $0xb0] ss:$20 sps:$4 sm:$0xff]  }
 0x30e   :  { %6473 = vmatprep.subr.bf16.mxu0 %v10721_v25 }
 0x30f   :  { %6392 = vmatpush1.bf16.msra.mxu1 %v10722_v52 }
 0x310   :  { %6393 = vmatprep.subr.bf16.mxu1 %v10723_v28  ;;  %v10765_v28 = vld [vmem:[%s15918_s3 + $0x218] ss:$20 sps:$4 sm:$0xff]  }
 0x311   :  { %6474 = vmatpush1.bf16.msra.mxu0 %v10724_v29 }
 0x312   :  { %6475 = vmatprep.subr.bf16.mxu0 %v10725_v18 }
 0x313   :  { %6394 = vmatpush1.bf16.msra.mxu1 %v10726_v49  ;;  %v10766_v49 = vld [vmem:[%s15918_s3 + $0xd0] ss:$20 sps:$4 sm:$0xff]  }
 0x314   :  { %6395 = vmatprep.subr.bf16.mxu1 %v10727_v24 }
 0x315   :  { %6476 = vmatpush1.bf16.msra.mxu0 %v10728_v26 }
 0x316   :  { %6477 = vmatprep.subr.bf16.mxu0 %v10729_v30 }
 0x317   :  { %6396 = vmatpush1.bf16.msra.mxu1 %v10730_v43  ;;  %v10769_v43 = vld [vmem:[%s15918_s3 + $0x240] ss:$20 sps:$4 sm:$0xff]  }
 0x318   :  { %6397 = vmatprep.subr.bf16.mxu1 %v10731_v11  ;;  %v10772_v11 = vld [vmem:[%s15918_s3 + $0x100] ss:$20 sps:$4 sm:$0xff]  }
 0x319   :  { %6478 = vmatpush1.bf16.msra.mxu0 %v10732_v46  ;;  %v10773_v46 = vld [vmem:[%s15918_s3 + $0x268] ss:$20 sps:$4 sm:$0xff]  }
 0x31a   :  { %6479 = vmatprep.subr.bf16.mxu0 %v10733_v48  ;;  %v10774_v48 = vld [vmem:[%s15918_s3 + $0x120] ss:$20 sps:$4 sm:$0xff]  }
 0x31b   :  { %v9303_v31 = vpop.f32.mrb[108].mxu0  ;;  %6398 = vmatpush1.bf16.msra.mxu1 %v10734_v36  ;;  %v13950_v36 = vld [vmem:[#allocation2 + $0x30] sm:$0xff] }
 0x31c   :  { %v9304_v38 = vpop.f32.mrb[109].mxu0  ;;  %6399 = vmatprep.subr.bf16.mxu1 %v10735_v39  ;;  %v10777_v39 = vld [vmem:[%s15918_s3 + $0x784] ss:$20 sps:$4 sm:$0xff]  }
 0x31d   :  { %v13816_v53 = vadd.f32 %v9304_v38, %v9303_v31  ;;  %v9306_v55 = vpop.f32.mrb[110].mxu0  ;;  %6480 = vmatpush1.bf16.msra.mxu0 %v10736_v41  ;;  %v10775_v31 = vld [vmem:[%s15918_s3 + $0x14c] ss:$20 sps:$4 sm:$0xff]   ;;  %v10776_v38 = vld [vmem:[%s15918_s3 + $0x128] ss:$20 sps:$4 sm:$0xff]   ;;  %v13963_v41 = vcombine.high %v13950_v36, %v13950_v36 }
 0x31e   :  { %v9307_v42 = vpop.f32.mrb[111].mxu0  ;;  %6481 = vmatprep.subr.bf16.mxu0 %v10737_v45  ;;  %v10778_v55 = vld [vmem:[%s15918_s3 + $0x148] ss:$20 sps:$4 sm:$0xff]   ;;  %v10780_v45 = vld [vmem:[%s15918_s3 + $0x780] ss:$20 sps:$4 sm:$0xff]  }
 0x31f   :  { %6400 = vmatpush1.bf16.msra.mxu1 %v10738_v47  ;;  %v10779_v42 = vld [vmem:[%s15918_s3 + $0x174] ss:$20 sps:$4 sm:$0xff]   ;;  %v10781_v47 = vld [vmem:[%s15918_s3 + $0x7ac] ss:$20 sps:$4 sm:$0xff]  }
 0x320   :  { %6401 = vmatprep.subr.bf16.mxu1 %v10739_v9  ;;  %v10782_v9 = vld [vmem:[%s15918_s3 + $0x170] ss:$20 sps:$4 sm:$0xff]  }
 0x321   :  { %6482 = vmatpush1.bf16.msra.mxu0 %v10740_v59  ;;  %v10783_v59 = vld [vmem:[%s15918_s3 + $0x19c] ss:$20 sps:$4 sm:$0xff]  }
 0x322   :  { %6483 = vmatprep.subr.bf16.mxu0 %v10741_v63  ;;  %v10784_v63 = vld [vmem:[%s15918_s3 + $0x7a8] ss:$20 sps:$4 sm:$0xff]  }
 0x323   :  { %6402 = vmatpush1.bf16.msra.mxu1 %v10742_v0  ;;  %v10785_v0 = vld [vmem:[%s15918_s3 + $0x7d4] ss:$20 sps:$4 sm:$0xff]  }
 0x324   :  { %6428 = vmatprep.subr.bf16.mxu1 %v10743_v2  ;;  %v10786_v2 = vld [vmem:[%s15918_s3 + $0x198] ss:$20 sps:$4 sm:$0xff]  }
 0x325   :  { %6484 = vmatpush1.bf16.msra.mxu0 %v10744_v7  ;;  %v10787_v7 = vld [vmem:[%s15918_s3 + $0x1c4] ss:$20 sps:$4 sm:$0xff]  }
 0x326   :  { %6420 = vmatmul.mubr.bf16.vlgmr.msra.gmra.mrb[140].mxu1 %v13018_v51  ;;  %9349 = vmatprep.subr.bf16.mxu0 %v10745_v6  ;;  %v10788_v6 = vld [vmem:[%s15918_s3 + $0x7d0] ss:$20 sps:$4 sm:$0xff]  }
 0x327   :  { %6429 = vmatpush1.bf16.msra.mxu1 %v10746_v23  ;;  %6460 = vmatprep.mubr.bf16.mxu1 %v12724_v62  ;;  %v10789_v23 = vld [vmem:[%s15918_s3 + $0x7fc] ss:$20 sps:$4 sm:$0xff]  }
 0x328   :  { %6502 = vmatmul.mubr.bf16.vlgmr.msra.gmra.mrb[128].mxu0 %v13018_v51  ;;  %6430 = vmatprep.subr.bf16.mxu1 %v10747_v40  ;;  %v10750_v51 = vld [vmem:[%s15918_s3 + $0x30] ss:$20 sps:$4 sm:$0xff]   ;;  %v10790_v40 = vld [vmem:[%s15918_s3 + $0x1c0] ss:$20 sps:$4 sm:$0xff]  }
 0x329   :  { %9350 = vmatpush3.bf16.msra.mxu0 %v10748_v13  ;;  %6542 = vmatprep.mubr.bf16.mxu0 %v12724_v62  ;;  %v10753_v62 = vld [vmem:[%s15918_s3 + $0x1a0] ss:$20 sps:$4 sm:$0xff]  }
 0x32a   :  { %9351 = vmatprep.subr.bf16.mxu0 %v10749_v44  ;;  %v10791_v13 = vld [vmem:[%s15918_s3 + $0x1ec] ss:$20 sps:$4 sm:$0xff]  }
 0x32b   :  { %6431 = vmatpush1.bf16.msra.mxu1 %v10750_v51  ;;  %v10792_v44 = vld [vmem:[%s15918_s3 + $0x7f8] ss:$20 sps:$4 sm:$0xff]  }
 0x32c   :  { %6432 = vmatprep.subr.bf16.mxu1 %v10751_v14  ;;  %v10793_v51 = vld [vmem:[%s15918_s3 + $0x824] ss:$20 sps:$4 sm:$0xff]   ;;  %v10794_v14 = vld [vmem:[%s15918_s3 + $0x1e8] ss:$20 sps:$4 sm:$0xff]  }
 0x32d   :  { %9352 = vmatpush3.bf16.msra.mxu0 %v10752_v50  ;;  %v10795_v50 = vld [vmem:[%s15918_s3 + $0x214] ss:$20 sps:$4 sm:$0xff]  }
 0x32e   :  { %9353 = vmatprep.subr.bf16.mxu0 %v10753_v62 }
 0x32f   :  { %6433 = vmatpush1.bf16.msra.mxu1 %v10754_v16  ;;  %v10796_v16 = vld [vmem:[%s15918_s3 + $0x820] ss:$20 sps:$4 sm:$0xff]  }
 0x330   :  { %6434 = vmatprep.subr.bf16.mxu1 %v10755_v17 }
 0x331   :  { %9354 = vmatpush3.bf16.msra.mxu0 %v10756_v34 }
 0x332   :  { %9355 = vmatprep.subr.bf16.mxu0 %v10757_v61  ;;  %v10797_v61 = vld [vmem:[%s15918_s3 + $0x84c] ss:$20 sps:$4 sm:$0xff]  }
 0x333   :  { %6435 = vmatpush1.bf16.msra.mxu1 %v10758_v20 }
 0x334   :  { %6436 = vmatprep.subr.bf16.mxu1 %v10759_v32 }
 0x335   :  { %9356 = vmatpush3.bf16.msra.mxu0 %v10760_v22  ;;  %v10798_v22 = vld [vmem:[%s15918_s3 + $0x210] ss:$20 sps:$4 sm:$0xff]  }
 0x336   :  { %9357 = vmatprep.subr.bf16.mxu0 %v10761_v54 }
 0x337   :  { %6437 = vmatpush1.bf16.msra.mxu1 %v10762_v60 }
 0x338   :  { %6438 = vmatprep.subr.bf16.mxu1 %v10763_v58 }
 0x339   :  { %v5919_v21 = vpop.f32.mrb[120].mxu1  ;;  %9358 = vmatpush3.bf16.msra.mxu0 %v10764_v19  ;;  %v10800_v19 = vld [vmem:[%s15918_s3 + $0x848] ss:$20 sps:$4 sm:$0xff]  }
 0x33a   :  { %v5961_v25 = vadd.f32 %v13704_v3, %v5919_v21  ;;  %v5921_v52 = vpop.f32.mrb[121].mxu1  ;;  %9359 = vmatprep.subr.bf16.mxu0 %v10765_v28  ;;  %v10767_v3 = vld [vmem:[%s15918_s3 + $0xfc] ss:$20 sps:$4 sm:$0xff]   ;;  %v10803_v28 = vld [vmem:[%s15918_s3 + $0x264] ss:$20 sps:$4 sm:$0xff]  }
 0x33b   :  { %v5963_v29 = vadd.f32 %v13712_v8, %v5921_v52  ;;  %v5923_v18 = vpop.f32.mrb[122].mxu1  ;;  %6439 = vmatpush1.bf16.msra.mxu1 %v10766_v49  ;;  %v10768_v8 = vld [vmem:[%s15918_s3 + $0xd8] ss:$20 sps:$4 sm:$0xff]   ;;  %v10806_v49 = vld [vmem:[%s15918_s3 + $0x260] ss:$20 sps:$4 sm:$0xff]  }
 0x33c   :  { %v13918_v24 = vadd.f32 %v5961_v25, %v13508_v56  ;;  %v5924_v26 = vpop.f32.mrb[123].mxu1  ;;  %6440 = vmatprep.subr.bf16.mxu1 %v10767_v3  ;;  %v10770_v56 = vld [vmem:[%s15918_s3 + $0xf8] ss:$20 sps:$4 sm:$0xff]   ;;  %v10805_v18 = vld [vmem:[%s15918_s3 + $0x89c] ss:$20 sps:$4 sm:$0xff]  }
 0x33d   :  { %v13924_v30 = vadd.f32 %v5963_v29, %v13514_v57  ;;  %9360 = vmatpush3.bf16.msra.mxu0 %v10768_v8  ;;  %v10771_v57 = vld [vmem:[%s15918_s3 + $0x124] ss:$20 sps:$4 sm:$0xff]  }
 0x33e   :  { %9361 = vmatprep.subr.bf16.mxu0 %v10769_v43  ;;  %v10802_v52 = vld [vmem:[%s15918_s3 + $0x238] ss:$20 sps:$4 sm:$0xff]   ;;  %v10804_v29 = vld [vmem:[%s15918_s3 + $0x870] ss:$20 sps:$4 sm:$0xff]   ;;  %v10810_v43 = vld [vmem:[%s15918_s3 + $0x8c0] ss:$20 sps:$4 sm:$0xff]  }
 0x33f   :  { %6441 = vmatpush1.bf16.msra.mxu1 %v10770_v56  ;;  %v10807_v26 = vld [vmem:[%s15918_s3 + $0x898] ss:$20 sps:$4 sm:$0xff]   ;;  %v10809_v8 = vld [vmem:[%s15918_s3 + $0x290] ss:$20 sps:$4 sm:$0xff]  }
 0x340   :  { %6442 = vmatprep.subr.bf16.mxu1 %v10771_v57  ;;  %v10808_v3 = vld [vmem:[%s15918_s3 + $0x8c4] ss:$20 sps:$4 sm:$0xff]   ;;  %v10813_v57 = vld [vmem:[%s15918_s3 + $0x8e8] ss:$20 sps:$4 sm:$0xff]  }
 0x341   :  { %9362 = vmatpush3.bf16.msra.mxu0 %v10772_v11  ;;  %v10812_v56 = vld [vmem:[%s15918_s3 + $0x2b8] ss:$20 sps:$4 sm:$0xff]   ;;  %v10814_v11 = vld [vmem:[%s15918_s3 + $0x914] ss:$20 sps:$4 sm:$0xff]  }
 0x342   :  { %9363 = vmatprep.subr.bf16.mxu0 %v10773_v46  ;;  %v10815_v46 = vld [vmem:[%s15918_s3 + $0x2e0] ss:$20 sps:$4 sm:$0xff]  }
 0x343   :  { %6443 = vmatpush1.bf16.msra.mxu1 %v10774_v48  ;;  %v10816_v48 = vld [vmem:[%s15918_s3 + $0x910] ss:$20 sps:$4 sm:$0xff]  }
 0x344   :  { %6444 = vmatprep.subr.bf16.mxu1 %v10775_v31  ;;  %v10817_v31 = vld [vmem:[%s15918_s3 + $0x93c] ss:$20 sps:$4 sm:$0xff]  }
 0x345   :  { %9364 = vmatpush3.bf16.msra.mxu0 %v10776_v38  ;;  %v10818_v38 = vld [vmem:[%s15918_s3 + $0x308] ss:$20 sps:$4 sm:$0xff]  }
 0x346   :  { %6603 = vmatprep.subr.bf16.mxu0 %v10777_v39  ;;  %v10819_v39 = vld [vmem:[%s15918_s3 + $0x938] ss:$20 sps:$4 sm:$0xff]  }
 0x347   :  { %6445 = vmatpush1.bf16.msra.mxu1 %v10778_v55  ;;  %v10820_v55 = vld [vmem:[%s15918_s3 + $0x964] ss:$20 sps:$4 sm:$0xff]  }
 0x348   :  { %6543 = vmatmul.mubr.bf16.vlgmr.msra.gmra.mrb[132].mxu0 %v12920_v15  ;;  %6446 = vmatprep.subr.bf16.mxu1 %v10779_v42  ;;  %v10821_v42 = vld [vmem:[%s15918_s3 + $0x330] ss:$20 sps:$4 sm:$0xff]  }
 0x349   :  { %6604 = vmatpush1.bf16.msra.mxu0 %v10780_v45  ;;  %6635 = vmatprep.mubr.bf16.mxu0 %v13963_v41 }
 0x34a   :  { %6605 = vmatprep.subr.bf16.mxu0 %v10781_v47  ;;  %v10822_v47 = vld [vmem:[%s15918_s3 + $0x960] ss:$20 sps:$4 sm:$0xff]  }
 0x34b   :  { %6447 = vmatpush1.bf16.msra.mxu1 %v10782_v9 }
 0x34c   :  { %6448 = vmatprep.subr.bf16.mxu1 %v10783_v59 }
 0x34d   :  { %6606 = vmatpush1.bf16.msra.mxu0 %v10784_v63  ;;  %v10823_v63 = vld [vmem:[%s15918_s3 + $0x98c] ss:$20 sps:$4 sm:$0xff]  }
 0x34e   :  { %6607 = vmatprep.subr.bf16.mxu0 %v10785_v0 }
 0x34f   :  { %6449 = vmatpush1.bf16.msra.mxu1 %v10786_v2 }
 0x350   :  { %6450 = vmatprep.subr.bf16.mxu1 %v10787_v7 }
 0x351   :  { %6608 = vmatpush1.bf16.msra.mxu0 %v10788_v6  ;;  %v10824_v6 = vld [vmem:[%s15918_s3 + $0x358] ss:$20 sps:$4 sm:$0xff]  }
 0x352   :  { %6609 = vmatprep.subr.bf16.mxu0 %v10789_v23 }
 0x353   :  { %6451 = vmatpush1.bf16.msra.mxu1 %v10790_v40 }
 0x354   :  { %6452 = vmatprep.subr.bf16.mxu1 %v10791_v13 }
 0x355   :  { %6610 = vmatpush1.bf16.msra.mxu0 %v10792_v44  ;;  %v10825_v44 = vld [vmem:[%s15918_s3 + $0x988] ss:$20 sps:$4 sm:$0xff]  }
 0x356   :  { %6611 = vmatprep.subr.bf16.mxu0 %v10793_v51 }
 0x357   :  { %6453 = vmatpush1.bf16.msra.mxu1 %v10794_v14  ;;  %v10826_v14 = vld [vmem:[%s15918_s3 + $0x9b4] ss:$20 sps:$4 sm:$0xff]  }
 0x358   :  { %6454 = vmatprep.subr.bf16.mxu1 %v10795_v50  ;;  %v10827_v50 = vld [vmem:[%s15918_s3 + $0x380] ss:$20 sps:$4 sm:$0xff]  }
 0x359   :  { %v6041_v62 = vpop.f32.mrb[124].mxu1  ;;  %6612 = vmatpush1.bf16.msra.mxu0 %v10796_v16  ;;  %v10829_v16 = vld [vmem:[%s15918_s3 + $0x9dc] ss:$20 sps:$4 sm:$0xff]  }
 0x35a   :  { %v6042_v17 = vadd.f32 %v13816_v53, %v6041_v62  ;;  %v9783_v34 = vpop.f32.mrb[125].mxu1  ;;  %6613 = vmatprep.subr.bf16.mxu0 %v10797_v61  ;;  %v10799_v53 = vld [vmem:[%s15918_s3 + $0x23c] ss:$20 sps:$4 sm:$0xff]   ;;  %v10832_v61 = vld [vmem:[%s15918_s3 + $0x9d8] ss:$20 sps:$4 sm:$0xff]  }
 0x35b   :  { %v6044_v20 = vpop.f32.mrb[126].mxu1  ;;  %v14025_v32 = vpop.f32.mrb[112].mxu0  ;;  %6455 = vmatpush1.bf16.msra.mxu1 %v10798_v22  ;;  %v10828_v62 = vld [vmem:[%s15918_s3 + $0x9b0] ss:$20 sps:$4 sm:$0xff]   ;;  %v10834_v22 = vld [vmem:[%s15918_s3 + $0xa0c] ss:$20 sps:$4 sm:$0xff]  }
 0x35c   :  { %v14031_v54 = vadd.f32 %v6042_v17, %v13606_v37  ;;  %v9784_v60 = vpop.f32.mrb[127].mxu1  ;;  %v14033_v58 = vpop.f32.mrb[113].mxu0  ;;  %6456 = vmatprep.subr.bf16.mxu1 %v10799_v53  ;;  %v10801_v37 = vld [vmem:[%s15918_s3 + $0x874] ss:$20 sps:$4 sm:$0xff]   ;;  %v10831_v34 = vld [vmem:[%s15918_s3 + $0xa04] ss:$20 sps:$4 sm:$0xff]  }
 0x35d   :  { %v6140_v21 = vpop.f32.mrb[114].mxu0  ;;  %6614 = vmatpush1.bf16.msra.mxu0 %v10800_v19  ;;  %v10830_v17 = vld [vmem:[%s15918_s3 + $0x3a8] ss:$20 sps:$4 sm:$0xff]   ;;  %v10833_v20 = vld [vmem:[#allocation2 + $0x20] ss:$0 sps:$4 sm:$0xff]  }
 0x35e   :  { %v6141_v25 = vpop.f32.mrb[115].mxu0  ;;  %6615 = vmatprep.subr.bf16.mxu0 %v10801_v37  ;;  %v10835_v60 = vld [vmem:[%s15918_s3 + $0xa00] ss:$20 sps:$4 sm:$0xff]   ;;  %v10839_v21 = vld [vmem:[%s15918_s3 + $0xa28] ss:$20 sps:$4 sm:$0xff]  }
 0x35f   :  { %6457 = vmatpush1.bf16.msra.mxu1 %v10802_v52  ;;  %v10838_v53 = vld [vmem:[%s15918_s3 + $0xa34] ss:$20 sps:$4 sm:$0xff]   ;;  %v10841_v25 = vld [vmem:[%s15918_s3 + $0xa30] ss:$20 sps:$4 sm:$0xff]  }
 0x360   :  { %6458 = vmatprep.subr.bf16.mxu1 %v10803_v28  ;;  %v10840_v19 = vld [vmem:[%s15918_s3 + $0xa54] ss:$20 sps:$4 sm:$0xff]   ;;  %v10842_v37 = vld [vmem:[%s15918_s3 + $0xa5c] ss:$20 sps:$4 sm:$0xff]  }
 0x361   :  { %6616 = vmatpush1.bf16.msra.mxu0 %v10804_v29  ;;  %v10843_v52 = vld [vmem:[%s15918_s3 + $0xa50] ss:$20 sps:$4 sm:$0xff]   ;;  %v10845_v29 = vld [vmem:[%s15918_s3 + $0xa58] ss:$20 sps:$4 sm:$0xff]  }
 0x362   :  { %6617 = vmatprep.subr.bf16.mxu0 %v10805_v18  ;;  %v10844_v28 = vld [vmem:[%s15918_s3 + $0xa7c] ss:$20 sps:$4 sm:$0xff]   ;;  %v10846_v18 = vld [vmem:[%s15918_s3 + $0xa84] ss:$20 sps:$4 sm:$0xff]  }
 0x363   :  { %6459 = vmatpush1.bf16.msra.mxu1 %v10806_v49  ;;  %v10847_v49 = vld [vmem:[%s15918_s3 + $0xa78] ss:$20 sps:$4 sm:$0xff]  }
 0x364   :  { %9805 = vmatprep.subr.bf16.mxu1 %v11287_v12 }
 0x365   :  { %6618 = vmatpush1.bf16.msra.mxu0 %v10807_v26  ;;  %v10848_v26 = vld [vmem:[%s15918_s3 + $0xaa4] ss:$20 sps:$4 sm:$0xff]  }
 0x366   :  { %6461 = vmatmul.mubr.bf16.vlgmr.msra.gmra.mrb[144].mxu1 %v12920_v15  ;;  %6619 = vmatprep.subr.bf16.mxu0 %v10808_v3  ;;  %v10811_v15 = vld [vmem:[%s15918_s3 + $0x8ec] ss:$20 sps:$4 sm:$0xff]  }
 0x367   :  { %9806 = vmatpush3.bf16.msra.mxu1 %v10809_v8  ;;  %9821 = vmatprep.mubr.msk.bf16.mxu1 %vm11288_vm1, %v11287_v12  ;;  %v10849_v3 = vld [vmem:[%s15918_s3 + $0xa80] ss:$20 sps:$4 sm:$0xff]  }
 0x368   :  { %9807 = vmatprep.subr.bf16.mxu1 %v11287_v12  ;;  %v10850_v8 = vld [vmem:[%s15918_s3 + $0xaac] ss:$20 sps:$4 sm:$0xff]  }
 0x369   :  { %6620 = vmatpush1.bf16.msra.mxu0 %v10810_v43  ;;  %v10851_v43 = vld [vmem:[%s15918_s3 + $0xaa0] ss:$20 sps:$4 sm:$0xff]  }
 0x36a   :  { %6621 = vmatprep.subr.bf16.mxu0 %v10811_v15  ;;  %v10852_v15 = vld [vmem:[%s15918_s3 + $0xacc] ss:$20 sps:$4 sm:$0xff]  }
 0x36b   :  { %9808 = vmatpush3.bf16.msra.mxu1 %v10812_v56  ;;  %v10853_v56 = vld [vmem:[%s15918_s3 + $0xaa8] ss:$20 sps:$4 sm:$0xff]  }
 0x36c   :  { %9809 = vmatprep.subr.bf16.mxu1 %v11287_v12 }
 0x36d   :  { %6622 = vmatpush1.bf16.msra.mxu0 %v10813_v57  ;;  %v10854_v57 = vld [vmem:[%s15918_s3 + $0xad4] ss:$20 sps:$4 sm:$0xff]  }
 0x36e   :  { %6623 = vmatprep.subr.bf16.mxu0 %v10814_v11 }
 0x36f   :  { %9810 = vmatpush3.bf16.msra.mxu1 %v10815_v46  ;;  %v10855_v46 = vld [vmem:[%s15918_s3 + $0xac8] ss:$20 sps:$4 sm:$0xff]  }
 0x370   :  { %9811 = vmatprep.subr.bf16.mxu1 %v11287_v12 }
 0x371   :  { %6624 = vmatpush1.bf16.msra.mxu0 %v10816_v48 }
 0x372   :  { %6625 = vmatprep.subr.bf16.mxu0 %v10817_v31  ;;  %v10856_v31 = vld [vmem:[%s15918_s3 + $0xaf4] ss:$20 sps:$4 sm:$0xff]  }
 0x373   :  { %9812 = vmatpush3.bf16.msra.mxu1 %v10818_v38 }
 0x374   :  { %9813 = vmatprep.subr.bf16.mxu1 %v11287_v12 }
 0x375   :  { %6626 = vmatpush1.bf16.msra.mxu0 %v10819_v39 }
 0x376   :  { %6627 = vmatprep.subr.bf16.mxu0 %v10820_v55  ;;  %v10857_v55 = vld [vmem:[%s15918_s3 + $0xad0] ss:$20 sps:$4 sm:$0xff]  }
 0x377   :  { %9814 = vmatpush3.bf16.msra.mxu1 %v10821_v42 }
 0x378   :  { %9815 = vmatprep.subr.bf16.mxu1 %v11287_v12 }
 0x379   :  { %v6177_v45 = vpop.f32.mrb[128].mxu1  ;;  %6628 = vmatpush1.bf16.msra.mxu0 %v10822_v47  ;;  %v10859_v47 = vld [vmem:[%s15918_s3 + $0xaf0] ss:$20 sps:$4 sm:$0xff]  }
 0x37a   :  { %v14117_v9 = vadd.f32 %v6177_v45, %v14025_v32  ;;  %v6179_v59 = vpop.f32.mrb[129].mxu1  ;;  %6629 = vmatprep.subr.bf16.mxu0 %v10823_v63  ;;  %v14160_v32 = vcombine.low %v13950_v36, %v13950_v36  ;;  %v10837_v36 = vld [vmem:[%s15918_s3 + $0xa08] ss:$20 sps:$4 sm:$0xff]   ;;  %v10861_v63 = vld [vmem:[%s15918_s3 + $0xaf8] ss:$20 sps:$4 sm:$0xff]  }
 0x37b   :  { %v14123_v0 = vadd.f32 %v6179_v59, %v14033_v58  ;;  %v6181_v2 = vpop.f32.mrb[130].mxu1  ;;  %v14125_v7 = vpop.f32.mrb[116].mxu0  ;;  %9816 = vmatpush3.bf16.msra.mxu1 %v10824_v6  ;;  %v10836_v58 = vld [vmem:[%s15918_s3 + $0xa2c] ss:$20 sps:$4 sm:$0xff]   ;;  %v10858_v45 = vld [vmem:[%s15918_s3 + $0xafc] ss:$20 sps:$4 sm:$0xff]  }
 0x37c   :  { %v6182_v23 = vpop.f32.mrb[131].mxu1  ;;  %v14130_v40 = vpop.f32.mrb[117].mxu0  ;;  %9817 = vmatprep.subr.bf16.mxu1 %v11287_v12  ;;  %v10860_v59 = vld [vmem:[%s15918_s3 + $0xb1c] ss:$20 sps:$4 sm:$0xff]   ;;  %v10862_v2 = vld [vmem:[%s15918_s3 + $0xb24] ss:$20 sps:$4 sm:$0xff]  }
 0x37d   :  { %v6263_v13 = vpop.f32.mrb[118].mxu0  ;;  %6630 = vmatpush1.bf16.msra.mxu0 %v10825_v44  ;;  %v10863_v6 = vld [vmem:[%s15918_s3 + $0xb18] ss:$20 sps:$4 sm:$0xff]   ;;  %v10865_v44 = vld [vmem:[%s15918_s3 + $0xb20] ss:$20 sps:$4 sm:$0xff]  }
 0x37e   :  { %v6264_v51 = vpop.f32.mrb[119].mxu0  ;;  %6631 = vmatprep.subr.bf16.mxu0 %v10826_v14  ;;  %v14257_v23 = vld [vmem:[#allocation2 + $0x38] ss:$0 sps:$4 sm:$0xff]   ;;  %v10864_v13 = vld [vmem:[%s15918_s3 + $0x78c] ss:$20 sps:$4 sm:$0xff]  }
 0x37f   :  { %9818 = vmatpush3.bf16.msra.mxu1 %v10827_v50  ;;  %v10866_v51 = vld [vmem:[%s15918_s3 + $0x8d0] ss:$20 sps:$4 sm:$0xff]   ;;  %v10867_v14 = vld [vmem:[%s15918_s3 + $0x788] ss:$20 sps:$4 sm:$0xff]  }
 0x380   :  { %9819 = vmatprep.subr.bf16.mxu1 %v11287_v12  ;;  %v10868_v50 = vld [vmem:[%s15918_s3 + $0x7b4] ss:$20 sps:$4 sm:$0xff]  }
 0x381   :  { %6632 = vmatpush1.bf16.msra.mxu0 %v10828_v62  ;;  %v10869_v62 = vld [vmem:[%s15918_s3 + $0x790] ss:$20 sps:$4 sm:$0xff]  }
 0x382   :  { %6633 = vmatprep.subr.bf16.mxu0 %v10829_v16  ;;  %v10870_v16 = vld [vmem:[%s15918_s3 + $0x8f8] ss:$20 sps:$4 sm:$0xff]  }
 0x383   :  { %9820 = vmatpush3.bf16.msra.mxu1 %v10830_v17  ;;  %v10871_v17 = vld [vmem:[%s15918_s3 + $0x7b0] ss:$20 sps:$4 sm:$0xff]  }
 0x384   :  { %6644 = vmatprep.subr.bf16.mxu1 %v10831_v34  ;;  %v10872_v34 = vld [vmem:[%s15918_s3 + $0x7dc] ss:$20 sps:$4 sm:$0xff]  }
 0x385   :  { %6634 = vmatpush1.bf16.msra.mxu0 %v10832_v61  ;;  %v10873_v61 = vld [vmem:[%s15918_s3 + $0x7b8] ss:$20 sps:$4 sm:$0xff]  }
 0x386   :  { %9822 = vmatmul.mubr.bf16.vlgmr.msra.gmra.mrb[148].mxu1 %v10833_v20  ;;  %6726 = vmatprep.subr.bf16.mxu0 %v10834_v22  ;;  %v10874_v20 = vld [vmem:[%s15918_s3 + $0x920] ss:$20 sps:$4 sm:$0xff]   ;;  %v10875_v22 = vld [vmem:[%s15918_s3 + $0x7d8] ss:$20 sps:$4 sm:$0xff]  }
 0x387   :  { %6645 = vmatpush1.bf16.msra.mxu1 %v10835_v60  ;;  %6676 = vmatprep.mubr.bf16.mxu1 %v11286_v1  ;;  %v10876_v60 = vld [vmem:[%s15918_s3 + $0x804] ss:$20 sps:$4 sm:$0xff]  }
 0x388   :  { %6636 = vmatmul.mubr.bf16.vlgmr.msra.gmra.mrb[136].mxu0 %v14160_v32  ;;  %6646 = vmatprep.subr.bf16.mxu1 %v10836_v58  ;;  %v10877_v58 = vld [vmem:[%s15918_s3 + $0x7e0] ss:$20 sps:$4 sm:$0xff]  }
 0x389   :  { %6727 = vmatpush1.bf16.msra.mxu0 %v10837_v36  ;;  %6758 = vmatprep.mubr.bf16.mxu0 %v11286_v1  ;;  %v10878_v36 = vld [vmem:[%s15918_s3 + $0x948] ss:$20 sps:$4 sm:$0xff]  }
 0x38a   :  { %6728 = vmatprep.subr.bf16.mxu0 %v10838_v53  ;;  %v10879_v53 = vld [vmem:[%s15918_s3 + $0x800] ss:$20 sps:$4 sm:$0xff]  }
 0x38b   :  { %6647 = vmatpush1.bf16.msra.mxu1 %v10839_v21  ;;  %v10880_v21 = vld [vmem:[%s15918_s3 + $0x82c] ss:$20 sps:$4 sm:$0xff]  }
 0x38c   :  { %6648 = vmatprep.subr.bf16.mxu1 %v10840_v19  ;;  %v10881_v19 = vld [vmem:[%s15918_s3 + $0x808] ss:$20 sps:$4 sm:$0xff]  }
 0x38d   :  { %6729 = vmatpush1.bf16.msra.mxu0 %v10841_v25  ;;  %v10882_v25 = vld [vmem:[%s15918_s3 + $0x970] ss:$20 sps:$4 sm:$0xff]  }
 0x38e   :  { %6730 = vmatprep.subr.bf16.mxu0 %v10842_v37  ;;  %v10883_v37 = vld [vmem:[%s15918_s3 + $0x828] ss:$20 sps:$4 sm:$0xff]  }
 0x38f   :  { %6649 = vmatpush1.bf16.msra.mxu1 %v10843_v52  ;;  %v10884_v52 = vld [vmem:[%s15918_s3 + $0x854] ss:$20 sps:$4 sm:$0xff]  }
 0x390   :  { %6650 = vmatprep.subr.bf16.mxu1 %v10844_v28 }
 0x391   :  { %6731 = vmatpush1.bf16.msra.mxu0 %v10845_v29  ;;  %v10885_v29 = vld [vmem:[%s15918_s3 + $0x830] ss:$20 sps:$4 sm:$0xff]  }
 0x392   :  { %6732 = vmatprep.subr.bf16.mxu0 %v10846_v18 }
 0x393   :  { %6651 = vmatpush1.bf16.msra.mxu1 %v10847_v49 }
 0x394   :  { %6652 = vmatprep.subr.bf16.mxu1 %v10848_v26  ;;  %v10886_v26 = vld [vmem:[%s15918_s3 + $0x998] ss:$20 sps:$4 sm:$0xff]  }
 0x395   :  { %6733 = vmatpush1.bf16.msra.mxu0 %v10849_v3 }
 0x396   :  { %6734 = vmatprep.subr.bf16.mxu0 %v10850_v8 }
 0x397   :  { %6653 = vmatpush1.bf16.msra.mxu1 %v10851_v43  ;;  %v10887_v43 = vld [vmem:[%s15918_s3 + $0x850] ss:$20 sps:$4 sm:$0xff]  }
 0x398   :  { %6654 = vmatprep.subr.bf16.mxu1 %v10852_v15 }
 0x399   :  { %6735 = vmatpush1.bf16.msra.mxu0 %v10853_v56  ;;  %v10889_v56 = vld [vmem:[%s15918_s3 + $0x858] ss:$20 sps:$4 sm:$0xff]  }
 0x39a   :  { %6736 = vmatprep.subr.bf16.mxu0 %v10854_v57  ;;  %v10891_v57 = vld [vmem:[%s15918_s3 + $0x878] ss:$20 sps:$4 sm:$0xff]  }
 0x39b   :  { %v9334_v11 = vpop.f32.mrb[120].mxu0  ;;  %6655 = vmatpush1.bf16.msra.mxu1 %v10855_v46  ;;  %v10893_v46 = vld [vmem:[%s15918_s3 + $0x880] ss:$20 sps:$4 sm:$0xff]  }
 0x39c   :  { %v9335_v48 = vpop.f32.mrb[121].mxu0  ;;  %6656 = vmatprep.subr.bf16.mxu1 %v10856_v31  ;;  %v10895_v31 = vld [vmem:[%s15918_s3 + $0x8a0] ss:$20 sps:$4 sm:$0xff]  }
 0x39d   :  { %v14234_v38 = vadd.f32 %v9335_v48, %v9334_v11  ;;  %v9337_v39 = vpop.f32.mrb[122].mxu0  ;;  %6737 = vmatpush1.bf16.msra.mxu0 %v10857_v55  ;;  %v10892_v11 = vld [vmem:[%s15918_s3 + $0x8a4] ss:$20 sps:$4 sm:$0xff]   ;;  %v10894_v48 = vld [vmem:[%s15918_s3 + $0x9e8] ss:$20 sps:$4 sm:$0xff]  }
 0x39e   :  { %v9338_v42 = vpop.f32.mrb[123].mxu0  ;;  %6738 = vmatprep.subr.bf16.mxu0 %v10858_v45  ;;  %v10896_v39 = vld [vmem:[%s15918_s3 + $0x8cc] ss:$20 sps:$4 sm:$0xff]   ;;  %v10898_v45 = vld [vmem:[%s15918_s3 + $0x3c4] ss:$20 sps:$4 sm:$0xff]  }
 0x39f   :  { %6657 = vmatpush1.bf16.msra.mxu1 %v10859_v47  ;;  %v14368_v55 = vld [vmem:[#allocation2 + $0x3c] sm:$0xff] }
 0x3a0   :  { %6658 = vmatprep.subr.bf16.mxu1 %v10860_v59  ;;  %v10897_v42 = vld [vmem:[%s15918_s3 + $0x8a8] ss:$20 sps:$4 sm:$0xff]   ;;  %v14381_v59 = vcombine.high %v14368_v55, %v14368_v55 }
 0x3a1   :  { %6739 = vmatpush1.bf16.msra.mxu0 %v10861_v63  ;;  %v10899_v47 = vld [vmem:[%s15918_s3 + $0x8c8] ss:$20 sps:$4 sm:$0xff]  }
 0x3a2   :  { %6740 = vmatprep.subr.bf16.mxu0 %v10862_v2  ;;  %v10900_v63 = vld [vmem:[%s15918_s3 + $0x8f4] ss:$20 sps:$4 sm:$0xff]  }
 0x3a3   :  { %6659 = vmatpush1.bf16.msra.mxu1 %v10863_v6  ;;  %v10901_v2 = vld [vmem:[%s15918_s3 + $0x3c0] ss:$20 sps:$4 sm:$0xff]  }
 0x3a4   :  { %6685 = vmatprep.subr.bf16.mxu1 %v10864_v13  ;;  %v10902_v6 = vld [vmem:[%s15918_s3 + $0x3ec] ss:$20 sps:$4 sm:$0xff]   ;;  %v10903_v13 = vld [vmem:[%s15918_s3 + $0x8f0] ss:$20 sps:$4 sm:$0xff]  }
 0x3a5   :  { %6741 = vmatpush1.bf16.msra.mxu0 %v10865_v44  ;;  %v10904_v44 = vld [vmem:[%s15918_s3 + $0x91c] ss:$20 sps:$4 sm:$0xff]  }
 0x3a6   :  { %6677 = vmatmul.mubr.bf16.vlgmr.msra.gmra.mrb[152].mxu1 %v14257_v23  ;;  %9380 = vmatprep.subr.bf16.mxu0 %v10866_v51  ;;  %v10905_v51 = vld [vmem:[%s15918_s3 + $0x3e8] ss:$20 sps:$4 sm:$0xff]  }
 0x3a7   :  { %6686 = vmatpush1.bf16.msra.mxu1 %v10867_v14  ;;  %6717 = vmatprep.mubr.bf16.mxu1 %v13963_v41  ;;  %v10906_v14 = vld [vmem:[%s15918_s3 + $0x414] ss:$20 sps:$4 sm:$0xff]  }
 0x3a8   :  { %6759 = vmatmul.mubr.bf16.vlgmr.msra.gmra.mrb[140].mxu0 %v14257_v23  ;;  %6687 = vmatprep.subr.bf16.mxu1 %v10868_v50  ;;  %v10907_v50 = vld [vmem:[%s15918_s3 + $0x918] ss:$20 sps:$4 sm:$0xff]  }
 0x3a9   :  { %9381 = vmatpush3.bf16.msra.mxu0 %v10869_v62  ;;  %6799 = vmatprep.mubr.bf16.mxu0 %v13963_v41  ;;  %v10908_v62 = vld [vmem:[%s15918_s3 + $0x944] ss:$20 sps:$4 sm:$0xff]  }
 0x3aa   :  { %9382 = vmatprep.subr.bf16.mxu0 %v10870_v16  ;;  %v10909_v16 = vld [vmem:[%s15918_s3 + $0x410] ss:$20 sps:$4 sm:$0xff]  }
 0x3ab   :  { %6688 = vmatpush1.bf16.msra.mxu1 %v10871_v17  ;;  %v10910_v17 = vld [vmem:[%s15918_s3 + $0x43c] ss:$20 sps:$4 sm:$0xff]  }
 0x3ac   :  { %6689 = vmatprep.subr.bf16.mxu1 %v10872_v34  ;;  %v10911_v34 = vld [vmem:[%s15918_s3 + $0x940] ss:$20 sps:$4 sm:$0xff]  }
 0x3ad   :  { %9383 = vmatpush3.bf16.msra.mxu0 %v10873_v61  ;;  %v10912_v61 = vld [vmem:[%s15918_s3 + $0x96c] ss:$20 sps:$4 sm:$0xff]  }
 0x3ae   :  { %9384 = vmatprep.subr.bf16.mxu0 %v10874_v20  ;;  %v10913_v20 = vld [vmem:[%s15918_s3 + $0x438] ss:$20 sps:$4 sm:$0xff]  }
 0x3af   :  { %6690 = vmatpush1.bf16.msra.mxu1 %v10875_v22  ;;  %v10914_v22 = vld [vmem:[%s15918_s3 + $0x464] ss:$20 sps:$4 sm:$0xff]  }
 0x3b0   :  { %6691 = vmatprep.subr.bf16.mxu1 %v10876_v60  ;;  %v10915_v60 = vld [vmem:[%s15918_s3 + $0x968] ss:$20 sps:$4 sm:$0xff]  }
 0x3b1   :  { %9385 = vmatpush3.bf16.msra.mxu0 %v10877_v58  ;;  %v10916_v58 = vld [vmem:[%s15918_s3 + $0x994] ss:$20 sps:$4 sm:$0xff]  }
 0x3b2   :  { %9386 = vmatprep.subr.bf16.mxu0 %v10878_v36 }
 0x3b3   :  { %6692 = vmatpush1.bf16.msra.mxu1 %v10879_v53  ;;  %v10917_v53 = vld [vmem:[%s15918_s3 + $0x460] ss:$20 sps:$4 sm:$0xff]  }
 0x3b4   :  { %6693 = vmatprep.subr.bf16.mxu1 %v10880_v21 }
 0x3b5   :  { %9387 = vmatpush3.bf16.msra.mxu0 %v10881_v19 }
 0x3b6   :  { %9388 = vmatprep.subr.bf16.mxu0 %v10882_v25  ;;  %v10918_v25 = vld [vmem:[%s15918_s3 + $0x48c] ss:$20 sps:$4 sm:$0xff]  }
 0x3b7   :  { %6694 = vmatpush1.bf16.msra.mxu1 %v10883_v37 }
 0x3b8   :  { %6695 = vmatprep.subr.bf16.mxu1 %v10884_v52 }
 0x3b9   :  { %v6218_v28 = vpop.f32.mrb[132].mxu1  ;;  %9389 = vmatpush3.bf16.msra.mxu0 %v10885_v29 }
 0x3ba   :  { %v14330_v18 = vadd.f32 %v14125_v7, %v6218_v28  ;;  %v6220_v49 = vpop.f32.mrb[133].mxu1  ;;  %9390 = vmatprep.subr.bf16.mxu0 %v10886_v26  ;;  %v10888_v7 = vld [vmem:[%s15918_s3 + $0x87c] ss:$20 sps:$4 sm:$0xff]  }
 0x3bb   :  { %v14336_v3 = vadd.f32 %v14130_v40, %v6220_v49  ;;  %v6222_v8 = vpop.f32.mrb[134].mxu1  ;;  %6696 = vmatpush1.bf16.msra.mxu1 %v10887_v43  ;;  %v10890_v40 = vld [vmem:[%s15918_s3 + $0x9c0] ss:$20 sps:$4 sm:$0xff]   ;;  %v10919_v28 = vld [vmem:[%s15918_s3 + $0x990] ss:$20 sps:$4 sm:$0xff]  }
 0x3bc   :  { %v6223_v15 = vpop.f32.mrb[135].mxu1  ;;  %6697 = vmatprep.subr.bf16.mxu1 %v10888_v7 }
 0x3bd   :  { %9391 = vmatpush3.bf16.msra.mxu0 %v10889_v56  ;;  %v10921_v15 = vld [vmem:[%s15918_s3 + $0x488] ss:$20 sps:$4 sm:$0xff]   ;;  %v10923_v56 = vld [vmem:[%s15918_s3 + $0x9b8] ss:$20 sps:$4 sm:$0xff]  }
 0x3be   :  { %9392 = vmatprep.subr.bf16.mxu0 %v10890_v40  ;;  %v10925_v40 = vld [vmem:[%s15918_s3 + $0x4b0] ss:$20 sps:$4 sm:$0xff]  }
 0x3bf   :  { %6698 = vmatpush1.bf16.msra.mxu1 %v10891_v57  ;;  %v10926_v57 = vld [vmem:[%s15918_s3 + $0x4dc] ss:$20 sps:$4 sm:$0xff]  }
 0x3c0   :  { %6699 = vmatprep.subr.bf16.mxu1 %v10892_v11  ;;  %v10927_v11 = vld [vmem:[%s15918_s3 + $0x9e0] ss:$20 sps:$4 sm:$0xff]  }
 0x3c1   :  { %9393 = vmatpush3.bf16.msra.mxu0 %v10893_v46  ;;  %v10928_v46 = vld [vmem:[%s15918_s3 + $0x4d8] ss:$20 sps:$4 sm:$0xff]  }
 0x3c2   :  { %9394 = vmatprep.subr.bf16.mxu0 %v10894_v48  ;;  %v10929_v48 = vld [vmem:[%s15918_s3 + $0x504] ss:$20 sps:$4 sm:$0xff]  }
 0x3c3   :  { %6700 = vmatpush1.bf16.msra.mxu1 %v10895_v31  ;;  %v10930_v31 = vld [vmem:[%s15918_s3 + $0xa10] ss:$20 sps:$4 sm:$0xff]  }
 0x3c4   :  { %6701 = vmatprep.subr.bf16.mxu1 %v10896_v39  ;;  %v10931_v39 = vld [vmem:[%s15918_s3 + $0x500] ss:$20 sps:$4 sm:$0xff]  }
 0x3c5   :  { %9395 = vmatpush3.bf16.msra.mxu0 %v10897_v42  ;;  %v10932_v42 = vld [vmem:[%s15918_s3 + $0x52c] ss:$20 sps:$4 sm:$0xff]  }
 0x3c6   :  { %6880 = vmatprep.subr.bf16.mxu0 %v10898_v45  ;;  %v10933_v45 = vld [vmem:[%s15918_s3 + $0xa38] ss:$20 sps:$4 sm:$0xff]  }
 0x3c7   :  { %6702 = vmatpush1.bf16.msra.mxu1 %v10899_v47  ;;  %v10934_v47 = vld [vmem:[%s15918_s3 + $0x528] ss:$20 sps:$4 sm:$0xff]  }
 0x3c8   :  { %6800 = vmatmul.mubr.bf16.vlgmr.msra.gmra.mrb[144].mxu0 %v14160_v32  ;;  %6703 = vmatprep.subr.bf16.mxu1 %v10900_v63  ;;  %v10935_v63 = vld [vmem:[%s15918_s3 + $0x554] ss:$20 sps:$4 sm:$0xff]  }
 0x3c9   :  { %6881 = vmatpush1.bf16.msra.mxu0 %v10901_v2  ;;  %6912 = vmatprep.mubr.bf16.mxu0 %v14381_v59  ;;  %v10936_v2 = vld [vmem:[%s15918_s3 + $0xa60] ss:$20 sps:$4 sm:$0xff]  }
 0x3ca   :  { %6882 = vmatprep.subr.bf16.mxu0 %v10902_v6  ;;  %v10937_v6 = vld [vmem:[%s15918_s3 + $0x550] ss:$20 sps:$4 sm:$0xff]  }
 0x3cb   :  { %6704 = vmatpush1.bf16.msra.mxu1 %v10903_v13  ;;  %v10938_v13 = vld [vmem:[%s15918_s3 + $0x57c] ss:$20 sps:$4 sm:$0xff]  }
 0x3cc   :  { %6705 = vmatprep.subr.bf16.mxu1 %v10904_v44  ;;  %v10939_v44 = vld [vmem:[%s15918_s3 + $0xa88] ss:$20 sps:$4 sm:$0xff]  }
 0x3cd   :  { %6883 = vmatpush1.bf16.msra.mxu0 %v10905_v51  ;;  %v10940_v51 = vld [vmem:[%s15918_s3 + $0x578] ss:$20 sps:$4 sm:$0xff]  }
 0x3ce   :  { %6884 = vmatprep.subr.bf16.mxu0 %v10906_v14  ;;  %v10941_v14 = vld [vmem:[%s15918_s3 + $0x5a4] ss:$20 sps:$4 sm:$0xff]  }
 0x3cf   :  { %6706 = vmatpush1.bf16.msra.mxu1 %v10907_v50  ;;  %v10942_v50 = vld [vmem:[%s15918_s3 + $0xab0] ss:$20 sps:$4 sm:$0xff]  }
 0x3d0   :  { %6707 = vmatprep.subr.bf16.mxu1 %v10908_v62 }
 0x3d1   :  { %6885 = vmatpush1.bf16.msra.mxu0 %v10909_v16  ;;  %v10943_v16 = vld [vmem:[%s15918_s3 + $0x5a0] ss:$20 sps:$4 sm:$0xff]  }
 0x3d2   :  { %6886 = vmatprep.subr.bf16.mxu0 %v10910_v17 }
 0x3d3   :  { %6708 = vmatpush1.bf16.msra.mxu1 %v10911_v34 }
 0x3d4   :  { %6709 = vmatprep.subr.bf16.mxu1 %v10912_v61  ;;  %v10944_v61 = vld [vmem:[%s15918_s3 + $0x5cc] ss:$20 sps:$4 sm:$0xff]  }
 0x3d5   :  { %6887 = vmatpush1.bf16.msra.mxu0 %v10913_v20 }
 0x3d6   :  { %6888 = vmatprep.subr.bf16.mxu0 %v10914_v22 }
 0x3d7   :  { %6710 = vmatpush1.bf16.msra.mxu1 %v10915_v60 }
 0x3d8   :  { %6711 = vmatprep.subr.bf16.mxu1 %v10916_v58  ;;  %v10945_v58 = vld [vmem:[%s15918_s3 + $0xad8] ss:$20 sps:$4 sm:$0xff]  }
 0x3d9   :  { %v6340_v36 = vpop.f32.mrb[136].mxu1  ;;  %6889 = vmatpush1.bf16.msra.mxu0 %v10917_v53 }
 0x3da   :  { %v14440_v21 = vadd.f32 %v14234_v38, %v6340_v36  ;;  %v9803_v19 = vpop.f32.mrb[137].mxu1  ;;  %6890 = vmatprep.subr.bf16.mxu0 %v10918_v25  ;;  %v10920_v38 = vld [vmem:[%s15918_s3 + $0x9bc] ss:$20 sps:$4 sm:$0xff]  }
 0x3db   :  { %v6343_v37 = vpop.f32.mrb[138].mxu1  ;;  %v6380_v52 = vpop.f32.mrb[124].mxu0  ;;  %6712 = vmatpush1.bf16.msra.mxu1 %v10919_v28  ;;  %v10946_v25 = vld [vmem:[%s15918_s3 + $0x5c8] ss:$20 sps:$4 sm:$0xff]   ;;  %v10948_v28 = vld [vmem:[%s15918_s3 + $0xb00] ss:$20 sps:$4 sm:$0xff]  }
 0x3dc   :  { %v14449_v29 = vadd.f32 %v6380_v52, %v14117_v9  ;;  %v9804_v49 = vpop.f32.mrb[139].mxu1  ;;  %v6382_v26 = vpop.f32.mrb[125].mxu0  ;;  %6713 = vmatprep.subr.bf16.mxu1 %v10920_v38  ;;  %v10922_v9 = vld [vmem:[%s15918_s3 + $0x4b4] ss:$20 sps:$4 sm:$0xff]   ;;  %v10952_v38 = vld [vmem:[%s15918_s3 + $0x644] ss:$20 sps:$4 sm:$0xff]  }
 0x3dd   :  { %v6383_v8 = vadd.f32 %v6382_v26, %v14123_v0  ;;  %v6384_v43 = vpop.f32.mrb[126].mxu0  ;;  %6891 = vmatpush1.bf16.msra.mxu0 %v10921_v15  ;;  %v10924_v0 = vld [vmem:[%s15918_s3 + $0x9e4] ss:$20 sps:$4 sm:$0xff]   ;;  %v10947_v52 = vld [vmem:[%s15918_s3 + $0x5f4] ss:$20 sps:$4 sm:$0xff]  }
 0x3de   :  { %v6385_v7 = vpop.f32.mrb[127].mxu0  ;;  %6892 = vmatprep.subr.bf16.mxu0 %v10922_v9  ;;  %v10950_v49 = vld [vmem:[%s15918_s3 + $0x61c] ss:$20 sps:$4 sm:$0xff]   ;;  %v14576_v43 = vcombine.low %v14368_v55, %v14368_v55  ;;  %v10954_v15 = vld [vmem:[%s15918_s3 + $0x64c] ss:$20 sps:$4 sm:$0xff]  }
 0x3df   :  { %6714 = vmatpush1.bf16.msra.mxu1 %v10923_v56  ;;  %v10951_v26 = vld [vmem:[%s15918_s3 + $0xb28] ss:$20 sps:$4 sm:$0xff]   ;;  %v10955_v7 = vld [vmem:[%s15918_s3 + $0x640] ss:$20 sps:$4 sm:$0xff]  }
 0x3e0   :  { %6715 = vmatprep.subr.bf16.mxu1 %v10924_v0  ;;  %v10956_v55 = vld [vmem:[%s15918_s3 + $0x66c] ss:$20 sps:$4 sm:$0xff]   ;;  %v10957_v9 = vld [vmem:[%s15918_s3 + $0x648] ss:$20 sps:$4 sm:$0xff]  }
 0x3e1   :  { %6893 = vmatpush1.bf16.msra.mxu0 %v10925_v40  ;;  %v10958_v56 = vld [vmem:[%s15918_s3 + $0x674] ss:$20 sps:$4 sm:$0xff]  }
 0x3e2   :  { %6894 = vmatprep.subr.bf16.mxu0 %v10926_v57  ;;  %v10959_v0 = vld [vmem:[%s15918_s3 + $0x668] ss:$20 sps:$4 sm:$0xff]   ;;  %v10961_v57 = vld [vmem:[%s15918_s3 + $0x670] ss:$20 sps:$4 sm:$0xff]  }
 0x3e3   :  { %6716 = vmatpush1.bf16.msra.mxu1 %v10927_v11  ;;  %v10960_v40 = vld [vmem:[%s15918_s3 + $0x694] ss:$20 sps:$4 sm:$0xff]   ;;  %v10962_v11 = vld [vmem:[%s15918_s3 + $0x69c] ss:$20 sps:$4 sm:$0xff]  }
 0x3e4   :  { %9825 = vmatprep.subr.bf16.mxu1 %v11287_v12 }
 0x3e5   :  { %6895 = vmatpush1.bf16.msra.mxu0 %v10928_v46  ;;  %v10963_v46 = vld [vmem:[%s15918_s3 + $0x690] ss:$20 sps:$4 sm:$0xff]  }
 0x3e6   :  { %6718 = vmatmul.mubr.bf16.vlgmr.msra.gmra.mrb[156].mxu1 %v14160_v32  ;;  %6896 = vmatprep.subr.bf16.mxu0 %v10929_v48  ;;  %v10964_v48 = vld [vmem:[%s15918_s3 + $0x6bc] ss:$20 sps:$4 sm:$0xff]  }
 0x3e7   :  { %9826 = vmatpush3.bf16.msra.mxu1 %v10930_v31  ;;  %9841 = vmatprep.mubr.msk.bf16.mxu1 %vm11288_vm1, %v11287_v12  ;;  %v10965_v31 = vld [vmem:[%s15918_s3 + $0x698] ss:$20 sps:$4 sm:$0xff]  }
 0x3e8   :  { %9827 = vmatprep.subr.bf16.mxu1 %v11287_v12 }
 0x3e9   :  { %6897 = vmatpush1.bf16.msra.mxu0 %v10931_v39  ;;  %v10966_v39 = vld [vmem:[%s15918_s3 + $0x6c4] ss:$20 sps:$4 sm:$0xff]  }
 0x3ea   :  { %6898 = vmatprep.subr.bf16.mxu0 %v10932_v42  ;;  %v10967_v42 = vld [vmem:[%s15918_s3 + $0x6b8] ss:$20 sps:$4 sm:$0xff]  }
 0x3eb   :  { %9828 = vmatpush3.bf16.msra.mxu1 %v10933_v45  ;;  %v10968_v45 = vld [vmem:[%s15918_s3 + $0x6e4] ss:$20 sps:$4 sm:$0xff]  }
 0x3ec   :  { %9829 = vmatprep.subr.bf16.mxu1 %v11287_v12 }
 0x3ed   :  { %6899 = vmatpush1.bf16.msra.mxu0 %v10934_v47  ;;  %v10969_v47 = vld [vmem:[%s15918_s3 + $0x6c0] ss:$20 sps:$4 sm:$0xff]  }
 0x3ee   :  { %6900 = vmatprep.subr.bf16.mxu0 %v10935_v63  ;;  %v10970_v63 = vld [vmem:[%s15918_s3 + $0x6ec] ss:$20 sps:$4 sm:$0xff]  }
 0x3ef   :  { %9830 = vmatpush3.bf16.msra.mxu1 %v10936_v2  ;;  %v10971_v2 = vld [vmem:[%s15918_s3 + $0x6e0] ss:$20 sps:$4 sm:$0xff]  }
 0x3f0   :  { %9831 = vmatprep.subr.bf16.mxu1 %v11287_v12 }
 0x3f1   :  { %6901 = vmatpush1.bf16.msra.mxu0 %v10937_v6  ;;  %v10972_v6 = vld [vmem:[%s15918_s3 + $0x70c] ss:$20 sps:$4 sm:$0xff]  }
 0x3f2   :  { %6902 = vmatprep.subr.bf16.mxu0 %v10938_v13  ;;  %v10973_v13 = vld [vmem:[%s15918_s3 + $0x6e8] ss:$20 sps:$4 sm:$0xff]  }
 0x3f3   :  { %9832 = vmatpush3.bf16.msra.mxu1 %v10939_v44  ;;  %v10974_v44 = vld [vmem:[%s15918_s3 + $0x714] ss:$20 sps:$4 sm:$0xff]  }
 0x3f4   :  { %9833 = vmatprep.subr.bf16.mxu1 %v11287_v12 }
 0x3f5   :  { %6903 = vmatpush1.bf16.msra.mxu0 %v10940_v51 }
 0x3f6   :  { %6904 = vmatprep.subr.bf16.mxu0 %v10941_v14  ;;  %v10975_v14 = vld [vmem:[%s15918_s3 + $0x708] ss:$20 sps:$4 sm:$0xff]  }
 0x3f7   :  { %9834 = vmatpush3.bf16.msra.mxu1 %v10942_v50 }
 0x3f8   :  { %9835 = vmatprep.subr.bf16.mxu1 %v11287_v12 }
 0x3f9   :  { %v6421_v62 = vpop.f32.mrb[140].mxu1  ;;  %6905 = vmatpush1.bf16.msra.mxu0 %v10943_v16 }
 0x3fa   :  { %v14534_v17 = vadd.f32 %v6421_v62, %v14449_v29  ;;  %v6423_v34 = vpop.f32.mrb[141].mxu1  ;;  %6906 = vmatprep.subr.bf16.mxu0 %v10944_v61  ;;  %v10949_v29 = vld [vmem:[%s15918_s3 + $0x5f0] ss:$20 sps:$4 sm:$0xff]   ;;  %v10976_v62 = vld [vmem:[%s15918_s3 + $0x734] ss:$20 sps:$4 sm:$0xff]  }
 0x3fb   :  { %v14539_v20 = vadd.f32 %v6423_v34, %v6383_v8  ;;  %v6425_v22 = vpop.f32.mrb[142].mxu1  ;;  %v14541_v60 = vpop.f32.mrb[128].mxu0  ;;  %9836 = vmatpush3.bf16.msra.mxu1 %v10945_v58  ;;  %v10953_v8 = vld [vmem:[%s15918_s3 + $0x618] ss:$20 sps:$4 sm:$0xff]   ;;  %v10977_v61 = vld [vmem:[%s15918_s3 + $0x710] ss:$20 sps:$4 sm:$0xff]  }
 0x3fc   :  { %v6426_v36 = vpop.f32.mrb[143].mxu1  ;;  %v14546_v53 = vpop.f32.mrb[129].mxu0  ;;  %9837 = vmatprep.subr.bf16.mxu1 %v11287_v12  ;;  %v10978_v58 = vld [vmem:[%s15918_s3 + $0x73c] ss:$20 sps:$4 sm:$0xff]  }
 0x3fd   :  { %v6507_v19 = vpop.f32.mrb[130].mxu0  ;;  %6907 = vmatpush1.bf16.msra.mxu0 %v10946_v25  ;;  %v10979_v36 = vld [vmem:[%s15918_s3 + $0x730] ss:$20 sps:$4 sm:$0xff]  }
 0x3fe   :  { %v6508_v37 = vpop.f32.mrb[131].mxu0  ;;  %6908 = vmatprep.subr.bf16.mxu0 %v10947_v52  ;;  %v10980_v25 = vld [vmem:[%s15918_s3 + $0x75c] ss:$20 sps:$4 sm:$0xff]   ;;  %v10982_v52 = vld [vmem:[%s15918_s3 + $0x764] ss:$20 sps:$4 sm:$0xff]  }
 0x3ff   :  { %9838 = vmatpush3.bf16.msra.mxu1 %v10948_v28  ;;  %v10981_v37 = vld [vmem:[%s15918_s3 + $0x738] ss:$20 sps:$4 sm:$0xff]   ;;  %v14675_v28 = vld [vmem:[#allocation2 + $0x44] ss:$0 sps:$4 sm:$0xff]  }
 0x400   :  { %9839 = vmatprep.subr.bf16.mxu1 %v11287_v12 }
 0x401   :  { %6909 = vmatpush1.bf16.msra.mxu0 %v10949_v29  ;;  %v10984_v29 = vld [vmem:[%s15918_s3 + $0x3cc] ss:$20 sps:$4 sm:$0xff]  }
 0x402   :  { %6910 = vmatprep.subr.bf16.mxu0 %v10950_v49  ;;  %v10985_v49 = vld [vmem:[%s15918_s3 + $0x760] ss:$20 sps:$4 sm:$0xff]  }
 0x403   :  { %9840 = vmatpush3.bf16.msra.mxu1 %v10951_v26  ;;  %v10986_v26 = vld [vmem:[%s15918_s3 + $0x510] ss:$20 sps:$4 sm:$0xff]  }
 0x404   :  { %6921 = vmatprep.subr.bf16.mxu1 %v10952_v38  ;;  %v10987_v38 = vld [vmem:[%s15918_s3 + $0x3c8] ss:$20 sps:$4 sm:$0xff]  }
 0x405   :  { %6911 = vmatpush1.bf16.msra.mxu0 %v10953_v8  ;;  %v10988_v8 = vld [vmem:[%s15918_s3 + $0x3f4] ss:$20 sps:$4 sm:$0xff]  }
 0x406   :  { %9842 = vmatmul.mubr.bf16.vlgmr.msra.gmra.mrb[160].mxu1 %v14257_v23  ;;  %7003 = vmatprep.subr.bf16.mxu0 %v10954_v15  ;;  %v10989_v15 = vld [vmem:[%s15918_s3 + $0x3d0] ss:$20 sps:$4 sm:$0xff]  }
 0x407   :  { %6922 = vmatpush1.bf16.msra.mxu1 %v10955_v7  ;;  %6953 = vmatprep.mubr.bf16.mxu1 %v11286_v1  ;;  %v10990_v7 = vld [vmem:[%s15918_s3 + $0x538] ss:$20 sps:$4 sm:$0xff]  }
 0x408   :  { %6913 = vmatmul.mubr.bf16.vlgmr.msra.gmra.mrb[148].mxu0 %v14576_v43  ;;  %6923 = vmatprep.subr.bf16.mxu1 %v10956_v55  ;;  %v10991_v55 = vld [vmem:[%s15918_s3 + $0x3f0] ss:$20 sps:$4 sm:$0xff]  }
 0x409   :  { %7004 = vmatpush1.bf16.msra.mxu0 %v10957_v9  ;;  %7035 = vmatprep.mubr.bf16.mxu0 %v11286_v1  ;;  %v10992_v9 = vld [vmem:[%s15918_s3 + $0x41c] ss:$20 sps:$4 sm:$0xff]  }
 0x40a   :  { %7005 = vmatprep.subr.bf16.mxu0 %v10958_v56  ;;  %v10993_v56 = vld [vmem:[%s15918_s3 + $0x3f8] ss:$20 sps:$4 sm:$0xff]  }
 0x40b   :  { %6924 = vmatpush1.bf16.msra.mxu1 %v10959_v0  ;;  %v10995_v0 = vld [vmem:[%s15918_s3 + $0x418] ss:$20 sps:$4 sm:$0xff]  }
 0x40c   :  { %6925 = vmatprep.subr.bf16.mxu1 %v10960_v40  ;;  %v10996_v40 = vld [vmem:[%s15918_s3 + $0x444] ss:$20 sps:$4 sm:$0xff]  }
 0x40d   :  { %7006 = vmatpush1.bf16.msra.mxu0 %v10961_v57  ;;  %v10997_v57 = vld [vmem:[%s15918_s3 + $0x420] ss:$20 sps:$4 sm:$0xff]  }
 0x40e   :  { %7007 = vmatprep.subr.bf16.mxu0 %v10962_v11  ;;  %v10998_v11 = vld [vmem:[%s15918_s3 + $0x588] ss:$20 sps:$4 sm:$0xff]  }
 0x40f   :  { %6926 = vmatpush1.bf16.msra.mxu1 %v10963_v46  ;;  %v10999_v46 = vld [vmem:[%s15918_s3 + $0x440] ss:$20 sps:$4 sm:$0xff]  }
 0x410   :  { %6927 = vmatprep.subr.bf16.mxu1 %v10964_v48  ;;  %v11000_v48 = vld [vmem:[%s15918_s3 + $0x46c] ss:$20 sps:$4 sm:$0xff]  }
 0x411   :  { %7008 = vmatpush1.bf16.msra.mxu0 %v10965_v31  ;;  %v11001_v31 = vld [vmem:[%s15918_s3 + $0x448] ss:$20 sps:$4 sm:$0xff]  }
 0x412   :  { %7009 = vmatprep.subr.bf16.mxu0 %v10966_v39  ;;  %v11002_v39 = vld [vmem:[%s15918_s3 + $0x5b0] ss:$20 sps:$4 sm:$0xff]  }
 0x413   :  { %6928 = vmatpush1.bf16.msra.mxu1 %v10967_v42  ;;  %v11003_v42 = vld [vmem:[%s15918_s3 + $0x468] ss:$20 sps:$4 sm:$0xff]  }
 0x414   :  { %6929 = vmatprep.subr.bf16.mxu1 %v10968_v45  ;;  %v11004_v45 = vld [vmem:[%s15918_s3 + $0x494] ss:$20 sps:$4 sm:$0xff]  }
 0x415   :  { %7010 = vmatpush1.bf16.msra.mxu0 %v10969_v47 }
 0x416   :  { %7011 = vmatprep.subr.bf16.mxu0 %v10970_v63  ;;  %v11005_v63 = vld [vmem:[%s15918_s3 + $0x470] ss:$20 sps:$4 sm:$0xff]  }
 0x417   :  { %6930 = vmatpush1.bf16.msra.mxu1 %v10971_v2 }
 0x418   :  { %6931 = vmatprep.subr.bf16.mxu1 %v10972_v6 }
 0x419   :  { %7012 = vmatpush1.bf16.msra.mxu0 %v10973_v13  ;;  %v11006_v13 = vld [vmem:[%s15918_s3 + $0x5d8] ss:$20 sps:$4 sm:$0xff]  }
 0x41a   :  { %7013 = vmatprep.subr.bf16.mxu0 %v10974_v44 }
 0x41b   :  { %v9365_v51 = vpop.f32.mrb[132].mxu0  ;;  %6932 = vmatpush1.bf16.msra.mxu1 %v10975_v14  ;;  %v11007_v14 = vld [vmem:[%s15918_s3 + $0x490] ss:$20 sps:$4 sm:$0xff]  }
 0x41c   :  { %v9366_v50 = vpop.f32.mrb[133].mxu0  ;;  %6933 = vmatprep.subr.bf16.mxu1 %v10976_v62 }
 0x41d   :  { %v9367_v16 = vadd.f32 %v9366_v50, %v9365_v51  ;;  %v9368_v34 = vpop.f32.mrb[134].mxu0  ;;  %7014 = vmatpush1.bf16.msra.mxu0 %v10977_v61  ;;  %v11013_v61 = vld [vmem:[%s15918_s3 + $0x4c0] ss:$20 sps:$4 sm:$0xff]  }
 0x41e   :  { %v9369_v22 = vpop.f32.mrb[135].mxu0  ;;  %7015 = vmatprep.subr.bf16.mxu0 %v10978_v58  ;;  %v11010_v34 = vld [vmem:[%s15918_s3 + $0x600] ss:$20 sps:$4 sm:$0xff]  }
 0x41f   :  { %6934 = vmatpush1.bf16.msra.mxu1 %v10979_v36  ;;  %v14661_v19 = vadd.f32 %v9367_v16, %v14440_v21  ;;  %v10983_v21 = vld [vmem:[%s15918_s3 + $0x758] ss:$20 sps:$4 sm:$0xff]   ;;  %v11014_v22 = vld [vmem:[%s15918_s3 + $0x628] ss:$20 sps:$4 sm:$0xff]   ;;  %v11015_v58 = vld [vmem:[%s15918_s3 + $0x4e0] ss:$20 sps:$4 sm:$0xff]  }
 0x420   :  { %6935 = vmatprep.subr.bf16.mxu1 %v10980_v25  ;;  %v11016_v36 = vld [vmem:[%s15918_s3 + $0x50c] ss:$20 sps:$4 sm:$0xff]   ;;  %v11017_v25 = vld [vmem:[%s15918_s3 + $0x4e8] ss:$20 sps:$4 sm:$0xff]  }
 0x421   :  { %7016 = vmatpush1.bf16.msra.mxu0 %v10981_v37  ;;  %v11018_v37 = vld [vmem:[%s15918_s3 + $0x4] ss:$20 sps:$4 sm:$0xff]  }
 0x422   :  { %7017 = vmatprep.subr.bf16.mxu0 %v10982_v52  ;;  %v11019_v52 = vld [vmem:[%s15918_s3 + $0x508] ss:$20 sps:$4 sm:$0xff]  }
 0x423   :  { %6936 = vmatpush1.bf16.msra.mxu1 %v10983_v21  ;;  %v11020_v21 = vld [vmem:[%s15918_s3 + $0x534] ss:$20 sps:$4 sm:$0xff]  }
 0x424   :  { %6962 = vmatprep.subr.bf16.mxu1 %v10984_v29  ;;  %v11021_v29 = vld [vmem:[%s15918_s3] ss:$20 sps:$4 sm:$0xff]  }
 0x425   :  { %7018 = vmatpush1.bf16.msra.mxu0 %v10985_v49  ;;  %v11022_v49 = vld [vmem:[%s15918_s3 + $0x2c] ss:$20 sps:$4 sm:$0xff]  }
 0x426   :  { %6954 = vmatmul.mubr.bf16.vlgmr.msra.gmra.mrb[164].mxu1 %v14675_v28  ;;  %9411 = vmatprep.subr.bf16.mxu0 %v10986_v26  ;;  %v11023_v26 = vld [vmem:[%s15918_s3 + $0x530] ss:$20 sps:$4 sm:$0xff]  }
 0x427   :  { %6963 = vmatpush1.bf16.msra.mxu1 %v10987_v38  ;;  %6994 = vmatprep.mubr.bf16.mxu1 %v14381_v59  ;;  %v11024_v38 = vld [vmem:[%s15918_s3 + $0x55c] ss:$20 sps:$4 sm:$0xff]  }
 0x428   :  { %7036 = vmatmul.mubr.bf16.vlgmr.msra.gmra.mrb[152].mxu0 %v14675_v28  ;;  %6964 = vmatprep.subr.bf16.mxu1 %v10988_v8  ;;  %v11025_v8 = vld [vmem:[%s15918_s3 + $0x28] ss:$20 sps:$4 sm:$0xff]  }
 0x429   :  { %9412 = vmatpush3.bf16.msra.mxu0 %v10989_v15  ;;  %7076 = vmatprep.mubr.bf16.mxu0 %v14381_v59  ;;  %v10994_v59 = vld [vmem:[%s15918_s3 + $0x560] ss:$20 sps:$4 sm:$0xff]  }
 0x42a   :  { %9413 = vmatprep.subr.bf16.mxu0 %v10990_v7  ;;  %v11026_v15 = vld [vmem:[%s15918_s3 + $0x54] ss:$20 sps:$4 sm:$0xff]   ;;  %v11027_v7 = vld [vmem:[%s15918_s3 + $0x558] ss:$20 sps:$4 sm:$0xff]  }
 0x42b   :  { %6965 = vmatpush1.bf16.msra.mxu1 %v10991_v55  ;;  %v11028_v55 = vld [vmem:[%s15918_s3 + $0x584] ss:$20 sps:$4 sm:$0xff]  }
 0x42c   :  { %6966 = vmatprep.subr.bf16.mxu1 %v10992_v9  ;;  %v11029_v9 = vld [vmem:[%s15918_s3 + $0x50] ss:$20 sps:$4 sm:$0xff]  }
 0x42d   :  { %9414 = vmatpush3.bf16.msra.mxu0 %v10993_v56  ;;  %v11030_v56 = vld [vmem:[%s15918_s3 + $0x7c] ss:$20 sps:$4 sm:$0xff]  }
 0x42e   :  { %9415 = vmatprep.subr.bf16.mxu0 %v10994_v59  ;;  %v11031_v59 = vld [vmem:[%s15918_s3 + $0x580] ss:$20 sps:$4 sm:$0xff]  }
 0x42f   :  { %6967 = vmatpush1.bf16.msra.mxu1 %v10995_v0  ;;  %v11032_v0 = vld [vmem:[%s15918_s3 + $0x5ac] ss:$20 sps:$4 sm:$0xff]  }
 0x430   :  { %6968 = vmatprep.subr.bf16.mxu1 %v10996_v40  ;;  %v11033_v40 = vld [vmem:[%s15918_s3 + $0x78] ss:$20 sps:$4 sm:$0xff]  }
 0x431   :  { %9416 = vmatpush3.bf16.msra.mxu0 %v10997_v57  ;;  %v11034_v57 = vld [vmem:[%s15918_s3 + $0xa4] ss:$20 sps:$4 sm:$0xff]  }
 0x432   :  { %9417 = vmatprep.subr.bf16.mxu0 %v10998_v11  ;;  %v11035_v11 = vld [vmem:[%s15918_s3 + $0x5a8] ss:$20 sps:$4 sm:$0xff]  }
 0x433   :  { %6969 = vmatpush1.bf16.msra.mxu1 %v10999_v46  ;;  %v11036_v46 = vld [vmem:[%s15918_s3 + $0x5d4] ss:$20 sps:$4 sm:$0xff]  }
 0x434   :  { %6970 = vmatprep.subr.bf16.mxu1 %v11000_v48 }
 0x435   :  { %9418 = vmatpush3.bf16.msra.mxu0 %v11001_v31  ;;  %v11037_v31 = vld [vmem:[%s15918_s3 + $0xa0] ss:$20 sps:$4 sm:$0xff]  }
 0x436   :  { %9419 = vmatprep.subr.bf16.mxu0 %v11002_v39 }
 0x437   :  { %6971 = vmatpush1.bf16.msra.mxu1 %v11003_v42 }
 0x438   :  { %6972 = vmatprep.subr.bf16.mxu1 %v11004_v45  ;;  %v11038_v45 = vld [vmem:[%s15918_s3 + $0xcc] ss:$20 sps:$4 sm:$0xff]  }
 0x439   :  { %v6462_v47 = vpop.f32.mrb[144].mxu1  ;;  %9420 = vmatpush3.bf16.msra.mxu0 %v11005_v63 }
 0x43a   :  { %v6463_v2 = vadd.f32 %v6462_v47, %v14330_v18  ;;  %v6464_v6 = vpop.f32.mrb[145].mxu1  ;;  %9421 = vmatprep.subr.bf16.mxu0 %v11006_v13  ;;  %v11008_v18 = vld [vmem:[%s15918_s3 + $0x4bc] ss:$20 sps:$4 sm:$0xff]  }
 0x43b   :  { %v6465_v44 = vadd.f32 %v6464_v6, %v14336_v3  ;;  %v6466_v51 = vpop.f32.mrb[146].mxu1  ;;  %6973 = vmatpush1.bf16.msra.mxu1 %v11007_v14  ;;  %v11009_v3 = vld [vmem:[%s15918_s3 + $0x498] ss:$20 sps:$4 sm:$0xff]  }
 0x43c   :  { %v14756_v50 = vadd.f32 %v14541_v60, %v6463_v2  ;;  %v6467_v62 = vpop.f32.mrb[147].mxu1  ;;  %6974 = vmatprep.subr.bf16.mxu1 %v11008_v18  ;;  %v11011_v60 = vld [vmem:[%s15918_s3 + $0x4b8] ss:$20 sps:$4 sm:$0xff]   ;;  %v11039_v2 = vld [vmem:[%s15918_s3 + $0x5d0] ss:$20 sps:$4 sm:$0xff]  }
 0x43d   :  { %v14762_v16 = vadd.f32 %v14546_v53, %v6465_v44  ;;  %9422 = vmatpush3.bf16.msra.mxu0 %v11009_v3  ;;  %v11012_v53 = vld [vmem:[%s15918_s3 + $0x4e4] ss:$20 sps:$4 sm:$0xff]   ;;  %v11041_v51 = vld [vmem:[%s15918_s3 + $0xc8] ss:$20 sps:$4 sm:$0xff]  }
 0x43e   :  { %9423 = vmatprep.subr.bf16.mxu0 %v11010_v34  ;;  %v11042_v62 = vld [vmem:[%s15918_s3 + $0xf4] ss:$20 sps:$4 sm:$0xff]   ;;  %v11043_v18 = vld [vmem:[%s15918_s3 + $0x5f8] ss:$20 sps:$4 sm:$0xff]   ;;  %v11045_v34 = vld [vmem:[%s15918_s3 + $0xf0] ss:$20 sps:$4 sm:$0xff]  }
 0x43f   :  { %6975 = vmatpush1.bf16.msra.mxu1 %v11011_v60  ;;  %v11044_v3 = vld [vmem:[%s15918_s3 + $0x624] ss:$20 sps:$4 sm:$0xff]   ;;  %v11046_v60 = vld [vmem:[%s15918_s3 + $0x11c] ss:$20 sps:$4 sm:$0xff]  }
 0x440   :  { %6976 = vmatprep.subr.bf16.mxu1 %v11012_v53  ;;  %v11047_v53 = vld [vmem:[%s15918_s3 + $0x620] ss:$20 sps:$4 sm:$0xff]  }
 0x441   :  { %9424 = vmatpush3.bf16.msra.mxu0 %v11013_v61  ;;  %v11048_v61 = vld [vmem:[%s15918_s3 + $0x118] ss:$20 sps:$4 sm:$0xff]  }
 0x442   :  { %9425 = vmatprep.subr.bf16.mxu0 %v11014_v22  ;;  %v11049_v22 = vld [vmem:[%s15918_s3 + $0x144] ss:$20 sps:$4 sm:$0xff]  }
 0x443   :  { %6977 = vmatpush1.bf16.msra.mxu1 %v11015_v58  ;;  %v11050_v58 = vld [vmem:[%s15918_s3 + $0x650] ss:$20 sps:$4 sm:$0xff]  }
 0x444   :  { %6978 = vmatprep.subr.bf16.mxu1 %v11016_v36  ;;  %v11051_v36 = vld [vmem:[%s15918_s3 + $0x140] ss:$20 sps:$4 sm:$0xff]  }
 0x445   :  { %9426 = vmatpush3.bf16.msra.mxu0 %v11017_v25  ;;  %v11053_v25 = vld [vmem:[%s15918_s3 + $0x678] ss:$20 sps:$4 sm:$0xff]  }
 0x446   :  { %7124 = vmatprep.subr.bf16.mxu0 %v11018_v37  ;;  %v11054_v37 = vld [vmem:[%s15918_s3 + $0x168] ss:$20 sps:$4 sm:$0xff]  }
 0x447   :  { %6979 = vmatpush1.bf16.msra.mxu1 %v11019_v52  ;;  %v11055_v52 = vld [vmem:[%s15918_s3 + $0x194] ss:$20 sps:$4 sm:$0xff]  }
 0x448   :  { %7077 = vmatmul.mubr.bf16.vlgmr.msra.gmra.mrb[156].mxu0 %v14576_v43  ;;  %6980 = vmatprep.subr.bf16.mxu1 %v11020_v21  ;;  %v11056_v21 = vld [vmem:[%s15918_s3 + $0x6a0] ss:$20 sps:$4 sm:$0xff]  }
 0x449   :  { %7125 = vmatpush1.bf16.msra.mxu0 %v11021_v29  ;;  %7156 = vmatprep.mubr.bf16.mxu0 %v13963_v41  ;;  %v11057_v29 = vld [vmem:[%s15918_s3 + $0x190] ss:$20 sps:$4 sm:$0xff]  }
 0x44a   :  { %7126 = vmatprep.subr.bf16.mxu0 %v11022_v49  ;;  %v11058_v49 = vld [vmem:[%s15918_s3 + $0x1bc] ss:$20 sps:$4 sm:$0xff]  }
 0x44b   :  { %6981 = vmatpush1.bf16.msra.mxu1 %v11023_v26  ;;  %v11059_v26 = vld [vmem:[%s15918_s3 + $0x6c8] ss:$20 sps:$4 sm:$0xff]  }
 0x44c   :  { %6982 = vmatprep.subr.bf16.mxu1 %v11024_v38  ;;  %v14937_v38 = vld [vmem:[%s15920_s4] sm:$0x1f] }
 0x44d   :  { %7127 = vmatpush1.bf16.msra.mxu0 %v11025_v8  ;;  %v11060_v8 = vld [vmem:[%s15918_s3 + $0x1b8] ss:$20 sps:$4 sm:$0xff]  }
 0x44e   :  { %7128 = vmatprep.subr.bf16.mxu0 %v11026_v15  ;;  %v11061_v15 = vld [vmem:[%s15918_s3 + $0x1e4] ss:$20 sps:$4 sm:$0xff]  }
 0x44f   :  { %6983 = vmatpush1.bf16.msra.mxu1 %v11027_v7  ;;  %v11062_v7 = vld [vmem:[%s15918_s3 + $0x6f0] ss:$20 sps:$4 sm:$0xff]  }
 0x450   :  { %6984 = vmatprep.subr.bf16.mxu1 %v11028_v55  ;;  %v14950_v55 = vrot.slane %v14937_v38, %v12072_v33  ;;  %v11064_v33 = vld [vmem:[%s15918_s3 + $0x20c] ss:$20 sps:$4 sm:$0xff]  }
 0x451   :  { %7129 = vmatpush1.bf16.msra.mxu0 %v11029_v9  ;;  %v14955_v9 = vrot.slane %v14937_v38, %v12078_v35  ;;  %v11065_v35 = vld [vmem:[%s15918_s3 + $0x718] ss:$20 sps:$4 sm:$0xff]  }
 0x452   :  { %7130 = vmatprep.subr.bf16.mxu0 %v11030_v56 }
 0x453   :  { %6985 = vmatpush1.bf16.msra.mxu1 %v11031_v59  ;;  %v11063_v59 = vld [vmem:[%s15918_s3 + $0x1e0] ss:$20 sps:$4 sm:$0xff]  }
 0x454   :  { %6986 = vmatprep.subr.bf16.mxu1 %v11032_v0 }
 0x455   :  { %7131 = vmatpush1.bf16.msra.mxu0 %v11033_v40 }
 0x456   :  { %7132 = vmatprep.subr.bf16.mxu0 %v11034_v57 }
 0x457   :  { %6987 = vmatpush1.bf16.msra.mxu1 %v11035_v11 }
 0x458   :  { %6988 = vmatprep.subr.bf16.mxu1 %v11036_v46 }
 0x459   :  { %v6584_v48 = vpop.f32.mrb[148].mxu1  ;;  %7133 = vmatpush1.bf16.msra.mxu0 %v11037_v31 }
 0x45a   :  { %v14854_v39 = vadd.f32 %v6584_v48, %v14661_v19  ;;  %v9823_v42 = vpop.f32.mrb[149].mxu1  ;;  %7134 = vmatprep.subr.bf16.mxu0 %v11038_v45  ;;  %v11040_v19 = vld [vmem:[%s15918_s3 + $0x5fc] ss:$20 sps:$4 sm:$0xff]   ;;  %v6079_v48 = vadd.f32 %v14950_v55, %v13710_v5 }
 0x45b   :  { %v6587_v47 = vpop.f32.mrb[150].mxu1  ;;  %v14859_v63 = vpop.f32.mrb[136].mxu0  ;;  %6989 = vmatpush1.bf16.msra.mxu1 %v11039_v2 }
 0x45c   :  { %v9824_v6 = vpop.f32.mrb[151].mxu1  ;;  %v14864_v13 = vpop.f32.mrb[137].mxu0  ;;  %6990 = vmatprep.subr.bf16.mxu1 %v11040_v19  ;;  %v6080_v47 = vadd.f32 %v14955_v9, %v13716_v10  ;;  %v11068_v10 = vld [vmem:[%s15918_s3 + $0x740] ss:$20 sps:$4 sm:$0xff]  }
 0x45d   :  { %v6641_v44 = vpop.f32.mrb[138].mxu0  ;;  %7135 = vmatpush1.bf16.msra.mxu0 %v11041_v51  ;;  %v11066_v6 = vld [vmem:[%s15918_s3 + $0x208] ss:$20 sps:$4 sm:$0xff]  }
 0x45e   :  { %v6642_v14 = vpop.f32.mrb[139].mxu0  ;;  %7136 = vmatprep.subr.bf16.mxu0 %v11042_v62  ;;  %v6085_v51 = vmax.f32 %v6080_v47, 0.0  ;;  %v11069_v62 = vld [vmem:[%s15918_s3 + $0x230] ss:$20 sps:$4 sm:$0xff]  }
 0x45f   :  { %6991 = vmatpush1.bf16.msra.mxu1 %v11043_v18 }
 0x460   :  { %6992 = vmatprep.subr.bf16.mxu1 %v11044_v3  ;;  %v11070_v3 = vld [vmem:[%s15918_s3 + $0x25c] ss:$20 sps:$4 sm:$0xff]  }
 0x461   :  { %7137 = vmatpush1.bf16.msra.mxu0 %v11045_v34  ;;  %v11071_v34 = vld [vmem:[%s15918_s3 + $0x768] ss:$20 sps:$4 sm:$0xff]  }
 0x462   :  { %7138 = vmatprep.subr.bf16.mxu0 %v11046_v60 }
 0x463   :  { %6993 = vmatpush1.bf16.msra.mxu1 %v11047_v53  ;;  %v11072_v53 = vld [vmem:[%s15918_s3 + $0x284] ss:$20 sps:$4 sm:$0xff]  }
 0x464   :  { %9845 = vmatprep.subr.bf16.mxu1 %v11287_v12 }
 0x465   :  { %7139 = vmatpush1.bf16.msra.mxu0 %v11048_v61  ;;  %v11073_v61 = vld [vmem:[%s15918_s3 + $0x258] ss:$20 sps:$4 sm:$0xff]  }
 0x466   :  { %6995 = vmatmul.mubr.bf16.vlgmr.msra.gmra.mrb[168].mxu1 %v14576_v43  ;;  %7140 = vmatprep.subr.bf16.mxu0 %v11049_v22  ;;  %v11052_v43 = vld [vmem:[%s15918_s3 + $0x16c] ss:$20 sps:$4 sm:$0xff]  }
 0x467   :  { %9846 = vmatpush3.bf16.msra.mxu1 %v11050_v58  ;;  %9861 = vmatprep.mubr.msk.bf16.mxu1 %vm11288_vm1, %v11287_v12  ;;  %v11074_v22 = vld [vmem:[%s15918_s3 + $0x28c] ss:$20 sps:$4 sm:$0xff]  }
 0x468   :  { %9847 = vmatprep.subr.bf16.mxu1 %v11287_v12  ;;  %v11075_v58 = vld [vmem:[%s15918_s3 + $0x280] ss:$20 sps:$4 sm:$0xff]  }
 0x469   :  { %7141 = vmatpush1.bf16.msra.mxu0 %v11051_v36  ;;  %v11076_v36 = vld [vmem:[%s15918_s3 + $0x2ac] ss:$20 sps:$4 sm:$0xff]  }
 0x46a   :  { %7142 = vmatprep.subr.bf16.mxu0 %v11052_v43  ;;  %v11078_v43 = vld [vmem:[%s15918_s3 + $0x2b4] ss:$20 sps:$4 sm:$0xff]  }
 0x46b   :  { %9848 = vmatpush3.bf16.msra.mxu1 %v11053_v25  ;;  %v11079_v25 = vld [vmem:[%s15918_s3 + $0x2a8] ss:$20 sps:$4 sm:$0xff]  }
 0x46c   :  { %9849 = vmatprep.subr.bf16.mxu1 %v11287_v12 }
 0x46d   :  { %7143 = vmatpush1.bf16.msra.mxu0 %v11054_v37  ;;  %v11080_v37 = vld [vmem:[%s15918_s3 + $0x2d4] ss:$20 sps:$4 sm:$0xff]  }
 0x46e   :  { %7144 = vmatprep.subr.bf16.mxu0 %v11055_v52  ;;  %v11081_v52 = vld [vmem:[%s15918_s3 + $0x2b0] ss:$20 sps:$4 sm:$0xff]  }
 0x46f   :  { %9850 = vmatpush3.bf16.msra.mxu1 %v11056_v21  ;;  %v11082_v21 = vld [vmem:[%s15918_s3 + $0x2dc] ss:$20 sps:$4 sm:$0xff]  }
 0x470   :  { %9851 = vmatprep.subr.bf16.mxu1 %v11287_v12 }
 0x471   :  { %7145 = vmatpush1.bf16.msra.mxu0 %v11057_v29  ;;  %v11083_v29 = vld [vmem:[%s15918_s3 + $0x2d0] ss:$20 sps:$4 sm:$0xff]  }
 0x472   :  { %7146 = vmatprep.subr.bf16.mxu0 %v11058_v49  ;;  %v11084_v49 = vld [vmem:[%s15918_s3 + $0x2fc] ss:$20 sps:$4 sm:$0xff]  }
 0x473   :  { %9852 = vmatpush3.bf16.msra.mxu1 %v11059_v26  ;;  %v11085_v26 = vld [vmem:[%s15918_s3 + $0x2d8] ss:$20 sps:$4 sm:$0xff]  }
 0x474   :  { %9853 = vmatprep.subr.bf16.mxu1 %v11287_v12 }
 0x475   :  { %7147 = vmatpush1.bf16.msra.mxu0 %v11060_v8  ;;  %v11086_v8 = vld [vmem:[%s15918_s3 + $0x304] ss:$20 sps:$4 sm:$0xff]  }
 0x476   :  { %7148 = vmatprep.subr.bf16.mxu0 %v11061_v15  ;;  %v11087_v15 = vld [vmem:[%s15918_s3 + $0x2f8] ss:$20 sps:$4 sm:$0xff]  }
 0x477   :  { %9854 = vmatpush3.bf16.msra.mxu1 %v11062_v7  ;;  %v11088_v7 = vld [vmem:[%s15918_s3 + $0x324] ss:$20 sps:$4 sm:$0xff]  }
 0x478   :  { %9855 = vmatprep.subr.bf16.mxu1 %v11287_v12 }
 0x479   :  { %v6678_v56 = vpop.f32.mrb[152].mxu1  ;;  %7149 = vmatpush1.bf16.msra.mxu0 %v11063_v59  ;;  %v11090_v59 = vld [vmem:[%s15918_s3 + $0x32c] ss:$20 sps:$4 sm:$0xff]  }
 0x47a   :  { %v6679_v0 = vadd.f32 %v6678_v56, %v14859_v63  ;;  %v6680_v40 = vpop.f32.mrb[153].mxu1  ;;  %7150 = vmatprep.subr.bf16.mxu0 %v11064_v33  ;;  %v11089_v56 = vld [vmem:[%s15918_s3 + $0x300] ss:$20 sps:$4 sm:$0xff]   ;;  %v11093_v33 = vld [vmem:[%s15918_s3 + $0x328] ss:$20 sps:$4 sm:$0xff]  }
 0x47b   :  { %v6681_v57 = vadd.f32 %v6680_v40, %v14864_v13  ;;  %v6682_v11 = vpop.f32.mrb[154].mxu1  ;;  %v14965_v46 = vpop.f32.mrb[140].mxu0  ;;  %9856 = vmatpush3.bf16.msra.mxu1 %v11065_v35  ;;  %v11092_v40 = vld [vmem:[%s15918_s3 + $0x34c] ss:$20 sps:$4 sm:$0xff]   ;;  %v11095_v35 = vld [vmem:[%s15918_s3 + $0x348] ss:$20 sps:$4 sm:$0xff]  }
 0x47c   :  { %v6847_v31 = vadd.f32 %v6679_v0, %v14534_v17  ;;  %v6683_v42 = vpop.f32.mrb[155].mxu1  ;;  %v14973_v45 = vpop.f32.mrb[141].mxu0  ;;  %9857 = vmatprep.subr.bf16.mxu1 %v11287_v12  ;;  %v11067_v17 = vld [vmem:[%s15918_s3 + $0x234] ss:$20 sps:$4 sm:$0xff]  }
 0x47d   :  { %v6848_v63 = vadd.f32 %v6681_v57, %v14539_v20  ;;  %v6764_v2 = vpop.f32.mrb[142].mxu0  ;;  %7151 = vmatpush1.bf16.msra.mxu0 %v11066_v6  ;;  %v6084_v20 = vmax.f32 %v6079_v48, 0.0  ;;  %v11091_v0 = vld [vmem:[%s15918_s3 + $0x320] ss:$20 sps:$4 sm:$0xff]   ;;  %v11098_v6 = vld [vmem:[%s15918_s3 + $0x37c] ss:$20 sps:$4 sm:$0xff]  }
 0x47e   :  { %v6852_v5 = vadd.f32 %v6847_v31, %v14950_v55  ;;  %v6765_v13 = vpop.f32.mrb[143].mxu0  ;;  %7152 = vmatprep.subr.bf16.mxu0 %v11067_v17  ;;  %v11094_v57 = vld [vmem:[%s15918_s3 + $0x354] ss:$20 sps:$4 sm:$0xff]   ;;  %v11101_v17 = vld [vmem:[%s15918_s3 + $0x378] ss:$20 sps:$4 sm:$0xff]  }
 0x47f   :  { %v6853_v19 = vadd.f32 %v6848_v63, %v14955_v9  ;;  %9858 = vmatpush3.bf16.msra.mxu1 %v11068_v10  ;;  %v11096_v31 = vld [vmem:[%s15918_s3 + $0x374] ss:$20 sps:$4 sm:$0xff]   ;;  %v11097_v63 = vld [vmem:[%s15918_s3 + $0x350] ss:$20 sps:$4 sm:$0xff]   ;;  %v11103_v10 = vld [vmem:[%s15918_s3 + $0x398] ss:$20 sps:$4 sm:$0xff]  }
 0x480   :  { %v6857_v44 = vmax.f32 %v6852_v5, 0.0  ;;  %9859 = vmatprep.subr.bf16.mxu1 %v11287_v12  ;;  %v11099_v5 = vld [vmem:[%s15918_s3 + $0x370] ss:$20 sps:$4 sm:$0xff]  }
 0x481   :  { %v6858_v14 = vmax.f32 %v6853_v19, 0.0  ;;  %7153 = vmatpush1.bf16.msra.mxu0 %v11069_v62  ;;  %v11100_v13 = vld [vmem:[%s15918_s3 + $0x39c] ss:$20 sps:$4 sm:$0xff]   ;;  %v11102_v19 = vld [vmem:[%s15918_s3 + $0x3a4] ss:$20 sps:$4 sm:$0xff]  }
 0x482   :  { %v14994_v18 = vmax.f32 %v6084_v20, %v6857_v44  ;;  %7154 = vmatprep.subr.bf16.mxu0 %v11070_v3  ;;  %v11104_v20 = vld [vmem:[%s15918_s3 + $0xc] ss:$20 sps:$4 sm:$0xff]   ;;  %v11108_v62 = vld [vmem:[%s15918_s3 + $0x34] ss:$20 sps:$4 sm:$0xff]   ;;  %v11109_v3 = vld [vmem:[%s15918_s3 + $0x10] ss:$20 sps:$4 sm:$0xff]  }
 0x483   :  { %9860 = vmatpush3.bf16.msra.mxu1 %v11071_v34  ;;  %v15002_v60 = vmax.f32 %v6085_v51, %v6858_v14  ;;  %v11105_v44 = vld [vmem:[%s15918_s3 + $0x3a0] ss:$20 sps:$4 sm:$0xff]   ;;  %v11106_v51 = vld [vmem:[%s15918_s3 + $0x150] ss:$20 sps:$4 sm:$0xff]   ;;  %v11107_v14 = vld [vmem:[%s15918_s3 + $0x8] ss:$20 sps:$4 sm:$0xff]  }
 0x484   :  { %7165 = vmatprep.subr.bf16.mxu1 %v11072_v53  ;;  %v11110_v34 = vld [vmem:[%s15918_s3 + $0x178] ss:$20 sps:$4 sm:$0xff]   ;;  %v11112_v53 = vld [vmem:[%s15918_s3 + $0x5c] ss:$20 sps:$4 sm:$0xff]  }
 0x485   :  { %7155 = vmatpush1.bf16.msra.mxu0 %v11073_v61  ;;  %v11113_v61 = vld [vmem:[%s15918_s3 + $0x38] ss:$20 sps:$4 sm:$0xff]  }
 0x486   :  { %9862 = vmatmul.mubr.bf16.vlgmr.msra.gmra.mrb[172].mxu1 %v14675_v28  ;;  %7247 = vmatprep.subr.bf16.mxu0 %v11074_v22  ;;  %v11077_v28 = vld [vmem:[%s15918_s3 + $0x288] ss:$20 sps:$4 sm:$0xff]   ;;  %v11115_v22 = vld [vmem:[%s15918_s3 + $0x58] ss:$20 sps:$4 sm:$0xff]  }
 0x487   :  { %7166 = vmatpush1.bf16.msra.mxu1 %v11075_v58  ;;  %7197 = vmatprep.mubr.bf16.mxu1 %v11286_v1  ;;  %v11116_v58 = vld [vmem:[%s15918_s3 + $0x84] ss:$20 sps:$4 sm:$0xff]  }
 0x488   :  { %7157 = vmatmul.mubr.bf16.vlgmr.msra.gmra.mrb[160].mxu0 %v14160_v32  ;;  %7167 = vmatprep.subr.bf16.mxu1 %v11076_v36  ;;  %v11117_v36 = vld [vmem:[%s15918_s3 + $0x60] ss:$20 sps:$4 sm:$0xff]  }
 0x489   :  { %7248 = vmatpush1.bf16.msra.mxu0 %v11077_v28  ;;  %7279 = vmatprep.mubr.bf16.mxu0 %v11286_v1  ;;  %v11118_v28 = vld [vmem:[%s15918_s3 + $0x1c8] ss:$20 sps:$4 sm:$0xff]  }
 0x48a   :  { %7249 = vmatprep.subr.bf16.mxu0 %v11078_v43  ;;  %v11119_v43 = vld [vmem:[%s15918_s3 + $0x80] ss:$20 sps:$4 sm:$0xff]  }
 0x48b   :  { %7168 = vmatpush1.bf16.msra.mxu1 %v11079_v25  ;;  %v11120_v25 = vld [vmem:[%s15918_s3 + $0xac] ss:$20 sps:$4 sm:$0xff]  }
 0x48c   :  { %7169 = vmatprep.subr.bf16.mxu1 %v11080_v37  ;;  %v6068_v37 = vsub.s32 3, %v12069_v27 }
 0x48d   :  { %7250 = vmatpush1.bf16.msra.mxu0 %v11081_v52  ;;  %v11121_v52 = vld [vmem:[%s15918_s3 + $0x88] ss:$20 sps:$4 sm:$0xff]  }
 0x48e   :  { %7251 = vmatprep.subr.bf16.mxu0 %v11082_v21  ;;  %v11122_v21 = vld [vmem:[%s15918_s3 + $0x1f0] ss:$20 sps:$4 sm:$0xff]  }
 0x48f   :  { %7170 = vmatpush1.bf16.msra.mxu1 %v11083_v29  ;;  %v11123_v29 = vld [vmem:[%s15918_s3 + $0xa8] ss:$20 sps:$4 sm:$0xff]  }
 0x490   :  { %7171 = vmatprep.subr.bf16.mxu1 %v11084_v49  ;;  %v15173_v49 = vrot.slane %v14937_v38, %v12098_v4  ;;  %v11126_v4 = vld [vmem:[%s15918_s3 + $0x218] ss:$20 sps:$4 sm:$0xff]  }
 0x491   :  { %7252 = vmatpush1.bf16.msra.mxu0 %v11085_v26  ;;  %v11124_v26 = vld [vmem:[%s15918_s3 + $0xd4] ss:$20 sps:$4 sm:$0xff]  }
 0x492   :  { %7253 = vmatprep.subr.bf16.mxu0 %v11086_v8  ;;  %v15179_v8 = vrot.slane %v14937_v38, %v6068_v37  ;;  %v11150_v37 = vld [vmem:[%s15918_s3 + $0x7fc] ss:$20 sps:$4 sm:$0xff]  }
 0x493   :  { %7172 = vmatpush1.bf16.msra.mxu1 %v11087_v15 }
 0x494   :  { %7173 = vmatprep.subr.bf16.mxu1 %v11088_v7  ;;  %v11125_v7 = vld [vmem:[%s15918_s3 + $0xb0] ss:$20 sps:$4 sm:$0xff]  }
 0x495   :  { %7254 = vmatpush1.bf16.msra.mxu0 %v11089_v56 }
 0x496   :  { %7255 = vmatprep.subr.bf16.mxu0 %v11090_v59 }
 0x497   :  { %7174 = vmatpush1.bf16.msra.mxu1 %v11091_v0 }
 0x498   :  { %7175 = vmatprep.subr.bf16.mxu1 %v11092_v40 }
 0x499   :  { %7256 = vmatpush1.bf16.msra.mxu0 %v11093_v33  ;;  %v11127_v33 = vld [vmem:[%s15918_s3 + $0xd0] ss:$20 sps:$4 sm:$0xff]  }
 0x49a   :  { %7257 = vmatprep.subr.bf16.mxu0 %v11094_v57  ;;  %v6081_v57 = vadd.f32 %v15173_v49, %v13918_v24 }
 0x49b   :  { %v9396_v11 = vpop.f32.mrb[144].mxu0  ;;  %7176 = vmatpush1.bf16.msra.mxu1 %v11095_v35  ;;  %v11128_v35 = vld [vmem:[%s15918_s3 + $0xfc] ss:$20 sps:$4 sm:$0xff]  }
 0x49c   :  { %v9397_v48 = vpop.f32.mrb[145].mxu0  ;;  %7177 = vmatprep.subr.bf16.mxu1 %v11096_v31  ;;  %v11129_v31 = vld [vmem:[%s15918_s3 + $0xd8] ss:$20 sps:$4 sm:$0xff]  }
 0x49d   :  { %v15083_v42 = vadd.f32 %v9397_v48, %v9396_v11  ;;  %v9399_v47 = vpop.f32.mrb[146].mxu0  ;;  %7258 = vmatpush1.bf16.msra.mxu0 %v11097_v63 }
 0x49e   :  { %v9400_v2 = vpop.f32.mrb[147].mxu0  ;;  %7259 = vmatprep.subr.bf16.mxu0 %v11098_v6 }
 0x49f   :  { %7178 = vmatpush1.bf16.msra.mxu1 %v11099_v5  ;;  %v11132_v2 = vld [vmem:[%s15918_s3 + $0x124] ss:$20 sps:$4 sm:$0xff]  }
 0x4a0   :  { %7179 = vmatprep.subr.bf16.mxu1 %v11100_v13  ;;  %v11133_v13 = vld [vmem:[%s15918_s3 + $0x100] ss:$20 sps:$4 sm:$0xff]  }
 0x4a1   :  { %7260 = vmatpush1.bf16.msra.mxu0 %v11101_v17 }
 0x4a2   :  { %7261 = vmatprep.subr.bf16.mxu0 %v11102_v19  ;;  %v11134_v19 = vld [vmem:[%s15918_s3 + $0x268] ss:$20 sps:$4 sm:$0xff]  }
 0x4a3   :  { %7180 = vmatpush1.bf16.msra.mxu1 %v11103_v10  ;;  %v11135_v10 = vld [vmem:[%s15918_s3 + $0x120] ss:$20 sps:$4 sm:$0xff]  }
 0x4a4   :  { %7206 = vmatprep.subr.bf16.mxu1 %v11104_v20 }
 0x4a5   :  { %7262 = vmatpush1.bf16.msra.mxu0 %v11105_v44  ;;  %v11136_v44 = vld [vmem:[%s15918_s3 + $0x14c] ss:$20 sps:$4 sm:$0xff]  }
 0x4a6   :  { %7198 = vmatmul.mubr.bf16.vlgmr.msra.gmra.mrb[176].mxu1 %v14257_v23  ;;  %9442 = vmatprep.subr.bf16.mxu0 %v11106_v51  ;;  %v15231_v51 = vld [vmem:[#allocation2 + $0x48] sm:$0xff] }
 0x4a7   :  { %7207 = vmatpush1.bf16.msra.mxu1 %v11107_v14  ;;  %7238 = vmatprep.mubr.bf16.mxu1 %v13963_v41  ;;  %v11137_v14 = vld [vmem:[%s15918_s3 + $0x128] ss:$20 sps:$4 sm:$0xff]  }
 0x4a8   :  { %7280 = vmatmul.mubr.bf16.vlgmr.msra.gmra.mrb[164].mxu0 %v14257_v23  ;;  %7208 = vmatprep.subr.bf16.mxu1 %v11108_v62  ;;  %v11111_v23 = vld [vmem:[%s15918_s3 + $0x30] ss:$20 sps:$4 sm:$0xff]  }
 0x4a9   :  { %9443 = vmatpush3.bf16.msra.mxu0 %v11109_v3  ;;  %7320 = vmatprep.mubr.bf16.mxu0 %v13963_v41  ;;  %v11114_v41 = vld [vmem:[%s15918_s3 + $0x1a0] ss:$20 sps:$4 sm:$0xff]   ;;  %v11138_v62 = vld [vmem:[%s15918_s3 + $0x784] ss:$20 sps:$4 sm:$0xff]   ;;  %v11139_v3 = vld [vmem:[%s15918_s3 + $0x148] ss:$20 sps:$4 sm:$0xff]  }
 0x4aa   :  { %9444 = vmatprep.subr.bf16.mxu0 %v11110_v34  ;;  %v15244_v34 = vcombine.high %v15231_v51, %v15231_v51 }
 0x4ab   :  { %7209 = vmatpush1.bf16.msra.mxu1 %v11111_v23  ;;  %v11140_v23 = vld [vmem:[%s15918_s3 + $0x174] ss:$20 sps:$4 sm:$0xff]  }
 0x4ac   :  { %7210 = vmatprep.subr.bf16.mxu1 %v11112_v53  ;;  %v11141_v53 = vld [vmem:[%s15918_s3 + $0x780] ss:$20 sps:$4 sm:$0xff]  }
 0x4ad   :  { %9445 = vmatpush3.bf16.msra.mxu0 %v11113_v61  ;;  %v11142_v61 = vld [vmem:[%s15918_s3 + $0x7ac] ss:$20 sps:$4 sm:$0xff]  }
 0x4ae   :  { %9446 = vmatprep.subr.bf16.mxu0 %v11114_v41  ;;  %v11143_v41 = vld [vmem:[%s15918_s3 + $0x170] ss:$20 sps:$4 sm:$0xff]  }
 0x4af   :  { %7211 = vmatpush1.bf16.msra.mxu1 %v11115_v22  ;;  %v11144_v22 = vld [vmem:[%s15918_s3 + $0x19c] ss:$20 sps:$4 sm:$0xff]  }
 0x4b0   :  { %7212 = vmatprep.subr.bf16.mxu1 %v11116_v58  ;;  %v11145_v58 = vld [vmem:[%s15918_s3 + $0x7a8] ss:$20 sps:$4 sm:$0xff]  }
 0x4b1   :  { %9447 = vmatpush3.bf16.msra.mxu0 %v11117_v36  ;;  %v11146_v36 = vld [vmem:[%s15918_s3 + $0x7d4] ss:$20 sps:$4 sm:$0xff]  }
 0x4b2   :  { %9448 = vmatprep.subr.bf16.mxu0 %v11118_v28  ;;  %v11147_v28 = vld [vmem:[%s15918_s3 + $0x198] ss:$20 sps:$4 sm:$0xff]  }
 0x4b3   :  { %7213 = vmatpush1.bf16.msra.mxu1 %v11119_v43  ;;  %v11148_v43 = vld [vmem:[%s15918_s3 + $0x1c4] ss:$20 sps:$4 sm:$0xff]  }
 0x4b4   :  { %7214 = vmatprep.subr.bf16.mxu1 %v11120_v25  ;;  %v11149_v25 = vld [vmem:[%s15918_s3 + $0x7d0] ss:$20 sps:$4 sm:$0xff]  }
 0x4b5   :  { %9449 = vmatpush3.bf16.msra.mxu0 %v11121_v52  ;;  %v11151_v52 = vld [vmem:[%s15918_s3 + $0x1c0] ss:$20 sps:$4 sm:$0xff]  }
 0x4b6   :  { %9450 = vmatprep.subr.bf16.mxu0 %v11122_v21  ;;  %v6072_v21 = vsub.s32 4, %v12069_v27 }
 0x4b7   :  { %7215 = vmatpush1.bf16.msra.mxu1 %v11123_v29  ;;  %v11152_v29 = vld [vmem:[%s15918_s3 + $0x1ec] ss:$20 sps:$4 sm:$0xff]  }
 0x4b8   :  { %7216 = vmatprep.subr.bf16.mxu1 %v11124_v26  ;;  %v11153_v26 = vld [vmem:[%s15918_s3 + $0x7f8] ss:$20 sps:$4 sm:$0xff]   ;;  %v15298_v27 = vrot.slane %v14937_v38, %v6072_v21 }
 0x4b9   :  { %v6719_v15 = vpop.f32.mrb[156].mxu1  ;;  %9451 = vmatpush3.bf16.msra.mxu0 %v11125_v7  ;;  %v11155_v7 = vld [vmem:[%s15918_s3 + $0x1e8] ss:$20 sps:$4 sm:$0xff]   ;;  %v11184_v21 = vld [vmem:[%s15918_s3 + $0x98c] ss:$20 sps:$4 sm:$0xff]  }
 0x4ba   :  { %v6761_v56 = vadd.f32 %v14965_v46, %v6719_v15  ;;  %v6721_v59 = vpop.f32.mrb[157].mxu1  ;;  %9452 = vmatprep.subr.bf16.mxu0 %v11126_v4  ;;  %v11154_v15 = vld [vmem:[%s15918_s3 + $0x824] ss:$20 sps:$4 sm:$0xff]   ;;  %v11157_v4 = vld [vmem:[%s15918_s3 + $0x820] ss:$20 sps:$4 sm:$0xff]  }
 0x4bb   :  { %v6763_v0 = vadd.f32 %v14973_v45, %v6721_v59  ;;  %v6723_v40 = vpop.f32.mrb[158].mxu1  ;;  %7217 = vmatpush1.bf16.msra.mxu1 %v11127_v33  ;;  %v6082_v45 = vadd.f32 %v15179_v8, %v13924_v30  ;;  %v11131_v30 = vld [vmem:[%s15918_s3 + $0xf8] ss:$20 sps:$4 sm:$0xff]  }
 0x4bc   :  { %v6849_v11 = vadd.f32 %v6761_v56, %v14756_v50  ;;  %v6724_v46 = vpop.f32.mrb[159].mxu1  ;;  %7218 = vmatprep.subr.bf16.mxu1 %v11128_v35  ;;  %v11130_v50 = vld [vmem:[%s15918_s3 + $0x240] ss:$20 sps:$4 sm:$0xff]  }
 0x4bd   :  { %v6850_v48 = vadd.f32 %v6763_v0, %v14762_v16  ;;  %9453 = vmatpush3.bf16.msra.mxu0 %v11129_v31  ;;  %v6086_v16 = vmax.f32 %v6081_v57, 0.0  ;;  %v6087_v6 = vmax.f32 %v6082_v45, 0.0  ;;  %v11156_v56 = vld [vmem:[%s15918_s3 + $0x214] ss:$20 sps:$4 sm:$0xff]   ;;  %v11158_v33 = vld [vmem:[%s15918_s3 + $0x84c] ss:$20 sps:$4 sm:$0xff]   ;;  %v6083_v46 = vadd.f32 %v15298_v27, %v14031_v54 }
 0x4be   :  { %v6854_v24 = vadd.f32 %v6849_v11, %v15173_v49  ;;  %9454 = vmatprep.subr.bf16.mxu0 %v11130_v50  ;;  %v11159_v11 = vld [vmem:[%s15918_s3 + $0x210] ss:$20 sps:$4 sm:$0xff]   ;;  %v11162_v54 = vld [vmem:[%s15918_s3 + $0x874] ss:$20 sps:$4 sm:$0xff]  }
 0x4bf   :  { %v6855_v47 = vadd.f32 %v6850_v48, %v15179_v8  ;;  %7219 = vmatpush1.bf16.msra.mxu1 %v11131_v30  ;;  %v11160_v48 = vld [vmem:[%s15918_s3 + $0x23c] ss:$20 sps:$4 sm:$0xff]   ;;  %v6088_v30 = vmax.f32 %v6083_v46, 0.0 }
 0x4c0   :  { %v6859_v63 = vmax.f32 %v6854_v24, 0.0  ;;  %7220 = vmatprep.subr.bf16.mxu1 %v11132_v2  ;;  %v11161_v24 = vld [vmem:[%s15918_s3 + $0x848] ss:$20 sps:$4 sm:$0xff]   ;;  %v11165_v2 = vld [vmem:[%s15918_s3 + $0x870] ss:$20 sps:$4 sm:$0xff]  }
 0x4c1   :  { %v6860_v5 = vmax.f32 %v6855_v47, 0.0  ;;  %9455 = vmatpush3.bf16.msra.mxu0 %v11133_v13  ;;  %v11167_v13 = vld [vmem:[%s15918_s3 + $0x260] ss:$20 sps:$4 sm:$0xff]   ;;  %v11191_v46 = vld [vmem:[%s15918_s3 + $0x3a8] ss:$20 sps:$4 sm:$0xff]  }
 0x4c2   :  { %v15218_v17 = vmax.f32 %v6086_v16, %v6859_v63  ;;  %9456 = vmatprep.subr.bf16.mxu0 %v11134_v19  ;;  %v11164_v63 = vld [vmem:[%s15918_s3 + $0x264] ss:$20 sps:$4 sm:$0xff]  }
 0x4c3   :  { %7221 = vmatpush1.bf16.msra.mxu1 %v11135_v10  ;;  %v15226_v20 = vmax.f32 %v6087_v6, %v6860_v5  ;;  %v11166_v5 = vld [vmem:[%s15918_s3 + $0x89c] ss:$20 sps:$4 sm:$0xff]   ;;  %v11168_v19 = vld [vmem:[%s15918_s3 + $0x898] ss:$20 sps:$4 sm:$0xff]  }
 0x4c4   :  { %7222 = vmatprep.subr.bf16.mxu1 %v11136_v44  ;;  %v11169_v10 = vld [vmem:[%s15918_s3 + $0x8c4] ss:$20 sps:$4 sm:$0xff]  }
 0x4c5   :  { %9457 = vmatpush3.bf16.msra.mxu0 %v11137_v14  ;;  %v11170_v44 = vld [vmem:[%s15918_s3 + $0x290] ss:$20 sps:$4 sm:$0xff]   ;;  %v11171_v14 = vld [vmem:[%s15918_s3 + $0x8c0] ss:$20 sps:$4 sm:$0xff]  }
 0x4c6   :  { %7381 = vmatprep.subr.bf16.mxu0 %v11138_v62  ;;  %v11173_v62 = vld [vmem:[%s15918_s3 + $0x2b8] ss:$20 sps:$4 sm:$0xff]  }
 0x4c7   :  { %7223 = vmatpush1.bf16.msra.mxu1 %v11139_v3  ;;  %v11174_v3 = vld [vmem:[%s15918_s3 + $0x8e8] ss:$20 sps:$4 sm:$0xff]  }
 0x4c8   :  { %7321 = vmatmul.mubr.bf16.vlgmr.msra.gmra.mrb[168].mxu0 %v14160_v32  ;;  %7224 = vmatprep.subr.bf16.mxu1 %v11140_v23  ;;  %v11175_v23 = vld [vmem:[%s15918_s3 + $0x914] ss:$20 sps:$4 sm:$0xff]  }
 0x4c9   :  { %7382 = vmatpush1.bf16.msra.mxu0 %v11141_v53  ;;  %7413 = vmatprep.mubr.bf16.mxu0 %v15244_v34  ;;  %v11176_v53 = vld [vmem:[%s15918_s3 + $0x2e0] ss:$20 sps:$4 sm:$0xff]  }
 0x4ca   :  { %7383 = vmatprep.subr.bf16.mxu0 %v11142_v61  ;;  %v11177_v61 = vld [vmem:[%s15918_s3 + $0x910] ss:$20 sps:$4 sm:$0xff]  }
 0x4cb   :  { %7225 = vmatpush1.bf16.msra.mxu1 %v11143_v41  ;;  %v11178_v41 = vld [vmem:[%s15918_s3 + $0x93c] ss:$20 sps:$4 sm:$0xff]  }
 0x4cc   :  { %7226 = vmatprep.subr.bf16.mxu1 %v11144_v22  ;;  %v11179_v22 = vld [vmem:[%s15918_s3 + $0x308] ss:$20 sps:$4 sm:$0xff]  }
 0x4cd   :  { %7384 = vmatpush1.bf16.msra.mxu0 %v11145_v58  ;;  %v11180_v58 = vld [vmem:[%s15918_s3 + $0x938] ss:$20 sps:$4 sm:$0xff]  }
 0x4ce   :  { %7385 = vmatprep.subr.bf16.mxu0 %v11146_v36  ;;  %v11181_v36 = vld [vmem:[%s15918_s3 + $0x964] ss:$20 sps:$4 sm:$0xff]  }
 0x4cf   :  { %7227 = vmatpush1.bf16.msra.mxu1 %v11147_v28  ;;  %v11182_v28 = vld [vmem:[%s15918_s3 + $0x330] ss:$20 sps:$4 sm:$0xff]  }
 0x4d0   :  { %7228 = vmatprep.subr.bf16.mxu1 %v11148_v43 }
 0x4d1   :  { %7386 = vmatpush1.bf16.msra.mxu0 %v11149_v25  ;;  %v11183_v25 = vld [vmem:[%s15918_s3 + $0x960] ss:$20 sps:$4 sm:$0xff]  }
 0x4d2   :  { %7387 = vmatprep.subr.bf16.mxu0 %v11150_v37 }
 0x4d3   :  { %7229 = vmatpush1.bf16.msra.mxu1 %v11151_v52 }
 0x4d4   :  { %7230 = vmatprep.subr.bf16.mxu1 %v11152_v29 }
 0x4d5   :  { %7388 = vmatpush1.bf16.msra.mxu0 %v11153_v26 }
 0x4d6   :  { %7389 = vmatprep.subr.bf16.mxu0 %v11154_v15 }
 0x4d7   :  { %7231 = vmatpush1.bf16.msra.mxu1 %v11155_v7  ;;  %v11185_v7 = vld [vmem:[%s15918_s3 + $0x358] ss:$20 sps:$4 sm:$0xff]  }
 0x4d8   :  { %7232 = vmatprep.subr.bf16.mxu1 %v11156_v56 }
 0x4d9   :  { %v6841_v59 = vpop.f32.mrb[160].mxu1  ;;  %7390 = vmatpush1.bf16.msra.mxu0 %v11157_v4 }
 0x4da   :  { %v6842_v0 = vadd.f32 %v15083_v42, %v6841_v59  ;;  %v9843_v40 = vpop.f32.mrb[161].mxu1  ;;  %7391 = vmatprep.subr.bf16.mxu0 %v11158_v33  ;;  %v11187_v33 = vld [vmem:[%s15918_s3 + $0x9b4] ss:$20 sps:$4 sm:$0xff]  }
 0x4db   :  { %v6844_v38 = vpop.f32.mrb[162].mxu1  ;;  %v15310_v57 = vpop.f32.mrb[148].mxu0  ;;  %7233 = vmatpush1.bf16.msra.mxu1 %v11159_v11  ;;  %v11190_v11 = vld [vmem:[%s15918_s3 + $0x9dc] ss:$20 sps:$4 sm:$0xff]  }
 0x4dc   :  { %v6851_v35 = vadd.f32 %v6842_v0, %v14854_v39  ;;  %v9844_v42 = vpop.f32.mrb[163].mxu1  ;;  %v15318_v45 = vpop.f32.mrb[149].mxu0  ;;  %7234 = vmatprep.subr.bf16.mxu1 %v11160_v48  ;;  %v11163_v39 = vld [vmem:[%s15918_s3 + $0x238] ss:$20 sps:$4 sm:$0xff]   ;;  %v11186_v0 = vld [vmem:[%s15918_s3 + $0x988] ss:$20 sps:$4 sm:$0xff]  }
 0x4dd   :  { %v6918_v31 = vpop.f32.mrb[150].mxu0  ;;  %7392 = vmatpush1.bf16.msra.mxu0 %v11161_v24  ;;  %v11188_v38 = vld [vmem:[%s15918_s3 + $0x380] ss:$20 sps:$4 sm:$0xff]   ;;  %v11193_v42 = vld [vmem:[%s15918_s3 + $0x9d8] ss:$20 sps:$4 sm:$0xff]  }
 0x4de   :  { %v6856_v50 = vadd.f32 %v6851_v35, %v15298_v27  ;;  %v6919_v47 = vpop.f32.mrb[151].mxu0  ;;  %7393 = vmatprep.subr.bf16.mxu0 %v11162_v54  ;;  %v11192_v35 = vld [vmem:[%s15918_s3 + $0xa04] ss:$20 sps:$4 sm:$0xff]   ;;  %v11195_v31 = vld [vmem:[%s15918_s3 + $0xa0c] ss:$20 sps:$4 sm:$0xff]  }
 0x4df   :  { %7235 = vmatpush1.bf16.msra.mxu1 %v11163_v39  ;;  %v11194_v48 = vld [vmem:[#allocation2 + $0x38] ss:$0 sps:$4 sm:$0xff]   ;;  %v11196_v24 = vld [vmem:[%s15918_s3 + $0xa00] ss:$20 sps:$4 sm:$0xff]   ;;  %v11200_v54 = vld [vmem:[%s15918_s3 + $0xa28] ss:$20 sps:$4 sm:$0xff]  }
 0x4e0   :  { %v6861_v16 = vmax.f32 %v6856_v50, 0.0  ;;  %7236 = vmatprep.subr.bf16.mxu1 %v11164_v63  ;;  %v11198_v50 = vld [vmem:[%s15918_s3 + $0xa08] ss:$20 sps:$4 sm:$0xff]  }
 0x4e1   :  { %7394 = vmatpush1.bf16.msra.mxu0 %v11165_v2  ;;  %v11199_v47 = vld [vmem:[%s15918_s3 + $0xa34] ss:$20 sps:$4 sm:$0xff]   ;;  %v11205_v63 = vld [vmem:[%s15918_s3 + $0xa7c] ss:$20 sps:$4 sm:$0xff]   ;;  %v11206_v2 = vld [vmem:[%s15918_s3 + $0xa58] ss:$20 sps:$4 sm:$0xff]  }
 0x4e2   :  { %v15339_v6 = vmax.f32 %v6088_v30, %v6861_v16  ;;  %7395 = vmatprep.subr.bf16.mxu0 %v11166_v5  ;;  %v11201_v39 = vld [vmem:[%s15918_s3 + $0xa54] ss:$20 sps:$4 sm:$0xff]   ;;  %v11202_v30 = vld [vmem:[%s15918_s3 + $0xa30] ss:$20 sps:$4 sm:$0xff]  }
 0x4e3   :  { %7237 = vmatpush1.bf16.msra.mxu1 %v11167_v13  ;;  %v11204_v16 = vld [vmem:[%s15918_s3 + $0xa50] ss:$20 sps:$4 sm:$0xff]   ;;  %v11208_v13 = vld [vmem:[%s15918_s3 + $0xa78] ss:$20 sps:$4 sm:$0xff]  }
 0x4e4   :  { %9865 = vmatprep.subr.bf16.mxu1 %v11287_v12  ;;  %v11207_v5 = vld [vmem:[%s15918_s3 + $0xa84] ss:$20 sps:$4 sm:$0xff]  }
 0x4e5   :  { %7396 = vmatpush1.bf16.msra.mxu0 %v11168_v19  ;;  %v11209_v19 = vld [vmem:[%s15918_s3 + $0xaa4] ss:$20 sps:$4 sm:$0xff]  }
 0x4e6   :  { %7239 = vmatmul.mubr.bf16.vlgmr.msra.gmra.mrb[180].mxu1 %v14160_v32  ;;  %7397 = vmatprep.subr.bf16.mxu0 %v11169_v10  ;;  %v11172_v32 = vld [vmem:[%s15918_s3 + $0x8ec] ss:$20 sps:$4 sm:$0xff]  }
 0x4e7   :  { %9866 = vmatpush3.bf16.msra.mxu1 %v11170_v44  ;;  %9881 = vmatprep.mubr.msk.bf16.mxu1 %vm11288_vm1, %v11287_v12  ;;  %v11210_v10 = vld [vmem:[%s15918_s3 + $0xa80] ss:$20 sps:$4 sm:$0xff]  }
 0x4e8   :  { %9867 = vmatprep.subr.bf16.mxu1 %v11287_v12  ;;  %v11211_v44 = vld [vmem:[%s15918_s3 + $0xaac] ss:$20 sps:$4 sm:$0xff]  }
 0x4e9   :  { %7398 = vmatpush1.bf16.msra.mxu0 %v11171_v14  ;;  %v11212_v14 = vld [vmem:[%s15918_s3 + $0xaa0] ss:$20 sps:$4 sm:$0xff]  }
 0x4ea   :  { %7399 = vmatprep.subr.bf16.mxu0 %v11172_v32  ;;  %v11213_v32 = vld [vmem:[%s15918_s3 + $0xacc] ss:$20 sps:$4 sm:$0xff]  }
 0x4eb   :  { %9868 = vmatpush3.bf16.msra.mxu1 %v11173_v62  ;;  %v11214_v62 = vld [vmem:[%s15918_s3 + $0xaa8] ss:$20 sps:$4 sm:$0xff]  }
 0x4ec   :  { %9869 = vmatprep.subr.bf16.mxu1 %v11287_v12 }
 0x4ed   :  { %7400 = vmatpush1.bf16.msra.mxu0 %v11174_v3  ;;  %v11215_v3 = vld [vmem:[%s15918_s3 + $0xad4] ss:$20 sps:$4 sm:$0xff]  }
 0x4ee   :  { %7401 = vmatprep.subr.bf16.mxu0 %v11175_v23 }
 0x4ef   :  { %9870 = vmatpush3.bf16.msra.mxu1 %v11176_v53  ;;  %v11216_v53 = vld [vmem:[%s15918_s3 + $0xac8] ss:$20 sps:$4 sm:$0xff]  }
 0x4f0   :  { %9871 = vmatprep.subr.bf16.mxu1 %v11287_v12 }
 0x4f1   :  { %7402 = vmatpush1.bf16.msra.mxu0 %v11177_v61 }
 0x4f2   :  { %7403 = vmatprep.subr.bf16.mxu0 %v11178_v41  ;;  %v11217_v41 = vld [vmem:[%s15918_s3 + $0xaf4] ss:$20 sps:$4 sm:$0xff]  }
 0x4f3   :  { %9872 = vmatpush3.bf16.msra.mxu1 %v11179_v22 }
 0x4f4   :  { %9873 = vmatprep.subr.bf16.mxu1 %v11287_v12 }
 0x4f5   :  { %7404 = vmatpush1.bf16.msra.mxu0 %v11180_v58 }
 0x4f6   :  { %7405 = vmatprep.subr.bf16.mxu0 %v11181_v36  ;;  %v11218_v36 = vld [vmem:[%s15918_s3 + $0xad0] ss:$20 sps:$4 sm:$0xff]  }
 0x4f7   :  { %9874 = vmatpush3.bf16.msra.mxu1 %v11182_v28 }
 0x4f8   :  { %9875 = vmatprep.subr.bf16.mxu1 %v11287_v12 }
 0x4f9   :  { %v6955_v43 = vpop.f32.mrb[164].mxu1  ;;  %7406 = vmatpush1.bf16.msra.mxu0 %v11183_v25  ;;  %v11220_v25 = vld [vmem:[%s15918_s3 + $0xaf0] ss:$20 sps:$4 sm:$0xff]  }
 0x4fa   :  { %v15405_v37 = vadd.f32 %v6955_v43, %v15310_v57  ;;  %v6957_v52 = vpop.f32.mrb[165].mxu1  ;;  %7407 = vmatprep.subr.bf16.mxu0 %v11184_v21  ;;  %v11189_v57 = vld [vmem:[%s15918_s3 + $0x9b0] ss:$20 sps:$4 sm:$0xff]   ;;  %v11222_v21 = vld [vmem:[%s15918_s3 + $0xaf8] ss:$20 sps:$4 sm:$0xff]  }
 0x4fb   :  { %v15411_v29 = vadd.f32 %v6957_v52, %v15318_v45  ;;  %v6959_v26 = vpop.f32.mrb[166].mxu1  ;;  %v15413_v15 = vpop.f32.mrb[152].mxu0  ;;  %9876 = vmatpush3.bf16.msra.mxu1 %v11185_v7  ;;  %v15448_v45 = vcombine.low %v15231_v51, %v15231_v51  ;;  %v11197_v51 = vld [vmem:[%s15918_s3 + $0xa2c] ss:$20 sps:$4 sm:$0xff]   ;;  %v11219_v43 = vld [vmem:[%s15918_s3 + $0xafc] ss:$20 sps:$4 sm:$0xff]  }
 0x4fc   :  { %v6960_v56 = vpop.f32.mrb[167].mxu1  ;;  %v15418_v59 = vpop.f32.mrb[153].mxu0  ;;  %9877 = vmatprep.subr.bf16.mxu1 %v11287_v12  ;;  %v11221_v52 = vld [vmem:[%s15918_s3 + $0xb1c] ss:$20 sps:$4 sm:$0xff]   ;;  %v11223_v26 = vld [vmem:[%s15918_s3 + $0xb24] ss:$20 sps:$4 sm:$0xff]  }
 0x4fd   :  { %v7041_v4 = vpop.f32.mrb[154].mxu0  ;;  %7408 = vmatpush1.bf16.msra.mxu0 %v11186_v0  ;;  %v11224_v7 = vld [vmem:[%s15918_s3 + $0xb18] ss:$20 sps:$4 sm:$0xff]   ;;  %v15545_v56 = vld [vmem:[#allocation2 + $0x50] ss:$0 sps:$4 sm:$0xff]  }
 0x4fe   :  { %v7042_v40 = vpop.f32.mrb[155].mxu0  ;;  %7409 = vmatprep.subr.bf16.mxu0 %v11187_v33  ;;  %v11225_v4 = vld [vmem:[%s15918_s3 + $0x78c] ss:$20 sps:$4 sm:$0xff]   ;;  %v11228_v33 = vld [vmem:[%s15918_s3 + $0x788] ss:$20 sps:$4 sm:$0xff]  }
 0x4ff   :  { %9878 = vmatpush3.bf16.msra.mxu1 %v11188_v38  ;;  %v11226_v0 = vld [vmem:[%s15918_s3 + $0xb20] ss:$20 sps:$4 sm:$0xff]   ;;  %v11227_v40 = vld [vmem:[%s15918_s3 + $0x8d0] ss:$20 sps:$4 sm:$0xff]  }
 0x500   :  { %9879 = vmatprep.subr.bf16.mxu1 %v11287_v12  ;;  %v11229_v38 = vld [vmem:[%s15918_s3 + $0x7b4] ss:$20 sps:$4 sm:$0xff]  }
 0x501   :  { %7410 = vmatpush1.bf16.msra.mxu0 %v11189_v57  ;;  %v11230_v57 = vld [vmem:[%s15918_s3 + $0x790] ss:$20 sps:$4 sm:$0xff]  }
 0x502   :  { %7411 = vmatprep.subr.bf16.mxu0 %v11190_v11  ;;  %v11231_v11 = vld [vmem:[%s15918_s3 + $0x8f8] ss:$20 sps:$4 sm:$0xff]  }
 0x503   :  { %9880 = vmatpush3.bf16.msra.mxu1 %v11191_v46  ;;  %v11232_v46 = vld [vmem:[%s15918_s3 + $0x7b0] ss:$20 sps:$4 sm:$0xff]  }
 0x504   :  { %7422 = vmatprep.subr.bf16.mxu1 %v11192_v35  ;;  %v11233_v35 = vld [vmem:[%s15918_s3 + $0x7dc] ss:$20 sps:$4 sm:$0xff]  }
 0x505   :  { %7412 = vmatpush1.bf16.msra.mxu0 %v11193_v42  ;;  %v11234_v42 = vld [vmem:[%s15918_s3 + $0x7b8] ss:$20 sps:$4 sm:$0xff]  }
 0x506   :  { %9882 = vmatmul.mubr.bf16.vlgmr.msra.gmra.mrb[184].mxu1 %v11194_v48  ;;  %7504 = vmatprep.subr.bf16.mxu0 %v11195_v31  ;;  %v11236_v48 = vld [vmem:[%s15918_s3 + $0x7d8] ss:$20 sps:$4 sm:$0xff]  }
 0x507   :  { %7423 = vmatpush1.bf16.msra.mxu1 %v11196_v24  ;;  %7454 = vmatprep.mubr.bf16.mxu1 %v11286_v1  ;;  %v11237_v31 = vld [vmem:[%s15918_s3 + $0x804] ss:$20 sps:$4 sm:$0xff]   ;;  %v11238_v24 = vld [vmem:[%s15918_s3 + $0x7e0] ss:$20 sps:$4 sm:$0xff]  }
 0x508   :  { %7414 = vmatmul.mubr.bf16.vlgmr.msra.gmra.mrb[172].mxu0 %v15448_v45  ;;  %7424 = vmatprep.subr.bf16.mxu1 %v11197_v51  ;;  %v11239_v51 = vld [vmem:[%s15918_s3 + $0x948] ss:$20 sps:$4 sm:$0xff]  }
 0x509   :  { %7505 = vmatpush1.bf16.msra.mxu0 %v11198_v50  ;;  %7536 = vmatprep.mubr.bf16.mxu0 %v11286_v1  ;;  %v11203_v1 = vld [vmem:[%s15918_s3 + $0xa5c] ss:$20 sps:$4 sm:$0xff]   ;;  %v11240_v50 = vld [vmem:[%s15918_s3 + $0x800] ss:$20 sps:$4 sm:$0xff]  }
 0x50a   :  { %7506 = vmatprep.subr.bf16.mxu0 %v11199_v47  ;;  %v11241_v47 = vld [vmem:[%s15918_s3 + $0x82c] ss:$20 sps:$4 sm:$0xff]  }
 0x50b   :  { %7425 = vmatpush1.bf16.msra.mxu1 %v11200_v54  ;;  %v11242_v54 = vld [vmem:[%s15918_s3 + $0x808] ss:$20 sps:$4 sm:$0xff]  }
 0x50c   :  { %7426 = vmatprep.subr.bf16.mxu1 %v11201_v39  ;;  %v11243_v39 = vld [vmem:[%s15918_s3 + $0x970] ss:$20 sps:$4 sm:$0xff]  }
 0x50d   :  { %7507 = vmatpush1.bf16.msra.mxu0 %v11202_v30  ;;  %v11244_v30 = vld [vmem:[%s15918_s3 + $0x828] ss:$20 sps:$4 sm:$0xff]  }
 0x50e   :  { %7508 = vmatprep.subr.bf16.mxu0 %v11203_v1  ;;  %v11245_v1 = vld [vmem:[%s15918_s3 + $0x854] ss:$20 sps:$4 sm:$0xff]  }
 0x50f   :  { %7427 = vmatpush1.bf16.msra.mxu1 %v11204_v16 }
 0x510   :  { %7428 = vmatprep.subr.bf16.mxu1 %v11205_v63  ;;  %v11246_v63 = vld [vmem:[%s15918_s3 + $0x830] ss:$20 sps:$4 sm:$0xff]  }
 0x511   :  { %7509 = vmatpush1.bf16.msra.mxu0 %v11206_v2 }
 0x512   :  { %7510 = vmatprep.subr.bf16.mxu0 %v11207_v5 }
 0x513   :  { %7429 = vmatpush1.bf16.msra.mxu1 %v11208_v13  ;;  %v11247_v13 = vld [vmem:[%s15918_s3 + $0x998] ss:$20 sps:$4 sm:$0xff]  }
 0x514   :  { %7430 = vmatprep.subr.bf16.mxu1 %v11209_v19 }
 0x515   :  { %7511 = vmatpush1.bf16.msra.mxu0 %v11210_v10 }
 0x516   :  { %7512 = vmatprep.subr.bf16.mxu0 %v11211_v44  ;;  %v11248_v44 = vld [vmem:[%s15918_s3 + $0x850] ss:$20 sps:$4 sm:$0xff]  }
 0x517   :  { %7431 = vmatpush1.bf16.msra.mxu1 %v11212_v14 }
 0x518   :  { %7432 = vmatprep.subr.bf16.mxu1 %v11213_v32  ;;  %v11250_v32 = vld [vmem:[%s15918_s3 + $0x858] ss:$20 sps:$4 sm:$0xff]  }
 0x519   :  { %7513 = vmatpush1.bf16.msra.mxu0 %v11214_v62  ;;  %v11252_v62 = vld [vmem:[%s15918_s3 + $0x878] ss:$20 sps:$4 sm:$0xff]  }
 0x51a   :  { %7514 = vmatprep.subr.bf16.mxu0 %v11215_v3  ;;  %v11253_v3 = vld [vmem:[%s15918_s3 + $0x8a4] ss:$20 sps:$4 sm:$0xff]  }
 0x51b   :  { %v9427_v23 = vpop.f32.mrb[156].mxu0  ;;  %7433 = vmatpush1.bf16.msra.mxu1 %v11216_v53  ;;  %v11255_v53 = vld [vmem:[%s15918_s3 + $0x9e8] ss:$20 sps:$4 sm:$0xff]  }
 0x51c   :  { %v9428_v61 = vpop.f32.mrb[157].mxu0  ;;  %7434 = vmatprep.subr.bf16.mxu1 %v11217_v41  ;;  %v11257_v41 = vld [vmem:[%s15918_s3 + $0x8cc] ss:$20 sps:$4 sm:$0xff]  }
 0x51d   :  { %v15522_v22 = vadd.f32 %v9428_v61, %v9427_v23  ;;  %v9430_v58 = vpop.f32.mrb[158].mxu0  ;;  %7515 = vmatpush1.bf16.msra.mxu0 %v11218_v36  ;;  %v11254_v23 = vld [vmem:[%s15918_s3 + $0x880] ss:$20 sps:$4 sm:$0xff]   ;;  %v11259_v36 = vld [vmem:[%s15918_s3 + $0x8c8] ss:$20 sps:$4 sm:$0xff]  }
 0x51e   :  { %v9431_v28 = vpop.f32.mrb[159].mxu0  ;;  %7516 = vmatprep.subr.bf16.mxu0 %v11219_v43  ;;  %v11256_v61 = vld [vmem:[%s15918_s3 + $0x8a0] ss:$20 sps:$4 sm:$0xff]   ;;  %v11258_v58 = vld [vmem:[%s15918_s3 + $0x8a8] ss:$20 sps:$4 sm:$0xff]  }
 0x51f   :  { %7435 = vmatpush1.bf16.msra.mxu1 %v11220_v25  ;;  %v11260_v28 = vld [vmem:[%s15918_s3 + $0x8f4] ss:$20 sps:$4 sm:$0xff]   ;;  %v11261_v43 = vld [vmem:[%s15918_s3 + $0x8f0] ss:$20 sps:$4 sm:$0xff]  }
 0x520   :  { %7436 = vmatprep.subr.bf16.mxu1 %v11221_v52  ;;  %v11262_v25 = vld [vmem:[%s15918_s3 + $0x91c] ss:$20 sps:$4 sm:$0xff]   ;;  %v11263_v52 = vld [vmem:[%s15918_s3 + $0x918] ss:$20 sps:$4 sm:$0xff]  }
 0x521   :  { %7517 = vmatpush1.bf16.msra.mxu0 %v11222_v21  ;;  %v11264_v21 = vld [vmem:[%s15918_s3 + $0x944] ss:$20 sps:$4 sm:$0xff]  }
 0x522   :  { %7518 = vmatprep.subr.bf16.mxu0 %v11223_v26  ;;  %v11265_v26 = vld [vmem:[%s15918_s3 + $0x940] ss:$20 sps:$4 sm:$0xff]  }
 0x523   :  { %7437 = vmatpush1.bf16.msra.mxu1 %v11224_v7  ;;  %v11266_v7 = vld [vmem:[%s15918_s3 + $0x96c] ss:$20 sps:$4 sm:$0xff]  }
 0x524   :  { %7463 = vmatprep.subr.bf16.mxu1 %v11225_v4  ;;  %v11267_v4 = vld [vmem:[%s15918_s3 + $0x968] ss:$20 sps:$4 sm:$0xff]  }
 0x525   :  { %7519 = vmatpush1.bf16.msra.mxu0 %v11226_v0  ;;  %v11268_v0 = vld [vmem:[%s15918_s3 + $0x994] ss:$20 sps:$4 sm:$0xff]  }
 0x526   :  { %7455 = vmatmul.mubr.bf16.vlgmr.msra.gmra.mrb[188].mxu1 %v15545_v56  ;;  %9473 = vmatprep.subr.bf16.mxu0 %v11227_v40 }
 0x527   :  { %7464 = vmatpush1.bf16.msra.mxu1 %v11228_v33  ;;  %7495 = vmatprep.mubr.bf16.mxu1 %v15244_v34 }
 0x528   :  { %7537 = vmatmul.mubr.bf16.vlgmr.msra.gmra.mrb[176].mxu0 %v15545_v56  ;;  %7465 = vmatprep.subr.bf16.mxu1 %v11229_v38 }
 0x529   :  { %9474 = vmatpush3.bf16.msra.mxu0 %v11230_v57  ;;  %7577 = vmatprep.mubr.bf16.mxu0 %v15244_v34  ;;  %v11235_v34 = vld [vmem:[%s15918_s3 + $0x920] ss:$20 sps:$4 sm:$0xff]  }
 0x52a   :  { %9475 = vmatprep.subr.bf16.mxu0 %v11231_v11 }
 0x52b   :  { %7466 = vmatpush1.bf16.msra.mxu1 %v11232_v46  ;;  %v11269_v46 = vld [vmem:[%s15918_s3 + $0x990] ss:$20 sps:$4 sm:$0xff]  }
 0x52c   :  { %7467 = vmatprep.subr.bf16.mxu1 %v11233_v35 }
 0x52d   :  { %9476 = vmatpush3.bf16.msra.mxu0 %v11234_v42 }
 0x52e   :  { %9477 = vmatprep.subr.bf16.mxu0 %v11235_v34 }
 0x52f   :  { %7468 = vmatpush1.bf16.msra.mxu1 %v11236_v48  ;;  %v11270_v48 = vld [vmem:[%s15918_s3 + $0x9bc] ss:$20 sps:$4 sm:$0xff]  }
 0x530   :  { %7469 = vmatprep.subr.bf16.mxu1 %v11237_v31 }
 0x531   :  { %9478 = vmatpush3.bf16.msra.mxu0 %v11238_v24 }
 0x532   :  { %9479 = vmatprep.subr.bf16.mxu0 %v11239_v51  ;;  %v11271_v51 = vld [vmem:[%s15918_s3 + $0x9b8] ss:$20 sps:$4 sm:$0xff]  }
 0x533   :  { %7470 = vmatpush1.bf16.msra.mxu1 %v11240_v50  ;;  %v11272_v50 = vld [vmem:[%s15918_s3 + $0x9e4] ss:$20 sps:$4 sm:$0xff]  }
 0x534   :  { %7471 = vmatprep.subr.bf16.mxu1 %v11241_v47  ;;  %v10509_v47 = vld [vmem:[%s15921_s5 + $0x48] sm:$0xff]  }
 0x535   :  { %9480 = vmatpush3.bf16.msra.mxu0 %v11242_v54  ;;  %v10510_v54 = vld [vmem:[%s15921_s5 + $0x8] sm:$0xff]  }
 0x536   :  { %9481 = vmatprep.subr.bf16.mxu0 %v11243_v39  ;;  %v11273_v39 = vld [vmem:[%s15918_s3 + $0x9e0] ss:$20 sps:$4 sm:$0xff]  }
 0x537   :  { %7472 = vmatpush1.bf16.msra.mxu1 %v11244_v30  ;;  %v10511_v30 = vld [vmem:[%s15921_s5 + $0x50] sm:$0xff]  }
 0x538   :  { %7473 = vmatprep.subr.bf16.mxu1 %v11245_v1  ;;  %v10512_v1 = vld [vmem:[%s15921_s5 + $0x10] sm:$0xff]  }
 0x539   :  { %v6996_v16 = vpop.f32.mrb[168].mxu1  ;;  %9482 = vmatpush3.bf16.msra.mxu0 %v11246_v63  ;;  %v10513_v63 = vld [vmem:[%s15921_s5 + $0x58] sm:$0xff]  }
 0x53a   :  { %v15618_v2 = vadd.f32 %v15413_v15, %v6996_v16  ;;  %v6998_v5 = vpop.f32.mrb[169].mxu1  ;;  %9483 = vmatprep.subr.bf16.mxu0 %v11247_v13  ;;  %v11249_v15 = vld [vmem:[%s15918_s3 + $0x87c] ss:$20 sps:$4 sm:$0xff]   ;;  %v11275_v13 = vld [vmem:[%s15918_s3 + $0xa38] ss:$20 sps:$4 sm:$0xff]  }
 0x53b   :  { %v15624_v19 = vadd.f32 %v15418_v59, %v6998_v5  ;;  %v7000_v10 = vpop.f32.mrb[170].mxu1  ;;  %7474 = vmatpush1.bf16.msra.mxu1 %v11248_v44  ;;  %v11251_v59 = vld [vmem:[%s15918_s3 + $0x9c0] ss:$20 sps:$4 sm:$0xff]   ;;  %v11274_v16 = vld [vmem:[%s15918_s3 + $0xa10] ss:$20 sps:$4 sm:$0xff]  }
 0x53c   :  { %v7001_v14 = vpop.f32.mrb[171].mxu1  ;;  %7475 = vmatprep.subr.bf16.mxu1 %v11249_v15  ;;  %v10515_v5 = vld [vmem:[%s15921_s5 + $0x60] sm:$0xff]   ;;  %v11277_v44 = vld [vmem:[%s15918_s3 + $0xa88] ss:$20 sps:$4 sm:$0xff]  }
 0x53d   :  { %9484 = vmatpush3.bf16.msra.mxu0 %v11250_v32  ;;  %v11276_v10 = vld [vmem:[%s15918_s3 + $0xa60] ss:$20 sps:$4 sm:$0xff]   ;;  %v11278_v14 = vld [vmem:[%s15918_s3 + $0xab0] ss:$20 sps:$4 sm:$0xff]  }
 0x53e   :  { %9485 = vmatprep.subr.bf16.mxu0 %v11251_v59  ;;  %v10516_v32 = vld [vmem:[%s15921_s5 + $0x20] sm:$0xff]  }
 0x53f   :  { %7476 = vmatpush1.bf16.msra.mxu1 %v11252_v62 }
 0x540   :  { %7477 = vmatprep.subr.bf16.mxu1 %v11253_v3 }
 0x541   :  { %9486 = vmatpush3.bf16.msra.mxu0 %v11254_v23 }
 0x542   :  { %9487 = vmatprep.subr.bf16.mxu0 %v11255_v53 }
 0x543   :  { %7478 = vmatpush1.bf16.msra.mxu1 %v11256_v61  ;;  %v11279_v61 = vld [vmem:[%s15918_s3 + $0xad8] ss:$20 sps:$4 sm:$0xff]  }
 0x544   :  { %7479 = vmatprep.subr.bf16.mxu1 %v11257_v41 }
 0x545   :  { %9488 = vmatpush3.bf16.msra.mxu0 %v11258_v58 }
 0x547   :  { %7480 = vmatpush1.bf16.msra.mxu1 %v11259_v36  ;;  %v10517_v36 = vld [vmem:[%s15921_s5 + $0x68] sm:$0xff]  }
 0x548   :  { %7578 = vmatmul.mubr.bf16.vlgmr.msra.gmra.mrb[180].mxu0 %v15448_v45  ;;  %7481 = vmatprep.subr.bf16.mxu1 %v11260_v28 }
 0x54b   :  { %7482 = vmatpush1.bf16.msra.mxu1 %v11261_v43  ;;  %v10518_v43 = vld [vmem:[%s15921_s5 + $0x28] sm:$0xff]  }
 0x54c   :  { %7483 = vmatprep.subr.bf16.mxu1 %v11262_v25 }
 0x54f   :  { %7484 = vmatpush1.bf16.msra.mxu1 %v11263_v52  ;;  %v11280_v52 = vld [vmem:[%s15918_s3 + $0xb00] ss:$20 sps:$4 sm:$0xff]  }
 0x550   :  { %7485 = vmatprep.subr.bf16.mxu1 %v11264_v21  ;;  %v10519_v21 = vld [vmem:[%s15921_s5 + $0x70] sm:$0xff]  }
 0x553   :  { %7486 = vmatpush1.bf16.msra.mxu1 %v11265_v26  ;;  %v10520_v26 = vld [vmem:[%s15921_s5 + $0x30] sm:$0xff]  }
 0x554   :  { %7487 = vmatprep.subr.bf16.mxu1 %v11266_v7  ;;  %v10521_v7 = vld [vmem:[%s15921_s5 + $0x78] sm:$0xff]  }
 0x557   :  { %7488 = vmatpush1.bf16.msra.mxu1 %v11267_v4  ;;  %v11281_v4 = vld [vmem:[%s15918_s3 + $0xb28] ss:$20 sps:$4 sm:$0xff]  }
 0x558   :  { %7489 = vmatprep.subr.bf16.mxu1 %v11268_v0  ;;  %v10522_v0 = vld [vmem:[%s15921_s5 + $0x38] sm:$0xff]  }
 0x559   :  { %v7118_v40 = vpop.f32.mrb[172].mxu1 }
 0x55a   :  { %v15691_v33 = vadd.f32 %v15522_v22, %v7118_v40  ;;  %v9863_v38 = vpop.f32.mrb[173].mxu1 }
 0x55b   :  { %v7121_v57 = vpop.f32.mrb[174].mxu1  ;;  %v7158_v11 = vpop.f32.mrb[160].mxu0  ;;  %7490 = vmatpush1.bf16.msra.mxu1 %v11269_v46 }
 0x55c   :  { %v7159_v35 = vadd.f32 %v7158_v11, %v15405_v37  ;;  %v9864_v42 = vpop.f32.mrb[175].mxu1  ;;  %v7160_v34 = vpop.f32.mrb[161].mxu0  ;;  %7491 = vmatprep.subr.bf16.mxu1 %v11270_v48  ;;  %v10507_v37 = vld [vmem:[%s15921_s5 + $0x40] sm:$0xff]   ;;  %v10526_v48 = vld [vmem:[%s15921_s5 + $0x88] sm:$0xff]  }
 0x55d   :  { %v7161_v22 = vadd.f32 %v7160_v34, %v15411_v29  ;;  %v7162_v31 = vpop.f32.mrb[162].mxu0  ;;  %v10508_v29 = vld [vmem:[%s15921_s5] sm:$0xff]   ;;  %9504 = vmatprep.subr.bf16.mxu0 %v10507_v37 }
 0x55e   :  { %v7163_v24 = vpop.f32.mrb[163].mxu0  ;;  %9505 = vmatpush3.bf16.msra.mxu0 %v10508_v29  ;;  %v10524_v42 = vld [vmem:[%s15921_s5 + $0x80] sm:$0xff]   ;;  %v10528_v31 = vld [vmem:[%s15921_s5 + $0x90] sm:$0xff]  }
 0x55f   :  { %7492 = vmatpush1.bf16.msra.mxu1 %v11271_v51  ;;  %9506 = vmatprep.subr.bf16.mxu0 %v10509_v47  ;;  %v10530_v24 = vld [vmem:[%s15921_s5 + $0x98] sm:$0xff]   ;;  %v10531_v51 = vld [vmem:[%s15921_s5 + $0xe0] sm:$0xff]  }
 0x560   :  { %7493 = vmatprep.subr.bf16.mxu1 %v11272_v50  ;;  %v10532_v50 = vld [vmem:[%s15921_s5 + $0xa0] sm:$0xff]  }
 0x562   :  { %9507 = vmatpush3.bf16.msra.mxu0 %v10510_v54 }
 0x563   :  { %7494 = vmatpush1.bf16.msra.mxu1 %v11273_v39  ;;  %9508 = vmatprep.subr.bf16.mxu0 %v10511_v30 }
 0x564   :  { %9885 = vmatprep.subr.bf16.mxu1 %v11287_v12 }
 0x566   :  { %7496 = vmatmul.mubr.bf16.vlgmr.msra.gmra.mrb[192].mxu1 %v15448_v45  ;;  %v10514_v45 = vld [vmem:[%s15921_s5 + $0x18] sm:$0xff]   ;;  %9509 = vmatpush3.bf16.msra.mxu0 %v10512_v1 }
 0x567   :  { %9886 = vmatpush3.bf16.msra.mxu1 %v11274_v16  ;;  %9901 = vmatprep.mubr.msk.bf16.mxu1 %vm11288_vm1, %v11287_v12  ;;  %v10533_v16 = vld [vmem:[%s15921_s5 + $0xe8] sm:$0xff]  }
 0x568   :  { %9887 = vmatprep.subr.bf16.mxu1 %v11287_v12  ;;  %9510 = vmatprep.subr.bf16.mxu0 %v10513_v63 }
 0x56a   :  { %9511 = vmatpush3.bf16.msra.mxu0 %v10514_v45  ;;  %v10534_v45 = vld [vmem:[%s15921_s5 + $0xa8] sm:$0xff]  }
 0x56b   :  { %9888 = vmatpush3.bf16.msra.mxu1 %v11275_v13  ;;  %9512 = vmatprep.subr.bf16.mxu0 %v10515_v5  ;;  %v10537_v5 = vld [vmem:[%s15921_s5 + $0xf8] sm:$0xff]  }
 0x56c   :  { %9889 = vmatprep.subr.bf16.mxu1 %v11287_v12  ;;  %v10538_v13 = vld [vmem:[%s15921_s5 + $0xb8] sm:$0xff]  }
 0x56e   :  { %9513 = vmatpush3.bf16.msra.mxu0 %v10516_v32 }
 0x56f   :  { %9890 = vmatpush3.bf16.msra.mxu1 %v11276_v10  ;;  %9514 = vmatprep.subr.bf16.mxu0 %v10517_v36 }
 0x570   :  { %9891 = vmatprep.subr.bf16.mxu1 %v11287_v12 }
 0x572   :  { %9515 = vmatpush3.bf16.msra.mxu0 %v10518_v43 }
 0x573   :  { %9892 = vmatpush3.bf16.msra.mxu1 %v11277_v44  ;;  %9516 = vmatprep.subr.bf16.mxu0 %v10519_v21 }
 0x574   :  { %9893 = vmatprep.subr.bf16.mxu1 %v11287_v12 }
 0x576   :  { %9517 = vmatpush3.bf16.msra.mxu0 %v10520_v26 }
 0x577   :  { %9894 = vmatpush3.bf16.msra.mxu1 %v11278_v14  ;;  %9518 = vmatprep.subr.bf16.mxu0 %v10521_v7 }
 0x578   :  { %9895 = vmatprep.subr.bf16.mxu1 %v11287_v12 }
 0x579   :  { %v7199_v15 = vpop.f32.mrb[176].mxu1 }
 0x57a   :  { %v15764_v59 = vadd.f32 %v7199_v15, %v7159_v35  ;;  %v7201_v62 = vpop.f32.mrb[177].mxu1  ;;  %9519 = vmatpush3.bf16.msra.mxu0 %v10522_v0  ;;  %v10523_v35 = vld [vmem:[%s15921_s5 + $0xc0] sm:$0xff]  }
 0x57b   :  { %v15766_v3 = vadd.f32 %v7201_v62, %v7161_v22  ;;  %v7203_v23 = vpop.f32.mrb[178].mxu1  ;;  %v7281_v53 = vpop.f32.mrb[164].mxu0  ;;  %9896 = vmatpush3.bf16.msra.mxu1 %v11279_v61  ;;  %9905 = vmatprep.subr.bf16.mxu0 %v11287_v12  ;;  %v10527_v22 = vld [vmem:[%s15921_s5 + $0xd0] sm:$0xff]  }
 0x57c   :  { %v7204_v41 = vpop.f32.mrb[179].mxu1  ;;  %v7283_v58 = vpop.f32.mrb[165].mxu0  ;;  %9897 = vmatprep.subr.bf16.mxu1 %v11287_v12 }
 0x57d   :  { %v7285_v28 = vpop.f32.mrb[166].mxu0 }
 0x57e   :  { %v7286_v25 = vpop.f32.mrb[167].mxu0 }
 0x57f   :  { %9898 = vmatpush3.bf16.msra.mxu1 %v11280_v52 }
 0x580   :  { %9899 = vmatprep.subr.bf16.mxu1 %v11287_v12 }
 0x583   :  { %9900 = vmatpush3.bf16.msra.mxu1 %v11281_v4 }
 0x584   :  { %9526 = vmatprep.subr.bf16.mxu1 %v10523_v35 }
 0x586   :  { %9902 = vmatmul.mubr.bf16.vlgmr.msra.gmra.mrb[196].mxu1 %v15545_v56  ;;  %v10525_v56 = vld [vmem:[%s15921_s5 + $0xc8] sm:$0xff]  }
 0x587   :  { %9527 = vmatpush3.bf16.msra.mxu1 %v10524_v42 }
 0x588   :  { %9528 = vmatprep.subr.bf16.mxu1 %v10525_v56 }
 0x58b   :  { %9529 = vmatpush3.bf16.msra.mxu1 %v10526_v48 }
 0x58c   :  { %9530 = vmatprep.subr.bf16.mxu1 %v10527_v22 }
 0x58f   :  { %9531 = vmatpush3.bf16.msra.mxu1 %v10528_v31 }
 0x59b   :  { %v9458_v40 = vpop.f32.mrb[168].mxu0 }
 0x59c   :  { %v9459_v38 = vpop.f32.mrb[169].mxu0 }
 0x59d   :  { %v9460_v57 = vadd.f32 %v9459_v38, %v9458_v40  ;;  %v9461_v11 = vpop.f32.mrb[170].mxu0 }
 0x59e   :  { %v9462_v46 = vpop.f32.mrb[171].mxu0 }
 0x59f   :  { %v7323_v34 = vadd.f32 %v9460_v57, %v15691_v33  ;;  %v10529_v33 = vld [vmem:[%s15921_s5 + $0xd8] sm:$0xff]  }
 0x5a0   :  { %9532 = vmatprep.subr.bf16.mxu1 %v10529_v33  ;;  %v10545_v33 = vld [vmem:[%s15921_s5 + $0x130] sm:$0xff]  }
 0x5a1   :  { %9533 = vmatpush3.bf16.msra.mxu1 %v10530_v24 }
 0x5a2   :  { %9534 = vmatprep.subr.bf16.mxu1 %v10531_v51  ;;  %v10546_v51 = vld [vmem:[%s15921_s5 + $0x138] sm:$0xff]  }
 0x5a5   :  { %9535 = vmatpush3.bf16.msra.mxu1 %v10532_v50 }
 0x5a6   :  { %9536 = vmatprep.subr.bf16.mxu1 %v10533_v16 }
 0x5a9   :  { %9537 = vmatpush3.bf16.msra.mxu1 %v10534_v45 }
 0x5b9   :  { %v7240_v37 = vpop.f32.mrb[180].mxu1 }
 0x5ba   :  { %v7241_v29 = vadd.f32 %v7240_v37, %v15618_v2  ;;  %v7242_v47 = vpop.f32.mrb[181].mxu1  ;;  %v10535_v2 = vld [vmem:[%s15921_s5 + $0xf0] sm:$0xff]  }
 0x5bb   :  { %v7243_v54 = vadd.f32 %v7242_v47, %v15624_v19  ;;  %v7244_v39 = vpop.f32.mrb[182].mxu1  ;;  %v10536_v19 = vld [vmem:[%s15921_s5 + $0xb0] sm:$0xff]   ;;  %9538 = vmatprep.subr.bf16.mxu1 %v10535_v2 }
 0x5bc   :  { %v15832_v30 = vadd.f32 %v7281_v53, %v7241_v29  ;;  %v7245_v1 = vpop.f32.mrb[183].mxu1  ;;  %9539 = vmatpush3.bf16.msra.mxu1 %v10536_v19 }
 0x5bd   :  { %v15837_v63 = vadd.f32 %v7283_v58, %v7243_v54  ;;  %9540 = vmatprep.subr.bf16.mxu1 %v10537_v5 }
 0x5c0   :  { %9541 = vmatpush3.bf16.msra.mxu1 %v10538_v13 }
 0x5d9   :  { %v7362_v10 = vpop.f32.mrb[184].mxu1 }
 0x5da   :  { %v15854_v44 = vadd.f32 %v7362_v10, %v7323_v34  ;;  %v9883_v14 = vpop.f32.mrb[185].mxu1 }
 0x5db   :  { %v7365_v15 = vpop.f32.mrb[186].mxu1  ;;  %v7415_v32 = vpop.f32.mrb[172].mxu0 }
 0x5dc   :  { %v9884_v62 = vpop.f32.mrb[187].mxu1  ;;  %v7417_v23 = vpop.f32.mrb[173].mxu0 }
 0x5dd   :  { %v7419_v53 = vpop.f32.mrb[174].mxu0 }
 0x5de   :  { %v7420_v61 = vpop.f32.mrb[175].mxu0 }
 0x5f9   :  { %v7456_v41 = vpop.f32.mrb[188].mxu1 }
 0x5fa   :  { %v7457_v58 = vadd.f32 %v7456_v41, %v7415_v32  ;;  %v7458_v36 = vpop.f32.mrb[189].mxu1 }
 0x5fb   :  { %v7459_v28 = vadd.f32 %v7458_v36, %v7417_v23  ;;  %v7460_v43 = vpop.f32.mrb[190].mxu1  ;;  %v7538_v25 = vpop.f32.mrb[176].mxu0 }
 0x5fc   :  { %v7625_v52 = vadd.f32 %v7457_v58, %v15764_v59  ;;  %v7461_v21 = vpop.f32.mrb[191].mxu1  ;;  %v7540_v26 = vpop.f32.mrb[177].mxu0  ;;  %v10539_v59 = vld [vmem:[%s15921_s5 + $0x100] sm:$0xff]  }
 0x5fd   :  { %v7626_v7 = vadd.f32 %v7459_v28, %v15766_v3  ;;  %v7542_v4 = vpop.f32.mrb[178].mxu0  ;;  %v10544_v3 = vld [vmem:[%s15921_s5 + $0x128] sm:$0xff]  }
 0x5fe   :  { %v7630_v0 = vadd.f32 %v7625_v52, %v14950_v55  ;;  %v7543_v40 = vpop.f32.mrb[179].mxu0  ;;  %v10540_v55 = vld [vmem:[%s15921_s5 + $0x108] sm:$0xff]  }
 0x5ff   :  { %v7631_v38 = vadd.f32 %v7626_v7, %v14955_v9  ;;  %v10541_v9 = vld [vmem:[%s15921_s5 + $0x110] sm:$0xff]  }
 0x600   :  { %v7635_v57 = vmax.f32 %v7630_v0, 0.0 }
 0x601   :  { %v7636_v11 = vmax.f32 %v7631_v38, 0.0  ;;  %v9146_v38 = vld [vmem:[%s15924_s7] ss:$0 sm:$0xff] }
 0x602   :  { %v7640_v46 = vmax.f32 %v14994_v18, %v7635_v57  ;;  %v10542_v18 = vld [vmem:[%s15921_s5 + $0x118] sm:$0xff]  }
 0x603   :  { %v7641_v35 = vmax.f32 %v15002_v60, %v7636_v11  ;;  %v10543_v60 = vld [vmem:[%s15921_s5 + $0x120] sm:$0xff]  }
 0x604   :  { %v7645_v56 = vpack.c.bf16 %v7640_v46, %v7640_v46 }
 0x605   :  { %v7646_v42 = vpack.c.bf16 %v7641_v35, %v7641_v35 }
 0x607   :  { %8009 = vmatprep.mubr.bf16.mxu0 %v7646_v42 }
 0x608   :  { %8010 = vmatmul.mubr.bf16.vlgmr.msra.gmra.mrb[184].mxu0 %v7645_v56 }
 0x609   :  { %9906 = vmatpush3.bf16.msra.mxu0 %v10539_v59  ;;  %9921 = vmatprep.mubr.msk.bf16.mxu0 %vm11288_vm1, %v11287_v12 }
 0x60a   :  { %9907 = vmatprep.subr.bf16.mxu0 %v11287_v12 }
 0x60d   :  { %9908 = vmatpush3.bf16.msra.mxu0 %v10540_v55 }
 0x60e   :  { %9909 = vmatprep.subr.bf16.mxu0 %v11287_v12 }
 0x611   :  { %9910 = vmatpush3.bf16.msra.mxu0 %v10541_v9 }
 0x612   :  { %9911 = vmatprep.subr.bf16.mxu0 %v11287_v12 }
 0x615   :  { %9912 = vmatpush3.bf16.msra.mxu0 %v10542_v18 }
 0x616   :  { %9913 = vmatprep.subr.bf16.mxu0 %v11287_v12 }
 0x619   :  { %9914 = vmatpush3.bf16.msra.mxu0 %v10543_v60 }
 0x61a   :  { %9915 = vmatprep.subr.bf16.mxu0 %v11287_v12 }
 0x61b   :  { %v9489_v34 = vpop.f32.mrb[180].mxu0 }
 0x61c   :  { %v9490_v48 = vpop.f32.mrb[181].mxu0 }
 0x61d   :  { %v9491_v22 = vadd.f32 %v9490_v48, %v9489_v34  ;;  %v9492_v31 = vpop.f32.mrb[182].mxu0  ;;  %9916 = vmatpush3.bf16.msra.mxu0 %v10544_v3 }
 0x61e   :  { %v9493_v24 = vpop.f32.mrb[183].mxu0  ;;  %9917 = vmatprep.subr.bf16.mxu0 %v11287_v12 }
 0x621   :  { %9918 = vmatpush3.bf16.msra.mxu0 %v10545_v33 }
 0x622   :  { %9919 = vmatprep.subr.bf16.mxu0 %v11287_v12 }
 0x625   :  { %9920 = vmatpush3.bf16.msra.mxu0 %v10546_v51 }
 0x639   :  { %v7497_v37 = vpop.f32.mrb[192].mxu1 }
 0x63a   :  { %v7539_v50 = vadd.f32 %v7538_v25, %v7497_v37  ;;  %v7499_v29 = vpop.f32.mrb[193].mxu1 }
 0x63b   :  { %v7541_v47 = vadd.f32 %v7540_v26, %v7499_v29  ;;  %v7501_v54 = vpop.f32.mrb[194].mxu1 }
 0x63c   :  { %v7627_v39 = vadd.f32 %v7539_v50, %v15832_v30  ;;  %v7502_v1 = vpop.f32.mrb[195].mxu1 }
 0x63d   :  { %v7628_v16 = vadd.f32 %v7541_v47, %v15837_v63 }
 0x63e   :  { %v7632_v45 = vadd.f32 %v7627_v39, %v15173_v49 }
 0x63f   :  { %v7633_v2 = vadd.f32 %v7628_v16, %v15179_v8 }
 0x640   :  { %v7637_v19 = vmax.f32 %v7632_v45, 0.0 }
 0x641   :  { %v7638_v5 = vmax.f32 %v7633_v2, 0.0 }
 0x642   :  { %v7642_v13 = vmax.f32 %v15218_v17, %v7637_v19  ;;  %v14_v17 = vstv %s15922_s8 }
 0x643   :  { %v7643_v12 = vmax.f32 %v15226_v20, %v7638_v5  ;;  %15 = vst [vmem:[#allocation3] sm:$0x1] %v14_v17 }
 0x644   :  { %v7647_v14 = vpack.c.bf16 %v7642_v13, %v7642_v13 }
 0x645   :  { %v7648_v10 = vpack.c.bf16 %v7643_v12, %v7643_v12 }
 0x647   :  { %8049 = vmatprep.mubr.bf16.mxu1 %v7648_v10 }
 0x648   :  { %8050 = vmatmul.mubr.bf16.vlgmr.msra.gmra.mrb[200].mxu1 %v7647_v14 }
 0x64a   :  { %v9147_v35 = vld [vmem:[#allocation3] ss:$0 sm:$0xff] }
 0x659   :  { %v7619_v15 = vpop.f32.mrb[196].mxu1 }
 0x65a   :  { %v7620_v32 = vadd.f32 %v9491_v22, %v7619_v15  ;;  %v9903_v30 = vpop.f32.mrb[197].mxu1 }
 0x65b   :  { %v7622_v62 = vpop.f32.mrb[198].mxu1 }
 0x65c   :  { %v7629_v63 = vadd.f32 %v7620_v32, %v15854_v44  ;;  %v9904_v23 = vpop.f32.mrb[199].mxu1  ;;  %v9105_v44 = vld [vmem:[%s15923_s6] ss:$0 sm:$0xff] }
 0x65e   :  { %v7634_v49 = vadd.f32 %v7629_v63, %v15298_v27 }
 0x660   :  { %v7639_v8 = vmax.f32 %v7634_v49, 0.0 }
 0x662   :  { %v7644_v53 = vmax.f32 %v15339_v6, %v7639_v8 }
 0x664   :  { %v7649_v61 = vpack.c.bf16 %v7644_v53, %v7644_v53 }
 0x666   :  { %9922 = vmatmul.mubr.bf16.vlgmr.msra.gmra.mrb[188].mxu0 %v7649_v61 }
 0x6db   :  { %v9520_v20 = vpop.f32.mrb[184].mxu0 }
 0x6dc   :  { %v9521_v41 = vpop.f32.mrb[185].mxu0 }
 0x6dd   :  { %v9522_v58 = vadd.f32 %v9521_v41, %v9520_v20  ;;  %v9523_v36 = vpop.f32.mrb[186].mxu0 }
 0x6de   :  { %v9524_v28 = vpop.f32.mrb[187].mxu0 }
 0x6df   :  { %v8012_v25 = vadd.f32 %v9522_v58, %v9105_v44 }
 0x71b   :  { %v9542_v27 = vpop.f32.mrb[200].mxu1 }
 0x71c   :  { %v9543_v43 = vpop.f32.mrb[201].mxu1 }
 0x71d   :  { %v9544_v6 = vadd.f32 %v9543_v43, %v9542_v27  ;;  %v9545_v52 = vpop.f32.mrb[202].mxu1 }
 0x71e   :  { %v9546_v21 = vpop.f32.mrb[203].mxu1 }
 0x71f   :  { %v8052_v26 = vadd.f32 %v9544_v6, %v8012_v25 }
 0x739   :  { %v8091_v7 = vpop.f32.mrb[188].mxu0 }
 0x73a   :  { %v8092_v4 = vadd.f32 %v8091_v7, %v8052_v26  ;;  %v9923_v0 = vpop.f32.mrb[189].mxu0 }
 0x73b   :  { %v8094_v40 = vpop.f32.mrb[190].mxu0 }
 0x73c   :  { %v8097_v57 = vmax.f32 %v8092_v4, 0.0  ;;  %v9924_v11 = vpop.f32.mrb[191].mxu0 }
 0x73e   :  { %v8105_v46 = vmul.f32 %v9146_v38, %v8097_v57 }
 0x740   :  { %8106 = vadd.xlane.f32.xlu0 %v8105_v46 }
 0x7cd   :  { %v8107_v42 = vpop.xlane.xlu0 %8106 }
 0x7ce   :  { %v8115_v59 = vadd.f32 %v9147_v35, %v8107_v42 }
 0x7d0   :  { %8117 = vst.msk [vmem:[%s15925_s9] sm:$0xff] %vm8116_vm2, %v8115_v59 }

</bundles_post_ra>
